<compile_context>
chip_gen: v7x
topology: tpu7x:2x2x1
jax: 0.10.0
libtpu: 0.0.40
codegen_flags: <defaults>
</compile_context>

<pallas_src>
import functools

import jax
import jax.numpy as jnp
from jax.experimental import pallas as pl
from jax.experimental.pallas import tpu as pltpu


_COL0 = 16                       # sublane-aligned column offset of the valid image
_VMEM_CAP = 48 * 1024 * 1024     # portable scoped-VMEM ceiling (below v7x physical)


# -----------------------------------------------------------------------------
# In-kernel helpers
# -----------------------------------------------------------------------------
def _im2col9(src_ref, col0, H, W):
    """Stack the nine 3x3-tap slices along channels -> [H*W, 9*cin] (src dtype)."""
    taps = []
    for dy in range(3):
        for dx in range(3):
            c0 = col0 - 1 + dx
            taps.append(src_ref[dy:dy + H, c0:c0 + W, :])
    return jnp.concatenate(taps, axis=-1).reshape(H * W, -1)


def _zero_ring(ref, H, W, col0):
    """Zero only the 1-pixel halo that the 3x3 taps read (interior is rewritten)."""
    c = ref.shape[-1]
    zrow = jnp.zeros((1, W + 2, c), ref.dtype)
    ref[0:1, col0 - 1:col0 + W + 1, :] = zrow
    ref[H + 1:H + 2, col0 - 1:col0 + W + 1, :] = zrow
    zcol = jnp.zeros((H, 1, c), ref.dtype)
    ref[1:H + 1, col0 - 1:col0, :] = zcol
    ref[1:H + 1, col0 + W:col0 + W + 1, :] = zcol


# -----------------------------------------------------------------------------
# Fused encoder kernel (one batch element per grid step)
# -----------------------------------------------------------------------------
def _encoder_kernel(x_ref, w1_ref, b1_ref, w2_ref, b2_ref,
                    wf1_ref, bf1_ref, wf2t_ref, bf2_ref,
                    o_ref, a1pad_ref, a3pad_ref, *, H, W):
    """conv3x3(block-diag 2->32) -> conv3x3(block-diag 32->32) ->
    conv1x1(32->64) -> conv3x3(64->64).  Eval-mode BatchNorm is folded into the
    weights/biases; every conv is followed by bias + ReLU.  All intermediates
    stay in VMEM and every 3x3 conv is a single im2col MXU matmul."""
    HW = H * W

    # ---- layer 1: merged dem|slope 3x3 conv (block-diagonal), K = 9*2 = 18.
    p1 = _im2col9(x_ref, 1, H, W)                                   # [HW, 18] bf16
    a1 = jnp.maximum(
        jnp.dot(p1, w1_ref[...], preferred_element_type=jnp.float32)
        + b1_ref[...], 0.0)                                         # [HW, 32] f32
    _zero_ring(a1pad_ref, H, W, _COL0)
    a1pad_ref[1:H + 1, _COL0:_COL0 + W, :] = (
        a1.astype(jnp.bfloat16).reshape(H, W, a1pad_ref.shape[-1]))

    # ---- layer 2: merged dem|slope 3x3 conv (block-diagonal), K = 9*32 = 288.
    p2 = _im2col9(a1pad_ref, _COL0, H, W)                           # [HW, 288] bf16
    a2 = jnp.maximum(
        jnp.dot(p2, w2_ref[...], preferred_element_type=jnp.float32)
        + b2_ref[...], 0.0)                                         # [HW, 32] f32

    # ---- fusion 1: 1x1 conv 32 -> 64 (single matmul, K = 32).
    a3 = jnp.dot(a2.astype(jnp.bfloat16), wf1_ref[...],
                 preferred_element_type=jnp.float32)
    a3 = jnp.maximum(a3 + bf1_ref[...], 0.0)                        # [HW, 64] f32
    _zero_ring(a3pad_ref, H, W, _COL0)
    a3pad_ref[1:H + 1, _COL0:_COL0 + W, :] = (
        a3.astype(jnp.bfloat16).reshape(H, W, a3pad_ref.shape[-1]))

    # ---- fusion 2: 3x3 conv 64 -> 64, K = 9*64 = 576.  Channel-major result
    # ([Cout, HW], contract-on-last-dims) so the store is NCHW-flat lane-dense.
    p4 = _im2col9(a3pad_ref, _COL0, H, W)                           # [HW, 576] bf16
    acc = jax.lax.dot_general(
        wf2t_ref[...], p4,
        dimension_numbers=(((1,), (1,)), ((), ())),
        preferred_element_type=jnp.float32)                         # [64, HW]
    o_ref[...] = jnp.maximum(acc + bf2_ref[...], 0.0)


# -----------------------------------------------------------------------------
# Parameter construction (deterministic, synthetic) + BN folding + branch merge
# -----------------------------------------------------------------------------
def _fold_bn(w_taps, conv_bias, gamma, beta, mean, var, eps=1e-5):
    """Fold eval-mode BatchNorm into conv taps [T, Cin, Cout] and bias [Cout]."""
    scale = gamma / jnp.sqrt(var + eps)
    return w_taps * scale[None, None, :], (conv_bias - mean) * scale + beta


def _make_conv_bn(key, cin, cout, ksize):
    k = jax.random.split(key, 6)
    # PyTorch conv weight layout [Cout, Cin, K, K] -> taps [K*K, Cin, Cout]
    w = 0.1 * jax.random.normal(k[0], (cout, cin, ksize, ksize), jnp.float32)
    w_taps = jnp.transpose(w, (2, 3, 1, 0)).reshape(ksize * ksize, cin, cout)
    b = 0.1 * jax.random.normal(k[1], (cout,), jnp.float32)
    gamma = 1.0 + 0.1 * jax.random.normal(k[2], (cout,), jnp.float32)
    beta = 0.1 * jax.random.normal(k[3], (cout,), jnp.float32)
    mean = 0.1 * jax.random.normal(k[4], (cout,), jnp.float32)
    var = 1.0 + 0.1 * jnp.abs(jax.random.normal(k[5], (cout,), jnp.float32))
    return _fold_bn(w_taps, b, gamma, beta, mean, var)


def make_params(key, output_channels=64):
    keys = jax.random.split(key, 6)
    dem1_w, dem1_b = _make_conv_bn(keys[0], 1, 16, 3)
    dem2_w, dem2_b = _make_conv_bn(keys[1], 16, 16, 3)
    slope1_w, slope1_b = _make_conv_bn(keys[2], 1, 16, 3)
    slope2_w, slope2_b = _make_conv_bn(keys[3], 16, 16, 3)
    fus1_w, fus1_b = _make_conv_bn(keys[4], 32, output_channels, 1)
    fus2_w, fus2_b = _make_conv_bn(keys[5], output_channels, output_channels, 3)

    # Layer 1 (block-diagonal dem|slope), im2col-packed [9*2, 32].
    # Row order = (tap, input channel) to match the kernel's concat order.
    w1 = jnp.zeros((9, 2, 32), jnp.float32)
    w1 = w1.at[:, 0, 0:16].set(dem1_w[:, 0, :])
    w1 = w1.at[:, 1, 16:32].set(slope1_w[:, 0, :])
    w1 = w1.reshape(9 * 2, 32)
    b1 = jnp.concatenate([dem1_b, slope1_b]).reshape(1, 32)

    # Layer 2 (block-diagonal), im2col-packed [9*32, 32].
    w2 = jnp.zeros((9, 32, 32), jnp.float32)
    w2 = w2.at[:, 0:16, 0:16].set(dem2_w)
    w2 = w2.at[:, 16:32, 16:32].set(slope2_w)
    w2 = w2.reshape(9 * 32, 32)
    b2 = jnp.concatenate([dem2_b, slope2_b]).reshape(1, 32)

    wf1 = fus1_w[0]                                    # [32, 64]
    bf1 = fus1_b.reshape(1, output_channels)

    # Fusion 2, transposed im2col packing [Cout, 9*Cin] for the
    # contract-on-last-dims matmul that yields a channel-major [Cout, HW].
    wf2t = jnp.transpose(fus2_w, (2, 0, 1)).reshape(output_channels,
                                                    9 * output_channels)
    bf2 = fus2_b.reshape(output_channels, 1)

    return dict(
        w1=w1.astype(jnp.bfloat16), b1=b1,
        w2=w2.astype(jnp.bfloat16), b2=b2,
        wf1=wf1.astype(jnp.bfloat16), bf1=bf1,
        wf2t=wf2t.astype(jnp.bfloat16), bf2=bf2,
    )


# -----------------------------------------------------------------------------
# Forward pass (mirrors PhysicalFeatureEncoder.forward)
# -----------------------------------------------------------------------------
def _round_up(a, b):
    return (a + b - 1) // b * b


def _vmem_bytes_estimate(H, W, c_mid, c_out):
    """Rough whole-image working-set estimate (VMEM-layout padded)."""
    HW, Hp, Wp, Wg = H * W, H + 2, W + 2, W + 2 * _COL0
    inp = 2 * Hp * _round_up(Wp, 16) * 128 * 2                  # bf16 input block x2
    outb = 2 * _round_up(c_out, 8) * _round_up(HW, 128) * 4     # f32 output block x2
    scr = 2 * Hp * _round_up(Wg, 16) * 128 * 2                  # two bf16 padded scratches
    im2col = 2 * _round_up(HW, 16) * _round_up(9 * c_out, 128) * 2
    acts = 4 * _round_up(HW, 8) * 128 * 4                       # f32 activations/accums
    wts = 4 * 9 * c_out * c_out * 2
    return inp + outb + scr + im2col + acts + wts


def physical_feature_encoder_forward(physical_data_nchw, params,
                                     output_channels=64):
    B, num_layers, H, W = physical_data_nchw.shape
    if num_layers == 0:
        return jnp.zeros((B, output_channels, H, W), jnp.float32)
    # The PyTorch fusion head requires 32 input channels (dem + slope), so
    # num_layers == 1 would fail in the reference implementation as well.
    assert num_layers >= 2, "fusion head needs both dem and slope layers"
    assert H % 8 == 0 and W % 8 == 0, "H and W must be multiples of 8"

    # NCHW -> NHWC for the tiny 2-channel raw input, cast to bf16 (MXU-native),
    # add the 1-pixel zero ring once.  All other layout work happens in-kernel.
    x = jnp.transpose(physical_data_nchw[:, 0:2], (0, 2, 3, 1)).astype(jnp.bfloat16)
    x = jnp.pad(x, ((0, 0), (1, 1), (1, 1), (0, 0)))
    Hp, Wp = H + 2, W + 2
    HW = H * W
    Wg = W + 2 * _COL0

    w1, b1 = params["w1"], params["b1"]
    w2, b2 = params["w2"], params["b2"]
    wf1, bf1 = params["wf1"], params["bf1"]
    wf2t, bf2 = params["wf2t"], params["bf2"]
    c_mid = w1.shape[-1]              # 32
    c_out = wf1.shape[-1]             # output_channels
    assert c_out == output_channels

    est = _vmem_bytes_estimate(H, W, c_mid, c_out)
    vmem_limit = int(max(32 * 1024 * 1024, 2 * est))
    # TODO(synk): add row-band spatial tiling (1-row halo) + a second parallel
    # grid axis for large rasters / B==1 dual-TC on v7x; fail loudly for now.
    assert vmem_limit <= _VMEM_CAP, (
        "raster too large for the whole-image VMEM-resident kernel")

    out_flat = pl.pallas_call(
        functools.partial(_encoder_kernel, H=H, W=W),
        out_shape=jax.ShapeDtypeStruct((B, c_out, HW), jnp.float32),
        grid=(B,),
        in_specs=[
            pl.BlockSpec((None, Hp, Wp, 2), lambda b: (b, 0, 0, 0)),
            pl.BlockSpec(w1.shape, lambda b: (0, 0)),
            pl.BlockSpec(b1.shape, lambda b: (0, 0)),
            pl.BlockSpec(w2.shape, lambda b: (0, 0)),
            pl.BlockSpec(b2.shape, lambda b: (0, 0)),
            pl.BlockSpec(wf1.shape, lambda b: (0, 0)),
            pl.BlockSpec(bf1.shape, lambda b: (0, 0)),
            pl.BlockSpec(wf2t.shape, lambda b: (0, 0)),
            pl.BlockSpec(bf2.shape, lambda b: (0, 0)),
        ],
        out_specs=pl.BlockSpec((None, c_out, HW), lambda b: (b, 0, 0)),
        scratch_shapes=[
            pltpu.VMEM((Hp, Wg, c_mid), jnp.bfloat16),
            pltpu.VMEM((Hp, Wg, c_out), jnp.bfloat16),
        ],
        compiler_params=pltpu.CompilerParams(
            dimension_semantics=("parallel",),
            vmem_limit_bytes=vmem_limit),
    )(x, w1, b1, w2, b2, wf1, bf1, wf2t, bf2)

    # Contiguous reshape only: the kernel already wrote NCHW-flat data.
    return out_flat.reshape(B, c_out, H, W)


# -----------------------------------------------------------------------------
# Slope attention prior (elementwise; tiled lane-dense blocks)
# -----------------------------------------------------------------------------
def _slope_prior_kernel(s_ref, o_ref):
    lo = 20.0 / 90.0
    hi = 45.0 / 90.0
    s = s_ref[...]
    o_ref[...] = jax.nn.sigmoid(10.0 * (s - lo)) * jax.nn.sigmoid(10.0 * (hi - s))


def _pick_block(hw, target=512 * 128):
    if hw <= target:
        return hw
    blk = (target // 128) * 128
    while blk >= 128:
        if hw % blk == 0:
            return blk
        blk -= 128
    return hw


def get_slope_attention_prior(slope_data):
    shape = slope_data.shape
    flat = slope_data.astype(jnp.float32).reshape(shape[0], -1)   # [B, H*W]
    B, HW = flat.shape
    blk = _pick_block(HW)
    out = pl.pallas_call(
        _slope_prior_kernel,
        out_shape=jax.ShapeDtypeStruct(flat.shape, jnp.float32),
        grid=(B, HW // blk),
        in_specs=[pl.BlockSpec((1, blk), lambda b, j: (b, j))],
        out_specs=pl.BlockSpec((1, blk), lambda b, j: (b, j)),
        compiler_params=pltpu.CompilerParams(
            dimension_semantics=("parallel", "parallel")),
    )(flat)
    return out.reshape(shape)


# -----------------------------------------------------------------------------
# Pure-JAX reference (same bf16-quantized weights/activations; f32 matmuls)
# -----------------------------------------------------------------------------
def _reference_forward(physical_data_nchw, params):
    f32 = jnp.float32
    hp = jax.lax.Precision.HIGHEST
    x = jnp.transpose(physical_data_nchw[:, 0:2], (0, 2, 3, 1))
    x = x.astype(jnp.bfloat16).astype(f32)
    B, H, W, _ = x.shape

    def im2col(a):
        ap = jnp.pad(a, ((0, 0), (1, 1), (1, 1), (0, 0)))
        cols = [ap[:, dy:dy + H, dx:dx + W, :]
                for dy in range(3) for dx in range(3)]
        return jnp.concatenate(cols, axis=-1).reshape(B, H * W, -1)

    def conv3x3(a, w_packed, b):
        y = jnp.einsum("bpk,kc->bpc", im2col(a), w_packed.astype(f32),
                       precision=hp) + b
        return jnp.maximum(y, 0.0).reshape(B, H, W, -1)

    q = lambda a: a.astype(jnp.bfloat16).astype(f32)   # mirror in-kernel bf16 casts

    a1 = conv3x3(x, params["w1"], params["b1"])
    a2 = conv3x3(q(a1), params["w2"], params["b2"])
    a3 = jnp.einsum("bhwc,cd->bhwd", q(a2), params["wf1"].astype(f32),
                    precision=hp) + params["bf1"]
    a3 = jnp.maximum(a3, 0.0)
    p4 = im2col(q(a3))
    y = jnp.einsum("bpk,ck->bcp", p4, params["wf2t"].astype(f32),
                   precision=hp) + params["bf2"].reshape(1, -1, 1)
    return jnp.maximum(y, 0.0).reshape(B, -1, H, W)


if __name__ == "__main__":
    key = jax.random.PRNGKey(0)
    k_in, k_par = jax.random.split(key)

    B, C, H, W = 2, 2, 16, 16          # input layers: dem, slope
    physical_data = jax.random.normal(k_in, (B, C, H, W), jnp.float32)
    params = make_params(k_par, output_channels=64)

    out = jax.block_until_ready(
        physical_feature_encoder_forward(physical_data, params))
    assert out.shape == (B, 64, H, W), out.shape

    ref = _reference_forward(physical_data, params)
    err = float(jnp.max(jnp.abs(out - ref)))
    assert err < 1e-2, f"encoder mismatch vs reference: max abs err {err}"

    prior = jax.block_until_ready(
        get_slope_attention_prior(physical_data[:, 1, :, :]))
    assert prior.shape == (B, H, W), prior.shape
    lo, hi = 20.0 / 90.0, 45.0 / 90.0
    s = physical_data[:, 1].astype(jnp.float32)
    prior_ref = jax.nn.sigmoid(10.0 * (s - lo)) * jax.nn.sigmoid(10.0 * (hi - s))
    perr = float(jnp.max(jnp.abs(prior - prior_ref)))
    assert perr < 1e-5, f"slope prior mismatch: max abs err {perr}"

    print("KERNEL_OK")
</pallas_src>

<mosaic_0001>
module attributes {stable_mosaic.version = 11 : i64} {
  func.func @_encoder_kernel(%arg0: i32, %arg1: memref<1x18x18x2xbf16, #tpu.memory_space<vmem>>, %arg2: memref<18x32xbf16, #tpu.memory_space<vmem>>, %arg3: memref<1x32xf32, #tpu.memory_space<vmem>>, %arg4: memref<288x32xbf16, #tpu.memory_space<vmem>>, %arg5: memref<1x32xf32, #tpu.memory_space<vmem>>, %arg6: memref<32x64xbf16, #tpu.memory_space<vmem>>, %arg7: memref<1x64xf32, #tpu.memory_space<vmem>>, %arg8: memref<64x576xbf16, #tpu.memory_space<vmem>>, %arg9: memref<64x1xf32, #tpu.memory_space<vmem>>, %arg10: memref<1x64x256xf32, #tpu.memory_space<vmem>>, %arg11: memref<18x48x32xbf16, #tpu.memory_space<vmem>>, %arg12: memref<18x48x64xbf16, #tpu.memory_space<vmem>>) attributes {dimension_semantics = [#tpu.dimension_semantics<parallel>], iteration_bounds = array<i64: 2>, scalar_prefetch = 0 : i64, scratch_operands = 2 : i64, tpu.core_type = #tpu.core_type<tc>, window_params = [{transform_indices = @transform_0, window_bounds = array<i64: 1, 18, 18, 2>}, {pipeline_mode = #tpu.pipeline_mode<synchronous>, transform_indices = @transform_1, window_bounds = array<i64: 18, 32>}, {pipeline_mode = #tpu.pipeline_mode<synchronous>, transform_indices = @transform_2, window_bounds = array<i64: 1, 32>}, {pipeline_mode = #tpu.pipeline_mode<synchronous>, transform_indices = @transform_3, window_bounds = array<i64: 288, 32>}, {pipeline_mode = #tpu.pipeline_mode<synchronous>, transform_indices = @transform_4, window_bounds = array<i64: 1, 32>}, {pipeline_mode = #tpu.pipeline_mode<synchronous>, transform_indices = @transform_5, window_bounds = array<i64: 32, 64>}, {pipeline_mode = #tpu.pipeline_mode<synchronous>, transform_indices = @transform_6, window_bounds = array<i64: 1, 64>}, {pipeline_mode = #tpu.pipeline_mode<synchronous>, transform_indices = @transform_7, window_bounds = array<i64: 64, 576>}, {pipeline_mode = #tpu.pipeline_mode<synchronous>, transform_indices = @transform_8, window_bounds = array<i64: 64, 1>}, {transform_indices = @transform_9, window_bounds = array<i64: 1, 64, 256>}]} {
    %c0 = arith.constant 0 : index
    %c0_0 = arith.constant 0 : index
    %c0_1 = arith.constant 0 : index
    %c0_2 = arith.constant 0 : index
    %0 = vector.load %arg1[%c0, %c0_0, %c0_1, %c0_2] : memref<1x18x18x2xbf16, #tpu.memory_space<vmem>>, vector<1x16x16x2xbf16>
    %1 = vector.shape_cast %0 : vector<1x16x16x2xbf16> to vector<16x16x2xbf16>
    %c0_3 = arith.constant 0 : index
    %c0_4 = arith.constant 0 : index
    %c1 = arith.constant 1 : index
    %c0_5 = arith.constant 0 : index
    %2 = vector.load %arg1[%c0_3, %c0_4, %c1, %c0_5] : memref<1x18x18x2xbf16, #tpu.memory_space<vmem>>, vector<1x16x16x2xbf16>
    %3 = vector.shape_cast %2 : vector<1x16x16x2xbf16> to vector<16x16x2xbf16>
    %c0_6 = arith.constant 0 : index
    %c0_7 = arith.constant 0 : index
    %c2 = arith.constant 2 : index
    %c0_8 = arith.constant 0 : index
    %4 = vector.load %arg1[%c0_6, %c0_7, %c2, %c0_8] : memref<1x18x18x2xbf16, #tpu.memory_space<vmem>>, vector<1x16x16x2xbf16>
    %5 = vector.shape_cast %4 : vector<1x16x16x2xbf16> to vector<16x16x2xbf16>
    %c0_9 = arith.constant 0 : index
    %c1_10 = arith.constant 1 : index
    %c0_11 = arith.constant 0 : index
    %c0_12 = arith.constant 0 : index
    %6 = vector.load %arg1[%c0_9, %c1_10, %c0_11, %c0_12] : memref<1x18x18x2xbf16, #tpu.memory_space<vmem>>, vector<1x16x16x2xbf16>
    %7 = vector.shape_cast %6 : vector<1x16x16x2xbf16> to vector<16x16x2xbf16>
    %c0_13 = arith.constant 0 : index
    %c1_14 = arith.constant 1 : index
    %c1_15 = arith.constant 1 : index
    %c0_16 = arith.constant 0 : index
    %8 = vector.load %arg1[%c0_13, %c1_14, %c1_15, %c0_16] : memref<1x18x18x2xbf16, #tpu.memory_space<vmem>>, vector<1x16x16x2xbf16>
    %9 = vector.shape_cast %8 : vector<1x16x16x2xbf16> to vector<16x16x2xbf16>
    %c0_17 = arith.constant 0 : index
    %c1_18 = arith.constant 1 : index
    %c2_19 = arith.constant 2 : index
    %c0_20 = arith.constant 0 : index
    %10 = vector.load %arg1[%c0_17, %c1_18, %c2_19, %c0_20] : memref<1x18x18x2xbf16, #tpu.memory_space<vmem>>, vector<1x16x16x2xbf16>
    %11 = vector.shape_cast %10 : vector<1x16x16x2xbf16> to vector<16x16x2xbf16>
    %c0_21 = arith.constant 0 : index
    %c2_22 = arith.constant 2 : index
    %c0_23 = arith.constant 0 : index
    %c0_24 = arith.constant 0 : index
    %12 = vector.load %arg1[%c0_21, %c2_22, %c0_23, %c0_24] : memref<1x18x18x2xbf16, #tpu.memory_space<vmem>>, vector<1x16x16x2xbf16>
    %13 = vector.shape_cast %12 : vector<1x16x16x2xbf16> to vector<16x16x2xbf16>
    %c0_25 = arith.constant 0 : index
    %c2_26 = arith.constant 2 : index
    %c1_27 = arith.constant 1 : index
    %c0_28 = arith.constant 0 : index
    %14 = vector.load %arg1[%c0_25, %c2_26, %c1_27, %c0_28] : memref<1x18x18x2xbf16, #tpu.memory_space<vmem>>, vector<1x16x16x2xbf16>
    %15 = vector.shape_cast %14 : vector<1x16x16x2xbf16> to vector<16x16x2xbf16>
    %c0_29 = arith.constant 0 : index
    %c2_30 = arith.constant 2 : index
    %c2_31 = arith.constant 2 : index
    %c0_32 = arith.constant 0 : index
    %16 = vector.load %arg1[%c0_29, %c2_30, %c2_31, %c0_32] : memref<1x18x18x2xbf16, #tpu.memory_space<vmem>>, vector<1x16x16x2xbf16>
    %17 = vector.shape_cast %16 : vector<1x16x16x2xbf16> to vector<16x16x2xbf16>
    %18 = tpu.concatenate %1, %3, %5, %7, %9, %11, %13, %15, %17 in 2 : vector<16x16x2xbf16>, vector<16x16x2xbf16>, vector<16x16x2xbf16>, vector<16x16x2xbf16>, vector<16x16x2xbf16>, vector<16x16x2xbf16>, vector<16x16x2xbf16>, vector<16x16x2xbf16>, vector<16x16x2xbf16> -> vector<16x16x18xbf16>
    %19 = vector.shape_cast %18 : vector<16x16x18xbf16> to vector<256x18xbf16>
    %c0_33 = arith.constant 0 : index
    %c0_34 = arith.constant 0 : index
    %20 = vector.load %arg2[%c0_33, %c0_34] : memref<18x32xbf16, #tpu.memory_space<vmem>>, vector<18x32xbf16>
    %cst = arith.constant dense<0.000000e+00> : vector<256x32xf32>
    %21 = tpu.matmul %19, %20, %cst {dimension_numbers = #tpu.dot_dimension_numbers<[1], [0], [0], [1], [0, 0, 1, 1], [], []>} : vector<256x18xbf16>, vector<18x32xbf16>, vector<256x32xf32> -> vector<256x32xf32>
    %c0_35 = arith.constant 0 : index
    %c0_36 = arith.constant 0 : index
    %22 = vector.load %arg3[%c0_35, %c0_36] : memref<1x32xf32, #tpu.memory_space<vmem>>, vector<1x32xf32>
    %23 = vector.broadcast %22 : vector<1x32xf32> to vector<256x32xf32>
    %24 = arith.addf %21, %23 : vector<256x32xf32>
    %cst_37 = arith.constant 0.000000e+00 : f32
    %25 = vector.broadcast %cst_37 : f32 to vector<256x32xf32>
    %26 = arith.maximumf %24, %25 : vector<256x32xf32>
    %cst_38 = arith.constant 0.000000e+00 : bf16
    %27 = vector.broadcast %cst_38 : bf16 to vector<1x18x32xbf16>
    %c0_39 = arith.constant 0 : index
    %c15 = arith.constant 15 : index
    %c0_40 = arith.constant 0 : index
    %28 = vector.load %arg11[%c0_39, %c15, %c0_40] : memref<18x48x32xbf16, #tpu.memory_space<vmem>>, vector<1x18x32xbf16>
    tpu.vector_store %arg11[%c0_39, %c15, %c0_40], %27 {strides = array<i32>} : memref<18x48x32xbf16, #tpu.memory_space<vmem>>, vector<1x18x32xbf16>,
    %c17 = arith.constant 17 : index
    %c15_41 = arith.constant 15 : index
    %c0_42 = arith.constant 0 : index
    %29 = vector.load %arg11[%c17, %c15_41, %c0_42] : memref<18x48x32xbf16, #tpu.memory_space<vmem>>, vector<1x18x32xbf16>
    tpu.vector_store %arg11[%c17, %c15_41, %c0_42], %27 {strides = array<i32>} : memref<18x48x32xbf16, #tpu.memory_space<vmem>>, vector<1x18x32xbf16>,
    %cst_43 = arith.constant 0.000000e+00 : bf16
    %30 = vector.broadcast %cst_43 : bf16 to vector<16x1x32xbf16>
    %c1_44 = arith.constant 1 : index
    %c15_45 = arith.constant 15 : index
    %c0_46 = arith.constant 0 : index
    %31 = vector.load %arg11[%c1_44, %c15_45, %c0_46] : memref<18x48x32xbf16, #tpu.memory_space<vmem>>, vector<16x1x32xbf16>
    tpu.vector_store %arg11[%c1_44, %c15_45, %c0_46], %30 {strides = array<i32>} : memref<18x48x32xbf16, #tpu.memory_space<vmem>>, vector<16x1x32xbf16>,
    %c1_47 = arith.constant 1 : index
    %c32 = arith.constant 32 : index
    %c0_48 = arith.constant 0 : index
    %32 = vector.load %arg11[%c1_47, %c32, %c0_48] : memref<18x48x32xbf16, #tpu.memory_space<vmem>>, vector<16x1x32xbf16>
    tpu.vector_store %arg11[%c1_47, %c32, %c0_48], %30 {strides = array<i32>} : memref<18x48x32xbf16, #tpu.memory_space<vmem>>, vector<16x1x32xbf16>,
    %33 = arith.truncf %26 : vector<256x32xf32> to vector<256x32xbf16>
    %34 = vector.shape_cast %33 : vector<256x32xbf16> to vector<16x16x32xbf16>
    %c1_49 = arith.constant 1 : index
    %c16 = arith.constant 16 : index
    %c0_50 = arith.constant 0 : index
    %35 = vector.load %arg11[%c1_49, %c16, %c0_50] : memref<18x48x32xbf16, #tpu.memory_space<vmem>>, vector<16x16x32xbf16>
    tpu.vector_store %arg11[%c1_49, %c16, %c0_50], %34 {strides = array<i32>} : memref<18x48x32xbf16, #tpu.memory_space<vmem>>, vector<16x16x32xbf16>,
    %c0_51 = arith.constant 0 : index
    %c15_52 = arith.constant 15 : index
    %c0_53 = arith.constant 0 : index
    %36 = vector.load %arg11[%c0_51, %c15_52, %c0_53] : memref<18x48x32xbf16, #tpu.memory_space<vmem>>, vector<16x16x32xbf16>
    %c0_54 = arith.constant 0 : index
    %c16_55 = arith.constant 16 : index
    %c0_56 = arith.constant 0 : index
    %37 = vector.load %arg11[%c0_54, %c16_55, %c0_56] : memref<18x48x32xbf16, #tpu.memory_space<vmem>>, vector<16x16x32xbf16>
    %c0_57 = arith.constant 0 : index
    %c17_58 = arith.constant 17 : index
    %c0_59 = arith.constant 0 : index
    %38 = vector.load %arg11[%c0_57, %c17_58, %c0_59] : memref<18x48x32xbf16, #tpu.memory_space<vmem>>, vector<16x16x32xbf16>
    %c1_60 = arith.constant 1 : index
    %c15_61 = arith.constant 15 : index
    %c0_62 = arith.constant 0 : index
    %39 = vector.load %arg11[%c1_60, %c15_61, %c0_62] : memref<18x48x32xbf16, #tpu.memory_space<vmem>>, vector<16x16x32xbf16>
    %c1_63 = arith.constant 1 : index
    %c16_64 = arith.constant 16 : index
    %c0_65 = arith.constant 0 : index
    %40 = vector.load %arg11[%c1_63, %c16_64, %c0_65] : memref<18x48x32xbf16, #tpu.memory_space<vmem>>, vector<16x16x32xbf16>
    %c1_66 = arith.constant 1 : index
    %c17_67 = arith.constant 17 : index
    %c0_68 = arith.constant 0 : index
    %41 = vector.load %arg11[%c1_66, %c17_67, %c0_68] : memref<18x48x32xbf16, #tpu.memory_space<vmem>>, vector<16x16x32xbf16>
    %c2_69 = arith.constant 2 : index
    %c15_70 = arith.constant 15 : index
    %c0_71 = arith.constant 0 : index
    %42 = vector.load %arg11[%c2_69, %c15_70, %c0_71] : memref<18x48x32xbf16, #tpu.memory_space<vmem>>, vector<16x16x32xbf16>
    %c2_72 = arith.constant 2 : index
    %c16_73 = arith.constant 16 : index
    %c0_74 = arith.constant 0 : index
    %43 = vector.load %arg11[%c2_72, %c16_73, %c0_74] : memref<18x48x32xbf16, #tpu.memory_space<vmem>>, vector<16x16x32xbf16>
    %c2_75 = arith.constant 2 : index
    %c17_76 = arith.constant 17 : index
    %c0_77 = arith.constant 0 : index
    %44 = vector.load %arg11[%c2_75, %c17_76, %c0_77] : memref<18x48x32xbf16, #tpu.memory_space<vmem>>, vector<16x16x32xbf16>
    %45 = tpu.concatenate %36, %37, %38, %39, %40, %41, %42, %43, %44 in 2 : vector<16x16x32xbf16>, vector<16x16x32xbf16>, vector<16x16x32xbf16>, vector<16x16x32xbf16>, vector<16x16x32xbf16>, vector<16x16x32xbf16>, vector<16x16x32xbf16>, vector<16x16x32xbf16>, vector<16x16x32xbf16> -> vector<16x16x288xbf16>
    %46 = vector.shape_cast %45 : vector<16x16x288xbf16> to vector<256x288xbf16>
    %c0_78 = arith.constant 0 : index
    %c0_79 = arith.constant 0 : index
    %47 = vector.load %arg4[%c0_78, %c0_79] : memref<288x32xbf16, #tpu.memory_space<vmem>>, vector<288x32xbf16>
    %cst_80 = arith.constant dense<0.000000e+00> : vector<256x32xf32>
    %48 = tpu.matmul %46, %47, %cst_80 {dimension_numbers = #tpu.dot_dimension_numbers<[1], [0], [0], [1], [0, 0, 1, 1], [], []>} : vector<256x288xbf16>, vector<288x32xbf16>, vector<256x32xf32> -> vector<256x32xf32>
    %c0_81 = arith.constant 0 : index
    %c0_82 = arith.constant 0 : index
    %49 = vector.load %arg5[%c0_81, %c0_82] : memref<1x32xf32, #tpu.memory_space<vmem>>, vector<1x32xf32>
    %50 = vector.broadcast %49 : vector<1x32xf32> to vector<256x32xf32>
    %51 = arith.addf %48, %50 : vector<256x32xf32>
    %cst_83 = arith.constant 0.000000e+00 : f32
    %52 = vector.broadcast %cst_83 : f32 to vector<256x32xf32>
    %53 = arith.maximumf %51, %52 : vector<256x32xf32>
    %54 = arith.truncf %53 : vector<256x32xf32> to vector<256x32xbf16>
    %c0_84 = arith.constant 0 : index
    %c0_85 = arith.constant 0 : index
    %55 = vector.load %arg6[%c0_84, %c0_85] : memref<32x64xbf16, #tpu.memory_space<vmem>>, vector<32x64xbf16>
    %cst_86 = arith.constant dense<0.000000e+00> : vector<256x64xf32>
    %56 = tpu.matmul %54, %55, %cst_86 {dimension_numbers = #tpu.dot_dimension_numbers<[1], [0], [0], [1], [0, 0, 1, 1], [], []>} : vector<256x32xbf16>, vector<32x64xbf16>, vector<256x64xf32> -> vector<256x64xf32>
    %c0_87 = arith.constant 0 : index
    %c0_88 = arith.constant 0 : index
    %57 = vector.load %arg7[%c0_87, %c0_88] : memref<1x64xf32, #tpu.memory_space<vmem>>, vector<1x64xf32>
    %58 = vector.broadcast %57 : vector<1x64xf32> to vector<256x64xf32>
    %59 = arith.addf %56, %58 : vector<256x64xf32>
    %cst_89 = arith.constant 0.000000e+00 : f32
    %60 = vector.broadcast %cst_89 : f32 to vector<256x64xf32>
    %61 = arith.maximumf %59, %60 : vector<256x64xf32>
    %cst_90 = arith.constant 0.000000e+00 : bf16
    %62 = vector.broadcast %cst_90 : bf16 to vector<1x18x64xbf16>
    %c0_91 = arith.constant 0 : index
    %c15_92 = arith.constant 15 : index
    %c0_93 = arith.constant 0 : index
    %63 = vector.load %arg12[%c0_91, %c15_92, %c0_93] : memref<18x48x64xbf16, #tpu.memory_space<vmem>>, vector<1x18x64xbf16>
    tpu.vector_store %arg12[%c0_91, %c15_92, %c0_93], %62 {strides = array<i32>} : memref<18x48x64xbf16, #tpu.memory_space<vmem>>, vector<1x18x64xbf16>,
    %c17_94 = arith.constant 17 : index
    %c15_95 = arith.constant 15 : index
    %c0_96 = arith.constant 0 : index
    %64 = vector.load %arg12[%c17_94, %c15_95, %c0_96] : memref<18x48x64xbf16, #tpu.memory_space<vmem>>, vector<1x18x64xbf16>
    tpu.vector_store %arg12[%c17_94, %c15_95, %c0_96], %62 {strides = array<i32>} : memref<18x48x64xbf16, #tpu.memory_space<vmem>>, vector<1x18x64xbf16>,
    %cst_97 = arith.constant 0.000000e+00 : bf16
    %65 = vector.broadcast %cst_97 : bf16 to vector<16x1x64xbf16>
    %c1_98 = arith.constant 1 : index
    %c15_99 = arith.constant 15 : index
    %c0_100 = arith.constant 0 : index
    %66 = vector.load %arg12[%c1_98, %c15_99, %c0_100] : memref<18x48x64xbf16, #tpu.memory_space<vmem>>, vector<16x1x64xbf16>
    tpu.vector_store %arg12[%c1_98, %c15_99, %c0_100], %65 {strides = array<i32>} : memref<18x48x64xbf16, #tpu.memory_space<vmem>>, vector<16x1x64xbf16>,
    %c1_101 = arith.constant 1 : index
    %c32_102 = arith.constant 32 : index
    %c0_103 = arith.constant 0 : index
    %67 = vector.load %arg12[%c1_101, %c32_102, %c0_103] : memref<18x48x64xbf16, #tpu.memory_space<vmem>>, vector<16x1x64xbf16>
    tpu.vector_store %arg12[%c1_101, %c32_102, %c0_103], %65 {strides = array<i32>} : memref<18x48x64xbf16, #tpu.memory_space<vmem>>, vector<16x1x64xbf16>,
    %68 = arith.truncf %61 : vector<256x64xf32> to vector<256x64xbf16>
    %69 = vector.shape_cast %68 : vector<256x64xbf16> to vector<16x16x64xbf16>
    %c1_104 = arith.constant 1 : index
    %c16_105 = arith.constant 16 : index
    %c0_106 = arith.constant 0 : index
    %70 = vector.load %arg12[%c1_104, %c16_105, %c0_106] : memref<18x48x64xbf16, #tpu.memory_space<vmem>>, vector<16x16x64xbf16>
    tpu.vector_store %arg12[%c1_104, %c16_105, %c0_106], %69 {strides = array<i32>} : memref<18x48x64xbf16, #tpu.memory_space<vmem>>, vector<16x16x64xbf16>,
    %c0_107 = arith.constant 0 : index
    %c15_108 = arith.constant 15 : index
    %c0_109 = arith.constant 0 : index
    %71 = vector.load %arg12[%c0_107, %c15_108, %c0_109] : memref<18x48x64xbf16, #tpu.memory_space<vmem>>, vector<16x16x64xbf16>
    %c0_110 = arith.constant 0 : index
    %c16_111 = arith.constant 16 : index
    %c0_112 = arith.constant 0 : index
    %72 = vector.load %arg12[%c0_110, %c16_111, %c0_112] : memref<18x48x64xbf16, #tpu.memory_space<vmem>>, vector<16x16x64xbf16>
    %c0_113 = arith.constant 0 : index
    %c17_114 = arith.constant 17 : index
    %c0_115 = arith.constant 0 : index
    %73 = vector.load %arg12[%c0_113, %c17_114, %c0_115] : memref<18x48x64xbf16, #tpu.memory_space<vmem>>, vector<16x16x64xbf16>
    %c1_116 = arith.constant 1 : index
    %c15_117 = arith.constant 15 : index
    %c0_118 = arith.constant 0 : index
    %74 = vector.load %arg12[%c1_116, %c15_117, %c0_118] : memref<18x48x64xbf16, #tpu.memory_space<vmem>>, vector<16x16x64xbf16>
    %c1_119 = arith.constant 1 : index
    %c16_120 = arith.constant 16 : index
    %c0_121 = arith.constant 0 : index
    %75 = vector.load %arg12[%c1_119, %c16_120, %c0_121] : memref<18x48x64xbf16, #tpu.memory_space<vmem>>, vector<16x16x64xbf16>
    %c1_122 = arith.constant 1 : index
    %c17_123 = arith.constant 17 : index
    %c0_124 = arith.constant 0 : index
    %76 = vector.load %arg12[%c1_122, %c17_123, %c0_124] : memref<18x48x64xbf16, #tpu.memory_space<vmem>>, vector<16x16x64xbf16>
    %c2_125 = arith.constant 2 : index
    %c15_126 = arith.constant 15 : index
    %c0_127 = arith.constant 0 : index
    %77 = vector.load %arg12[%c2_125, %c15_126, %c0_127] : memref<18x48x64xbf16, #tpu.memory_space<vmem>>, vector<16x16x64xbf16>
    %c2_128 = arith.constant 2 : index
    %c16_129 = arith.constant 16 : index
    %c0_130 = arith.constant 0 : index
    %78 = vector.load %arg12[%c2_128, %c16_129, %c0_130] : memref<18x48x64xbf16, #tpu.memory_space<vmem>>, vector<16x16x64xbf16>
    %c2_131 = arith.constant 2 : index
    %c17_132 = arith.constant 17 : index
    %c0_133 = arith.constant 0 : index
    %79 = vector.load %arg12[%c2_131, %c17_132, %c0_133] : memref<18x48x64xbf16, #tpu.memory_space<vmem>>, vector<16x16x64xbf16>
    %80 = tpu.concatenate %71, %72, %73, %74, %75, %76, %77, %78, %79 in 2 : vector<16x16x64xbf16>, vector<16x16x64xbf16>, vector<16x16x64xbf16>, vector<16x16x64xbf16>, vector<16x16x64xbf16>, vector<16x16x64xbf16>, vector<16x16x64xbf16>, vector<16x16x64xbf16>, vector<16x16x64xbf16> -> vector<16x16x576xbf16>
    %81 = vector.shape_cast %80 : vector<16x16x576xbf16> to vector<256x576xbf16>
    %c0_134 = arith.constant 0 : index
    %c0_135 = arith.constant 0 : index
    %82 = vector.load %arg8[%c0_134, %c0_135] : memref<64x576xbf16, #tpu.memory_space<vmem>>, vector<64x576xbf16>
    %cst_136 = arith.constant dense<0.000000e+00> : vector<64x256xf32>
    %83 = tpu.matmul %82, %81, %cst_136 {dimension_numbers = #tpu.dot_dimension_numbers<[1], [1], [0], [0], [0, 0, 1, 0], [], []>} : vector<64x576xbf16>, vector<256x576xbf16>, vector<64x256xf32> -> vector<64x256xf32>
    %c0_137 = arith.constant 0 : index
    %c0_138 = arith.constant 0 : index
    %84 = vector.load %arg9[%c0_137, %c0_138] : memref<64x1xf32, #tpu.memory_space<vmem>>, vector<64x1xf32>
    %85 = vector.broadcast %84 : vector<64x1xf32> to vector<64x256xf32>
    %86 = arith.addf %83, %85 : vector<64x256xf32>
    %cst_139 = arith.constant 0.000000e+00 : f32
    %87 = vector.broadcast %cst_139 : f32 to vector<64x256xf32>
    %88 = arith.maximumf %86, %87 : vector<64x256xf32>
    %c0_140 = arith.constant 0 : index
    %c0_141 = arith.constant 0 : index
    %c0_142 = arith.constant 0 : index
    %89 = vector.load %arg10[%c0_140, %c0_141, %c0_142] : memref<1x64x256xf32, #tpu.memory_space<vmem>>, vector<1x64x256xf32>
    %90 = vector.shape_cast %89 : vector<1x64x256xf32> to vector<64x256xf32>
    %91 = vector.shape_cast %88 : vector<64x256xf32> to vector<1x64x256xf32>
    tpu.vector_store %arg10[%c0_140, %c0_141, %c0_142], %91 {strides = array<i32>} : memref<1x64x256xf32, #tpu.memory_space<vmem>>, vector<1x64x256xf32>,
    return
  }
  func.func @transform_0(%arg0: i32) -> (i32, i32, i32, i32) {
    %c0_i32 = arith.constant 0 : i32
    %c0_i32_0 = arith.constant 0 : i32
    %c0_i32_1 = arith.constant 0 : i32
    %c0_i32_2 = arith.constant 0 : i32
    return %arg0, %c0_i32, %c0_i32_0, %c0_i32_1 : i32, i32, i32, i32
  }
  func.func @transform_1(%arg0: i32) -> (i32, i32) {
    %c0_i32 = arith.constant 0 : i32
    %c0_i32_0 = arith.constant 0 : i32
    %c0_i32_1 = arith.constant 0 : i32
    return %c0_i32, %c0_i32_0 : i32, i32
  }
  func.func @transform_2(%arg0: i32) -> (i32, i32) {
    %c0_i32 = arith.constant 0 : i32
    %c0_i32_0 = arith.constant 0 : i32
    %c0_i32_1 = arith.constant 0 : i32
    return %c0_i32, %c0_i32_0 : i32, i32
  }
  func.func @transform_3(%arg0: i32) -> (i32, i32) {
    %c0_i32 = arith.constant 0 : i32
    %c0_i32_0 = arith.constant 0 : i32
    %c0_i32_1 = arith.constant 0 : i32
    return %c0_i32, %c0_i32_0 : i32, i32
  }
  func.func @transform_4(%arg0: i32) -> (i32, i32) {
    %c0_i32 = arith.constant 0 : i32
    %c0_i32_0 = arith.constant 0 : i32
    %c0_i32_1 = arith.constant 0 : i32
    return %c0_i32, %c0_i32_0 : i32, i32
  }
  func.func @transform_5(%arg0: i32) -> (i32, i32) {
    %c0_i32 = arith.constant 0 : i32
    %c0_i32_0 = arith.constant 0 : i32
    %c0_i32_1 = arith.constant 0 : i32
    return %c0_i32, %c0_i32_0 : i32, i32
  }
  func.func @transform_6(%arg0: i32) -> (i32, i32) {
    %c0_i32 = arith.constant 0 : i32
    %c0_i32_0 = arith.constant 0 : i32
    %c0_i32_1 = arith.constant 0 : i32
    return %c0_i32, %c0_i32_0 : i32, i32
  }
  func.func @transform_7(%arg0: i32) -> (i32, i32) {
    %c0_i32 = arith.constant 0 : i32
    %c0_i32_0 = arith.constant 0 : i32
    %c0_i32_1 = arith.constant 0 : i32
    return %c0_i32, %c0_i32_0 : i32, i32
  }
  func.func @transform_8(%arg0: i32) -> (i32, i32) {
    %c0_i32 = arith.constant 0 : i32
    %c0_i32_0 = arith.constant 0 : i32
    %c0_i32_1 = arith.constant 0 : i32
    return %c0_i32, %c0_i32_0 : i32, i32
  }
  func.func @transform_9(%arg0: i32) -> (i32, i32, i32) {
    %c0_i32 = arith.constant 0 : i32
    %c0_i32_0 = arith.constant 0 : i32
    %c0_i32_1 = arith.constant 0 : i32
    return %arg0, %c0_i32, %c0_i32_0 : i32, i32, i32
  }
}

</mosaic_0001>

<bundles_post_ra>
// kernel: tpu_custom_call.1
= control target key start
LH: loop header
LB: loop body
LE: loop exit
PB: predicated region body
PF: predicated region fallthrough
CT: control target
= control target key end

     0   :  { %14 = vsyncpa [#allocation5], 0  ;;  %s14146_s0 = inlined_call_operand.vmem [shape: bf16[2,18,18,2], index: 0, kind: input, shape index: {}]   ;;  %s14147_s1 = inlined_call_operand.vmem [shape: bf16[18,32], index: 1, kind: input, shape index: {}]   ;;  %s14148_s2 = inlined_call_operand.vmem [shape: f32[1,32], index: 2, kind: input, shape index: {}]   ;;  %s14149_s3 = inlined_call_operand.vmem [shape: bf16[288,32], index: 3, kind: input, shape index: {}]   ;;  %s14150_s4 = inlined_call_operand.vmem [shape: f32[1,32], index: 4, kind: input, shape index: {}]   ;;  %s14151_s5 = inlined_call_operand.vmem [shape: bf16[32,64], index: 5, kind: input, shape index: {}]   ;;  %s14152_s6 = inlined_call_operand.vmem [shape: f32[1,64], index: 6, kind: input, shape index: {}]   ;;  %s14153_s7 = inlined_call_operand.vmem [shape: bf16[64,576], index: 7, kind: input, shape index: {}]   ;;  %s14154_s8 = inlined_call_operand.vmem [shape: f32[64,1], index: 8, kind: input, shape index: {}]   ;;  %s14155_s9 = inlined_call_operand.hbm [shape: f32[2,64,256], index: 9, kind: output, shape index: {}]  }
   0x1   :  { %16 = vsyncpa [#allocation5 + $0x1], 0  ;;  %s9888_s30 = smov 0   ;;  %s9890_s10 = smov 0  }
   0x2   :  { %s9892_s11 = smov 0   ;;  %s9894_s12 = smov 0  }
   0x3 LB: > { %s9909_s13 = sadd.s32 4294967295, %s9822_s12   ;;  %s8592_s14 = sadd.s32 4294967294, %s9822_s12   ;;  %s9822_s12 = sphi %s9894_s12, %s14420_s12   ;;  %s9818_s11 = sphi %s9892_s11, %s14419_s11   ;;  %s9814_s10 = sphi %s9890_s10, %s14418_s10   ;;  %s9810_s30 = sphi %s9888_s30, %s14417_s30  }
   0x4   : > { %s9913_s15 = sadd.s32 1, %s9822_s12   ;;  %s223_s16 = sadd.s32 1, %s9818_s11 }
   0x5   : > { %s220_s17 = ssub.s32 %s9822_s12, %s9913_s15  ;;  %p233_p0 = scmp.ne.s32.totalorder %s9818_s11, %s9814_s10 }
   0x6   : > { %p221_p1 = scmp.eq.s32.totalorder %s220_s17, 0  ;;  %p234_p2 = scmp.eq.s32.totalorder %s9909_s13, 1 }
   0x7   : > { %p239_p3 = scmp.ne.s32.totalorder %s9814_s10, %s9810_s30  ;;  %p240_p4 = scmp.eq.s32.totalorder %s8592_s14, 1 }
   0x8   : > { %s9924_s18 = scalar_select %p221_p1, %s9818_s11, %s223_s16  }
   0x9   : > { %p9926_p5 = por %p234_p2, %p233_p0  ;;  %p9930_p6 = por %p240_p4, %p239_p3 }
   0xa   : > { %p8595_p7 = scmp.ge.s32.totalorder %s9822_s12, 1  ;;  %p290_p8 = scmp.lt.s32.totalorder %s9822_s12, 3 }
   0xc   : > { %p291_p9 = pnand %p8595_p7, %p290_p8 }
   0xe   : > { %294 = sbr.rel (%p291_p9) target bundleno = 1808 (0x710), region = 56 }
  0x15   : > { %p326_p10 = scmp.lt.s32.totalorder %s9909_s13, 1  ;;  %vm927_vm0 = vcmask 1046528   ;;  %s9824_s26 = smov 6   ;;  %vm654_vm1 = vsmask.f32 7424  ;;  %vm2348_vm2 = vcmask 1040384  }
  0x16   : > { %s9825_s27 = smov 10   ;;  %s9826_s28 = smov 4   ;;  %vm2032_vm3 = vcmask 15360   ;;  %vm2065_vm4 = vcmask 31744   ;;  %vm2098_vm5 = vcmask 48128   ;;  %vm2131_vm6 = vcmask 64512  }
  0x17   : > { %s327_s21 = scalar_select %p326_p10, %s9909_s13, 1  ;;  %vm2164_vm7 = vcmask 80896   ;;  %vm2197_vm8 = vcmask 97280   ;;  %vm2230_vm9 = vcmask 113664   ;;  %vm2263_vm10 = vcmask 130048  }
  0x18   : > { %s9827_s29 = smov 2   ;;  %s9828_s17 = smov 8   ;;  %vm2315_vm11 = vcmask 146432   ;;  %vm2551_vm12 = vcmask 261120   ;;  %vm2553_vm13 = vcmask 253952  }
  0x19   : > { %s9333_s22 = smul.u32 216, %s327_s21  ;;  %s9829_s21 = smov 12   ;;  %vm14156_vm14 = vsmask.f32 256 }
  0x1a   : > { %s9831_s23 = smov 16   ;;  %vm10692_vm15 = vmand %vm2553_vm13, %vm14156_vm14  ;;  %vm2546_vm13 = vsmask.f32 7966  ;;  %s9836_s14 = smov [#allocation4]  }
  0x1b   : > { %s9941_s25 = scalar_lea.vmem %s14146_s0, %s9333_s22  ;;  %s9830_s22 = smov 14  }
  0x1c   : > { %v8600_v0 = vld [vmem:[%s9941_s25 + $0x18] sm:$0xf]  ;;  %v8601_v1 = vld [vmem:[%s9941_s25 + $0x1c] sm:$0xf]  ;;  %v8598_v5 = vld [vmem:[%s9941_s25 + $0xc] sm:$0xf] }
  0x1d   : > { %v8647_v2 = vld [vmem:[%s9941_s25 + $0x18] sm:$0xe]  ;;  %v8775_v3 = vcombine.low %v8600_v0, %v8601_v1  ;;  %v8599_v6 = vld [vmem:[%s9941_s25 + $0x10] sm:$0xf]  ;;  %v8646_v7 = vld [vmem:[%s9941_s25 + $0xc] sm:$0xe] }
  0x1e   : > { %v8807_v4 = vcombine.low %v8647_v2, %v8601_v1  ;;  %v9949_v8 = vcombine.low %v8598_v5, %v8599_v6  ;;  %v8806_v9 = vcombine.low %v8646_v7, %v8599_v6  ;;  %v9952_v10 = vld [vmem:[%s9941_s25 + $0x14] ss:$0 sps:$4 sm:$0x11]   ;;  %v333_v12 = vld [vmem:[%s9941_s25 + $0x4] sm:$0xf] }
  0x1f   : > { %1090 = vrot.lane.b32.xlu1 %v8775_v3, %s9824_s26  ;;  %v1183_v11 = vshll.u32 %v8775_v3, 16  ;;  %v1441_v16 = vrot.slane %v9952_v10, 1  ;;  %v380_v17 = vld [vmem:[%s9941_s25] sm:$0xe]  ;;  %v1181_v18 = vshrl.u32 %v8775_v3, 16  ;;  %v1176_v60 = vshll.u32 %v9952_v10, 16 }
  0x20   : > { %v1443_v13 = vrot.slane %v8807_v4, 1  ;;  %1088 = vrot.lane.b32.xlu0 %v9949_v8, %s9824_s26  ;;  %v1171_v14 = vshll.u32 %v9949_v8, 16  ;;  %v1440_v15 = vrot.slane %v8806_v9, 1  ;;  %v9528_v19 = vld [vmem:[%s9941_s25 + $0x8] ss:$0 sps:$4 sm:$0x11]   ;;  %v8758_v20 = vcombine.low %v380_v17, %v333_v12 }
  0x21   : > { %v332_v21 = vld [vmem:[%s9941_s25] sm:$0xf]  ;;  %v1185_v22 = vrot.slane %v1183_v11, 1  ;;  %v334_v25 = vld [vmem:[%s9941_s25 + $0xc] sm:$0xf]  ;;  %v929_v28 = vrot.slane %v9528_v19, 1 }
  0x22   : > { %v1442_v23 = vsel %vm927_vm0, %v1440_v15, %v1441_v16  ;;  %v9964_v24 = vcombine.low %v332_v21, %v333_v12  ;;  %v335_v26 = vld [vmem:[%s9941_s25 + $0x10] sm:$0xf]  ;;  %v928_v27 = vrot.slane %v8758_v20, 1  ;;  %v381_v29 = vld [vmem:[%s9941_s25 + $0xc] sm:$0xe]  ;;  %v663_v31 = vshll.u32 %v9528_v19, 16 }
  0x23   : > { %v9969_v30 = vcombine.low %v334_v25, %v335_v26  ;;  %v9532_v32 = vld [vmem:[%s9941_s25 + $0x14] ss:$0 sps:$4 sm:$0x11]   ;;  %v8759_v33 = vcombine.low %v381_v29, %v335_v26  ;;  %v9534_v38 = vld [vmem:[%s9941_s25 + $0x20] ss:$0 sps:$4 sm:$0x11]   ;;  %v1186_v56 = vor.u32 %v1185_v22, %v1181_v18 }
  0x24   : > { %1488 = vrot.lane.b32.xlu0 %v1442_v23, %s9825_s27  ;;  %v656_v34 = vshrl.u32 %v9964_v24, 16  ;;  %v658_v35 = vshll.u32 %v9964_v24, 16  ;;  %v930_v36 = vsel %vm927_vm0, %v928_v27, %v929_v28  ;;  %v665_v37 = vrot.slane %v663_v31, 1  ;;  %v8664_v43 = vld [vmem:[%s9941_s25 + $0x24] sm:$0xf] }
  0x25   : > { %976 = vrot.lane.b32.xlu1 %v930_v36, %s9826_s28  ;;  %v931_v39 = vrot.slane %v8759_v33, 1  ;;  %v932_v40 = vrot.slane %v9532_v32, 1  ;;  %v668_v42 = vshrl.u32 %v9969_v30, 16  ;;  %v1444_v44 = vrot.slane %v9534_v38, 1  ;;  %v9982_v48 = vld [vmem:[%s9941_s25 + $0x28] sm:$0xf] }
  0x26   : > { %v660_v41 = vrot.slane %v658_v35, 1  ;;  %v670_v45 = vshll.u32 %v9969_v30, 16  ;;  %v675_v46 = vshll.u32 %v9532_v32, 16  ;;  %v1188_v47 = vshll.u32 %v9534_v38, 16  ;;  %v8662_v53 = vld [vmem:[%s9941_s25 + $0x18] sm:$0xf] }
  0x27   : > { %v933_v49 = vsel %vm927_vm0, %v931_v39, %v932_v40  ;;  %v1169_v51 = vshrl.u32 %v9949_v8, 16  ;;  %v1173_v52 = vrot.slane %v1171_v14, 1  ;;  %v8663_v57 = vld [vmem:[%s9941_s25 + $0x1c] sm:$0xf]  ;;  %v8823_v61 = vcombine.low %v8664_v43, %v9982_v48  ;;  %v8710_v7 = vld [vmem:[%s9941_s25 + $0x18] sm:$0xe] }
  0x28   : > { %v661_v50 = vor.u32 %v660_v41, %v656_v34  ;;  %v672_v54 = vrot.slane %v670_v45, 1  ;;  %v677_v55 = vrot.slane %v675_v46, 1  ;;  %v1190_v59 = vrot.slane %v1188_v47, 1  ;;  %v9995_v1 = vld [vmem:[%s9941_s25 + $0x2c] ss:$0 sps:$4 sm:$0x11]  }
  0x29   : > { %978 = vrot.lane.b32.xlu1 %v933_v49, %s9826_s28  ;;  %v1445_v62 = vsel %vm927_vm0, %v1443_v13, %v1444_v44  ;;  %v8822_v0 = vcombine.low %v8662_v53, %v8663_v57  ;;  %v1174_v2 = vor.u32 %v1173_v52, %v1169_v51  ;;  %v1178_v3 = vrot.slane %v1176_v60, 1  ;;  %v9998_v5 = vld [vmem:[%s9941_s25 + $0x20] ss:$0 sps:$4 sm:$0x11]   ;;  %v336_v9 = vld [vmem:[%s9941_s25 + $0x18] sm:$0xf] }
  0x2a   : > { %v666_v58 = vsel %vm654_vm1, %v661_v50, %v665_v37  ;;  %v673_v63 = vor.u32 %v672_v54, %v668_v42  ;;  %v1695_v4 = vshll.u32 %v8823_v61, 16  ;;  %v9605_v10 = vld [vmem:[%s14147_s1] sm:$0xff]   ;;  %v1191_v11 = vsel %vm654_vm1, %v1186_v56, %v1190_v59  ;;  %v10009_v13 = vld [vmem:[%s9941_s25 + $0x1c] sm:$0xf]  ;;  %v339_v23 = vld [vmem:[%s9941_s25 + $0x28] sm:$0xf] }
  0x2b   : > { %847 = vrot.lane.b32.xlu0 %v666_v58, %s9827_s29  ;;  %v1683_v8 = vshll.u32 %v8822_v0, 16  ;;  %v1693_v12 = vshrl.u32 %v8823_v61, 16  ;;  %v1700_v15 = vshll.u32 %v9995_v1, 16  ;;  %v1681_v16 = vshrl.u32 %v8822_v0, 16  ;;  %9163 = vmatprep.subr.bf16.mxu0 %v9605_v10  ;;  %v338_v22 = vld [vmem:[%s9941_s25 + $0x24] sm:$0xf] }
  0x2c   : > { %v678_v6 = vsel %vm654_vm1, %v673_v63, %v677_v55  ;;  %v1697_v14 = vrot.slane %v1695_v4, 1  ;;  %v10014_v17 = vcombine.low %v336_v9, %v10009_v13  ;;  %v10017_v18 = vld [vmem:[%s9941_s25 + $0x20] ss:$0 sps:$4 sm:$0x11]   ;;  %v1179_v19 = vsel %vm654_vm1, %v1174_v2, %v1178_v3  ;;  %9164 = vmatpush3.bf16.msra.mxu0 %v9605_v10  ;;  %9271 = vmatprep.subr.bf16.mxu1 %v9605_v10  ;;  %v8711_v38 = vld [vmem:[%s9941_s25 + $0x24] sm:$0xe] }
  0x2d   : > { %1490 = vrot.lane.b32.xlu1 %v1445_v62, %s9825_s27  ;;  %v1685_v20 = vrot.slane %v1683_v8, 1  ;;  %v1688_v21 = vshll.u32 %v9998_v5, 16  ;;  %v8854_v25 = vcombine.low %v8710_v7, %v8663_v57  ;;  %9273 = vmatpush3.bf16.msra.mxu1 %v9605_v10  ;;  %v687_v27 = vshll.u32 %v10017_v18, 16  ;;  %v10029_v29 = vld [vmem:[%s9941_s25 + $0x2c] ss:$0 sps:$4 sm:$0x11]  }
  0x2e   : > { %v682_v26 = vshll.u32 %v10014_v17, 16  ;;  %v10026_v28 = vcombine.low %v338_v22, %v339_v23  ;;  %v1698_v31 = vor.u32 %v1697_v14, %v1693_v12  ;;  %v1702_v32 = vrot.slane %v1700_v15, 1  ;;  %v383_v44 = vld [vmem:[%s9941_s25 + $0x24] sm:$0xe]  ;;  %v382_v49 = vld [vmem:[%s9941_s25 + $0x18] sm:$0xe] }
  0x2f   : > { %849 = vrot.lane.b32.xlu0 %v678_v6, %s9827_s29  ;;  %v680_v33 = vshrl.u32 %v10014_v17, 16  ;;  %v1686_v35 = vor.u32 %v1685_v20, %v1681_v16  ;;  %v1690_v36 = vrot.slane %v1688_v21, 1  ;;  %v1952_v39 = vrot.slane %v8854_v25, 1  ;;  %v8604_v50 = vld [vmem:[%s9941_s25 + $0x30] sm:$0xf] }
  0x30   : > { %v684_v34 = vrot.slane %v682_v26, 1  ;;  %v694_v37 = vshll.u32 %v10026_v28, 16  ;;  %v689_v40 = vrot.slane %v687_v27, 1  ;;  %v1953_v41 = vrot.slane %v9998_v5, 1  ;;  %v8605_v51 = vld [vmem:[%s9941_s25 + $0x34] sm:$0xf] }
  0x31   : > { %1362 = vrot.lane.b32.xlu1 %v1191_v11, %s9828_s17  ;;  %v692_v42 = vshrl.u32 %v10026_v28, 16  ;;  %v699_v43 = vshll.u32 %v10029_v29, 16  ;;  %v1703_v45 = vsel %vm654_vm1, %v1698_v31, %v1702_v32  ;;  %v8855_v52 = vcombine.low %v8711_v38, %v9982_v48  ;;  %v8602_v54 = vld [vmem:[%s9941_s25 + $0x24] sm:$0xf]  ;;  %v8603_v55 = vld [vmem:[%s9941_s25 + $0x28] sm:$0xf] }
  0x32   : > { %v685_v46 = vor.u32 %v684_v34, %v680_v33  ;;  %v696_v47 = vrot.slane %v694_v37, 1  ;;  %v1691_v53 = vsel %vm654_vm1, %v1686_v35, %v1690_v36  ;;  %v1954_v56 = vsel %vm927_vm0, %v1952_v39, %v1953_v41  ;;  %v10056_v2 = vld [vmem:[%s9941_s25 + $0x38] ss:$0 sps:$4 sm:$0x11]   ;;  %v8649_v11 = vld [vmem:[%s9941_s25 + $0x30] sm:$0xe] }
  0x33   : > { %1360 = vrot.lane.b32.xlu0 %v1179_v19, %s9828_s17  ;;  %v8777_v57 = vcombine.low %v8604_v50, %v8605_v51  ;;  %v701_v60 = vrot.slane %v699_v43, 1  ;;  %v1955_v62 = vrot.slane %v8855_v52, 1  ;;  %v1956_v48 = vrot.slane %v9995_v1, 1  ;;  %v9552_v10 = vld [vmem:[%s9941_s25 + $0x2c] ss:$0 sps:$4 sm:$0x11]  }
  0x34   : > { %v690_v58 = vsel %vm654_vm1, %v685_v46, %v689_v40  ;;  %v697_v59 = vor.u32 %v696_v47, %v692_v42  ;;  %v8760_v63 = vcombine.low %v382_v49, %v10009_v13  ;;  %v938_v6 = vrot.slane %v10029_v29, 1  ;;  %v8648_v12 = vld [vmem:[%s9941_s25 + $0x24] sm:$0xe]  ;;  %v8668_v20 = vld [vmem:[%s9941_s25 + $0x3c] sm:$0xf] }
  0x35   : > { %1602 = vrot.lane.b32.xlu1 %v8823_v61, %s9829_s21  ;;  %v8761_v61 = vcombine.low %v383_v44, %v339_v23  ;;  %v1207_v3 = vshll.u32 %v8777_v57, 16  ;;  %v1957_v1 = vsel %vm927_vm0, %v1955_v62, %v1956_v48  ;;  %v935_v8 = vrot.slane %v10017_v18, 1  ;;  %v8669_v21 = vld [vmem:[%s9941_s25 + $0x40] sm:$0xf]  ;;  %v8666_v25 = vld [vmem:[%s9941_s25 + $0x30] sm:$0xf] }
  0x36   : > { %v702_v4 = vsel %vm654_vm1, %v697_v59, %v701_v60  ;;  %v934_v7 = vrot.slane %v8760_v63, 1  ;;  %v1205_v13 = vshrl.u32 %v8777_v57, 16  ;;  %v1212_v15 = vshll.u32 %v10056_v2, 16  ;;  %v8667_v26 = vld [vmem:[%s9941_s25 + $0x34] sm:$0xf] }
  0x37   : > { %1600 = vrot.lane.b32.xlu0 %v8822_v0, %s9829_s21  ;;  %v8776_v0 = vcombine.low %v8602_v54, %v8603_v55  ;;  %v937_v5 = vrot.slane %v8761_v61, 1  ;;  %v1209_v14 = vrot.slane %v1207_v3, 1  ;;  %v1200_v23 = vshll.u32 %v9552_v10, 16  ;;  %v9557_v42 = vld [vmem:[%s9941_s25 + $0x44] ss:$0 sps:$4 sm:$0x11]  }
  0x38   : > { %v936_v18 = vsel %vm927_vm0, %v934_v7, %v935_v8  ;;  %v8809_v27 = vcombine.low %v8649_v11, %v8605_v51  ;;  %v8808_v29 = vcombine.low %v8648_v12, %v8603_v55  ;;  %v8825_v31 = vcombine.low %v8668_v20, %v8669_v21  ;;  %v342_v47 = vld [vmem:[%s9941_s25 + $0x3c] sm:$0xf]  ;;  %v343_v49 = vld [vmem:[%s9941_s25 + $0x40] sm:$0xf]  ;;  %v340_v50 = vld [vmem:[%s9941_s25 + $0x30] sm:$0xf] }
  0x39   : > { %1874 = vrot.lane.b32.xlu1 %v1703_v45, %s9830_s22  ;;  %v1195_v9 = vshll.u32 %v8776_v0, 16  ;;  %v1193_v16 = vshrl.u32 %v8776_v0, 16  ;;  %v939_v19 = vsel %vm927_vm0, %v937_v5, %v938_v6  ;;  %v1210_v32 = vor.u32 %v1209_v14, %v1205_v13  ;;  %v9558_v45 = vld [vmem:[%s9941_s25 + $0x38] ss:$0 sps:$4 sm:$0x11]  }
  0x3a   : > { %v1214_v33 = vrot.slane %v1212_v15, 1  ;;  %v8824_v34 = vcombine.low %v8666_v25, %v8667_v26  ;;  %v1202_v36 = vrot.slane %v1200_v23, 1  ;;  %v1449_v37 = vrot.slane %v8809_v27, 1  ;;  %v10089_v51 = vld [vmem:[%s9941_s25 + $0x34] sm:$0xf] }
  0x3b   : > { %1872 = vrot.lane.b32.xlu0 %v1691_v53, %s9830_s22  ;;  %v1197_v22 = vrot.slane %v1195_v9, 1  ;;  %v1450_v38 = vrot.slane %v10056_v2, 1  ;;  %v1446_v39 = vrot.slane %v8808_v29, 1  ;;  %v1447_v40 = vrot.slane %v9552_v10, 1  ;;  %v8713_v52 = vld [vmem:[%s9941_s25 + $0x3c] sm:$0xe] }
  0x3c   : > { %v1719_v41 = vshll.u32 %v8825_v31, 16  ;;  %v1215_v43 = vsel %vm654_vm1, %v1210_v32, %v1214_v33  ;;  %v1707_v44 = vshll.u32 %v8824_v34, 16  ;;  %v1717_v53 = vshrl.u32 %v8825_v31, 16  ;;  %v9562_v7 = vld [vmem:[%s9941_s25 + $0x38] ss:$0 sps:$4 sm:$0x11]  }
  0x3d   : > { %851 = vrot.lane.b32.xlu1 %v690_v58, %s9827_s29  ;;  %v1198_v35 = vor.u32 %v1197_v22, %v1193_v16  ;;  %v1724_v55 = vshll.u32 %v9557_v42, 16  ;;  %v8712_v58 = vld [vmem:[%s9941_s25 + $0x30] sm:$0xe]  ;;  %v10097_v59 = vcombine.low %v342_v47, %v343_v49  ;;  %v1705_v60 = vshrl.u32 %v8824_v34, 16  ;;  %v385_v14 = vld [vmem:[%s9941_s25 + $0x3c] sm:$0xe] }
  0x3e   : > { %v1721_v54 = vrot.slane %v1719_v41, 1  ;;  %v1709_v61 = vrot.slane %v1707_v44, 1  ;;  %v1712_v62 = vshll.u32 %v9558_v45, 16  ;;  %v10100_v48 = vcombine.low %v340_v50, %v10089_v51  ;;  %v8609_v25 = vld [vmem:[%s9941_s25 + $0x4c] sm:$0xf] }
  0x3f   : > { %2000 = vrot.lane.b32.xlu0 %v1954_v56, %s9831_s23  ;;  %v1203_v46 = vsel %vm654_vm1, %v1198_v35, %v1202_v36  ;;  %v1451_v56 = vsel %vm927_vm0, %v1449_v37, %v1450_v38  ;;  %v8857_v63 = vcombine.low %v8713_v52, %v8669_v21  ;;  %v1726_v3 = vrot.slane %v1724_v55, 1  ;;  %v8608_v21 = vld [vmem:[%s9941_s25 + $0x48] sm:$0xf]  ;;  %v8606_v27 = vld [vmem:[%s9941_s25 + $0x3c] sm:$0xf] }
  0x40   : > { %v1722_v2 = vor.u32 %v1721_v54, %v1717_v53  ;;  %v718_v5 = vshll.u32 %v10097_v59, 16  ;;  %v1710_v6 = vor.u32 %v1709_v61, %v1705_v60  ;;  %v706_v8 = vshll.u32 %v10100_v48, 16  ;;  %v8607_v29 = vld [vmem:[%s9941_s25 + $0x40] sm:$0xf]  ;;  %v8651_v53 = vld [vmem:[%s9941_s25 + $0x48] sm:$0xe] }
  0x41   : > { %853 = vrot.lane.b32.xlu1 %v702_v4, %s9827_s29  ;;  %v9560_v4 = vld [vmem:[%s9941_s25 + $0x44] ss:$0 sps:$4 sm:$0x11]   ;;  %v1961_v9 = vrot.slane %v8857_v63, 1  ;;  %v1962_v10 = vrot.slane %v9557_v42, 1  ;;  %v1959_v13 = vrot.slane %v9558_v45, 1  ;;  %v8763_v32 = vcombine.low %v385_v14, %v343_v49 }
  0x42   : > { %v1727_v11 = vsel %vm654_vm1, %v1722_v2, %v1726_v3  ;;  %v716_v15 = vshrl.u32 %v10097_v59, 16  ;;  %v720_v16 = vrot.slane %v718_v5, 1  ;;  %v704_v20 = vshrl.u32 %v10100_v48, 16  ;;  %v9569_v45 = vld [vmem:[%s9941_s25 + $0x50] ss:$0 sps:$4 sm:$0x11]  }
  0x43   : > { %2002 = vrot.lane.b32.xlu0 %v1957_v1, %s9831_s23  ;;  %v1714_v1 = vrot.slane %v1712_v62, 1  ;;  %v708_v22 = vrot.slane %v706_v8, 1  ;;  %v711_v23 = vshll.u32 %v9562_v7, 16  ;;  %v8779_v36 = vcombine.low %v8608_v21, %v8609_v25  ;;  %v8672_v54 = vld [vmem:[%s9941_s25 + $0x54] sm:$0xf] }
  0x44   : > { %v943_v41 = vrot.slane %v8763_v32, 1  ;;  %v944_v42 = vrot.slane %v9560_v4, 1  ;;  %v941_v49 = vrot.slane %v9562_v7, 1  ;;  %v8673_v60 = vld [vmem:[%s9941_s25 + $0x58] sm:$0xf] }
  0x45   : > { %982 = vrot.lane.b32.xlu1 %v939_v19, %s9826_s28  ;;  %v723_v19 = vshll.u32 %v9560_v4, 16  ;;  %v709_v37 = vor.u32 %v708_v22, %v704_v20  ;;  %v713_v38 = vrot.slane %v711_v23, 1  ;;  %v1231_v44 = vshll.u32 %v8779_v36, 16  ;;  %v8671_v2 = vld [vmem:[%s9941_s25 + $0x4c] sm:$0xf] }
  0x46   : > { %v945_v52 = vsel %vm927_vm0, %v943_v41, %v944_v42  ;;  %v1229_v55 = vshrl.u32 %v8779_v36, 16  ;;  %v8650_v3 = vld [vmem:[%s9941_s25 + $0x3c] sm:$0xe]  ;;  %v8811_v4 = vcombine.low %v8651_v53, %v8609_v25  ;;  %v8827_v5 = vcombine.low %v8672_v54, %v8673_v60  ;;  %v10145_v14 = vld [vmem:[%s9941_s25 + $0x5c] ss:$0 sps:$4 sm:$0x11]  }
  0x47   : > { %980 = vrot.lane.b32.xlu0 %v936_v18, %s9826_s28  ;;  %v1715_v18 = vsel %vm654_vm1, %v1710_v6, %v1714_v1  ;;  %v725_v35 = vrot.slane %v723_v19, 1  ;;  %v8810_v8 = vcombine.low %v8650_v3, %v8607_v29  ;;  %v10150_v19 = vld [vmem:[%s9941_s25 + $0x50] ss:$0 sps:$4 sm:$0x11]   ;;  %v346_v22 = vld [vmem:[%s9941_s25 + $0x54] sm:$0xf] }
  0x48   : > { %v10155_v23 = vld [vmem:[%s9941_s25 + $0x58] sm:$0xf]  ;;  %v344_v25 = vld [vmem:[%s9941_s25 + $0x48] sm:$0xf]  ;;  %v1968_v54 = vrot.slane %v10145_v14, 1 }
  0x49   : > { %1094 = vrot.lane.b32.xlu1 %v8777_v57, %s9824_s26  ;;  %v1448_v57 = vsel %vm927_vm0, %v1446_v39, %v1447_v40  ;;  %v8778_v40 = vcombine.low %v8606_v27, %v8607_v29  ;;  %v1452_v21 = vrot.slane %v8810_v8, 1  ;;  %v8715_v29 = vld [vmem:[%s9941_s25 + $0x54] sm:$0xe]  ;;  %v8611_v8 = vld [vmem:[%s9941_s25 + $0x58] sm:$0xf] }
  0x4a   : > { %v8859_v41 = vcombine.low %v8715_v29, %v8673_v60 }
  0x4b   : > { %1092 = vrot.lane.b32.xlu0 %v8776_v0, %s9824_s26  ;;  %v8856_v0 = vcombine.low %v8712_v58, %v8667_v26  ;;  %v384_v26 = vld [vmem:[%s9941_s25 + $0x30] sm:$0xe]  ;;  %v1219_v50 = vshll.u32 %v8778_v40, 16  ;;  %v1217_v58 = vshrl.u32 %v8778_v40, 16 }
  0x4c   : > { %v8762_v39 = vcombine.low %v384_v26, %v10089_v51  ;;  %v9570_v51 = vld [vmem:[%s9941_s25 + $0x44] ss:$0 sps:$4 sm:$0x11]   ;;  %v10159_v26 = vld [vmem:[%s9941_s25 + $0x4c] sm:$0xf]  ;;  %v1967_v53 = vrot.slane %v8859_v41, 1 }
  0x4d   : > { %1366 = vrot.lane.b32.xlu1 %v1215_v43, %s9828_s17  ;;  %v1958_v12 = vrot.slane %v8856_v0, 1  ;;  %v1221_v62 = vrot.slane %v1219_v50, 1  ;;  %v1224_v63 = vshll.u32 %v9570_v51, 16  ;;  %v8670_v0 = vld [vmem:[%s9941_s25 + $0x48] sm:$0xf] }
  0x4e   : > { %v940_v47 = vrot.slane %v8762_v39, 1  ;;  %v8826_v7 = vcombine.low %v8670_v0, %v8671_v2  ;;  %v10182_v50 = vld [vmem:[%s9941_s25 + $0x50] ss:$0 sps:$4 sm:$0x11]   ;;  %v8612_v0 = vld [vmem:[%s9941_s25 + $0x60] sm:$0xf] }
  0x4f   : > { %1364 = vrot.lane.b32.xlu0 %v1203_v46, %s9828_s17  ;;  %v1960_v33 = vsel %vm927_vm0, %v1958_v12, %v1959_v13  ;;  %v714_v46 = vsel %vm654_vm1, %v709_v37, %v713_v38  ;;  %v1456_v12 = vrot.slane %v9569_v45, 1  ;;  %v1743_v13 = vshll.u32 %v8827_v5, 16 }
  0x50   : > { %v942_v61 = vsel %vm927_vm0, %v940_v47, %v941_v49  ;;  %v1736_v37 = vshll.u32 %v10150_v19, 16  ;;  %v10169_v38 = vcombine.low %v346_v22, %v10155_v23 }
  0x51   : > { %1494 = vrot.lane.b32.xlu1 %v1451_v56, %s9825_s27  ;;  %v1233_v56 = vrot.slane %v1231_v44, 1  ;;  %v1745_v32 = vrot.slane %v1743_v13, 1  ;;  %v10177_v44 = vld [vmem:[%s9941_s25 + $0x5c] ss:$0 sps:$4 sm:$0x11]  }
  0x52   : > { %v1738_v47 = vrot.slane %v1736_v37, 1  ;;  %v742_v49 = vshll.u32 %v10169_v38, 16 }
  0x53   : > { %1492 = vrot.lane.b32.xlu0 %v1448_v57, %s9825_s27  ;;  %v1236_v57 = vshll.u32 %v9569_v45, 16  ;;  %v1234_v6 = vor.u32 %v1233_v56, %v1229_v55  ;;  %v1965_v56 = vrot.slane %v10150_v19, 1 }
  0x55   : > { %1606 = vrot.lane.b32.xlu1 %v8825_v31, %s9829_s21  ;;  %v1963_v31 = vsel %vm927_vm0, %v1961_v9, %v1962_v10  ;;  %v1238_v1 = vrot.slane %v1236_v57, 1  ;;  %v1222_v9 = vor.u32 %v1221_v62, %v1217_v58  ;;  %v1226_v10 = vrot.slane %v1224_v63, 1  ;;  %v387_v58 = vld [vmem:[%s9941_s25 + $0x54] sm:$0xe] }
  0x56   : > { %v740_v57 = vshrl.u32 %v10169_v38, 16  ;;  %v744_v62 = vrot.slane %v742_v49, 1  ;;  %v747_v63 = vshll.u32 %v10177_v44, 16  ;;  %v8675_v49 = vld [vmem:[%s9941_s25 + $0x64] sm:$0xf] }
  0x57   : > { %1604 = vrot.lane.b32.xlu0 %v8824_v34, %s9829_s21  ;;  %v721_v34 = vor.u32 %v720_v16, %v716_v15  ;;  %v1239_v15 = vsel %vm654_vm1, %v1234_v6, %v1238_v1  ;;  %v1731_v16 = vshll.u32 %v8826_v7, 16  ;;  %v1227_v20 = vsel %vm654_vm1, %v1222_v9, %v1226_v10  ;;  %v386_v6 = vld [vmem:[%s9941_s25 + $0x48] sm:$0xe] }
  0x58   : > { %v1969_v9 = vsel %vm927_vm0, %v1967_v53, %v1968_v54  ;;  %v749_v13 = vrot.slane %v747_v63, 1  ;;  %v8764_v19 = vcombine.low %v386_v6, %v10159_v26 }
  0x59   : > { %1878 = vrot.lane.b32.xlu1 %v1727_v11, %s9830_s22  ;;  %v726_v43 = vsel %vm654_vm1, %v721_v34, %v725_v35  ;;  %v1455_v11 = vrot.slane %v8811_v4, 1  ;;  %v8714_v34 = vld [vmem:[%s9941_s25 + $0x48] sm:$0xe]  ;;  %v1748_v35 = vshll.u32 %v10145_v14, 16  ;;  %v8765_v14 = vcombine.low %v387_v58, %v10155_v23 }
  0x5a   : > { %v8858_v42 = vcombine.low %v8714_v34, %v8671_v2  ;;  %v8613_v2 = vld [vmem:[%s9941_s25 + $0x64] sm:$0xf]  ;;  %v9587_v23 = vld [vmem:[%s9941_s25 + $0x68] ss:$0 sps:$4 sm:$0x11]   ;;  %v946_v29 = vrot.slane %v8764_v19, 1 }
  0x5b   : > { %1876 = vrot.lane.b32.xlu0 %v1715_v18, %s9830_s22  ;;  %v1453_v18 = vrot.slane %v9570_v51, 1  ;;  %v1457_v27 = vsel %vm927_vm0, %v1455_v11, %v1456_v12  ;;  %v1750_v45 = vrot.slane %v1748_v35, 1  ;;  %v8781_v10 = vcombine.low %v8612_v0, %v8613_v2  ;;  %v8652_v34 = vld [vmem:[%s9941_s25 + $0x54] sm:$0xe] }
  0x5c   : > { %v1964_v55 = vrot.slane %v8858_v42, 1  ;;  %v745_v12 = vor.u32 %v744_v62, %v740_v57  ;;  %v8676_v42 = vld [vmem:[%s9941_s25 + $0x6c] sm:$0xf]  ;;  %v10235_v0 = vld [vmem:[%s9941_s25 + $0x74] ss:$0 sps:$4 sm:$0x11]  }
  0x5d   : > { %2006 = vrot.lane.b32.xlu1 %v1963_v31, %s9831_s23  ;;  %v1741_v31 = vshrl.u32 %v8827_v5, 16  ;;  %v1454_v39 = vsel %vm927_vm0, %v1452_v21, %v1453_v18  ;;  %v950_v21 = vrot.slane %v10177_v44, 1  ;;  %v1255_v18 = vshll.u32 %v8781_v10, 16 }
  0x5e   : > { %v1966_v11 = vsel %vm927_vm0, %v1964_v55, %v1965_v56  ;;  %v750_v22 = vsel %vm654_vm1, %v745_v12, %v749_v13  ;;  %v1253_v35 = vshrl.u32 %v8781_v10, 16  ;;  %v1772_v12 = vshll.u32 %v10235_v0, 16 }
  0x5f   : > { %2004 = vrot.lane.b32.xlu0 %v1960_v33, %s9831_s23  ;;  %v1729_v33 = vshrl.u32 %v8826_v7, 16 }
  0x61   : > { %857 = vrot.lane.b32.xlu1 %v726_v43, %s9827_s29  ;;  %v1746_v43 = vor.u32 %v1745_v32, %v1741_v31  ;;  %v9588_v32 = vld [vmem:[%s9941_s25 + $0x5c] ss:$0 sps:$4 sm:$0x11]  }
  0x62   : > { %v1459_v62 = vrot.slane %v9588_v32, 1 }
  0x63   : > { %855 = vrot.lane.b32.xlu0 %v714_v46, %s9827_s29  ;;  %v1751_v60 = vsel %vm654_vm1, %v1746_v43, %v1750_v45  ;;  %v8677_v43 = vld [vmem:[%s9941_s25 + $0x70] sm:$0xf] }
  0x65   : > { %986 = vrot.lane.b32.xlu1 %v945_v52, %s9826_s28  ;;  %v9608_v52 = vld [vmem:[%s14147_s1 + $0x8] ss:$0 sps:$4 sm:$0x11]  }
  0x66   : > { %9323 = vmatprep.subr.msk.bf16.mxu0 %vm2348_vm2, %v9608_v52  ;;  %9324 = vmatprep.subr.msk.bf16.mxu1 %vm2348_vm2, %v9608_v52  ;;  %v2350_v1 = vsel %vm2348_vm2, %v9608_v52, 0  ;;  %v8829_v52 = vcombine.low %v8676_v42, %v8677_v43  ;;  %vm2545_vm2 = vcmask 261127  }
  0x67   : > { %984 = vrot.lane.b32.xlu0 %v942_v61, %s9826_s28  ;;  %9166 = vmatpush3.bf16.msra.mxu0 %v2350_v1  ;;  %vm10771_vm14 = vmand %vm2545_vm2, %vm2546_vm13  ;;  %vm3978_vm2 = vcmask 785408  }
  0x68   : > { %9274 = vmatpush3.bf16.msra.mxu1 %v2350_v1  ;;  %v1767_v63 = vshll.u32 %v8829_v52, 16  ;;  %v10245_v1 = vld [vmem:[%s9941_s25 + $0x70] sm:$0xf] }
  0x69   : > { %1098 = vrot.lane.b32.xlu1 %v8779_v36, %s9824_s26  ;;  %v1733_v36 = vrot.slane %v1731_v16, 1 }
  0x6b   : > { %1096 = vrot.lane.b32.xlu0 %v8778_v40, %s9824_s26  ;;  %v10173_v40 = vcombine.low %v344_v25, %v10159_v26  ;;  %v1734_v46 = vor.u32 %v1733_v36, %v1729_v33  ;;  %v949_v25 = vrot.slane %v8765_v14, 1  ;;  %v947_v26 = vrot.slane %v10182_v50, 1  ;;  %v8653_v33 = vld [vmem:[%s9941_s25 + $0x60] sm:$0xe] }
  0x6c   : > { %v1257_v36 = vrot.slane %v1255_v18, 1  ;;  %v1765_v14 = vshrl.u32 %v8829_v52, 16 }
  0x6d   : > { %1370 = vrot.lane.b32.xlu1 %v1239_v15, %s9828_s17  ;;  %v730_v51 = vshll.u32 %v10173_v40, 16  ;;  %v1739_v61 = vsel %vm654_vm1, %v1734_v46, %v1738_v47  ;;  %v728_v3 = vshrl.u32 %v10173_v40, 16  ;;  %v951_v37 = vsel %vm927_vm0, %v949_v25, %v950_v21  ;;  %v8674_v47 = vld [vmem:[%s9941_s25 + $0x60] sm:$0xf] }
  0x6e   : > { %v948_v44 = vsel %vm927_vm0, %v946_v29, %v947_v26  ;;  %v1248_v46 = vshll.u32 %v9588_v32, 16  ;;  %v1258_v53 = vor.u32 %v1257_v36, %v1253_v35  ;;  %v8828_v55 = vcombine.low %v8674_v47, %v8675_v49  ;;  %v10276_v35 = vld [vmem:[%s9941_s25 + $0x68] ss:$0 sps:$4 sm:$0x11]  }
  0x6f   : > { %1368 = vrot.lane.b32.xlu0 %v1227_v20, %s9828_s17  ;;  %v732_v4 = vrot.slane %v730_v51, 1  ;;  %v8812_v51 = vcombine.low %v8652_v34, %v8611_v8  ;;  %v1774_v29 = vrot.slane %v1772_v12, 1  ;;  %v10319_v12 = vld [vmem:[%s9941_s25 + $0x80] ss:$0 sps:$4 sm:$0x11]  }
  0x70   : > { %v1250_v57 = vrot.slane %v1248_v46, 1  ;;  %v1753_v19 = vshrl.u32 %v8828_v55, 16  ;;  %v10286_v46 = vld [vmem:[%s9941_s25 + $0x7c] sm:$0xf] }
  0x71   : > { %1498 = vrot.lane.b32.xlu1 %v1457_v27, %s9825_s27  ;;  %v733_v15 = vor.u32 %v732_v4, %v728_v3  ;;  %v1755_v3 = vshll.u32 %v8828_v55, 16  ;;  %v10240_v4 = vld [vmem:[%s9941_s25 + $0x68] ss:$0 sps:$4 sm:$0x11]  }
  0x72   : > { %v1760_v21 = vshll.u32 %v10240_v4, 16  ;;  %v1971_v42 = vrot.slane %v10240_v4, 1 }
  0x73   : > { %1496 = vrot.lane.b32.xlu0 %v1454_v39, %s9825_s27  ;;  %v1260_v39 = vshll.u32 %v9587_v23, 16 }
  0x74   : > { %v1762_v34 = vrot.slane %v1760_v21, 1 }
  0x75   : > { %1610 = vrot.lane.b32.xlu1 %v8827_v5, %s9829_s21  ;;  %v735_v5 = vshll.u32 %v10182_v50, 16  ;;  %v8813_v50 = vcombine.low %v8653_v33, %v8613_v2  ;;  %v1262_v54 = vrot.slane %v1260_v39, 1  ;;  %v1974_v39 = vrot.slane %v10235_v0, 1 }
  0x77   : > { %1608 = vrot.lane.b32.xlu0 %v8826_v7, %s9829_s21  ;;  %v8610_v7 = vld [vmem:[%s9941_s25 + $0x54] sm:$0xf]  ;;  %v737_v16 = vrot.slane %v735_v5, 1  ;;  %v1461_v58 = vrot.slane %v8813_v50, 1  ;;  %v1263_v2 = vsel %vm654_vm1, %v1258_v53, %v1262_v54  ;;  %v350_v5 = vld [vmem:[%s9941_s25 + $0x6c] sm:$0xf] }
  0x78   : > { %v8780_v20 = vcombine.low %v8610_v7, %v8611_v8  ;;  %v348_v7 = vld [vmem:[%s9941_s25 + $0x60] sm:$0xf]  ;;  %v10249_v8 = vld [vmem:[%s9941_s25 + $0x64] sm:$0xf]  ;;  %v8614_v53 = vld [vmem:[%s9941_s25 + $0x6c] sm:$0xf] }
  0x79   : > { %1882 = vrot.lane.b32.xlu1 %v1751_v60, %s9830_s22  ;;  %v738_v27 = vsel %vm654_vm1, %v733_v15, %v737_v16  ;;  %v1462_v60 = vrot.slane %v9587_v23, 1  ;;  %v1769_v15 = vrot.slane %v1767_v63, 1  ;;  %v10259_v16 = vcombine.low %v350_v5, %v10245_v1 }
  0x7a   : > { %v1243_v31 = vshll.u32 %v8780_v20, 16  ;;  %v1241_v41 = vshrl.u32 %v8780_v20, 16  ;;  %v10263_v18 = vcombine.low %v348_v7, %v10249_v8 }
  0x7b   : > { %1880 = vrot.lane.b32.xlu0 %v1739_v61, %s9830_s22  ;;  %v1458_v61 = vrot.slane %v8812_v51, 1  ;;  %v1770_v26 = vor.u32 %v1769_v15, %v1765_v14  ;;  %v766_v32 = vshll.u32 %v10259_v16, 16 }
  0x7c   : > { %v1245_v45 = vrot.slane %v1243_v31, 1  ;;  %v10272_v31 = vld [vmem:[%s9941_s25 + $0x74] ss:$0 sps:$4 sm:$0x11]   ;;  %v754_v36 = vshll.u32 %v10263_v18, 16 }
  0x7d   : > { %2010 = vrot.lane.b32.xlu1 %v1969_v9, %s9831_s23  ;;  %v1463_v9 = vsel %vm927_vm0, %v1461_v58, %v1462_v60  ;;  %v1460_v13 = vsel %vm927_vm0, %v1458_v61, %v1459_v62  ;;  %v768_v50 = vrot.slane %v766_v32, 1  ;;  %v771_v51 = vshll.u32 %v10272_v31, 16 }
  0x7e   : > { %v1246_v56 = vor.u32 %v1245_v45, %v1241_v41  ;;  %v8616_v45 = vld [vmem:[%s9941_s25 + $0x78] sm:$0xf]  ;;  %v756_v58 = vrot.slane %v754_v36, 1  ;;  %v759_v60 = vshll.u32 %v10276_v35, 16 }
  0x7f   : > { %2008 = vrot.lane.b32.xlu0 %v1966_v11, %s9831_s23  ;;  %v8716_v11 = vld [vmem:[%s9941_s25 + $0x60] sm:$0xe]  ;;  %v10304_v61 = vcombine.low %v8616_v45, %v10286_v46 }
  0x80   : > { %v1251_v6 = vsel %vm654_vm1, %v1246_v56, %v1250_v57  ;;  %v8860_v25 = vcombine.low %v8716_v11, %v8675_v49  ;;  %v1775_v49 = vsel %vm654_vm1, %v1770_v26, %v1774_v29  ;;  %v752_v57 = vshrl.u32 %v10263_v18, 16  ;;  %v8654_v26 = vld [vmem:[%s9941_s25 + $0x6c] sm:$0xe] }
  0x81   : > { %861 = vrot.lane.b32.xlu1 %v750_v22, %s9827_s29  ;;  %v761_v7 = vrot.slane %v759_v60, 1  ;;  %v1279_v11 = vshll.u32 %v10304_v61, 16  ;;  %v1277_v32 = vshrl.u32 %v10304_v61, 16 }
  0x82   : > { %v1970_v41 = vrot.slane %v8860_v25, 1  ;;  %v953_v25 = vrot.slane %v10276_v35, 1  ;;  %v8681_v35 = vld [vmem:[%s9941_s25 + $0x88] sm:$0xf] }
  0x83   : > { %859 = vrot.lane.b32.xlu0 %v738_v27, %s9827_s29 }
  0x84   : > { %v1972_v5 = vsel %vm927_vm0, %v1970_v41, %v1971_v42  ;;  %v8680_v41 = vld [vmem:[%s9941_s25 + $0x84] sm:$0xf] }
  0x85   : > { %990 = vrot.lane.b32.xlu1 %v951_v37, %s9826_s28 }
  0x87   : > { %988 = vrot.lane.b32.xlu0 %v948_v44, %s9826_s28  ;;  %v389_v44 = vld [vmem:[%s9941_s25 + $0x6c] sm:$0xe] }
  0x89   : > { %1102 = vrot.lane.b32.xlu1 %v8781_v10, %s9824_s26  ;;  %v8717_v10 = vld [vmem:[%s9941_s25 + $0x6c] sm:$0xe] }
  0x8a   : > { %v8861_v22 = vcombine.low %v8717_v10, %v8677_v43  ;;  %v764_v43 = vshrl.u32 %v10259_v16, 16 }
  0x8b   : > { %1100 = vrot.lane.b32.xlu0 %v8780_v20, %s9824_s26  ;;  %v1757_v20 = vrot.slane %v1755_v3, 1  ;;  %v8767_v3 = vcombine.low %v389_v44, %v10245_v1  ;;  %v8679_v44 = vld [vmem:[%s9941_s25 + $0x7c] sm:$0xf] }
  0x8c   : > { %v1973_v37 = vrot.slane %v8861_v22, 1  ;;  %v769_v0 = vor.u32 %v768_v50, %v764_v43  ;;  %v8678_v43 = vld [vmem:[%s9941_s25 + $0x78] sm:$0xf] }
  0x8d   : > { %1374 = vrot.lane.b32.xlu1 %v1263_v2, %s9828_s17  ;;  %v1758_v33 = vor.u32 %v1757_v20, %v1753_v19  ;;  %v773_v2 = vrot.slane %v771_v51, 1  ;;  %v955_v15 = vrot.slane %v8767_v3, 1  ;;  %v8655_v19 = vld [vmem:[%s9941_s25 + $0x78] sm:$0xe] }
  0x8e   : > { %v1975_v63 = vsel %vm927_vm0, %v1973_v37, %v1974_v39  ;;  %v8815_v36 = vcombine.low %v8655_v19, %v10286_v46  ;;  %v10367_v3 = vld [vmem:[%s9941_s25 + $0x80] ss:$0 sps:$4 sm:$0x11]   ;;  %v354_v19 = vld [vmem:[%s9941_s25 + $0x84] sm:$0xf] }
  0x8f   : > { %1372 = vrot.lane.b32.xlu0 %v1251_v6, %s9828_s17  ;;  %v1763_v56 = vsel %vm654_vm1, %v1758_v33, %v1762_v34  ;;  %v757_v6 = vor.u32 %v756_v58, %v752_v57  ;;  %v774_v14 = vsel %vm654_vm1, %v769_v0, %v773_v2  ;;  %v1281_v33 = vrot.slane %v1279_v11, 1  ;;  %v8719_v57 = vld [vmem:[%s9941_s25 + $0x84] sm:$0xe]  ;;  %v8718_v2 = vld [vmem:[%s9941_s25 + $0x78] sm:$0xe] }
  0x90   : > { %v10354_v58 = vcombine.low %v8680_v41, %v8681_v35  ;;  %v1467_v60 = vrot.slane %v8815_v36, 1 }
  0x91   : > { %1502 = vrot.lane.b32.xlu1 %v1463_v9, %s9825_s27  ;;  %v10266_v23 = vpop.permute.xlu1 %1090  ;;  %v762_v21 = vsel %vm654_vm1, %v757_v6, %v761_v7  ;;  %v1468_v7 = vrot.slane %v10319_v12, 1 }
  0x92   : > { %v10268_v27 = vpop.permute.xlu0 %1088 }
  0x93   : > { %1500 = vrot.lane.b32.xlu0 %v1460_v13, %s9825_s27  ;;  %v10324_v13 = vld [vmem:[%s9941_s25 + $0x74] ss:$0 sps:$4 sm:$0x11]  }
  0x94   : > { %v1272_v39 = vshll.u32 %v10324_v13, 16 }
  0x95   : > { %1614 = vrot.lane.b32.xlu1 %v8829_v52, %s9829_s21  ;;  %v10295_v52 = vld [vmem:[%s9941_s25 + $0x70] sm:$0xf] }
  0x96   : > { %v10289_v47 = vpop.permute.xlu0 %1488  ;;  %v10308_v62 = vcombine.low %v8614_v53, %v10295_v52  ;;  %v8814_v46 = vcombine.low %v8654_v26, %v10295_v52  ;;  %v1282_v53 = vor.u32 %v1281_v33, %v1277_v32  ;;  %v1274_v0 = vrot.slane %v1272_v39, 1  ;;  %v10409_v39 = vld [vmem:[%s9941_s25 + $0x7c] sm:$0xf] }
  0x97   : > { %1612 = vrot.lane.b32.xlu0 %v8828_v55, %s9829_s21  ;;  %v10297_v54 = vpop.permute.xlu1 %976  ;;  %v388_v55 = vld [vmem:[%s9941_s25 + $0x60] sm:$0xe] }
  0x98   : > { %v8766_v9 = vcombine.low %v388_v55, %v10249_v8  ;;  %v1267_v1 = vshll.u32 %v10308_v62, 16  ;;  %v956_v8 = vrot.slane %v10272_v31, 1  ;;  %v1284_v31 = vshll.u32 %v10319_v12, 16 }
  0x99   : > { %1886 = vrot.lane.b32.xlu1 %v1775_v49, %s9830_s22  ;;  %v1265_v34 = vshrl.u32 %v10308_v62, 16  ;;  %v10357_v55 = vcombine.low %v8678_v43, %v8679_v44  ;;  %v8862_v12 = vcombine.low %v8718_v2, %v8679_v44  ;;  %v1469_v44 = vsel %vm927_vm0, %v1467_v60, %v1468_v7  ;;  %v8618_v60 = vld [vmem:[%s9941_s25 + $0x84] sm:$0xf] }
  0x9a   : > { %v952_v22 = vrot.slane %v8766_v9, 1  ;;  %v1269_v37 = vrot.slane %v1267_v1, 1  ;;  %v957_v42 = vsel %vm927_vm0, %v955_v15, %v956_v8  ;;  %v1464_v9 = vrot.slane %v8814_v46, 1 }
  0x9b   : > { %1884 = vrot.lane.b32.xlu0 %v1763_v56, %s9830_s22  ;;  %v10313_v4 = vpop.permute.xlu1 %978  ;;  %v1286_v56 = vrot.slane %v1284_v31, 1  ;;  %v1465_v1 = vrot.slane %v10324_v13, 1  ;;  %v1777_v26 = vshrl.u32 %v10357_v55, 16  ;;  %v1977_v46 = vrot.slane %v10367_v3, 1 }
  0x9c   : > { %v954_v49 = vsel %vm927_vm0, %v952_v22, %v953_v25  ;;  %v1270_v52 = vor.u32 %v1269_v37, %v1265_v34  ;;  %v352_v37 = vld [vmem:[%s9941_s25 + $0x78] sm:$0xf] }
  0x9d   : > { %v848_v10 = vpop.permute.xlu0 %847  ;;  %2014 = vrot.lane.b32.xlu1 %v1975_v63, %s9831_s23  ;;  %v10360_v63 = vld [vmem:[%s9941_s25 + $0x8c] ss:$0 sps:$4 sm:$0x11]  }
  0x9e   : > { %v2034_v50 = vsel %vm2032_vm3, %v9964_v24, %v848_v10  ;;  %v8863_v10 = vcombine.low %v8719_v57, %v8681_v35  ;;  %v1796_v8 = vshll.u32 %v10360_v63, 16  ;;  %v1980_v34 = vrot.slane %v10360_v63, 1  ;;  %v8656_v63 = vld [vmem:[%s9941_s25 + $0x84] sm:$0xe] }
  0x9f   : > { %2012 = vrot.lane.b32.xlu0 %v1972_v5, %s9831_s23  ;;  %v10330_v20 = vpop.permute.xlu1 %1490  ;;  %v2067_v5 = vsel %vm2065_vm4, %v2034_v50, %v10297_v54  ;;  %v1779_v54 = vshll.u32 %v10357_v55, 16  ;;  %v8620_v50 = vld [vmem:[%s9941_s25 + $0x90] sm:$0xf] }
  0xa0   : > { %v2100_v13 = vsel %vm2098_vm5, %v2067_v5, %v10268_v27  ;;  %v10396_v32 = vrot.slane %v8863_v10, 1  ;;  %v10399_v27 = vld [vmem:[%s9941_s25 + $0x8c] ss:$0 sps:$4 sm:$0x11]   ;;  %v1798_v41 = vrot.slane %v1796_v8, 1 }
  0xa1   : > { %v850_v29 = vpop.permute.xlu0 %849  ;;  %865 = vrot.lane.b32.xlu1 %v774_v14, %s9827_s29  ;;  %v1791_v14 = vshll.u32 %v10354_v58, 16  ;;  %v1781_v35 = vrot.slane %v1779_v54, 1  ;;  %v795_v7 = vshll.u32 %v10399_v27, 16 }
  0xa2   : > { %v2036_v24 = vsel %vm2032_vm3, %v9969_v30, %v850_v29  ;;  %v1287_v30 = vsel %vm654_vm1, %v1282_v53, %v1286_v56  ;;  %v1789_v29 = vshrl.u32 %v10354_v58, 16 }
  0xa3   : > { %863 = vrot.lane.b32.xlu0 %v762_v21, %s9827_s29  ;;  %v10347_v45 = vpop.permute.xlu1 %1362  ;;  %v2069_v15 = vsel %vm2065_vm4, %v2036_v24, %v10313_v4  ;;  %v10385_v21 = vld [vmem:[%s9941_s25 + $0x88] sm:$0xf]  ;;  %v1275_v4 = vsel %vm654_vm1, %v1270_v52, %v1274_v0  ;;  %v1793_v31 = vrot.slane %v1791_v14, 1  ;;  %v10433_v24 = vcombine.low %v352_v37, %v10409_v39  ;;  %v10481_v37 = vld [vmem:[%s9941_s25 + $0x8c] ss:$0 sps:$4 sm:$0x11]  }
  0xa4   : > { %v10405_v36 = vcombine.low %v354_v19, %v10385_v21  ;;  %v10437_v52 = vld [vmem:[%s9941_s25 + $0x88] sm:$0xf] }
  0xa5   : > { %v1361_v51 = vpop.permute.xlu0 %1360  ;;  %994 = vrot.lane.b32.xlu1 %v957_v42, %s9826_s28  ;;  %v10412_v42 = vrot.slane %v8862_v12, 1  ;;  %v1794_v10 = vor.u32 %v1793_v31, %v1789_v29  ;;  %v962_v12 = vrot.slane %v10399_v27, 1  ;;  %v10457_v8 = vcombine.low %v8618_v60, %v10437_v52 }
  0xa6   : > { %v2133_v22 = vsel %vm2131_vm6, %v2100_v13, %v1361_v51  ;;  %v10424_v51 = vld [vmem:[%s9941_s25 + $0x94] sm:$0xf]  ;;  %v788_v5 = vshrl.u32 %v10405_v36, 16 }
  0xa7   : > { %992 = vrot.lane.b32.xlu0 %v954_v49, %s9826_s28  ;;  %v10371_v6 = vpop.permute.xlu1 %1602  ;;  %v2166_v43 = vsel %vm2164_vm7, %v2133_v22, %v10289_v47  ;;  %v1466_v47 = vsel %vm927_vm0, %v1464_v9, %v1465_v1  ;;  %v390_v1 = vld [vmem:[%s9941_s25 + $0x78] sm:$0xe]  ;;  %v10448_v14 = vcombine.low %v8620_v50, %v10424_v51 }
  0xa8   : > { %v8768_v27 = vcombine.low %v390_v1, %v10409_v39  ;;  %v10511_v1 = vld [vmem:[%s9941_s25 + $0xa0] sm:$0xf] }
  0xa9   : > { %v1601_v11 = vpop.permute.xlu0 %1600  ;;  %1106 = vrot.lane.b32.xlu1 %v10304_v61, %s9824_s26  ;;  %v1784_v61 = vshll.u32 %v10367_v3, 16  ;;  %v8684_v3 = vld [vmem:[%s9941_s25 + $0x9c] sm:$0xf] }
  0xaa   : > { %v2199_v56 = vsel %vm2197_vm8, %v2166_v43, %v1601_v11  ;;  %v1782_v11 = vor.u32 %v1781_v35, %v1777_v26 }
  0xab   : > { %1104 = vrot.lane.b32.xlu0 %v10308_v62, %s9824_s26  ;;  %v1875_v25 = vpop.permute.xlu1 %1874  ;;  %v2102_v62 = vsel %vm2098_vm5, %v2069_v15, %v10266_v23  ;;  %v10415_v23 = vld [vmem:[%s9941_s25 + $0x80] ss:$0 sps:$4 sm:$0x11]   ;;  %v1786_v49 = vrot.slane %v1784_v61, 1 }
  0xac   : > { %v2135_v53 = vsel %vm2131_vm6, %v2102_v62, %v10347_v45  ;;  %v790_v45 = vshll.u32 %v10405_v36, 16  ;;  %v783_v54 = vshll.u32 %v10415_v23, 16 }
  0xad   : > { %v1873_v33 = vpop.permute.xlu0 %1872  ;;  %1378 = vrot.lane.b32.xlu1 %v1287_v30, %s9828_s17  ;;  %v391_v30 = vld [vmem:[%s9941_s25 + $0x84] sm:$0xe]  ;;  %v2168_v15 = vsel %vm2164_vm7, %v2135_v53, %v10330_v20  ;;  %v10465_v20 = vld [vmem:[%s9941_s25 + $0x98] ss:$0 sps:$4 sm:$0x11]   ;;  %v1787_v31 = vsel %vm654_vm1, %v1782_v11, %v1786_v49  ;;  %v958_v53 = vrot.slane %v8768_v27, 1 }
  0xae   : > { %v2232_v0 = vsel %vm2230_vm9, %v2199_v56, %v1873_v33  ;;  %v2201_v19 = vsel %vm2197_vm8, %v2168_v15, %v10371_v6  ;;  %v792_v29 = vrot.slane %v790_v45, 1  ;;  %v8769_v26 = vcombine.low %v391_v30, %v10385_v21  ;;  %v8657_v11 = vld [vmem:[%s9941_s25 + $0x90] sm:$0xe] }
  0xaf   : > { %1376 = vrot.lane.b32.xlu0 %v1275_v4, %s9828_s17  ;;  %v10429_v57 = vpop.permute.xlu1 %851  ;;  %v778_v4 = vshll.u32 %v10433_v24, 16  ;;  %v2234_v61 = vsel %vm2230_vm9, %v2201_v19, %v1875_v25  ;;  %v797_v6 = vrot.slane %v795_v7, 1  ;;  %v1303_v33 = vshll.u32 %v10448_v14, 16 }
  0xb0   : > { %v1799_v25 = vsel %vm654_vm1, %v1794_v10, %v1798_v41  ;;  %v1291_v21 = vshll.u32 %v10457_v8, 16  ;;  %v785_v43 = vrot.slane %v783_v54, 1  ;;  %v1301_v41 = vshrl.u32 %v10448_v14, 16 }
  0xb1   : > { %v2001_v2 = vpop.permute.xlu0 %2000  ;;  %1506 = vrot.lane.b32.xlu1 %v1469_v44, %s9825_s27  ;;  %v780_v35 = vrot.slane %v778_v4, 1  ;;  %v959_v44 = vrot.slane %v10415_v23, 1  ;;  %v1305_v49 = vrot.slane %v1303_v33, 1  ;;  %v1308_v56 = vshll.u32 %v10465_v20, 16 }
  0xb2   : > { %v2265_v9 = vsel %vm2263_vm10, %v2232_v0, %v2001_v2  ;;  %v1981_v23 = vsel %vm927_vm0, %v10396_v32, %v1980_v34  ;;  %v793_v60 = vor.u32 %v792_v29, %v788_v5  ;;  %v1293_v0 = vrot.slane %v1291_v21, 1 }
  0xb3   : > { %1504 = vrot.lane.b32.xlu0 %v1466_v47, %s9825_s27  ;;  %9167 = vmatprep.mubr.msk.bf16.mxu0 %vm2315_vm11, %v2265_v9  ;;  %v10461_v13 = vpop.permute.xlu1 %853  ;;  %v1289_v47 = vshrl.u32 %v10457_v8, 16  ;;  %v1296_v2 = vshll.u32 %v10481_v37, 16  ;;  %v1978_v7 = vsel %vm927_vm0, %v10412_v42, %v1977_v46  ;;  %v8817_v42 = vcombine.low %v8657_v11, %v10424_v51  ;;  %v8682_v46 = vld [vmem:[%s9941_s25 + $0x90] sm:$0xf] }
  0xb4   : > { %v798_v32 = vsel %vm654_vm1, %v793_v60, %v797_v6  ;;  %v8816_v54 = vcombine.low %v8656_v63, %v10437_v52  ;;  %v960_v4 = vsel %vm927_vm0, %v958_v53, %v959_v44  ;;  %v10526_v51 = vcombine.low %v8684_v3, %v10511_v1  ;;  %v10553_v44 = vld [vmem:[%s9941_s25 + $0x98] ss:$0 sps:$4 sm:$0x11]  }
  0xb5   : > { %v2003_v22 = vpop.permute.xlu0 %2002  ;;  %1618 = vrot.lane.b32.xlu1 %v10354_v58, %s9829_s21  ;;  %v776_v58 = vshrl.u32 %v10433_v24, 16  ;;  %v1473_v29 = vrot.slane %v8817_v42, 1  ;;  %v1310_v27 = vrot.slane %v1308_v56, 1  ;;  %v2040_v6 = vsel %vm2032_vm3, %v10026_v28, %v10461_v13  ;;  %v10566_v56 = vld [vmem:[%s9941_s25 + $0xa0] sm:$0xf] }
  0xb6   : > { %v2267_v62 = vsel %vm2263_vm10, %v2234_v61, %v2003_v22  ;;  %v10521_v61 = vld [vmem:[%s9941_s25 + $0x94] sm:$0xf]  ;;  %v1470_v52 = vrot.slane %v8816_v54, 1  ;;  %v2038_v28 = vsel %vm2032_vm3, %v10014_v17, %v10429_v57 }
  0xb7   : > { %1616 = vrot.lane.b32.xlu0 %v10357_v55, %s9829_s21  ;;  %9168 = vmatmul.mubr.msk.bf16.vlgmr.msra.gmra.mrb[0].mxu0 %vm2315_vm11, %v2267_v62  ;;  %v10483_v39 = vpop.permute.xlu1 %982  ;;  %v961_v55 = vrot.slane %v8769_v26, 1  ;;  %v781_v9 = vor.u32 %v780_v35, %v776_v58  ;;  %v1474_v26 = vrot.slane %v10465_v20, 1  ;;  %v10530_v62 = vcombine.low %v8682_v46, %v10521_v61 }
  0xb8   : > { %v1294_v20 = vor.u32 %v1293_v0, %v1289_v47  ;;  %v1815_v35 = vshll.u32 %v10526_v51, 16  ;;  %v2073_v13 = vsel %vm2065_vm4, %v2040_v6, %v10483_v39 }
  0xb9   : > { %v10487_v50 = vpop.permute.xlu0 %980  ;;  %1890 = vrot.lane.b32.xlu1 %v1799_v25, %s9830_s22  ;;  %v786_v5 = vsel %vm654_vm1, %v781_v9, %v785_v43  ;;  %v963_v15 = vsel %vm927_vm0, %v961_v55, %v962_v12  ;;  %v1306_v12 = vor.u32 %v1305_v49, %v1301_v41  ;;  %v1298_v25 = vrot.slane %v1296_v2, 1  ;;  %v10541_v43 = vld [vmem:[%s9941_s25 + $0xa4] ss:$0 sps:$4 sm:$0x11]   ;;  %v356_v55 = vld [vmem:[%s9941_s25 + $0x90] sm:$0xf] }
  0xba   : > { %v1475_v58 = vsel %vm927_vm0, %v1473_v29, %v1474_v26  ;;  %v2071_v53 = vsel %vm2065_vm4, %v2038_v28, %v10487_v50  ;;  %v358_v49 = vld [vmem:[%s9941_s25 + $0x9c] sm:$0xf]  ;;  %v1813_v50 = vshrl.u32 %v10526_v51, 16  ;;  %v1801_v0 = vshrl.u32 %v10530_v62, 16  ;;  %v8720_v9 = vld [vmem:[%s9941_s25 + $0x90] sm:$0xe] }
  0xbb   : > { %1888 = vrot.lane.b32.xlu0 %v1787_v31, %s9830_s22  ;;  %v1095_v45 = vpop.permute.xlu1 %1094  ;;  %v1471_v31 = vrot.slane %v10481_v37, 1  ;;  %v1803_v37 = vshll.u32 %v10530_v62, 16  ;;  %v1299_v57 = vsel %vm654_vm1, %v1294_v20, %v1298_v25  ;;  %v1817_v11 = vrot.slane %v1815_v35, 1 }
  0xbc   : > { %v2106_v41 = vsel %vm2098_vm5, %v2073_v13, %v1095_v45  ;;  %v1820_v63 = vshll.u32 %v10541_v43, 16  ;;  %v8864_v29 = vcombine.low %v8720_v9, %v10521_v61  ;;  %v1983_v28 = vrot.slane %v10553_v44, 1 }
  0xbd   : > { %v1093_v10 = vpop.permute.xlu0 %1092  ;;  %2018 = vrot.lane.b32.xlu1 %v1981_v23, %s9831_s23  ;;  %v1472_v39 = vsel %vm927_vm0, %v1470_v52, %v1471_v31  ;;  %v1805_v46 = vrot.slane %v1803_v37, 1  ;;  %v10597_v52 = vld [vmem:[%s9941_s25 + $0x98] ss:$0 sps:$4 sm:$0x11]  }
  0xbe   : > { %v2104_v47 = vsel %vm2098_vm5, %v2071_v53, %v1093_v10  ;;  %v1982_v35 = vrot.slane %v8864_v29, 1  ;;  %v807_v37 = vshll.u32 %v10597_v52, 16  ;;  %v10620_v53 = vld [vmem:[%s9941_s25 + $0xa0] sm:$0xf] }
  0xbf   : > { %2016 = vrot.lane.b32.xlu0 %v1978_v7, %s9831_s23  ;;  %v1367_v34 = vpop.permute.xlu1 %1366  ;;  %v8721_v7 = vld [vmem:[%s9941_s25 + $0x9c] sm:$0xe]  ;;  %v1806_v20 = vor.u32 %v1805_v46, %v1801_v0  ;;  %v9832_v46 = vmov 0  }
  0xc0   : > { %v2139_v23 = vsel %vm2131_vm6, %v2106_v41, %v1367_v34  ;;  %2552 = vst.msk [vmem:[#allocation2 + $0x8] sm:$0xff] %vm2551_vm12, %v9832_v46  ;;  %2563 = vst.msk [vmem:[#allocation2 + $0x1a0] sm:$0xff] %vm2551_vm12, %v9832_v46  ;;  %9522 = vset.pattern.permute.xlu0 %v9832_v46  ;;  %9521 = vset.pattern.permute.xlu1 %v9832_v46 }
  0xc1   : > { %v1365_v30 = vpop.permute.xlu0 %1364  ;;  %869 = vrot.lane.b32.xlu1 %v798_v32, %s9827_s29 }
  0xc2   : > { %v2137_v2 = vsel %vm2131_vm6, %v2104_v47, %v1365_v30  ;;  %v8624_v47 = vld [vmem:[%s9941_s25 + $0xa8] sm:$0xf] }
  0xc3   : > { %867 = vrot.lane.b32.xlu0 %v786_v5, %s9827_s29  ;;  %v1495_v19 = vpop.permute.xlu1 %1494  ;;  %v10585_v5 = vcombine.low %v358_v49, %v10566_v56  ;;  %v393_v49 = vld [vmem:[%s9941_s25 + $0x9c] sm:$0xe] }
  0xc4   : > { %v2172_v45 = vsel %vm2164_vm7, %v2139_v23, %v1495_v19  ;;  %v10633_v23 = vld [vmem:[%s9941_s25 + $0xac] sm:$0xf] }
  0xc5   : > { %v1493_v22 = vpop.permute.xlu0 %1492  ;;  %998 = vrot.lane.b32.xlu1 %v963_v15, %s9826_s28  ;;  %v1808_v15 = vshll.u32 %v10553_v44, 16  ;;  %v812_v44 = vshrl.u32 %v10585_v5, 16  ;;  %v10646_v9 = vcombine.low %v8624_v47, %v10633_v23 }
  0xc6   : > { %v2170_v10 = vsel %vm2164_vm7, %v2137_v2, %v1493_v22  ;;  %v8865_v22 = vcombine.low %v8721_v7, %v10511_v1  ;;  %v814_v1 = vshll.u32 %v10585_v5, 16  ;;  %v8771_v7 = vcombine.low %v393_v49, %v10566_v56 }
  0xc7   : > { %996 = vrot.lane.b32.xlu0 %v960_v4, %s9826_s28  ;;  %v1607_v33 = vpop.permute.xlu1 %1606  ;;  %v1810_v25 = vrot.slane %v1808_v15, 1  ;;  %v965_v56 = vrot.slane %v10597_v52, 1 }
  0xc8   : > { %v2205_v32 = vsel %vm2197_vm8, %v2172_v45, %v1607_v33  ;;  %v10603_v33 = vld [vmem:[%s9941_s25 + $0xa4] ss:$0 sps:$4 sm:$0x11]   ;;  %v816_v41 = vrot.slane %v814_v1, 1  ;;  %v8658_v1 = vld [vmem:[%s9941_s25 + $0x9c] sm:$0xe] }
  0xc9   : > { %v1605_v21 = vpop.permute.xlu0 %1604  ;;  %1110 = vrot.lane.b32.xlu1 %v10448_v14, %s9824_s26  ;;  %v1311_v14 = vsel %vm654_vm1, %v1306_v12, %v1310_v27  ;;  %v1818_v12 = vor.u32 %v1817_v11, %v1813_v50  ;;  %v1822_v27 = vrot.slane %v1820_v63, 1  ;;  %v1984_v63 = vsel %vm927_vm0, %v1982_v35, %v1983_v28 }
  0xca   : > { %v2203_v30 = vsel %vm2197_vm8, %v2170_v10, %v1605_v21  ;;  %v1985_v21 = vrot.slane %v8865_v22, 1  ;;  %v817_v2 = vor.u32 %v816_v41, %v812_v44  ;;  %v1327_v22 = vshll.u32 %v10646_v9, 16 }
  0xcb   : > { %1108 = vrot.lane.b32.xlu0 %v10457_v8, %s9824_s26  ;;  %v1879_v17 = vpop.permute.xlu1 %1878  ;;  %v10562_v8 = vld [vmem:[%s9941_s25 + $0x94] sm:$0xf]  ;;  %v1823_v13 = vsel %vm654_vm1, %v1818_v12, %v1822_v27  ;;  %v8818_v44 = vcombine.low %v8658_v1, %v10620_v53 }
  0xcc   : > { %v10582_v34 = vcombine.low %v356_v55, %v10562_v8  ;;  %v2238_v3 = vsel %vm2230_vm9, %v2205_v32, %v1879_v17  ;;  %v8622_v55 = vld [vmem:[%s9941_s25 + $0x9c] sm:$0xf]  ;;  %v819_v17 = vshll.u32 %v10603_v33, 16  ;;  %v809_v32 = vrot.slane %v807_v37, 1  ;;  %v2556_v37 = vld [vmem:[#allocation2 + $0x10] sm:$0x1] }
  0xcd   : > { %v1877_v60 = vpop.permute.xlu0 %1876  ;;  %1382 = vrot.lane.b32.xlu1 %v1311_v14, %s9828_s17  ;;  %v10638_v50 = vcombine.low %v8622_v55, %v10620_v53  ;;  %v1329_v35 = vrot.slane %v1327_v22, 1 }
  0xce   : > { %v2236_v54 = vsel %vm2230_vm9, %v2203_v30, %v1877_v60  ;;  %v802_v6 = vshll.u32 %v10582_v34, 16  ;;  %v800_v14 = vshrl.u32 %v10582_v34, 16  ;;  %v821_v45 = vrot.slane %v819_v17, 1  ;;  %v8686_v17 = vld [vmem:[%s9941_s25 + $0xa8] sm:$0xf] }
  0xcf   : > { %1380 = vrot.lane.b32.xlu0 %v1299_v57, %s9828_s17  ;;  %v2007_v42 = vpop.permute.xlu1 %2006  ;;  %v1313_v12 = vshrl.u32 %v10638_v50, 16 }
  0xd0   : > { %v2271_v19 = vsel %vm2263_vm10, %v2238_v3, %v2007_v42  ;;  %v10657_v42 = vld [vmem:[%s9941_s25 + $0xa4] ss:$0 sps:$4 sm:$0x11]   ;;  %v822_v15 = vsel %vm654_vm1, %v817_v2, %v821_v45  ;;  %v10723_v2 = vld [vmem:[%s9941_s25 + $0xb0] ss:$0 sps:$4 sm:$0x11]  }
  0xd1   : > { %v2005_v4 = vpop.permute.xlu0 %2004  ;;  %1510 = vrot.lane.b32.xlu1 %v1475_v58, %s9825_s27  ;;  %v1986_v58 = vrot.slane %v10541_v43, 1  ;;  %v804_v43 = vrot.slane %v802_v6, 1  ;;  %v1325_v6 = vshrl.u32 %v10646_v9, 16 }
  0xd2   : > { %v2269_v26 = vsel %vm2263_vm10, %v2236_v54, %v2005_v4  ;;  %v967_v54 = vrot.slane %v8771_v7, 1  ;;  %v10668_v4 = vld [vmem:[%s9941_s25 + $0xb0] ss:$0 sps:$4 sm:$0x11]  }
  0xd3   : > { %1508 = vrot.lane.b32.xlu0 %v1472_v39, %s9825_s27  ;;  %9171 = vmatprep.mubr.msk.bf16.mxu0 %vm2315_vm11, %v2269_v26  ;;  %v10607_v61 = vpop.permute.xlu1 %857  ;;  %v1811_v39 = vsel %vm654_vm1, %v1806_v20, %v1810_v25  ;;  %v805_v10 = vor.u32 %v804_v43, %v800_v14  ;;  %v1320_v20 = vshll.u32 %v10657_v42, 16  ;;  %v8688_v25 = vld [vmem:[%s9941_s25 + $0xb4] sm:$0xf]  ;;  %v1332_v28 = vshll.u32 %v10668_v4, 16 }
  0xd4   : > { %9172 = vmatmul.mubr.msk.bf16.gmra.mrb[4].mxu0 %vm2315_vm11, %v2271_v19  ;;  %v968_v19 = vrot.slane %v10603_v33, 1  ;;  %v8659_v33 = vld [vmem:[%s9941_s25 + $0xa8] sm:$0xe]  ;;  %v14188_v14 = vmov 0  ;;  %v2044_v55 = vsel %vm2032_vm3, %v10097_v59, %v10607_v61  ;;  %v1477_v61 = vrot.slane %v10657_v42, 1 }
  0xd5   : > { %v10609_v31 = vpop.permute.xlu0 %855  ;;  %1622 = vrot.lane.b32.xlu1 %v10526_v51, %s9829_s21  ;;  %v392_v51 = vld [vmem:[%s9941_s25 + $0x90] sm:$0xe]  ;;  %v810_v26 = vsel %vm654_vm1, %v805_v10, %v809_v32  ;;  %v14189_v14 = vsel %vm10692_vm15, 4294967295, %v14188_v14  ;;  %v8819_v41 = vcombine.low %v8659_v33, %v10633_v23  ;;  %v1480_v53 = vrot.slane %v10668_v4, 1 }
  0xd6   : > { %v8770_v0 = vcombine.low %v392_v51, %v10562_v8  ;;  %v1315_v8 = vshll.u32 %v10638_v50, 16  ;;  %14190 = vst [vmem:[#allocation7_spill] sm:$0xff] %v14189_v14  ;;  %v10703_v51 = vld [vmem:[%s9941_s25 + $0xac] sm:$0xf]  ;;  %v2042_v49 = vsel %vm2032_vm3, %v10100_v48, %v10609_v31  ;;  %v1334_v48 = vrot.slane %v1332_v28, 1 }
  0xd7   : > { %1620 = vrot.lane.b32.xlu0 %v10530_v62, %s9829_s21  ;;  %v10627_v57 = vpop.permute.xlu1 %986  ;;  %v1987_v62 = vsel %vm927_vm0, %v1985_v21, %v1986_v58  ;;  %v969_v58 = vsel %vm927_vm0, %v967_v54, %v968_v19  ;;  %v10720_v31 = vcombine.low %v8686_v17, %v10703_v51  ;;  %v1476_v10 = vrot.slane %v8818_v44, 1 }
  0xd8   : > { %v964_v3 = vrot.slane %v8770_v0, 1  ;;  %v1317_v52 = vrot.slane %v1315_v8, 1  ;;  %v1330_v0 = vor.u32 %v1329_v35, %v1325_v6  ;;  %v1479_v32 = vrot.slane %v8819_v41, 1  ;;  %v2568_v35 = vld [vmem:[#allocation2 + $0x18] sm:$0x80] }
  0xd9   : > { %v10635_v60 = vpop.permute.xlu0 %984  ;;  %1894 = vrot.lane.b32.xlu1 %v1823_v13, %s9830_s22  ;;  %v10689_v13 = vld [vmem:[%s9941_s25 + $0xb8] sm:$0xf]  ;;  %v1827_v54 = vshll.u32 %v10720_v31, 16  ;;  %v1478_v4 = vsel %vm927_vm0, %v1476_v10, %v1477_v61  ;;  %v10794_v10 = vld [vmem:[%s9941_s25 + $0xbc] ss:$0 sps:$4 sm:$0x11]  }
  0xda   : > { %v966_v21 = vsel %vm927_vm0, %v964_v3, %v965_v56  ;;  %v1318_v59 = vor.u32 %v1317_v52, %v1313_v12  ;;  %v10714_v23 = vcombine.low %v8688_v25, %v10689_v13  ;;  %v2075_v45 = vsel %vm2065_vm4, %v2042_v49, %v10635_v60  ;;  %v360_v12 = vld [vmem:[%s9941_s25 + $0xa8] sm:$0xf]  ;;  %v10750_v52 = vld [vmem:[%s9941_s25 + $0xb8] sm:$0xf] }
  0xdb   : > { %1892 = vrot.lane.b32.xlu0 %v1811_v39, %s9830_s22  ;;  %v10648_v11 = vpop.permute.xlu1 %1098  ;;  %v2557_v39 = vsel %vm10692_vm15, 0, %v2556_v37  ;;  %v1825_v56 = vshrl.u32 %v10720_v31, 16  ;;  %v1481_v22 = vsel %vm927_vm0, %v1479_v32, %v1480_v53  ;;  %v1829_v37 = vrot.slane %v1827_v54, 1 }
  0xdc   : > { %2558 = vst [vmem:[#allocation2 + $0x10] sm:$0x1] %v2557_v39  ;;  %v1839_v60 = vshll.u32 %v10714_v23, 16  ;;  %v1837_v1 = vshrl.u32 %v10714_v23, 16  ;;  %v2569_v49 = vsel %vm10771_vm14, 0, %v2568_v35  ;;  %v1989_v54 = vrot.slane %v10723_v2, 1 }
  0xdd   : > { %v10651_v30 = vpop.permute.xlu0 %1096  ;;  %2022 = vrot.lane.b32.xlu1 %v1987_v62, %s9831_s23  ;;  %v2077_v62 = vsel %vm2065_vm4, %v2044_v55, %v10627_v57  ;;  %v10728_v57 = vld [vmem:[%s9941_s25 + $0xbc] ss:$0 sps:$4 sm:$0x11]   ;;  %v8723_v55 = vld [vmem:[%s9941_s25 + $0xb4] sm:$0xe] }
  0xde   : > { %v2110_v3 = vsel %vm2098_vm5, %v2077_v62, %v10648_v11  ;;  %v2108_v42 = vsel %vm2098_vm5, %v2075_v45, %v10651_v30  ;;  %v1832_v11 = vshll.u32 %v10723_v2, 16  ;;  %v362_v30 = vld [vmem:[%s9941_s25 + $0xb4] sm:$0xf]  ;;  %v1844_v33 = vshll.u32 %v10728_v57, 16  ;;  %2570 = vst [vmem:[#allocation2 + $0x18] sm:$0x80] %v2569_v49 }
  0xdf   : > { %2020 = vrot.lane.b32.xlu0 %v1984_v63, %s9831_s23  ;;  %v10672_v29 = vpop.permute.xlu1 %1370  ;;  %v1322_v63 = vrot.slane %v1320_v20, 1  ;;  %v10757_v20 = vld [vmem:[%s9941_s25 + $0xac] sm:$0xf]  ;;  %v10768_v44 = vcombine.low %v362_v30, %v10750_v52  ;;  %v8867_v45 = vcombine.low %v8723_v55, %v10689_v13 }
  0xe0   : > { %v10778_v39 = vcombine.low %v360_v12, %v10757_v20  ;;  %v1834_v13 = vrot.slane %v1832_v11, 1 }
  0xe1   : > { %v10676_v27 = vpop.permute.xlu0 %1368  ;;  %873 = vrot.lane.b32.xlu1 %v822_v15, %s9827_s29  ;;  %v1335_v15 = vsel %vm654_vm1, %v1330_v0, %v1334_v48  ;;  %v1846_v48 = vrot.slane %v1844_v33, 1  ;;  %v836_v2 = vshrl.u32 %v10768_v44, 16  ;;  %v10824_v33 = vld [vmem:[%s9941_s25 + $0xc4] sm:$0xf] }
  0xe2   : > { %v2141_v25 = vsel %vm2131_vm6, %v2108_v42, %v10676_v27 }
  0xe3   : > { %871 = vrot.lane.b32.xlu0 %v810_v26, %s9827_s29  ;;  %v1499_v43 = vpop.permute.xlu1 %1498  ;;  %v8722_v26 = vld [vmem:[%s9941_s25 + $0xa8] sm:$0xe] }
  0xe4   : > { %v8866_v53 = vcombine.low %v8722_v26, %v10703_v51  ;;  %v838_v51 = vshll.u32 %v10768_v44, 16  ;;  %v395_v26 = vld [vmem:[%s9941_s25 + $0xb4] sm:$0xe] }
  0xe5   : > { %v1497_v47 = vpop.permute.xlu0 %1496  ;;  %1002 = vrot.lane.b32.xlu1 %v969_v58, %s9826_s28  ;;  %v1841_v58 = vrot.slane %v1839_v60, 1  ;;  %v826_v60 = vshll.u32 %v10778_v39, 16 }
  0xe7   : > { %1000 = vrot.lane.b32.xlu0 %v966_v21, %s9826_s28  ;;  %v1611_v7 = vpop.permute.xlu1 %1610  ;;  %v1842_v0 = vor.u32 %v1841_v58, %v1837_v1  ;;  %v8628_v1 = vld [vmem:[%s9941_s25 + $0xc0] sm:$0xf]  ;;  %v10831_v58 = vld [vmem:[%s9941_s25 + $0xb8] sm:$0xf] }
  0xe9   : > { %v1609_v8 = vpop.permute.xlu0 %1608  ;;  %1114 = vrot.lane.b32.xlu1 %v10646_v9, %s9824_s26  ;;  %v1323_v9 = vsel %vm654_vm1, %v1318_v59, %v1322_v63  ;;  %v2574_v63 = vld [vmem:[#allocation2 + $0x48] sm:$0x80] }
  0xea   : > { %v2575_v32 = vsel %vm10771_vm14, 0, %v2574_v63 }
  0xeb   : > { %1112 = vrot.lane.b32.xlu0 %v10638_v50, %s9824_s26  ;;  %v1883_v19 = vpop.permute.xlu1 %1882  ;;  %v2143_v50 = vsel %vm2131_vm6, %v2110_v3, %v10672_v29  ;;  %v2174_v29 = vsel %vm2164_vm7, %v2141_v25, %v1497_v47  ;;  %v1830_v3 = vor.u32 %v1829_v37, %v1825_v56  ;;  %2576 = vst [vmem:[#allocation2 + $0x48] sm:$0x80] %v2575_v32  ;;  %v1992_v56 = vrot.slane %v10728_v57, 1  ;;  %v394_v25 = vld [vmem:[%s9941_s25 + $0xa8] sm:$0xe] }
  0xec   : > { %v2176_v21 = vsel %vm2164_vm7, %v2143_v50, %v1499_v43  ;;  %v2207_v43 = vsel %vm2197_vm8, %v2174_v29, %v1609_v8  ;;  %v824_v50 = vshrl.u32 %v10778_v39, 16  ;;  %v8773_v29 = vcombine.low %v395_v26, %v10750_v52 }
  0xed   : > { %v1881_v6 = vpop.permute.xlu0 %1880  ;;  %1386 = vrot.lane.b32.xlu1 %v1335_v15, %s9828_s17  ;;  %v2209_v28 = vsel %vm2197_vm8, %v2176_v21, %v1611_v7  ;;  %v10789_v7 = vld [vmem:[%s9941_s25 + $0xb0] ss:$0 sps:$4 sm:$0x11]   ;;  %v1988_v15 = vrot.slane %v8866_v53, 1  ;;  %v1835_v57 = vsel %vm654_vm1, %v1830_v3, %v1834_v13  ;;  %v8626_v21 = vld [vmem:[%s9941_s25 + $0xb4] sm:$0xf] }
  0xee   : > { %v2242_v41 = vsel %vm2230_vm9, %v2209_v28, %v1883_v19  ;;  %v2240_v47 = vsel %vm2230_vm9, %v2207_v43, %v1881_v6  ;;  %v1847_v19 = vsel %vm654_vm1, %v1842_v0, %v1846_v48  ;;  %v831_v11 = vshll.u32 %v10789_v7, 16  ;;  %v10854_v48 = vld [vmem:[%s9941_s25 + $0xc8] ss:$0 sps:$4 sm:$0x11]  }
  0xef   : > { %1384 = vrot.lane.b32.xlu0 %v1323_v9, %s9828_s17  ;;  %v2011_v17 = vpop.permute.xlu1 %2010  ;;  %v1991_v9 = vrot.slane %v8867_v45, 1  ;;  %v828_v6 = vrot.slane %v826_v60, 1  ;;  %v1990_v35 = vsel %vm927_vm0, %v1988_v15, %v1989_v54  ;;  %v10839_v43 = vcombine.low %v8628_v1, %v10824_v33  ;;  %v10864_v3 = vld [vmem:[%s9941_s25 + $0xbc] ss:$0 sps:$4 sm:$0x11]  }
  0xf0   : > { %v2275_v59 = vsel %vm2263_vm10, %v2242_v41, %v2011_v17  ;;  %v833_v49 = vrot.slane %v831_v11, 1  ;;  %v974_v53 = vrot.slane %v10794_v10, 1  ;;  %v8660_v15 = vld [vmem:[%s9941_s25 + $0xb4] sm:$0xe] }
  0xf1   : > { %v2009_v61 = vpop.permute.xlu0 %2008  ;;  %1514 = vrot.lane.b32.xlu1 %v1481_v22, %s9825_s27  ;;  %v840_v22 = vrot.slane %v838_v51, 1  ;;  %v1993_v28 = vsel %vm927_vm0, %v1991_v9, %v1992_v56  ;;  %v829_v17 = vor.u32 %v828_v6, %v824_v50  ;;  %v8661_v9 = vld [vmem:[%s9941_s25 + $0xc0] sm:$0xe]  ;;  %v2577_v56 = vld [vmem:[#allocation2 + $0x60] sm:$0x80] }
  0xf2   : > { %v2273_v62 = vsel %vm2263_vm10, %v2240_v47, %v2009_v61  ;;  %v8772_v47 = vcombine.low %v394_v25, %v10757_v20  ;;  %v973_v61 = vrot.slane %v8773_v29, 1  ;;  %v1351_v20 = vshll.u32 %v10839_v43, 16  ;;  %v8692_v50 = vld [vmem:[%s9941_s25 + $0xcc] sm:$0xf]  ;;  %v10886_v6 = vld [vmem:[%s9941_s25 + $0xd0] sm:$0xf] }
  0xf3   : > { %1512 = vrot.lane.b32.xlu0 %v1478_v4, %s9825_s27  ;;  %9175 = vmatprep.mubr.msk.bf16.mxu0 %vm2315_vm11, %v2273_v62  ;;  %v10800_v8 = vpop.permute.xlu1 %861  ;;  %v2571_v4 = vld [vmem:[#allocation2 + $0x30] sm:$0x80]  ;;  %v841_v37 = vor.u32 %v840_v22, %v836_v2  ;;  %v2580_v62 = vld [vmem:[#allocation2 + $0x78] sm:$0x80]  ;;  %v834_v51 = vsel %vm654_vm1, %v829_v17, %v833_v49  ;;  %v2578_v2 = vsel %vm10771_vm14, 0, %v2577_v56 }
  0xf4   : > { %9176 = vmatmul.mubr.msk.bf16.gmra.mrb[8].mxu0 %vm2315_vm11, %v2275_v59  ;;  %v2572_v12 = vsel %vm10771_vm14, 0, %v2571_v4  ;;  %v10845_v59 = vcombine.low %v8626_v21, %v10831_v58  ;;  %v2581_v45 = vsel %vm10771_vm14, 0, %v2580_v62  ;;  %v970_v32 = vrot.slane %v8772_v47, 1  ;;  %2579 = vst [vmem:[#allocation2 + $0x60] sm:$0x80] %v2578_v2 }
  0xf5   : > { %v10803_v42 = vpop.permute.xlu0 %859  ;;  %1626 = vrot.lane.b32.xlu1 %v10714_v23, %s9829_s21  ;;  %v843_v23 = vshll.u32 %v10794_v10, 16  ;;  %2573 = vst [vmem:[#allocation2 + $0x30] sm:$0x80] %v2572_v12  ;;  %v971_v10 = vrot.slane %v10789_v7, 1  ;;  %2582 = vst [vmem:[#allocation2 + $0x78] sm:$0x80] %v2581_v45  ;;  %v975_v54 = vsel %vm927_vm0, %v973_v61, %v974_v53  ;;  %v2048_v22 = vsel %vm2032_vm3, %v10169_v38, %v10800_v8 }
  0xf6   : > { %v1339_v13 = vshll.u32 %v10845_v59, 16  ;;  %v1349_v7 = vshrl.u32 %v10839_v43, 16  ;;  %v1353_v11 = vrot.slane %v1351_v20, 1  ;;  %v1356_v4 = vshll.u32 %v10854_v48, 16  ;;  %v8690_v38 = vld [vmem:[%s9941_s25 + $0xc0] sm:$0xf] }
  0xf7   : > { %1624 = vrot.lane.b32.xlu0 %v10720_v31, %s9829_s21  ;;  %v10818_v30 = vpop.permute.xlu1 %990  ;;  %v845_v55 = vrot.slane %v843_v23, 1  ;;  %v972_v26 = vsel %vm927_vm0, %v970_v32, %v971_v10  ;;  %v2046_v1 = vsel %vm2032_vm3, %v10173_v40, %v10803_v42  ;;  %v8820_v21 = vcombine.low %v8660_v15, %v10831_v58  ;;  %v10895_v8 = vld [vmem:[%s9941_s25 + $0xc4] sm:$0xf]  ;;  %v10921_v45 = vld [vmem:[%s9941_s25 + $0xd4] ss:$0 sps:$4 sm:$0x11]  }
  0xf8   : > { %v1341_v12 = vrot.slane %v1339_v13, 1  ;;  %v2081_v29 = vsel %vm2065_vm4, %v2048_v22, %v10818_v30  ;;  %v10907_v17 = vcombine.low %v8690_v38, %v10895_v8  ;;  %v1483_v47 = vrot.slane %v10864_v3, 1 }
  0xf9   : > { %v10826_v31 = vpop.permute.xlu0 %988  ;;  %1898 = vrot.lane.b32.xlu1 %v1847_v19, %s9830_s22  ;;  %v846_v0 = vsel %vm654_vm1, %v841_v37, %v845_v55  ;;  %v1337_v19 = vshrl.u32 %v10845_v59, 16  ;;  %v1358_v37 = vrot.slane %v1356_v4, 1  ;;  %v10902_v55 = vcombine.low %v8692_v50, %v10886_v6 }
  0xfa   : > { %v2079_v40 = vsel %vm2065_vm4, %v2046_v1, %v10826_v31  ;;  %v1482_v30 = vrot.slane %v8820_v21, 1  ;;  %v1486_v53 = vrot.slane %v10854_v48, 1  ;;  %v2586_v31 = vld [vmem:[#allocation2 + $0xa8] sm:$0x80]  ;;  %v1851_v10 = vshll.u32 %v10907_v17, 16 }
  0xfb   : > { %1896 = vrot.lane.b32.xlu0 %v1835_v57, %s9830_s22  ;;  %v10841_v41 = vpop.permute.xlu1 %1102  ;;  %v1344_v57 = vshll.u32 %v10864_v3, 16  ;;  %v2587_v48 = vsel %vm10771_vm14, 0, %v2586_v31  ;;  %v1849_v15 = vshrl.u32 %v10907_v17, 16  ;;  %v1861_v56 = vshrl.u32 %v10902_v55, 16  ;;  %v8724_v21 = vld [vmem:[%s9941_s25 + $0xc0] sm:$0xe] }
  0xfc   : > { %v2114_v62 = vsel %vm2098_vm5, %v2081_v29, %v10841_v41  ;;  %2588 = vst [vmem:[#allocation2 + $0xa8] sm:$0x80] %v2587_v48  ;;  %v1484_v3 = vsel %vm927_vm0, %v1482_v30, %v1483_v47 }
  0xfd   : > { %v10847_v52 = vpop.permute.xlu0 %1100  ;;  %2026 = vrot.lane.b32.xlu1 %v1993_v28, %s9831_s23  ;;  %v1354_v28 = vor.u32 %v1353_v11, %v1349_v7  ;;  %v1346_v58 = vrot.slane %v1344_v57, 1  ;;  %v8725_v57 = vld [vmem:[%s9941_s25 + $0xcc] sm:$0xe] }
  0xff   : > { %2024 = vrot.lane.b32.xlu0 %v1990_v35, %s9831_s23  ;;  %v10859_v63 = vpop.permute.xlu1 %1374  ;;  %v8821_v35 = vcombine.low %v8661_v9, %v10824_v33  ;;  %v1342_v33 = vor.u32 %v1341_v12, %v1337_v19  ;;  %v1359_v20 = vsel %vm654_vm1, %v1354_v28, %v1358_v37  ;;  %v2616_v28 = vld [vmem:[#allocation2 + $0x28] sm:$0x1] }
 0x101   : > { %v10867_v60 = vpop.permute.xlu0 %1372  ;;  %877 = vrot.lane.b32.xlu1 %v846_v0, %s9827_s29  ;;  %v1485_v61 = vrot.slane %v8821_v35, 1  ;;  %v2112_v0 = vsel %vm2098_vm5, %v2079_v40, %v10847_v52  ;;  %v1347_v32 = vsel %vm654_vm1, %v1342_v33, %v1346_v58  ;;  %v2619_v35 = vld [vmem:[#allocation2 + $0x40] sm:$0x1]  ;;  %v2697_v33 = vld [vmem:[#allocation2 + $0x8] sm:$0xff]  ;;  %v2617_v58 = vsel %vm10692_vm15, 0, %v2616_v28 }
 0x102   : > { %v2145_v19 = vsel %vm2131_vm6, %v2112_v0, %v10867_v60  ;;  %v1868_v60 = vshll.u32 %v10921_v45, 16  ;;  %v2620_v29 = vsel %vm10692_vm15, 0, %v2619_v35  ;;  %2618 = vst [vmem:[#allocation2 + $0x28] sm:$0x1] %v2617_v58  ;;  %v1998_v0 = vrot.slane %v10921_v45, 1 }
 0x103   : > { %875 = vrot.lane.b32.xlu0 %v834_v51, %s9827_s29  ;;  %v1503_v23 = vpop.permute.xlu1 %1502  ;;  %v1863_v51 = vshll.u32 %v10902_v55, 16  ;;  %v1487_v13 = vsel %vm927_vm0, %v1485_v61, %v1486_v53  ;;  %2621 = vst [vmem:[#allocation2 + $0x40] sm:$0x1] %v2620_v29  ;;  %v8868_v61 = vcombine.low %v8724_v21, %v10895_v8  ;;  %v2728_v45 = vld [vmem:[#allocation2 + $0x10] sm:$0x1]  ;;  %s323_s29 = sand.u32 1, %s9814_s10  }
 0x104   : > { %v1870_v40 = vrot.slane %v1868_v60, 1  ;;  %v2795_v29 = vld [vmem:[#allocation2 + $0x48] sm:$0x80]  ;;  %v2625_v28 = vld [vmem:[#allocation2 + $0x70] sm:$0x1]  ;;  %s8596_s16 = sshll.u32 %s323_s29, 7 }
 0x105   : > { %v1501_v25 = vpop.permute.xlu0 %1500  ;;  %1006 = vrot.lane.b32.xlu1 %v975_v54, %s9826_s28  ;;  %v2583_v54 = vld [vmem:[#allocation2 + $0x90] sm:$0x80]  ;;  %v1865_v4 = vrot.slane %v1863_v51, 1  ;;  %v1994_v48 = vrot.slane %v8868_v61, 1  ;;  %v2622_v58 = vld [vmem:[#allocation2 + $0x58] sm:$0x1] }
 0x106   : > { %v2178_v7 = vsel %vm2164_vm7, %v2145_v19, %v1501_v25  ;;  %v2623_v61 = vsel %vm10692_vm15, 0, %v2622_v58 }
 0x107   : > { %1004 = vrot.lane.b32.xlu0 %v972_v26, %s9826_s28  ;;  %v1615_v42 = vpop.permute.xlu1 %1614  ;;  %v1853_v26 = vrot.slane %v1851_v10, 1  ;;  %v1866_v37 = vor.u32 %v1865_v4, %v1861_v56  ;;  %2624 = vst [vmem:[#allocation2 + $0x58] sm:$0x1] %v2623_v61  ;;  %s9764_s28 = sshll.u32 %s9836_s14, 4  ;;  %s9765_s28 = int_to_ptr.vmem [resolvable:$false] %s9764_s28 }
 0x109   : > { %v1613_v49 = vpop.permute.xlu0 %1612  ;;  %1118 = vrot.lane.b32.xlu1 %v10839_v43, %s9824_s26  ;;  %v10928_v43 = vld [vmem:[%s9941_s25 + $0xc8] ss:$0 sps:$4 sm:$0x11]   ;;  %v1854_v30 = vor.u32 %v1853_v26, %v1849_v15  ;;  %s9833_s25 = smov 32  }
 0x10a   : > { %v2211_v2 = vsel %vm2197_vm8, %v2178_v7, %v1613_v49  ;;  %v1856_v12 = vshll.u32 %v10928_v43, 16  ;;  %v1995_v8 = vrot.slane %v10928_v43, 1  ;;  %v3049_v43 = vrot.slane %v2697_v33, 1  ;;  %v2797_v7 = vld [vmem:[#allocation2 + $0x60] sm:$0x80] }
 0x10b   : > { %1116 = vrot.lane.b32.xlu0 %v10845_v59, %s9824_s26  ;;  %v1887_v41 = vpop.permute.xlu1 %1886  ;;  %v2147_v59 = vsel %vm2131_vm6, %v2114_v62, %v10859_v63  ;;  %v2584_v63 = vsel %vm10771_vm14, 0, %v2583_v54  ;;  %v2842_v62 = vshll.u32 %v2697_v33, 16  ;;  %v2793_v54 = vld [vmem:[#allocation2 + $0x30] sm:$0x80]  ;;  %s9834_s26 = smov 64  }
 0x10c   : > { %v2180_v9 = vsel %vm2164_vm7, %v2147_v59, %v1503_v23  ;;  %2585 = vst [vmem:[#allocation2 + $0x90] sm:$0x80] %v2584_v63  ;;  %v1858_v47 = vrot.slane %v1856_v12, 1  ;;  %v1996_v59 = vsel %vm927_vm0, %v1994_v48, %v1995_v8  ;;  %v9669_v48 = vld [vmem:[%s14149_s3 + $0x80] sm:$0xff]   ;;  %v2799_v8 = vld [vmem:[#allocation2 + $0x78] sm:$0x80] }
 0x10d   : > { %v1885_v52 = vpop.permute.xlu0 %1884  ;;  %1390 = vrot.lane.b32.xlu1 %v1359_v20, %s9828_s17  ;;  %v2213_v11 = vsel %vm2197_vm8, %v2180_v9, %v1615_v42  ;;  %v8869_v42 = vcombine.low %v8725_v57, %v10886_v6  ;;  %v1871_v6 = vsel %vm654_vm1, %v1866_v37, %v1870_v40  ;;  %v2744_v57 = vld [vmem:[#allocation2 + $0x18] sm:$0x80]  ;;  %9199 = vmatprep.subr.bf16.mxu0 %v9669_v48 }
 0x10e   : > { %v2246_v22 = vsel %vm2230_vm9, %v2213_v11, %v1887_v41  ;;  %v2244_v50 = vsel %vm2230_vm9, %v2211_v2, %v1885_v52  ;;  %v1859_v51 = vsel %vm654_vm1, %v1854_v30, %v1858_v47  ;;  %9200 = vmatpush3.bf16.msra.mxu0 %v9669_v48  ;;  %vm3913_vm1 = vcmask 523264  }
 0x10f   : > { %1388 = vrot.lane.b32.xlu0 %v1347_v32, %s9828_s17  ;;  %v2015_v23 = vpop.permute.xlu1 %2014  ;;  %v1997_v31 = vrot.slane %v8869_v42, 1  ;;  %v10974_v32 = vrot.slane %v2842_v62, 1  ;;  %v2746_v62 = vld [vmem:[#allocation2 + $0x30] sm:$0x80]  ;;  %5649 = vst.msk [vmem:[#allocation3 + $0x8] sm:$0xff] %vm3913_vm1, %v9832_v46  ;;  %5659 = vst.msk [vmem:[#allocation3 + $0x1a0] sm:$0xff] %vm3913_vm1, %v9832_v46 }
 0x110   : > { %v2279_v1 = vsel %vm2263_vm10, %v2246_v22, %v2015_v23  ;;  %s14075_s17 = scalar_lea.vmem [#allocation4], %s8596_s16  ;;  %s9766_s16 = scalar_lea.vmem %s9765_s28, 4096 }
 0x111   : > { %v2013_v25 = vpop.permute.xlu0 %2012  ;;  %1518 = vrot.lane.b32.xlu1 %v1487_v13, %s9825_s27  ;;  %v3050_v13 = vrot.slane %v2728_v45, 1 }
 0x112   : > { %v2277_v38 = vsel %vm2263_vm10, %v2244_v50, %v2013_v25 }
 0x113   : > { %1516 = vrot.lane.b32.xlu0 %v1484_v3, %s9825_s27  ;;  %9179 = vmatprep.mubr.msk.bf16.mxu0 %vm2315_vm11, %v2277_v38  ;;  %v866_v49 = vpop.permute.xlu1 %865  ;;  %v3051_v9 = vsel %vm927_vm0, %v3049_v43, %v3050_v13  ;;  %v2801_v23 = vld [vmem:[#allocation2 + $0x90] sm:$0x80]  ;;  %s9835_s27 = smov 96  }
 0x114   : > { %9180 = vmatmul.mubr.msk.bf16.gmra.mrb[12].mxu0 %vm2315_vm11, %v2279_v1  ;;  %v2052_v56 = vsel %vm2032_vm3, %v10259_v16, %v866_v49 }
 0x115   : > { %v864_v53 = vpop.permute.xlu0 %863  ;;  %1630 = vrot.lane.b32.xlu1 %v10902_v55, %s9829_s21  ;;  %v2845_v55 = vshrl.u32 %v2697_v33, 16  ;;  %v2626_v33 = vsel %vm10692_vm15, 0, %v2625_v28 }
 0x116   : > { %v2050_v11 = vsel %vm2032_vm3, %v10263_v18, %v864_v53  ;;  %2627 = vst [vmem:[#allocation2 + $0x70] sm:$0x1] %v2626_v33 }
 0x117   : > { %1628 = vrot.lane.b32.xlu0 %v10907_v17, %s9829_s21  ;;  %v995_v20 = vpop.permute.xlu1 %994  ;;  %v1999_v17 = vsel %vm927_vm0, %v1997_v31, %v1998_v0  ;;  %v2847_v3 = vor.u32 %v2845_v55, %v10974_v32  ;;  %v2748_v0 = vld [vmem:[#allocation2 + $0x48] sm:$0x80] }
 0x118   : > { %v2085_v60 = vsel %vm2065_vm4, %v2052_v56, %v995_v20 }
 0x119   : > { %v993_v41 = vpop.permute.xlu0 %992  ;;  %1902 = vrot.lane.b32.xlu1 %v1871_v6, %s9830_s22 }
 0x11a   : > { %v2083_v2 = vsel %vm2065_vm4, %v2050_v11, %v993_v41 }
 0x11b   : > { %1900 = vrot.lane.b32.xlu0 %v1859_v51, %s9830_s22  ;;  %v1107_v10 = vpop.permute.xlu1 %1106 }
 0x11c   : > { %v2118_v12 = vsel %vm2098_vm5, %v2085_v60, %v1107_v10 }
 0x11d   : > { %v1105_v52 = vpop.permute.xlu0 %1104  ;;  %2030 = vrot.lane.b32.xlu1 %v1999_v17, %s9831_s23 }
 0x11e   : > { %v2116_v16 = vsel %vm2098_vm5, %v2083_v2, %v1105_v52  ;;  %v2750_v52 = vld [vmem:[#allocation2 + $0x60] sm:$0x80] }
 0x11f   : > { %2028 = vrot.lane.b32.xlu0 %v1996_v59, %s9831_s23  ;;  %v1379_v15 = vpop.permute.xlu1 %1378  ;;  %v9670_v59 = vld [vmem:[%s14149_s3 + $0x88] sm:$0xff]  }
 0x120   : > { %v2151_v50 = vsel %vm2131_vm6, %v2118_v12, %v1379_v15  ;;  %9201 = vmatprep.subr.bf16.mxu0 %v9670_v59  ;;  %v2752_v15 = vld [vmem:[#allocation2 + $0x78] sm:$0x80] }
 0x121   : > { %v1377_v19 = vpop.permute.xlu0 %1376  ;;  %2955 = vrot.lane.b32.xlu1 %v2847_v3, %s9833_s25  ;;  %9202 = vmatpush3.bf16.msra.mxu0 %v9670_v59 }
 0x122   : > { %v2149_v25 = vsel %vm2131_vm6, %v2116_v16, %v1377_v19 }
 0x123   : > { %3529 = vrot.lane.b32.xlu0 %v2793_v54, %s9834_s26  ;;  %v1507_v63 = vpop.permute.xlu1 %1506 }
 0x124   : > { %v2184_v21 = vsel %vm2164_vm7, %v2151_v50, %v1507_v63  ;;  %v2803_v63 = vld [vmem:[#allocation2 + $0xa8] sm:$0x80] }
 0x125   : > { %v1505_v4 = vpop.permute.xlu0 %1504  ;;  %3099 = vrot.lane.b32.xlu1 %v3051_v9, %s9834_s26 }
 0x126   : > { %v2182_v35 = vsel %vm2164_vm7, %v2149_v25, %v1505_v4 }
 0x127   : > { %3537 = vrot.lane.b32.xlu0 %v2797_v7, %s9834_s26  ;;  %v1619_v22 = vpop.permute.xlu1 %1618 }
 0x128   : > { %v2217_v38 = vsel %vm2197_vm8, %v2184_v21, %v1619_v22  ;;  %v2754_v22 = vld [vmem:[#allocation2 + $0x90] sm:$0x80]  ;;  %v2631_v21 = vld [vmem:[#allocation2 + $0xa0] sm:$0x1] }
 0x129   : > { %v1617_v26 = vpop.permute.xlu0 %1616  ;;  %3097 = vrot.lane.b32.xlu1 %v3049_v43, %s9834_s26 }
 0x12a   : > { %v2215_v37 = vsel %vm2197_vm8, %v2182_v35, %v1617_v26  ;;  %v2632_v35 = vsel %vm10692_vm15, 0, %v2631_v21 }
 0x12b   : > { %3545 = vrot.lane.b32.xlu0 %v2801_v23, %s9834_s26  ;;  %v1891_v18 = vpop.permute.xlu1 %1890  ;;  %2633 = vst [vmem:[#allocation2 + $0xa0] sm:$0x1] %v2632_v35 }
 0x12c   : > { %v2250_v40 = vsel %vm2230_vm9, %v2217_v38, %v1891_v18  ;;  %v2628_v38 = vld [vmem:[#allocation2 + $0x88] sm:$0x1] }
 0x12d   : > { %v1889_v1 = vpop.permute.xlu0 %1888  ;;  %3193 = vrot.lane.b32.xlu1 %v2744_v57, %s9835_s27  ;;  %v2629_v28 = vsel %vm10692_vm15, 0, %v2628_v38 }
 0x12e   : > { %v2248_v49 = vsel %vm2230_vm9, %v2215_v37, %v1889_v1  ;;  %2630 = vst [vmem:[#allocation2 + $0x88] sm:$0x1] %v2629_v28 }
 0x12f   : > { %v2019_v42 = vpop.permute.xlu1 %2018 }
 0x130   : > { %v2283_v30 = vsel %vm2263_vm10, %v2250_v40, %v2019_v42 }
 0x131   : > { %v2017_v47 = vpop.permute.xlu0 %2016  ;;  %3533 = vrot.lane.b32.xlu1 %v2795_v29, %s9834_s26 }
 0x132   : > { %v2281_v53 = vsel %vm2263_vm10, %v2248_v49, %v2017_v47 }
 0x133   : > { %9183 = vmatprep.mubr.msk.bf16.mxu1 %vm2315_vm11, %v2281_v53  ;;  %v870_v6 = vpop.permute.xlu1 %869 }
 0x134   : > { %9184 = vmatmul.mubr.msk.bf16.vlgmr.msra.gmra.mrb[0].mxu1 %vm2315_vm11, %v2283_v30  ;;  %v2056_v41 = vsel %vm2032_vm3, %v10405_v36, %v870_v6 }
 0x135   : > { %v868_v31 = vpop.permute.xlu0 %867  ;;  %3197 = vrot.lane.b32.xlu1 %v2746_v62, %s9835_s27 }
 0x136   : > { %v2054_v17 = vsel %vm2032_vm3, %v10433_v24, %v868_v31 }
 0x137   : > { %v999_v20 = vpop.permute.xlu1 %998 }
 0x138   : > { %v2089_v45 = vsel %vm2065_vm4, %v2056_v41, %v999_v20 }
 0x139   : > { %v997_v51 = vpop.permute.xlu0 %996  ;;  %3201 = vrot.lane.b32.xlu1 %v2748_v0, %s9835_s27 }
 0x13a   : > { %v2087_v3 = vsel %vm2065_vm4, %v2054_v17, %v997_v51 }
 0x13b   : > { %v1111_v55 = vpop.permute.xlu1 %1110 }
 0x13c   : > { %v2122_v13 = vsel %vm2098_vm5, %v2089_v45, %v1111_v55 }
 0x13d   : > { %v1109_v10 = vpop.permute.xlu0 %1108  ;;  %3541 = vrot.lane.b32.xlu1 %v2799_v8, %s9834_s26 }
 0x13e   : > { %v2120_v24 = vsel %vm2098_vm5, %v2087_v3, %v1109_v10 }
 0x13f   : > { %v1383_v43 = vpop.permute.xlu1 %1382 }
 0x140   : > { %v2155_v19 = vsel %vm2131_vm6, %v2122_v13, %v1383_v43  ;;  %v2637_v13 = vld [vmem:[#allocation2 + $0xd0] sm:$0x1] }
 0x141   : > { %v1381_v36 = vpop.permute.xlu0 %1380  ;;  %3205 = vrot.lane.b32.xlu1 %v2750_v52, %s9835_s27 }
 0x142   : > { %v2153_v56 = vsel %vm2131_vm6, %v2120_v24, %v1381_v36  ;;  %v2634_v24 = vld [vmem:[#allocation2 + $0xb8] sm:$0x1] }
 0x143   : > { %v1511_v54 = vpop.permute.xlu1 %1510 }
 0x144   : > { %v2188_v7 = vsel %vm2164_vm7, %v2155_v19, %v1511_v54  ;;  %v2635_v19 = vsel %vm10692_vm15, 0, %v2634_v24  ;;  %v2592_v24 = vld [vmem:[#allocation2 + $0xd8] sm:$0x80] }
 0x145   : > { %v1509_v9 = vpop.permute.xlu0 %1508  ;;  %3209 = vrot.lane.b32.xlu1 %v2752_v15, %s9835_s27  ;;  %v2638_v15 = vsel %vm10692_vm15, 0, %v2637_v13  ;;  %2636 = vst [vmem:[#allocation2 + $0xb8] sm:$0x1] %v2635_v19 }
 0x146   : > { %v2186_v4 = vsel %vm2164_vm7, %v2153_v56, %v1509_v9  ;;  %2639 = vst [vmem:[#allocation2 + $0xd0] sm:$0x1] %v2638_v15  ;;  %v2589_v15 = vld [vmem:[#allocation2 + $0xc0] sm:$0x80] }
 0x147   : > { %v1623_v11 = vpop.permute.xlu1 %1622 }
 0x148   : > { %v2221_v2 = vsel %vm2197_vm8, %v2188_v7, %v1623_v11 }
 0x149   : > { %v1621_v60 = vpop.permute.xlu0 %1620  ;;  %3549 = vrot.lane.b32.xlu1 %v2803_v63, %s9834_s26 }
 0x14a   : > { %v2219_v23 = vsel %vm2197_vm8, %v2186_v4, %v1621_v60 }
 0x14b   : > { %v1895_v26 = vpop.permute.xlu1 %1894 }
 0x14c   : > { %v2254_v16 = vsel %vm2230_vm9, %v2221_v2, %v1895_v26 }
 0x14d   : > { %v1893_v12 = vpop.permute.xlu0 %1892  ;;  %3213 = vrot.lane.b32.xlu1 %v2754_v22, %s9835_s27 }
 0x14e   : > { %v2252_v57 = vsel %vm2230_vm9, %v2219_v23, %v1893_v12 }
 0x14f   : > { %v2023_v18 = vpop.permute.xlu1 %2022 }
 0x150   : > { %v2287_v50 = vsel %vm2263_vm10, %v2254_v16, %v2023_v18 }
 0x151   : > { %v2021_v1 = vpop.permute.xlu0 %2020 }
 0x152   : > { %v2285_v25 = vsel %vm2263_vm10, %v2252_v57, %v2021_v1 }
 0x153   : > { %9187 = vmatprep.mubr.msk.bf16.mxu1 %vm2315_vm11, %v2285_v25  ;;  %v874_v29 = vpop.permute.xlu1 %873  ;;  %v11094_v25 = vld [vmem:[%s14148_s2] ss:$0 sm:$0xff] }
 0x154   : > { %9188 = vmatmul.mubr.msk.bf16.gmra.mrb[4].mxu1 %vm2315_vm11, %v2287_v50  ;;  %v2060_v33 = vsel %vm2032_vm3, %v10585_v5, %v874_v29 }
 0x155   : > { %v872_v37 = vpop.permute.xlu0 %871 }
 0x156   : > { %v2058_v49 = vsel %vm2032_vm3, %v10582_v34, %v872_v37 }
 0x157   : > { %v1003_v40 = vpop.permute.xlu1 %1002 }
 0x158   : > { %v2093_v47 = vsel %vm2065_vm4, %v2060_v33, %v1003_v40 }
 0x159   : > { %v1001_v42 = vpop.permute.xlu0 %1000 }
 0x15a   : > { %v2091_v61 = vsel %vm2065_vm4, %v2058_v49, %v1001_v42 }
 0x15b   : > { %v1115_v58 = vpop.permute.xlu1 %1114 }
 0x15c   : > { %v2126_v6 = vsel %vm2098_vm5, %v2093_v47, %v1115_v58 }
 0x15d   : > { %v1113_v30 = vpop.permute.xlu0 %1112 }
 0x15e   : > { %v2124_v5 = vsel %vm2098_vm5, %v2091_v61, %v1113_v30 }
 0x15f   : > { %v1387_v53 = vpop.permute.xlu1 %1386 }
 0x160   : > { %v2159_v34 = vsel %vm2131_vm6, %v2126_v6, %v1387_v53 }
 0x161   : > { %v1385_v62 = vpop.permute.xlu0 %1384 }
 0x162   : > { %v2157_v20 = vsel %vm2131_vm6, %v2124_v5, %v1385_v62 }
 0x163   : > { %v1515_v31 = vpop.permute.xlu1 %1514 }
 0x164   : > { %v2192_v51 = vsel %vm2164_vm7, %v2159_v34, %v1515_v31 }
 0x165   : > { %v1513_v0 = vpop.permute.xlu0 %1512 }
 0x166   : > { %v2190_v8 = vsel %vm2164_vm7, %v2157_v20, %v1513_v0 }
 0x167   : > { %v1627_v48 = vpop.permute.xlu1 %1626 }
 0x168   : > { %v2225_v55 = vsel %vm2197_vm8, %v2192_v51, %v1627_v48 }
 0x169   : > { %v1625_v41 = vpop.permute.xlu0 %1624 }
 0x16a   : > { %v2223_v17 = vsel %vm2197_vm8, %v2190_v8, %v1625_v41 }
 0x16b   : > { %v1899_v10 = vpop.permute.xlu1 %1898 }
 0x16c   : > { %v2258_v59 = vsel %vm2230_vm9, %v2225_v55, %v1899_v10  ;;  %v2643_v55 = vld [vmem:[#allocation2 + $0x100] sm:$0x1] }
 0x16d   : > { %v1897_v46 = vpop.permute.xlu0 %1896  ;;  %v2644_v10 = vsel %vm10692_vm15, 0, %v2643_v55  ;;  %v2826_v55 = vld [vmem:[#allocation2 + $0x58] sm:$0x1] }
 0x16e   : > { %v2256_v45 = vsel %vm2230_vm9, %v2223_v17, %v1897_v46  ;;  %v2640_v17 = vld [vmem:[#allocation2 + $0xe8] sm:$0x1]  ;;  %2645 = vst [vmem:[#allocation2 + $0x100] sm:$0x1] %v2644_v10 }
 0x16f   : > { %v2027_v52 = vpop.permute.xlu1 %2026  ;;  %v2641_v46 = vsel %vm10692_vm15, 0, %v2640_v17  ;;  %v2646_v17 = vld [vmem:[#allocation2 + $0x118] sm:$0x1] }
 0x170   : > { %v2291_v43 = vsel %vm2263_vm10, %v2258_v59, %v2027_v52  ;;  %2642 = vst [vmem:[#allocation2 + $0xe8] sm:$0x1] %v2641_v46  ;;  %v2825_v59 = vld [vmem:[#allocation2 + $0x40] sm:$0x1] }
 0x171   : > { %v2025_v3 = vpop.permute.xlu0 %2024 }
 0x172   : > { %v2289_v36 = vsel %vm2263_vm10, %v2256_v45, %v2025_v3  ;;  %v3786_v45 = vrot.slane %v2825_v59, 1  ;;  %v2647_v59 = vsel %vm10692_vm15, 0, %v2646_v17 }
 0x173   : > { %9191 = vmatprep.mubr.msk.bf16.mxu1 %vm2315_vm11, %v2289_v36  ;;  %v878_v54 = vpop.permute.xlu1 %877  ;;  %v2730_v36 = vld [vmem:[#allocation2 + $0x40] sm:$0x1]  ;;  %2648 = vst [vmem:[#allocation2 + $0x118] sm:$0x1] %v2647_v59 }
 0x174   : > { %9192 = vmatmul.mubr.msk.bf16.gmra.mrb[8].mxu1 %vm2315_vm11, %v2291_v43  ;;  %v2064_v7 = vsel %vm2032_vm3, %v10768_v44, %v878_v54 }
 0x175   : > { %v876_v9 = vpop.permute.xlu0 %875 }
 0x176   : > { %v2062_v4 = vsel %vm2032_vm3, %v10778_v39, %v876_v9  ;;  %v3056_v9 = vrot.slane %v2730_v36, 1  ;;  %vm14193_vm3 = vsmask.f32 256 }
 0x177   : > { %v1007_v56 = vpop.permute.xlu1 %1006 }
 0x178   : > { %v2097_v2 = vsel %vm2065_vm4, %v2064_v7, %v1007_v56  ;;  %v2729_v7 = vld [vmem:[#allocation2 + $0x28] sm:$0x1] }
 0x179   : > { %v1005_v63 = vpop.permute.xlu0 %1004 }
 0x17a   : > { %v2095_v22 = vsel %vm2065_vm4, %v2062_v4, %v1005_v63  ;;  %v2590_v4 = vsel %vm10771_vm14, 0, %v2589_v15  ;;  %vm14194_vm4 = vmmov %vm14193_vm3 }
 0x17b   : > { %v1119_v11 = vpop.permute.xlu1 %1118  ;;  %2591 = vst [vmem:[#allocation2 + $0xc0] sm:$0x80] %v2590_v4  ;;  %v9674_v4 = vld [vmem:[%s14149_s3 + $0x8] sm:$0xff]  }
 0x17c   : > { %v2130_v12 = vsel %vm2098_vm5, %v2097_v2, %v1119_v11  ;;  %v2593_v11 = vsel %vm10771_vm14, 0, %v2592_v24  ;;  %v2732_v24 = vld [vmem:[#allocation2 + $0x70] sm:$0x1] }
 0x17d   : > { %v1117_v60 = vpop.permute.xlu0 %1116  ;;  %2594 = vst [vmem:[#allocation2 + $0xd8] sm:$0x80] %v2593_v11 }
 0x17e   : > { %v2128_v16 = vsel %vm2098_vm5, %v2095_v22, %v1117_v60  ;;  %vm14196_vm5 = vmmov %vm14193_vm3 }
 0x17f   : > { %v1391_v23 = vpop.permute.xlu1 %1390 }
 0x180   : > { %v2163_v18 = vsel %vm2131_vm6, %v2130_v12, %v1391_v23  ;;  %v3053_v12 = vrot.slane %v2729_v7, 1 }
 0x181   : > { %v1389_v26 = vpop.permute.xlu0 %1388 }
 0x182   : > { %v2161_v44 = vsel %vm2131_vm6, %v2128_v16, %v1389_v26  ;;  %v2777_v16 = vld [vmem:[#allocation2 + $0x40] sm:$0x1]  ;;  %vm14200_vm6 = vmmov %vm14193_vm3 }
 0x183   : > { %v1519_v57 = vpop.permute.xlu1 %1518 }
 0x184   : > { %v2196_v1 = vsel %vm2164_vm7, %v2163_v18, %v1519_v57  ;;  %v2807_v14 = vld [vmem:[#allocation2 + $0xd8] sm:$0x80] }
 0x185   : > { %v1517_v50 = vpop.permute.xlu0 %1516 }
 0x186   : > { %v2194_v21 = vsel %vm2164_vm7, %v2161_v44, %v1517_v50  ;;  %v3389_v50 = vrot.slane %v2777_v16, 1  ;;  %v2548_v44 = vld [vmem:[#allocation2] sm:$0x80]  ;;  %vm14201_vm7 = vmmov %vm14193_vm3 }
 0x187   : > { %v1631_v39 = vpop.permute.xlu1 %1630 }
 0x188   : > { %v2229_v29 = vsel %vm2197_vm8, %v2196_v1, %v1631_v39 }
 0x189   : > { %v1629_v35 = vpop.permute.xlu0 %1628 }
 0x18a   : > { %v9169_v38 = vpop.f32.mrb[0].mxu0  ;;  %v2227_v40 = vsel %vm2197_vm8, %v2194_v21, %v1629_v35  ;;  %v2549_v21 = vsel %vm10771_vm14, 0, %v2548_v44  ;;  %vm14207_vm8 = vmmov %vm14193_vm3 }
 0x18b   : > { %v2395_v28 = vadd.f32 %v9169_v38, %v11094_v25  ;;  %v2386_v37 = vpop.f32.mrb[1].mxu0  ;;  %v1903_v58 = vpop.permute.xlu1 %1902  ;;  %2550 = vst [vmem:[#allocation2] sm:$0x80] %v2549_v21  ;;  %v9675_v21 = vld [vmem:[%s14149_s3 + $0x50] sm:$0xff]  }
 0x18c   : > { %v2387_v42 = vadd.f32 %v11094_v25, %v2386_v37  ;;  %v9170_v33 = vpop.f32.mrb[2].mxu0  ;;  %v2262_v53 = vsel %vm2230_vm9, %v2229_v29, %v1903_v58 }
 0x18d   : > { %v2398_v49 = vadd.f32 %v9170_v33, %v11094_v25  ;;  %v2389_v30 = vpop.f32.mrb[3].mxu0  ;;  %v1901_v47 = vpop.permute.xlu0 %1900  ;;  %v2515_v62 = vmax.f32 %v2395_v28, 0.0 }
 0x18e   : > { %v2390_v61 = vadd.f32 %v11094_v25, %v2389_v30  ;;  %v2260_v5 = vsel %vm2230_vm9, %v2227_v40, %v1901_v47  ;;  %v2513_v31 = vmax.f32 %v2387_v42, 0.0  ;;  %v2776_v47 = vld [vmem:[#allocation2 + $0x28] sm:$0x1]  ;;  %vm14209_vm9 = vmmov %vm14193_vm3 }
 0x18f   : > { %v2516_v6 = vmax.f32 %v2398_v49, 0.0  ;;  %v2031_v0 = vpop.permute.xlu1 %2030 }
 0x190   : > { %v2514_v34 = vmax.f32 %v2390_v61, 0.0  ;;  %v2295_v48 = vsel %vm2263_vm10, %v2262_v53, %v2031_v0 }
 0x191   : > { %v2665_v20 = vpack.c.bf16 %v2516_v6, %v2515_v62  ;;  %v2029_v51 = vpop.permute.xlu0 %2028 }
 0x192   : > { %v2664_v8 = vpack.c.bf16 %v2514_v34, %v2513_v31  ;;  %v2293_v41 = vsel %vm2263_vm10, %v2260_v5, %v2029_v51  ;;  %v3386_v31 = vrot.slane %v2776_v47, 1  ;;  %vm14214_vm10 = vmmov %vm14193_vm3 }
 0x193   : > { %2681 = vst.msk [vmem:[#allocation2 + $0x38] sm:$0xff] %vm2551_vm12, %v2665_v20  ;;  %9195 = vmatprep.mubr.msk.bf16.mxu1 %vm2315_vm11, %v2293_v41  ;;  %v2649_v41 = vld [vmem:[#allocation2 + $0x130] sm:$0x1] }
 0x194   : > { %2680 = vst.msk [vmem:[#allocation2 + $0x20] sm:$0xff] %vm2551_vm12, %v2664_v8  ;;  %9196 = vmatmul.mubr.msk.bf16.gmra.mrb[12].mxu1 %vm2315_vm11, %v2295_v48  ;;  %v2827_v8 = vld [vmem:[#allocation2 + $0x70] sm:$0x1]  ;;  %v2650_v10 = vsel %vm10692_vm15, 0, %v2649_v41  ;;  %v9679_v41 = vld [vmem:[%s14149_s3 + $0x60] sm:$0xff]   ;;  %vm14215_vm11 = vmmov %vm14193_vm3 }
 0x195   : > { %2651 = vst [vmem:[#allocation2 + $0x130] sm:$0x1] %v2650_v10 }
 0x19a   : > { %v2794_v52 = vld [vmem:[#allocation2 + $0x38] sm:$0xff] }
 0x19b   : > { %v3785_v3 = vrot.slane %v2794_v52, 1  ;;  %3531 = vrot.lane.b32.xlu0 %v2794_v52, %s9834_s26  ;;  %v11116_v43 = vld [vmem:[#allocation2 + $0x20] sm:$0xff]  ;;  %v3594_v60 = vshll.u32 %v2794_v52, 16  ;;  %v3597_v35 = vshrl.u32 %v2794_v52, 16 }
 0x19c   : > { %3195 = vrot.lane.b32.xlu1 %v11116_v43, %s9835_s27  ;;  %v3385_v26 = vrot.slane %v11116_v43, 1  ;;  %v2849_v49 = vshll.u32 %v11116_v43, 16  ;;  %v3261_v20 = vshrl.u32 %v11116_v43, 16  ;;  %v3789_v43 = vrot.slane %v2826_v55, 1  ;;  %v2598_v55 = vld [vmem:[#allocation2 + $0x108] sm:$0x80] }
 0x19d   : > { %v3787_v13 = vsel %vm927_vm0, %v3785_v3, %v3786_v45  ;;  %v4288_v54 = vshrl.u32 %v3785_v3, 16  ;;  %v3057_v23 = vsel %vm927_vm0, %v3785_v3, %v3056_v9  ;;  %v11133_v18 = vrot.slane %v3594_v60, 1 }
 0x19e   : > { %v4292_v19 = vshrl.u32 %v3787_v13, 16  ;;  %v4295_v63 = vshll.u32 %v3787_v13, 16  ;;  %v3054_v39 = vsel %vm927_vm0, %v3385_v26, %v3053_v12  ;;  %v3390_v33 = vsel %vm927_vm0, %v3785_v3, %v3389_v50 }
 0x19f   : > { %3199 = vrot.lane.b32.xlu0 %v2794_v52, %s9835_s27  ;;  %v4290_v2 = vrot.slane %v4288_v54, 7  ;;  %v11145_v58 = vor.u32 %v3597_v35, %v11133_v18  ;;  %v11152_v34 = vrot.slane %v2849_v49, 1  ;;  %v3387_v51 = vsel %vm927_vm0, %v3385_v26, %v3386_v31  ;;  %v9671_v52 = vld [vmem:[%s14149_s3 + $0x40] sm:$0xff]   ;;  %v9676_v35 = vld [vmem:[%s14149_s3 + $0x10] sm:$0xff]   ;;  %v9677_v49 = vld [vmem:[%s14149_s3 + $0x58] sm:$0xff]  }
 0x1a0   : > { %3105 = vrot.lane.b32.xlu1 %v3785_v3, %s9834_s26  ;;  %v4294_v56 = vrot.slane %v4292_v19, 7  ;;  %v3792_v45 = vrot.slane %v2827_v8, 1  ;;  %8991 = vmatprep.subr.bf16.mxu1 %v9671_v52  ;;  %v2599_v59 = vsel %vm10771_vm14, 0, %v2598_v55 }
 0x1a1   : > { %v11162_v48 = vor.u32 %v3261_v20, %v11152_v34  ;;  %v9386_v46 = vpack.i.bf16 %v11152_v34, %v10974_v32  ;;  %v9672_v32 = vld [vmem:[%s14149_s3] sm:$0xff]   ;;  %2600 = vst [vmem:[#allocation2 + $0x108] sm:$0x80] %v2599_v59 }
 0x1a2   : > { %v4297_v22 = vor.u32 %v4295_v63, %v4294_v56  ;;  %8992 = vmatpush3.bf16.msra.mxu1 %v9672_v32  ;;  %v9673_v56 = vld [vmem:[%s14149_s3 + $0x48] sm:$0xff]   ;;  %v3062_v63 = vrot.slane %v2732_v24, 1 }
 0x1a3   : > { %3437 = vrot.lane.b32.xlu0 %v3785_v3, %s9833_s25  ;;  %8993 = vmatprep.subr.bf16.mxu1 %v9673_v56 }
 0x1a4   : > { %3107 = vrot.lane.b32.xlu1 %v3057_v23, %s9834_s26  ;;  %v4298_v57 = vsel %vm14193_vm3, %v4290_v2, %v4297_v22  ;;  %v2731_v23 = vld [vmem:[#allocation2 + $0x58] sm:$0x1] }
 0x1a5   : > { %9203 = vmatprep.mubr.msk.bf16.mxu0 %vm2551_vm12, %v4298_v57 }
 0x1a6   : > { %8994 = vmatpush3.bf16.msra.mxu1 %v9674_v4  ;;  %v9682_v4 = vld [vmem:[%s14149_s3 + $0x28] sm:$0xff]  }
 0x1a7   : > { %v9173_v1 = vpop.f32.mrb[4].mxu0  ;;  %3433 = vrot.lane.b32.xlu0 %v3385_v26, %s9833_s25  ;;  %8995 = vmatprep.subr.bf16.mxu1 %v9675_v21  ;;  %v2652_v21 = vld [vmem:[#allocation2 + $0x148] sm:$0x1] }
 0x1a8   : > { %v2411_v38 = vadd.f32 %v9173_v1, %v11094_v25  ;;  %3103 = vrot.lane.b32.xlu1 %v3054_v39, %s9834_s26  ;;  %v2402_v29 = vpop.f32.mrb[5].mxu0  ;;  %v3059_v39 = vrot.slane %v2731_v23, 1  ;;  %v2829_v23 = vld [vmem:[#allocation2 + $0xa0] sm:$0x1] }
 0x1a9   : > { %v2403_v28 = vadd.f32 %v11094_v25, %v2402_v29  ;;  %v9174_v37 = vpop.f32.mrb[6].mxu0 }
 0x1aa   : > { %v2414_v40 = vadd.f32 %v9174_v37, %v11094_v25  ;;  %v2405_v42 = vpop.f32.mrb[7].mxu0  ;;  %v2519_v61 = vmax.f32 %v2411_v38, 0.0  ;;  %8996 = vmatpush3.bf16.msra.mxu1 %v9676_v35 }
 0x1ab   : > { %v2406_v30 = vadd.f32 %v11094_v25, %v2405_v42  ;;  %3439 = vrot.lane.b32.xlu0 %v3390_v33, %s9833_s25  ;;  %v2517_v62 = vmax.f32 %v2403_v28, 0.0  ;;  %v11225_v33 = vpop.permute.xlu1 %2955  ;;  %8997 = vmatprep.subr.bf16.mxu1 %v9677_v49  ;;  %v2653_v49 = vsel %vm10692_vm15, 0, %v2652_v21 }
 0x1ac   : > { %v2520_v53 = vmax.f32 %v2414_v40, 0.0  ;;  %3707 = vrot.lane.b32.xlu1 %v11145_v58, %s9835_s27  ;;  %2654 = vst [vmem:[#allocation2 + $0x148] sm:$0x1] %v2653_v49 }
 0x1ad   : > { %v2518_v6 = vmax.f32 %v2406_v30, 0.0 }
 0x1ae   : > { %v2667_v5 = vpack.c.bf16 %v2520_v53, %v2519_v61  ;;  %v2779_v53 = vld [vmem:[#allocation2 + $0x70] sm:$0x1] }
 0x1af   : > { %v2666_v0 = vpack.c.bf16 %v2518_v6, %v2517_v62  ;;  %3101 = vrot.lane.b32.xlu0 %v3385_v26, %s9834_s26  ;;  %v9678_v62 = vld [vmem:[%s14149_s3 + $0x18] sm:$0xff]   ;;  %v3395_v8 = vrot.slane %v2779_v53, 1 }
 0x1b0   : > { %2683 = vst.msk [vmem:[#allocation2 + $0x68] sm:$0xff] %vm2551_vm12, %v2667_v5  ;;  %2963 = vrot.lane.b32.xlu1 %v11145_v58, %s9833_s25  ;;  %8998 = vmatpush3.bf16.msra.mxu1 %v9678_v62 }
 0x1b1   : > { %2682 = vst.msk [vmem:[#allocation2 + $0x50] sm:$0xff] %vm2551_vm12, %v2666_v0  ;;  %8999 = vmatprep.subr.bf16.mxu1 %v9679_v41  ;;  %v2655_v41 = vld [vmem:[#allocation2 + $0x160] sm:$0x1] }
 0x1b3   : > { %3435 = vrot.lane.b32.xlu0 %v3387_v51, %s9833_s25 }
 0x1b4   : > { %2959 = vrot.lane.b32.xlu1 %v11162_v48, %s9833_s25 }
 0x1b7   : > { %9387 = vrot.lane.b32.xlu0 %v9386_v46, %s9833_s25  ;;  %v2798_v3 = vld [vmem:[#allocation2 + $0x68] sm:$0xff]  ;;  %v9680_v46 = vld [vmem:[%s14149_s3 + $0x20] sm:$0xff]  }
 0x1b8   : > { %v11177_v36 = vld [vmem:[#allocation2 + $0x50] sm:$0xff]  ;;  %v11179_v13 = vrot.slane %v2798_v3, 1  ;;  %v3608_v16 = vshll.u32 %v2798_v3, 16  ;;  %v3611_v42 = vshrl.u32 %v2798_v3, 16  ;;  %9000 = vmatpush3.bf16.msra.mxu1 %v9680_v46 }
 0x1b9   : > { %3203 = vrot.lane.b32.xlu1 %v11177_v36, %s9835_s27  ;;  %v11187_v15 = vrot.slane %v11177_v36, 1  ;;  %v3601_v30 = vshll.u32 %v11177_v36, 16  ;;  %v3275_v24 = vshrl.u32 %v11177_v36, 16 }
 0x1ba   : > { %v3793_v54 = vsel %vm927_vm0, %v11179_v13, %v3792_v45  ;;  %v4352_v60 = vshrl.u32 %v11179_v13, 16  ;;  %v3063_v50 = vsel %vm927_vm0, %v11179_v13, %v3062_v63  ;;  %v11215_v28 = vrot.slane %v3608_v16, 1  ;;  %v2595_v45 = vld [vmem:[#allocation2 + $0xf0] sm:$0x80]  ;;  %v9681_v63 = vld [vmem:[%s14149_s3 + $0x68] sm:$0xff]  }
 0x1bb   : > { %3539 = vrot.lane.b32.xlu0 %v2798_v3, %s9834_s26  ;;  %v3790_v19 = vsel %vm927_vm0, %v11187_v15, %v3789_v43  ;;  %v4356_v9 = vshrl.u32 %v3793_v54, 16  ;;  %v4320_v7 = vshrl.u32 %v11187_v15, 16  ;;  %v4359_v22 = vshll.u32 %v3793_v54, 16  ;;  %v11257_v43 = vpop.permute.xlu1 %3099  ;;  %9001 = vmatprep.subr.bf16.mxu1 %v9681_v63  ;;  %v2734_v16 = vld [vmem:[#allocation2 + $0xa0] sm:$0x1] }
 0x1bc   : > { %v4324_v11 = vshrl.u32 %v3790_v19, 16  ;;  %v4327_v12 = vshll.u32 %v3790_v19, 16  ;;  %v4354_v38 = vrot.slane %v4352_v60, 7  ;;  %14195 = vst [vmem:[#allocation8_spill] sm:$0xff] %v11215_v28  ;;  %v3060_v40 = vsel %vm927_vm0, %v11187_v15, %v3059_v39  ;;  %9002 = vmatpush3.bf16.msra.mxu1 %v9682_v4 }
 0x1bd   : > { %3113 = vrot.lane.b32.xlu1 %v11179_v13, %s9834_s26  ;;  %v4358_v2 = vrot.slane %v4356_v9, 7  ;;  %v4322_v44 = vrot.slane %v4320_v7, 7  ;;  %v11234_v61 = vor.u32 %v3611_v42, %v11215_v28  ;;  %v11247_v17 = vrot.slane %v3601_v30, 1 }
 0x1be   : > { %v4326_v26 = vrot.slane %v4324_v11, 7  ;;  %v2596_v32 = vsel %vm10771_vm14, 0, %v2595_v45  ;;  %v3396_v56 = vsel %vm927_vm0, %v11179_v13, %v3395_v8  ;;  %v2778_v11 = vld [vmem:[#allocation2 + $0x58] sm:$0x1] }
 0x1bf   : > { %3207 = vrot.lane.b32.xlu0 %v2798_v3, %s9835_s27  ;;  %v4361_v57 = vor.u32 %v4359_v22, %v4358_v2  ;;  %14197 = vst [vmem:[#allocation9_spill] sm:$0xff] %v11247_v17  ;;  %2597 = vst [vmem:[#allocation2 + $0xf0] sm:$0x80] %v2596_v32  ;;  %v11280_v60 = vpop.permute.xlu1 %3097  ;;  %v9683_v2 = vld [vmem:[%s14149_s3 + $0x70] sm:$0xff]  }
 0x1c0   : > { %v4329_v1 = vor.u32 %v4327_v12, %v4326_v26  ;;  %v9684_v22 = vld [vmem:[%s14149_s3 + $0x30] sm:$0xff]   ;;  %v2828_v26 = vld [vmem:[#allocation2 + $0x88] sm:$0x1]  ;;  %9003 = vmatprep.subr.bf16.mxu1 %v9683_v2  ;;  %v9685_v12 = vld [vmem:[%s14149_s3 + $0x78] sm:$0xff]  }
 0x1c1   : > { %3115 = vrot.lane.b32.xlu1 %v3063_v50, %s9834_s26  ;;  %v4362_v37 = vsel %vm14196_vm5, %v4354_v38, %v4361_v57  ;;  %9004 = vmatpush3.bf16.msra.mxu1 %v9684_v22  ;;  %v9686_v57 = vld [vmem:[%s14149_s3 + $0x38] sm:$0xff]   ;;  %v3795_v39 = vrot.slane %v2828_v26, 1  ;;  %vm14226_vm5 = vmmov %vm14193_vm3 }
 0x1c2   : > { %v4330_v29 = vsel %vm14194_vm4, %v4322_v44, %v4329_v1  ;;  %v3798_v44 = vrot.slane %v2829_v23, 1  ;;  %9005 = vmatprep.subr.bf16.mxu1 %v9685_v12  ;;  %vm14223_vm4 = vmmov %vm14193_vm3 }
 0x1c3   : > { %3535 = vrot.lane.b32.xlu0 %v11177_v36, %s9834_s26  ;;  %9204 = vmatmul.mubr.msk.bf16.vlgmr.msra.gmra.mrb[16].mxu0 %vm2551_vm12, %v4330_v29  ;;  %v11271_v36 = vor.u32 %v11247_v17, %v3275_v24  ;;  %v3068_v29 = vrot.slane %v2734_v16, 1  ;;  %v2656_v24 = vsel %vm10692_vm15, 0, %v2655_v41 }
 0x1c4   : > { %9207 = vmatprep.mubr.msk.bf16.mxu0 %vm2551_vm12, %v4362_v37  ;;  %v11308_v37 = vpop.permute.xlu1 %3193  ;;  %2657 = vst [vmem:[#allocation2 + $0x160] sm:$0x1] %v2656_v24 }
 0x1c5   : > { %3111 = vrot.lane.b32.xlu1 %v3060_v40, %s9834_s26  ;;  %v2733_v40 = vld [vmem:[#allocation2 + $0x88] sm:$0x1]  ;;  %9006 = vmatpush3.bf16.msra.mxu1 %v9686_v57 }
 0x1c7   : > { %v9177_v47 = vpop.f32.mrb[8].mxu0  ;;  %3445 = vrot.lane.b32.xlu0 %v11179_v13, %s9833_s25  ;;  %v3392_v13 = vrot.slane %v2778_v11, 1 }
 0x1c8   : > { %v2427_v6 = vadd.f32 %v9177_v47, %v11094_v25  ;;  %v2418_v5 = vpop.f32.mrb[9].mxu0  ;;  %v11330_v46 = vpop.permute.xlu1 %3533 }
 0x1c9   : > { %v2419_v31 = vadd.f32 %v11094_v25, %v2418_v5  ;;  %3715 = vrot.lane.b32.xlu1 %v11234_v61, %s9835_s27  ;;  %v9178_v0 = vpop.f32.mrb[10].mxu0  ;;  %v3393_v50 = vsel %vm927_vm0, %v11187_v15, %v3392_v13  ;;  %v3065_v5 = vrot.slane %v2733_v40, 1 }
 0x1ca   : > { %v2430_v20 = vadd.f32 %v9178_v0, %v11094_v25  ;;  %v2421_v51 = vpop.f32.mrb[11].mxu0  ;;  %v2523_v52 = vmax.f32 %v2427_v6, 0.0 }
 0x1cb   : > { %v2422_v10 = vadd.f32 %v11094_v25, %v2421_v51  ;;  %3441 = vrot.lane.b32.xlu0 %v11187_v15, %s9833_s25  ;;  %v2521_v54 = vmax.f32 %v2419_v31, 0.0 }
 0x1cc   : > { %v2524_v3 = vmax.f32 %v2430_v20, 0.0  ;;  %v11351_v11 = vpop.permute.xlu1 %3197 }
 0x1cd   : > { %v2522_v19 = vmax.f32 %v2422_v10, 0.0  ;;  %2971 = vrot.lane.b32.xlu1 %v11234_v61, %s9833_s25 }
 0x1ce   : > { %v2669_v9 = vpack.c.bf16 %v2524_v3, %v2523_v52 }
 0x1cf   : > { %v2668_v7 = vpack.c.bf16 %v2522_v19, %v2521_v54  ;;  %3447 = vrot.lane.b32.xlu0 %v3396_v56, %s9833_s25 }
 0x1d0   : > { %2685 = vst.msk [vmem:[#allocation2 + $0x98] sm:$0xff] %vm2551_vm12, %v2669_v9 }
 0x1d1   : > { %2684 = vst.msk [vmem:[#allocation2 + $0x80] sm:$0xff] %vm2551_vm12, %v2668_v7  ;;  %3711 = vrot.lane.b32.xlu1 %v11271_v36, %s9835_s27 }
 0x1d3   : > { %3109 = vrot.lane.b32.xlu0 %v11187_v15, %s9834_s26  ;;  %v9391_v15 = vpack.i.bf16 %v11247_v17, %v11133_v18  ;;  %v2737_v17 = vld [vmem:[#allocation2 + $0xe8] sm:$0x1] }
 0x1d5   : > { %2967 = vrot.lane.b32.xlu1 %v11271_v36, %s9833_s25 }
 0x1d7   : > { %3443 = vrot.lane.b32.xlu0 %v3393_v50, %s9833_s25  ;;  %v11301_v1 = vld [vmem:[#allocation2 + $0x98] sm:$0xff]  ;;  %v11363_v50 = vpop.permute.xlu1 %3201 }
 0x1d8   : > { %14198 = vst [vmem:[#allocation10_spill] sm:$0xff] %v11301_v1  ;;  %v11303_v35 = vld [vmem:[#allocation2 + $0x80] sm:$0xff]  ;;  %v11306_v38 = vrot.slane %v11301_v1, 1  ;;  %v3622_v53 = vshll.u32 %v11301_v1, 16  ;;  %v14158_v54 = vshrl.u32 %v11301_v1, 16 }
 0x1d9   : > { %14199 = vst [vmem:[#allocation11_spill] sm:$0xff] %v11303_v35  ;;  %3211 = vrot.lane.b32.xlu1 %v11303_v35, %s9835_s27  ;;  %v11315_v42 = vrot.slane %v11303_v35, 1  ;;  %v3615_v7 = vshll.u32 %v11303_v35, 16  ;;  %v14159_v23 = vshrl.u32 %v11303_v35, 16 }
 0x1da   : > { %v3799_v30 = vsel %vm927_vm0, %v11306_v38, %v3798_v44  ;;  %v3069_v6 = vsel %vm927_vm0, %v11306_v38, %v3068_v29  ;;  %v4416_v20 = vshrl.u32 %v11306_v38, 16  ;;  %v11333_v59 = vrot.slane %v3622_v53, 1 }
 0x1db   : > { %9392 = vrot.lane.b32.xlu0 %v9391_v15, %s9835_s27  ;;  %v3796_v47 = vsel %vm927_vm0, %v11315_v42, %v3795_v39  ;;  %v4420_v62 = vshrl.u32 %v3799_v30, 16  ;;  %v4384_v31 = vshrl.u32 %v11315_v42, 16  ;;  %v4423_v8 = vshll.u32 %v3799_v30, 16  ;;  %v11375_v53 = vpop.permute.xlu1 %3541 }
 0x1dc   : > { %v4388_v0 = vshrl.u32 %v3796_v47, 16  ;;  %v4391_v10 = vshll.u32 %v3796_v47, 16  ;;  %v3066_v52 = vsel %vm927_vm0, %v11315_v42, %v3065_v5  ;;  %v4418_v19 = vrot.slane %v4416_v20, 7  ;;  %v2781_v47 = vld [vmem:[#allocation2 + $0xa0] sm:$0x1]  ;;  %14202 = vst [vmem:[#allocation12_spill] sm:$0xff] %v11375_v53 }
 0x1dd   : > { %3123 = vrot.lane.b32.xlu1 %v3069_v6, %s9834_s26  ;;  %v4422_v51 = vrot.slane %v4420_v62, 7  ;;  %v4386_v3 = vrot.slane %v4384_v31, 7  ;;  %v3627_v63 = vor.u32 %v14158_v54, %v11333_v59  ;;  %v11356_v13 = vrot.slane %v3615_v7, 1  ;;  %v2831_v6 = vld [vmem:[#allocation2 + $0xd0] sm:$0x1]  ;;  %v11409_v7 = vpop.permute.xlu0 %3529 }
 0x1de   : > { %v4390_v55 = vrot.slane %v4388_v0, 7  ;;  %v3401_v62 = vrot.slane %v2781_v47, 1  ;;  %v2830_v5 = vld [vmem:[#allocation2 + $0xb8] sm:$0x1]  ;;  %v3804_v20 = vrot.slane %v2831_v6, 1 }
 0x1df   : > { %9397 = vrot.lane.b32.xlu0 %v9391_v15, %s9833_s25  ;;  %v4425_v45 = vor.u32 %v4423_v8, %v4422_v51  ;;  %v3620_v39 = vor.u32 %v11356_v13, %v14159_v23  ;;  %v11383_v0 = vpop.permute.xlu1 %3205  ;;  %v2780_v8 = vld [vmem:[#allocation2 + $0x88] sm:$0x1]  ;;  %v3801_v41 = vrot.slane %v2830_v5, 1 }
 0x1e0   : > { %v4393_v32 = vor.u32 %v4391_v10, %v4390_v55  ;;  %v3402_v31 = vsel %vm927_vm0, %v11306_v38, %v3401_v62  ;;  %14203 = vst [vmem:[#allocation13_spill] sm:$0xff] %v11383_v0  ;;  %v2604_v55 = vld [vmem:[#allocation2 + $0x138] sm:$0x80] }
 0x1e1   : > { %3119 = vrot.lane.b32.xlu1 %v3066_v52, %s9834_s26  ;;  %v4426_v56 = vsel %vm14201_vm7, %v4418_v19, %v4425_v45  ;;  %v2605_v24 = vsel %vm10771_vm14, 0, %v2604_v55  ;;  %vm14229_vm7 = vmmov %vm14193_vm3 }
 0x1e2   : > { %v4394_v9 = vsel %vm14200_vm6, %v4386_v3, %v4393_v32  ;;  %2606 = vst [vmem:[#allocation2 + $0x138] sm:$0x80] %v2605_v24  ;;  %vm14228_vm6 = vmmov %vm14193_vm3 }
 0x1e3   : > { %9208 = vmatmul.mubr.msk.bf16.gmra.mrb[20].mxu0 %vm2551_vm12, %v4394_v9  ;;  %3547 = vrot.lane.b32.xlu0 %v11301_v1, %s9834_s26 }
 0x1e4   : > { %9211 = vmatprep.mubr.msk.bf16.mxu0 %vm2551_vm12, %v4426_v56  ;;  %v3398_v56 = vrot.slane %v2780_v8, 1 }
 0x1e5   : > { %3723 = vrot.lane.b32.xlu1 %v3627_v63, %s9835_s27 }
 0x1e7   : > { %v9181_v4 = vpop.f32.mrb[12].mxu0  ;;  %3215 = vrot.lane.b32.xlu0 %v11301_v1, %s9835_s27 }
 0x1e8   : > { %v2443_v2 = vadd.f32 %v9181_v4, %v11094_v25  ;;  %v2434_v22 = vpop.f32.mrb[13].mxu0 }
 0x1e9   : > { %v2435_v26 = vadd.f32 %v11094_v25, %v2434_v22  ;;  %2979 = vrot.lane.b32.xlu1 %v3627_v63, %s9833_s25  ;;  %v9182_v12 = vpop.f32.mrb[14].mxu0 }
 0x1ea   : > { %v2446_v16 = vadd.f32 %v9182_v12, %v11094_v25  ;;  %v2437_v57 = vpop.f32.mrb[15].mxu0  ;;  %v2527_v21 = vmax.f32 %v2443_v2, 0.0 }
 0x1eb   : > { %v2438_v44 = vadd.f32 %v11094_v25, %v2437_v57  ;;  %3543 = vrot.lane.b32.xlu0 %v11303_v35, %s9834_s26  ;;  %v2525_v15 = vmax.f32 %v2435_v26, 0.0  ;;  %v11416_v26 = vpop.permute.xlu1 %3209 }
 0x1ec   : > { %v2528_v29 = vmax.f32 %v2446_v16, 0.0  ;;  %14205 = vst [vmem:[#allocation15_spill] sm:$0xff] %v11416_v26 }
 0x1ed   : > { %v2526_v40 = vmax.f32 %v2438_v44, 0.0  ;;  %3719 = vrot.lane.b32.xlu1 %v3620_v39, %s9835_s27  ;;  %v2601_v44 = vld [vmem:[#allocation2 + $0x120] sm:$0x80] }
 0x1ee   : > { %v2671_v49 = vpack.c.bf16 %v2528_v29, %v2527_v21  ;;  %v2602_v62 = vsel %vm10771_vm14, 0, %v2601_v44 }
 0x1ef   : > { %v2670_v30 = vpack.c.bf16 %v2526_v40, %v2525_v15  ;;  %3453 = vrot.lane.b32.xlu0 %v11306_v38, %s9833_s25  ;;  %v3399_v40 = vsel %vm927_vm0, %v11315_v42, %v3398_v56  ;;  %2603 = vst [vmem:[#allocation2 + $0x120] sm:$0x80] %v2602_v62  ;;  %v11439_v55 = vpop.permute.xlu1 %3549  ;;  %v2756_v56 = vld [vmem:[#allocation2 + $0xa8] sm:$0x80] }
 0x1f0   : > { %2687 = vst.msk [vmem:[#allocation2 + $0xc8] sm:$0xff] %vm2551_vm12, %v2671_v49  ;;  %14208 = vst [vmem:[#allocation17_spill] sm:$0xff] %v11439_v55 }
 0x1f1   : > { %2686 = vst.msk [vmem:[#allocation2 + $0xb0] sm:$0xff] %vm2551_vm12, %v2670_v30  ;;  %2975 = vrot.lane.b32.xlu1 %v3620_v39, %s9833_s25 }
 0x1f3   : > { %3449 = vrot.lane.b32.xlu0 %v11315_v42, %s9833_s25 }
 0x1f7   : > { %3455 = vrot.lane.b32.xlu0 %v3402_v31, %s9833_s25  ;;  %v11386_v51 = vld [vmem:[#allocation2 + $0xc8] sm:$0xff] }
 0x1f8   : > { %v11388_v10 = vld [vmem:[#allocation2 + $0xb0] sm:$0xff]  ;;  %v3636_v45 = vshll.u32 %v11386_v51, 16  ;;  %v11392_v52 = vrot.slane %v11386_v51, 1  ;;  %v3639_v9 = vshrl.u32 %v11386_v51, 16 }
 0x1f9   : > { %14204 = vst [vmem:[#allocation14_spill] sm:$0xff] %v11388_v10  ;;  %3219 = vrot.lane.b32.xlu1 %v11388_v10, %s9835_s27  ;;  %v3629_v3 = vshll.u32 %v11388_v10, 16  ;;  %v11398_v32 = vrot.slane %v11388_v10, 1  ;;  %v14157_v15 = vshrl.u32 %v11388_v10, 16 }
 0x1fa   : > { %v11402_v19 = vrot.slane %v3636_v45, 1  ;;  %v3805_v63 = vsel %vm927_vm0, %v11392_v52, %v3804_v20  ;;  %v4480_v39 = vshrl.u32 %v11392_v52, 16  ;;  %v9401_v20 = vpack.i.bf16 %v11356_v13, %v11215_v28 }
 0x1fb   : > { %3117 = vrot.lane.b32.xlu0 %v11315_v42, %s9834_s26  ;;  %v3802_v4 = vsel %vm927_vm0, %v11398_v32, %v3801_v41  ;;  %v4484_v2 = vshrl.u32 %v3805_v63, 16  ;;  %v11418_v12 = vrot.slane %v3629_v3, 1  ;;  %v4448_v16 = vshrl.u32 %v11398_v32, 16  ;;  %v11435_v42 = vpop.permute.xlu0 %3537  ;;  %v2658_v3 = vld [vmem:[#allocation2 + $0x178] sm:$0x1] }
 0x1fc   : > { %v11414_v22 = vor.u32 %v3639_v9, %v11402_v19  ;;  %v4452_v57 = vshrl.u32 %v3802_v4, 16  ;;  %v4487_v29 = vshll.u32 %v3805_v63, 16  ;;  %v4455_v30 = vshll.u32 %v3802_v4, 16  ;;  %14206 = vst [vmem:[#allocation16_spill] sm:$0xff] %v11435_v42 }
 0x1fd   : > { %v4486_v21 = vrot.slane %v4484_v2, 7  ;;  %v3634_v6 = vor.u32 %v11418_v12, %v14157_v15  ;;  %v4450_v5 = vrot.slane %v4448_v16, 7  ;;  %v4482_v8 = vrot.slane %v4480_v39, 7  ;;  %v11453_v2 = vpop.permute.xlu1 %3213  ;;  %v2661_v16 = vld [vmem:[#allocation2 + $0x190] sm:$0x1] }
 0x1fe   : > { %3731 = vrot.lane.b32.xlu1 %v11414_v22, %s9835_s27  ;;  %v4454_v49 = vrot.slane %v4452_v57, 7  ;;  %v2659_v13 = vsel %vm10692_vm15, 0, %v2658_v3  ;;  %14211 = vst [vmem:[#allocation19_spill] sm:$0xff] %v11453_v2  ;;  %v3077_v28 = vrot.slane %v2737_v17, 1 }
 0x1ff   : > { %3451 = vrot.lane.b32.xlu0 %v3399_v40, %s9833_s25  ;;  %v4489_v47 = vor.u32 %v4487_v29, %v4486_v21  ;;  %v11450_v9 = vpop.permute.xlu0 %3545  ;;  %2660 = vst [vmem:[#allocation2 + $0x178] sm:$0x1] %v2659_v13  ;;  %v2735_v29 = vld [vmem:[#allocation2 + $0xb8] sm:$0x1] }
 0x200   : > { %v4457_v31 = vor.u32 %v4455_v30, %v4454_v49  ;;  %14210 = vst [vmem:[#allocation18_spill] sm:$0xff] %v11450_v9 }
 0x201   : > { %v4490_v45 = vsel %vm14209_vm9, %v4482_v8, %v4489_v47  ;;  %vm14231_vm9 = vmmov %vm14193_vm3 }
 0x202   : > { %3727 = vrot.lane.b32.xlu1 %v3634_v6, %s9835_s27  ;;  %v4458_v41 = vsel %vm14207_vm8, %v4450_v5, %v4457_v31  ;;  %v3071_v31 = vrot.slane %v2735_v29, 1  ;;  %vm14230_vm8 = vmmov %vm14193_vm3 }
 0x203   : > { %9212 = vmatmul.mubr.msk.bf16.gmra.mrb[24].mxu0 %vm2551_vm12, %v4458_v41  ;;  %9402 = vrot.lane.b32.xlu0 %v9401_v20, %s9835_s27 }
 0x204   : > { %9215 = vmatprep.mubr.msk.bf16.mxu0 %vm2551_vm12, %v4490_v45  ;;  %v2782_v45 = vld [vmem:[#allocation2 + $0xb8] sm:$0x1]  ;;  %v3072_v13 = vsel %vm927_vm0, %v11398_v32, %v3071_v31 }
 0x206   : > { %3121 = vrot.lane.b32.xlu1 %v11306_v38, %s9834_s26  ;;  %v2662_v38 = vsel %vm10692_vm15, 0, %v2661_v16 }
 0x207   : > { %v9185_v24 = vpop.f32.mrb[0].mxu1  ;;  %9407 = vrot.lane.b32.xlu0 %v9401_v20, %s9833_s25  ;;  %2663 = vst [vmem:[#allocation2 + $0x190] sm:$0x1] %v2662_v38 }
 0x208   : > { %v2459_v63 = vadd.f32 %v9185_v24, %v11094_v25  ;;  %v2450_v4 = vpop.f32.mrb[1].mxu1 }
 0x209   : > { %v2451_v57 = vadd.f32 %v11094_v25, %v2450_v4  ;;  %v9186_v44 = vpop.f32.mrb[2].mxu1 }
 0x20a   : > { %v2462_v39 = vadd.f32 %v9186_v44, %v11094_v25  ;;  %3217 = vrot.lane.b32.xlu1 %v2756_v56, %s9835_s27  ;;  %v2453_v21 = vpop.f32.mrb[3].mxu1  ;;  %v2531_v49 = vmax.f32 %v2459_v63, 0.0  ;;  %v3404_v56 = vrot.slane %v2782_v45, 1  ;;  %v2832_v63 = vld [vmem:[#allocation2 + $0xe8] sm:$0x1] }
 0x20b   : > { %v2454_v40 = vadd.f32 %v11094_v25, %v2453_v21  ;;  %3555 = vrot.lane.b32.xlu0 %v11386_v51, %s9834_s26  ;;  %v2529_v47 = vmax.f32 %v2451_v57, 0.0  ;;  %v3807_v38 = vrot.slane %v2832_v63, 1 }
 0x20c   : > { %v2532_v30 = vmax.f32 %v2462_v39, 0.0  ;;  %v3405_v57 = vsel %vm927_vm0, %v11398_v32, %v3404_v56 }
 0x20d   : > { %v2530_v62 = vmax.f32 %v2454_v40, 0.0  ;;  %v11463_v5 = vpop.permute.xlu0 %3531 }
 0x20e   : > { %v2673_v20 = vpack.c.bf16 %v2532_v30, %v2531_v49  ;;  %v11465_v8 = vpop.permute.xlu1 %3195  ;;  %2983 = vrot.lane.b32.xlu1 %v3634_v6, %s9833_s25  ;;  %v2833_v6 = vld [vmem:[#allocation2 + $0x100] sm:$0x1]  ;;  %v9411_v49 = vpack.i.bf16 %v11418_v12, %v11333_v59 }
 0x20f   : > { %v2672_v41 = vpack.c.bf16 %v2530_v62, %v2529_v47  ;;  %3551 = vrot.lane.b32.xlu0 %v11388_v10, %s9834_s26  ;;  %v3810_v44 = vrot.slane %v2833_v6, 1 }
 0x210   : > { %2689 = vst.msk [vmem:[#allocation2 + $0xf8] sm:$0xff] %vm2551_vm12, %v2673_v20 }
 0x211   : > { %2688 = vst.msk [vmem:[#allocation2 + $0xe0] sm:$0xff] %vm2551_vm12, %v2672_v41  ;;  %v11472_v3 = vpop.permute.xlu0 %3199 }
 0x212   : > { %v11476_v24 = vpop.permute.xlu1 %3105  ;;  %3127 = vrot.lane.b32.xlu1 %v3072_v13, %s9834_s26 }
 0x213   : > { %3457 = vrot.lane.b32.xlu0 %v11398_v32, %s9833_s25 }
 0x215   : > { %v11481_v4 = vpop.permute.xlu0 %3437 }
 0x216   : > { %v11483_v16 = vpop.permute.xlu1 %3107 }
 0x217   : > { %3459 = vrot.lane.b32.xlu0 %v3405_v57, %s9833_s25  ;;  %v11488_v39 = vld [vmem:[#allocation2 + $0xf8] sm:$0xff] }
 0x218   : > { %v11490_v21 = vld [vmem:[#allocation2 + $0xe0] sm:$0xff]  ;;  %v11493_v29 = vrot.slane %v11488_v39, 1 }
 0x219   : > { %v11495_v40 = vpop.permute.xlu0 %3433  ;;  %v3643_v30 = vshll.u32 %v11490_v21, 16  ;;  %v11501_v47 = vrot.slane %v11490_v21, 1  ;;  %v3646_v41 = vshrl.u32 %v11490_v21, 16 }
 0x21a   : > { %v11503_v62 = vpop.permute.xlu1 %3103  ;;  %v3811_v31 = vsel %vm927_vm0, %v11493_v29, %v3810_v44  ;;  %v4544_v63 = vshrl.u32 %v11493_v29, 16 }
 0x21b   : > { %9412 = vrot.lane.b32.xlu0 %v9411_v49, %s9835_s27  ;;  %v11508_v20 = vrot.slane %v3643_v30, 1  ;;  %v3808_v45 = vsel %vm927_vm0, %v11501_v47, %v3807_v38  ;;  %v4512_v59 = vshrl.u32 %v11501_v47, 16  ;;  %v4548_v13 = vshrl.u32 %v3811_v31, 16 }
 0x21c   : > { %v4516_v12 = vshrl.u32 %v3808_v45, 16  ;;  %v4519_v30 = vshll.u32 %v3808_v45, 16  ;;  %v4551_v54 = vshll.u32 %v3811_v31, 16  ;;  %v4546_v55 = vrot.slane %v4544_v63, 7  ;;  %v2610_v45 = vld [vmem:[#allocation2 + $0x168] sm:$0x80] }
 0x21d   : > { %14212 = vst [vmem:[#allocation20_spill] sm:$0xff] %v11508_v20  ;;  %v11514_v56 = vpop.permute.xlu0 %3439  ;;  %v11517_v6 = vor.u32 %v3646_v41, %v11508_v20  ;;  %v4550_v15 = vrot.slane %v4548_v13, 7  ;;  %v4514_v38 = vrot.slane %v4512_v59, 7  ;;  %v2805_v41 = vld [vmem:[#allocation2 + $0xc0] sm:$0x80] }
 0x21e   : > { %v11520_v57 = vpop.permute.xlu1 %3707  ;;  %v4518_v44 = vrot.slane %v4516_v12, 7  ;;  %v2607_v59 = vld [vmem:[#allocation2 + $0x150] sm:$0x80] }
 0x21f   : > { %14213 = vst [vmem:[#allocation21_spill] sm:$0xff] %v11517_v6  ;;  %3735 = vrot.lane.b32.xlu1 %v11517_v6, %s9835_s27  ;;  %9417 = vrot.lane.b32.xlu0 %v9411_v49, %s9833_s25  ;;  %v4553_v2 = vor.u32 %v4551_v54, %v4550_v15  ;;  %v2758_v49 = vld [vmem:[#allocation2 + $0xc0] sm:$0x80]  ;;  %v2783_v54 = vld [vmem:[#allocation2 + $0xd0] sm:$0x1] }
 0x220   : > { %v4521_v23 = vor.u32 %v4519_v30, %v4518_v44  ;;  %v3407_v63 = vrot.slane %v2783_v54, 1  ;;  %v2736_v44 = vld [vmem:[#allocation2 + $0xd0] sm:$0x1] }
 0x221   : > { %v11525_v9 = vpop.permute.xlu0 %3101  ;;  %v4554_v31 = vsel %vm14215_vm11, %v4546_v55, %v4553_v2  ;;  %v2608_v55 = vsel %vm10771_vm14, 0, %v2607_v59  ;;  %v3074_v54 = vrot.slane %v2736_v44, 1  ;;  %vm14242_vm11 = vmmov %vm14193_vm3 }
 0x222   : > { %v11527_v10 = vpop.permute.xlu1 %2963  ;;  %v4522_v12 = vsel %vm14214_vm10, %v4514_v38, %v4521_v23  ;;  %v11541_v23 = vpack.i.bf16 %v11508_v20, %v11402_v19  ;;  %2609 = vst [vmem:[#allocation2 + $0x150] sm:$0x80] %v2608_v55  ;;  %vm14232_vm10 = vmmov %vm14193_vm3 }
 0x223   : > { %9216 = vmatmul.mubr.msk.bf16.gmra.mrb[28].mxu0 %vm2551_vm12, %v4522_v12  ;;  %3557 = vrot.lane.b32.xlu1 %v2807_v14, %s9834_s26  ;;  %v2611_v14 = vsel %vm10771_vm14, 0, %v2610_v45  ;;  %v3650_v12 = vshll.u32 %v11488_v39, 16  ;;  %v3075_v35 = vsel %vm927_vm0, %v11392_v52, %v3074_v54 }
 0x224   : > { %3553 = vrot.lane.b32.xlu0 %v2805_v41, %s9834_s26  ;;  %9219 = vmatprep.mubr.msk.bf16.mxu0 %vm2551_vm12, %v4554_v31  ;;  %2612 = vst [vmem:[#allocation2 + $0x168] sm:$0x80] %v2611_v14  ;;  %v3408_v14 = vsel %vm927_vm0, %v11392_v52, %v3407_v63  ;;  %v3653_v63 = vshrl.u32 %v11488_v39, 16 }
 0x225   : > { %v11535_v15 = vpop.permute.xlu0 %3435 }
 0x226   : > { %v11537_v13 = vpop.permute.xlu1 %2959 }
 0x227   : > { %3221 = vrot.lane.b32.xlu1 %v2758_v49, %s9835_s27  ;;  %v9189_v2 = vpop.f32.mrb[4].mxu1 }
 0x228   : > { %v2475_v30 = vadd.f32 %v9189_v2, %v11094_v25  ;;  %9422 = vrot.lane.b32.xlu0 %v11541_v23, %s9835_s27  ;;  %v2466_v19 = vpop.f32.mrb[5].mxu1 }
 0x229   : > { %v9190_v38 = vpop.f32.mrb[6].mxu1  ;;  %v11551_v41 = vpop.permute.xlu0 %9387  ;;  %v2467_v31 = vadd.f32 %v11094_v25, %v2466_v19  ;;  %v11566_v19 = vrot.slane %v3650_v12, 1 }
 0x22a   : > { %v2478_v49 = vadd.f32 %v9190_v38, %v11094_v25  ;;  %v2469_v45 = vpop.f32.mrb[7].mxu1  ;;  %v2535_v55 = vmax.f32 %v2475_v30, 0.0 }
 0x22b   : > { %v11556_v59 = vpop.permute.xlu1 %3203  ;;  %2987 = vrot.lane.b32.xlu1 %v11414_v22, %s9833_s25  ;;  %v2470_v20 = vadd.f32 %v11094_v25, %v2469_v45  ;;  %v2533_v38 = vmax.f32 %v2467_v31, 0.0  ;;  %v11580_v12 = vor.u32 %v3653_v63, %v11566_v19  ;;  %v2834_v31 = vld [vmem:[#allocation2 + $0x118] sm:$0x1] }
 0x22c   : > { %v2536_v2 = vmax.f32 %v2478_v49, 0.0  ;;  %3463 = vrot.lane.b32.xlu0 %v3408_v14, %s9833_s25  ;;  %v2784_v14 = vld [vmem:[#allocation2 + $0xe8] sm:$0x1] }
 0x22d   : > { %v11564_v26 = vpop.permute.xlu0 %3539  ;;  %v2534_v1 = vmax.f32 %v2470_v20, 0.0 }
 0x22e   : > { %v2675_v44 = vpack.c.bf16 %v2536_v2, %v2535_v55  ;;  %v3813_v55 = vrot.slane %v2834_v31, 1  ;;  %v2760_v31 = vld [vmem:[#allocation2 + $0xd8] sm:$0x80] }
 0x22f   : > { %v11570_v22 = vpop.permute.xlu1 %3113  ;;  %3131 = vrot.lane.b32.xlu1 %v3075_v35, %s9834_s26  ;;  %v2674_v25 = vpack.c.bf16 %v2534_v1, %v2533_v38  ;;  %v2835_v35 = vld [vmem:[#allocation2 + $0x130] sm:$0x1] }
 0x230   : > { %14216 = vst [vmem:[#allocation22_spill] sm:$0xff] %v11570_v22  ;;  %2691 = vst.msk [vmem:[#allocation2 + $0x128] sm:$0xff] %vm2551_vm12, %v2675_v44  ;;  %3559 = vrot.lane.b32.xlu0 %v11490_v21, %s9834_s26  ;;  %v3816_v49 = vrot.slane %v2835_v35, 1 }
 0x231   : > { %v11577_v30 = vpop.permute.xlu0 %3207  ;;  %2690 = vst.msk [vmem:[#allocation2 + $0x110] sm:$0xff] %vm2551_vm12, %v2674_v25 }
 0x232   : > { %14217 = vst [vmem:[#allocation23_spill] sm:$0xff] %v11577_v30 }
 0x233   : > { %v11583_v20 = vpop.permute.xlu1 %3115  ;;  %3739 = vrot.lane.b32.xlu1 %v11580_v12, %s9835_s27 }
 0x234   : > { %14218 = vst [vmem:[#allocation24_spill] sm:$0xff] %v11583_v20  ;;  %3461 = vrot.lane.b32.xlu0 %v11392_v52, %s9833_s25 }
 0x235   : > { %v11589_v1 = vpop.permute.xlu0 %3535 }
 0x237   : > { %v11591_v45 = vpop.permute.xlu1 %3111  ;;  %3227 = vrot.lane.b32.xlu1 %v11490_v21, %s9835_s27  ;;  %v11595_v54 = vld [vmem:[#allocation2 + $0x128] sm:$0xff] }
 0x238   : > { %14219 = vst [vmem:[#allocation25_spill] sm:$0xff] %v11591_v45  ;;  %3223 = vrot.lane.b32.xlu0 %v11386_v51, %s9835_s27  ;;  %v11600_v2 = vrot.slane %v11595_v54, 1  ;;  %v11604_v44 = vld [vmem:[#allocation2 + $0x110] sm:$0xff]  ;;  %v3410_v51 = vrot.slane %v2784_v14, 1 }
 0x239   : > { %v11602_v38 = vpop.permute.xlu0 %3445  ;;  %v11607_v63 = vrot.slane %v11604_v44, 1 }
 0x23a   : > { %14220 = vst [vmem:[#allocation26_spill] sm:$0xff] %v11600_v2  ;;  %v3817_v21 = vsel %vm927_vm0, %v11600_v2, %v3816_v49  ;;  %v4608_v42 = vshrl.u32 %v11600_v2, 16 }
 0x23b   : > { %v11611_v25 = vpop.permute.xlu1 %3715  ;;  %3129 = vrot.lane.b32.xlu1 %v11392_v52, %s9834_s26  ;;  %v4612_v35 = vshrl.u32 %v3817_v21, 16  ;;  %v3814_v22 = vsel %vm927_vm0, %v11607_v63, %v3813_v55  ;;  %v4576_v0 = vshrl.u32 %v11607_v63, 16  ;;  %v4615_v53 = vshll.u32 %v3817_v21, 16 }
 0x23c   : > { %3125 = vrot.lane.b32.xlu0 %v11398_v32, %s9834_s26  ;;  %v4580_v30 = vshrl.u32 %v3814_v22, 16  ;;  %v3411_v52 = vsel %vm927_vm0, %v11501_v47, %v3410_v51  ;;  %v4583_v14 = vshll.u32 %v3814_v22, 16  ;;  %v9389_v22 = vunpack.i.l.bf16 %v11551_v41 }
 0x23d   : > { %v11619_v20 = vpop.permute.xlu0 %3441  ;;  %v4614_v49 = vrot.slane %v4612_v35, 7  ;;  %v4578_v21 = vrot.slane %v4576_v0, 7  ;;  %v4610_v51 = vrot.slane %v4608_v42, 7 }
 0x23e   : > { %14221 = vst [vmem:[#allocation27_spill] sm:$0xff] %v11619_v20  ;;  %v4582_v32 = vrot.slane %v4580_v30, 7  ;;  %v9717_v20 = vld [vmem:[#allocation2 + $0x8] sm:$0xff]  ;;  %v4048_v30 = vsel %vm2551_vm12, %v11162_v48, %v11535_v15 }
 0x23f   : > { %v11623_v45 = vpop.permute.xlu1 %2971  ;;  %3225 = vrot.lane.b32.xlu1 %v2760_v31, %s9835_s27  ;;  %v4617_v55 = vor.u32 %v4615_v53, %v4614_v49  ;;  %v3837_v35 = vsel %vm2551_vm12, %v9717_v20, %v11225_v33  ;;  %v3657_v31 = vshll.u32 %v11604_v44, 16  ;;  %v4142_v42 = vsel %vm3913_vm1, %v4048_v30, %v11463_v5 }
 0x240   : > { %14222 = vst [vmem:[#allocation28_spill] sm:$0xff] %v11623_v45  ;;  %3467 = vrot.lane.b32.xlu0 %v3411_v52, %s9833_s25  ;;  %v4585_v45 = vor.u32 %v4583_v14, %v4582_v32  ;;  %v2696_v52 = vld [vmem:[#allocation2] sm:$0x80]  ;;  %v3917_v0 = vsel %vm3913_vm1, %v3837_v35, %v11257_v43  ;;  %v3660_v32 = vshrl.u32 %v11604_v44, 16  ;;  %v4054_v14 = vsel %vm2551_vm12, %v11145_v58, %v11514_v56 }
 0x241   : > { %v11631_v2 = vpop.permute.xlu0 %3447  ;;  %v4618_v48 = vsel %vm14223_vm4, %v4610_v51, %v4617_v55  ;;  %v11649_v17 = vsel %vm3978_vm2, %v3917_v0, %v11465_v8  ;;  %v11656_v20 = vrot.slane %v3657_v31, 1  ;;  %v3835_v43 = vsel %vm2551_vm12, %v2696_v52, %v9389_v22  ;;  %v11681_v31 = vld [vmem:[#allocation2 + $0x100] sm:$0x1]  ;;  %v2698_v0 = vld [vmem:[#allocation2 + $0x18] sm:$0x80]  ;;  %vm14246_vm4 = vmmov %vm14193_vm3 }
 0x242   : > { %v4586_v33 = vsel %vm14193_vm3, %v4578_v21, %v4585_v45  ;;  %v3078_v45 = vsel %vm927_vm0, %v11501_v47, %v3077_v28  ;;  %v4270_v5 = vshrl.u32 %v11649_v17, 16  ;;  %v11671_v55 = vsel %vm3978_vm2, %v4142_v42, %v11520_v57  ;;  %v11676_v28 = vld [vmem:[%s14148_s2] ss:$0 sm:$0xff] }
 0x243   : > { %v3712_v53 = vpop.permute.xlu1 %3711  ;;  %2991 = vrot.lane.b32.xlu1 %v11517_v6, %s9833_s25  ;;  %9220 = vmatmul.mubr.msk.bf16.gmra.mrb[32].mxu0 %vm2551_vm12, %v4586_v33  ;;  %14224 = vst [vmem:[#allocation29_spill] sm:$0xff] %v11656_v20  ;;  %v9390_v30 = vunpack.i.h.bf16 %v11551_v41  ;;  %v3915_v58 = vsel %vm3913_vm1, %v3835_v43, %v11280_v60  ;;  %v11690_v51 = vor.u32 %v3660_v32, %v11656_v20  ;;  %v9719_v52 = vld [vmem:[#allocation2 + $0x20] sm:$0xff] }
 0x244   : > { %3563 = vrot.lane.b32.xlu0 %v11488_v39, %s9834_s26  ;;  %9223 = vmatprep.mubr.msk.bf16.mxu0 %vm2551_vm12, %v4618_v48  ;;  %v3842_v33 = vsel %vm2551_vm12, %v9719_v52, %v11537_v13  ;;  %v4146_v48 = vsel %vm3913_vm1, %v4054_v14, %v11589_v1  ;;  %v4051_v43 = vsel %vm2551_vm12, %v11133_v18, %v11481_v4  ;;  %v2811_v18 = vld [vmem:[#allocation2 + $0x108] sm:$0x80] }
 0x245   : > { %v11654_v15 = vpop.permute.xlu0 %3109  ;;  %14225 = vst [vmem:[#allocation30_spill] sm:$0xff] %v11690_v51  ;;  %v3980_v4 = vsel %vm3978_vm2, %v3915_v58, %v11308_v37  ;;  %v4144_v37 = vsel %vm3913_vm1, %v4051_v43, %v11330_v46  ;;  %v2762_v46 = vld [vmem:[#allocation2 + $0xf0] sm:$0x80] }
 0x247   : > { %v11661_v49 = vpop.permute.xlu1 %2967  ;;  %3135 = vrot.lane.b32.xlu1 %v3078_v45, %s9834_s26  ;;  %v9193_v8 = vpop.f32.mrb[8].mxu1  ;;  %v4280_v45 = vshrl.u32 %v11671_v55, 16 }
 0x248   : > { %v2491_v35 = vadd.f32 %v11676_v28, %v9193_v8  ;;  %3465 = vrot.lane.b32.xlu0 %v11501_v47, %s9833_s25  ;;  %v2482_v21 = vpop.f32.mrb[9].mxu1  ;;  %v11702_v8 = vsel %vm3978_vm2, %v4146_v48, %v3712_v53  ;;  %v4272_v53 = vrot.slane %v4270_v5, 7  ;;  %v2809_v48 = vld [vmem:[#allocation2 + $0xf0] sm:$0x80] }
 0x249   : > { %v2483_v56 = vadd.f32 %v11676_v28, %v2482_v21  ;;  %v9194_v57 = vpop.f32.mrb[10].mxu1  ;;  %v11687_v22 = vpop.permute.xlu0 %3443  ;;  %v4045_v21 = vsel %vm2551_vm12, %v11152_v34, %v11495_v40  ;;  %v4282_v5 = vrot.slane %v4280_v45, 7  ;;  %v4267_v34 = vshrl.u32 %v3980_v4, 16 }
 0x24a   : > { %v2539_v41 = vmax.f32 %v2491_v35, 0.0  ;;  %v2494_v42 = vadd.f32 %v11676_v28, %v9194_v57  ;;  %v2485_v60 = vpop.f32.mrb[11].mxu1  ;;  %v3921_v57 = vsel %vm3913_vm1, %v3842_v33, %v11503_v62  ;;  %v4140_v40 = vsel %vm3913_vm1, %v4045_v21, %v11409_v7 }
 0x24b   : > { %v11704_v32 = vpop.permute.xlu1 %3211  ;;  %3743 = vrot.lane.b32.xlu1 %v11690_v51, %s9835_s27  ;;  %v2537_v1 = vmax.f32 %v2483_v56, 0.0  ;;  %v2486_v35 = vadd.f32 %v11676_v28, %v2485_v60  ;;  %v3840_v56 = vsel %vm2551_vm12, %v2698_v0, %v9390_v30  ;;  %v11730_v62 = vsel %vm3978_vm2, %v3921_v57, %v11472_v3  ;;  %v2613_v3 = vld [vmem:[#allocation2 + $0x180] sm:$0x80] }
 0x24c   : > { %v2540_v14 = vmax.f32 %v2494_v42, 0.0  ;;  %9427 = vrot.lane.b32.xlu0 %v11541_v23, %s9833_s25  ;;  %v4312_v42 = vshrl.u32 %v11702_v8, 16  ;;  %v4283_v0 = vshll.u32 %v11671_v55, 16  ;;  %v3919_v7 = vsel %vm3913_vm1, %v3840_v56, %v11525_v9  ;;  %v2837_v56 = vld [vmem:[#allocation2 + $0x160] sm:$0x1] }
 0x24d   : > { %v9393_v52 = vpop.permute.xlu0 %9392  ;;  %v2538_v23 = vmax.f32 %v2486_v35, 0.0  ;;  %v2614_v55 = vsel %vm10771_vm14, 0, %v2613_v3  ;;  %v4302_v4 = vshrl.u32 %v11730_v62, 16  ;;  %v4269_v57 = vrot.slane %v4267_v34, 7 }
 0x24e   : > { %v2677_v60 = vpack.c.bf16 %v2540_v14, %v2539_v41  ;;  %v9395_v13 = vunpack.i.h.bf16 %v9393_v52  ;;  %v9394_v58 = vunpack.i.l.bf16 %v9393_v52  ;;  %v4314_v14 = vrot.slane %v4312_v42, 7  ;;  %2615 = vst [vmem:[#allocation2 + $0x180] sm:$0x80] %v2614_v55 }
 0x24f   : > { %v11723_v6 = vpop.permute.xlu1 %3123  ;;  %3565 = vrot.lane.b32.xlu1 %v2811_v18, %s9834_s26  ;;  %v2676_v30 = vpack.c.bf16 %v2538_v23, %v2537_v1  ;;  %v11744_v1 = vpack.i.bf16 %v11656_v20, %v11566_v19  ;;  %v4273_v18 = vshll.u32 %v11649_v17, 16  ;;  %v4285_v9 = vor.u32 %v4283_v0, %v4282_v5  ;;  %v2836_v5 = vld [vmem:[#allocation2 + $0x148] sm:$0x1] }
 0x250   : > { %2693 = vst.msk [vmem:[#allocation2 + $0x158] sm:$0xff] %vm2551_vm12, %v2677_v60  ;;  %3561 = vrot.lane.b32.xlu0 %v2809_v48, %s9834_s26  ;;  %v4208_v33 = vsel %vm3978_vm2, %v4144_v37, %v9395_v13  ;;  %v4204_v43 = vsel %vm3978_vm2, %v4140_v40, %v9394_v58  ;;  %v2738_v13 = vld [vmem:[#allocation2 + $0x100] sm:$0x1]  ;;  %v4315_v19 = vshll.u32 %v11702_v8, 16  ;;  %v3984_v17 = vsel %vm3978_vm2, %v3919_v7, %v11351_v11 }
 0x251   : > { %v11736_v41 = vpop.permute.xlu0 %9397  ;;  %v4309_v45 = vshrl.u32 %v4208_v33, 16  ;;  %2692 = vst.msk [vmem:[#allocation2 + $0x140] sm:$0xff] %vm2551_vm12, %v2676_v30  ;;  %v4277_v35 = vshrl.u32 %v4204_v43, 16  ;;  %v4275_v42 = vor.u32 %v4273_v18, %v4272_v53  ;;  %v3080_v23 = vrot.slane %v2738_v13, 1 }
 0x252   : > { %v3664_v37 = vshll.u32 %v11595_v54, 16  ;;  %v4317_v58 = vor.u32 %v4315_v19, %v4314_v14  ;;  %v3822_v40 = vrot.slane %v2837_v56, 1  ;;  %v14227_v30 = vrot.slane %v11681_v31, 1 }
 0x253   : > { %v11750_v21 = vpop.permute.xlu1 %3119  ;;  %3229 = vrot.lane.b32.xlu1 %v2762_v46, %s9835_s27  ;;  %v4279_v52 = vrot.slane %v4277_v35, 7  ;;  %v4311_v48 = vrot.slane %v4309_v45, 7  ;;  %v4276_v53 = vsel %vm14228_vm6, %v4269_v57, %v4275_v42  ;;  %v4299_v46 = vshrl.u32 %v3984_v17, 16  ;;  %vm14252_vm6 = vmmov %vm14193_vm3 }
 0x254   : > { %9432 = vrot.lane.b32.xlu0 %v11744_v1, %s9835_s27  ;;  %v3414_v11 = vsel %vm927_vm0, %v11493_v29, %v14227_v30  ;;  %v4304_v0 = vrot.slane %v4302_v4, 7  ;;  %v3819_v45 = vrot.slane %v2836_v5, 1  ;;  %v3081_v31 = vsel %vm927_vm0, %v11493_v29, %v3080_v23 }
 0x255   : > { %v11758_v60 = vpop.permute.xlu0 %3547  ;;  %v4286_v34 = vsel %vm14226_vm5, %v4279_v52, %v4285_v9  ;;  %v4318_v43 = vsel %vm14229_vm7, %v4311_v48, %v4317_v58  ;;  %v11782_v3 = vrot.slane %v3664_v37, 1  ;;  %v4305_v35 = vshll.u32 %v11730_v62, 16  ;;  %vm14251_vm5 = vmmov %vm14193_vm3 }
 0x256   : > { %5042 = vmatprep.mubr.bf16.mxu1 %v4286_v34  ;;  %v3667_v9 = vshrl.u32 %v11595_v54, 16  ;;  %v4301_v57 = vrot.slane %v4299_v46, 7  ;;  %vm14261_vm7 = vmmov %vm14193_vm3 }
 0x257   : > { %v11762_v8 = vpop.permute.xlu1 %3723  ;;  %2995 = vrot.lane.b32.xlu1 %v11580_v12, %s9833_s25  ;;  %v11771_v33 = vld [vmem:[#allocation2 + $0x158] sm:$0xff]  ;;  %5043 = vmatmul.mubr.bf16.vlgmr.msra.gmra.mrb[16].mxu1 %v4276_v53  ;;  %v4307_v62 = vor.u32 %v4305_v35, %v4304_v0 }
 0x258   : > { %3471 = vrot.lane.b32.xlu0 %v3414_v11, %s9833_s25  ;;  %v11776_v7 = vrot.slane %v11771_v33, 1  ;;  %5050 = vmatprep.mubr.bf16.mxu1 %v4318_v43  ;;  %v11784_v14 = vld [vmem:[#allocation2 + $0x140] sm:$0xff]  ;;  %v11805_v42 = vor.u32 %v3667_v9, %v11782_v3  ;;  %v2560_v43 = vld [vmem:[#allocation2 + $0x198] sm:$0x80]  ;;  %v2786_v35 = vld [vmem:[#allocation2 + $0x118] sm:$0x1] }
 0x259   : > { %v11778_v12 = vpop.permute.xlu0 %3215  ;;  %v11788_v13 = vrot.slane %v11784_v14, 1  ;;  %v4308_v34 = vsel %vm14230_vm8, %v4301_v57, %v4307_v62  ;;  %v2700_v62 = vld [vmem:[#allocation2 + $0x30] sm:$0x80]  ;;  %vm14262_vm8 = vmmov %vm14193_vm3 }
 0x25a   : > { %v3823_v55 = vsel %vm927_vm0, %v11776_v7, %v3822_v40  ;;  %v4672_v18 = vshrl.u32 %v11776_v7, 16 }
 0x25b   : > { %v11793_v4 = vpop.permute.xlu1 %2979  ;;  %3139 = vrot.lane.b32.xlu1 %v3081_v31, %s9834_s26  ;;  %v4676_v56 = vshrl.u32 %v3823_v55, 16  ;;  %v4679_v19 = vshll.u32 %v3823_v55, 16  ;;  %v3820_v52 = vsel %vm927_vm0, %v11788_v13, %v3819_v45  ;;  %v4640_v48 = vshrl.u32 %v11788_v13, 16 }
 0x25c   : > { %3567 = vrot.lane.b32.xlu0 %v11604_v44, %s9834_s26  ;;  %v4644_v23 = vshrl.u32 %v3820_v52, 16  ;;  %v4647_v37 = vshll.u32 %v3820_v52, 16  ;;  %v4674_v58 = vrot.slane %v4672_v18, 7  ;;  %v2561_v55 = vsel %vm10771_vm14, 0, %v2560_v43  ;;  %v9720_v18 = vld [vmem:[#allocation2 + $0x38] sm:$0xff]  ;;  %vm14241_vm14 = vmmov %vm14193_vm3 }
 0x25d   : > { %v11802_v17 = vpop.permute.xlu0 %3543  ;;  %v4678_v5 = vrot.slane %v4676_v56, 7  ;;  %v4642_v40 = vrot.slane %v4640_v48, 7  ;;  %v3847_v9 = vsel %vm2551_vm12, %v9720_v18, %v11527_v10  ;;  %2562 = vst [vmem:[#allocation2 + $0x198] sm:$0x80] %v2561_v55  ;;  %v2764_v48 = vld [vmem:[#allocation2 + $0x108] sm:$0x80]  ;;  %v4066_v18 = vsel %vm2551_vm12, %v11234_v61, %v11631_v2 }
 0x25e   : > { %v4646_v30 = vrot.slane %v4644_v23, 7  ;;  %v3925_v27 = vsel %vm3913_vm1, %v3847_v9, %v11483_v16  ;;  %v2702_v9 = vld [vmem:[#allocation2 + $0x48] sm:$0x80]  ;;  %v3671_v61 = vshll.u32 %v11784_v14, 16 }
 0x25f   : > { %3747 = vrot.lane.b32.xlu1 %v11805_v42, %s9835_s27  ;;  %v4681_v11 = vor.u32 %v4679_v19, %v4678_v5  ;;  %5051 = vmatmul.mubr.bf16.gmra.mrb[20].mxu1 %v4308_v34  ;;  %v11812_v53 = vpop.permute.xlu1 %3719  ;;  %v3416_v19 = vrot.slane %v2786_v35, 1  ;;  %v11842_v23 = vsel %vm3978_vm2, %v3925_v27, %v11556_v59  ;;  %v4154_v27 = vsel %vm3913_vm1, %v4066_v18, %v11802_v17  ;;  %v9723_v17 = vld [vmem:[#allocation2 + $0x50] sm:$0xff] }
 0x260   : > { %3469 = vrot.lane.b32.xlu0 %v11493_v29, %s9833_s25  ;;  %v4649_v0 = vor.u32 %v4647_v37, %v4646_v30 }
 0x261   : > { %v11814_v46 = vpop.permute.xlu0 %3453  ;;  %v4682_v45 = vsel %vm14231_vm9, %v4674_v58, %v4681_v11  ;;  %vm14263_vm9 = vmmov %vm14193_vm3 }
 0x262   : > { %v4650_v31 = vsel %vm14232_vm10, %v4642_v40, %v4649_v0  ;;  %vm14264_vm10 = vmmov %vm14193_vm3 }
 0x263   : > { %3235 = vrot.lane.b32.xlu1 %v11604_v44, %s9835_s27  ;;  %9224 = vmatmul.mubr.msk.bf16.gmra.mrb[36].mxu0 %vm2551_vm12, %v4650_v31  ;;  %v9399_v44 = vunpack.i.l.bf16 %v11736_v41  ;;  %v11831_v56 = vpop.permute.xlu1 %2975  ;;  %v9400_v31 = vunpack.i.h.bf16 %v11736_v41 }
 0x264   : > { %3231 = vrot.lane.b32.xlu0 %v11488_v39, %s9835_s27  ;;  %9227 = vmatprep.mubr.msk.bf16.mxu0 %vm2551_vm12, %v4682_v45 }
 0x265   : > { %v11827_v57 = vpop.permute.xlu0 %3449  ;;  %v3845_v30 = vsel %vm2551_vm12, %v2700_v62, %v9399_v44  ;;  %v11868_v44 = vld [vmem:[#allocation2 + $0x80] sm:$0xff] }
 0x267   : > { %3137 = vrot.lane.b32.xlu1 %v11493_v29, %s9834_s26  ;;  %v9197_v39 = vpop.f32.mrb[12].mxu1  ;;  %v4060_v29 = vsel %vm2551_vm12, %v11271_v36, %v11687_v22  ;;  %v3417_v36 = vsel %vm927_vm0, %v11607_v63, %v3416_v19  ;;  %v4334_v22 = vshrl.u32 %v11842_v23, 16 }
 0x268   : > { %v2507_v10 = vadd.f32 %v11676_v28, %v9197_v39  ;;  %3133 = vrot.lane.b32.xlu0 %v11501_v47, %s9834_s26  ;;  %v2498_v52 = vpop.f32.mrb[13].mxu1  ;;  %v2739_v47 = vld [vmem:[#allocation2 + $0x118] sm:$0x1]  ;;  %v4150_v43 = vsel %vm3913_vm1, %v4060_v29, %v11564_v26  ;;  %v3286_v39 = vshll.u32 %v11868_v44, 16  ;;  %v3923_v26 = vsel %vm3913_vm1, %v3845_v30, %v11476_v24  ;;  %v2839_v30 = vld [vmem:[#allocation2 + $0x190] sm:$0x1] }
 0x269   : > { %v2499_v37 = vadd.f32 %v11676_v28, %v2498_v52  ;;  %v9198_v5 = vpop.f32.mrb[14].mxu1  ;;  %v11848_v16 = vpop.permute.xlu0 %3455  ;;  %v11875_v41 = vsel %vm3978_vm2, %v4150_v43, %v11611_v25  ;;  %v4336_v2 = vrot.slane %v4334_v22, 7  ;;  %v11890_v25 = vld [vmem:[#allocation2 + $0x178] sm:$0x1]  ;;  %v3850_v29 = vsel %vm2551_vm12, %v2702_v9, %v9400_v31  ;;  %v14234_v43 = vld [vmem:[#allocation27_spill] sm:$0xff]  ;;  %v14236_v31 = vld [vmem:[#allocation25_spill] sm:$0xff] }
 0x26a   : > { %v2543_v58 = vmax.f32 %v2507_v10, 0.0  ;;  %v2510_v34 = vadd.f32 %v11676_v28, %v9198_v5  ;;  %v2501_v40 = vpop.f32.mrb[15].mxu1  ;;  %v11882_v10 = vld [vmem:[#allocation2 + $0x98] sm:$0xff]  ;;  %v3674_v5 = vshrl.u32 %v11784_v14, 16  ;;  %v3825_v22 = vrot.slane %v11890_v25, 1 }
 0x26b   : > { %v2541_v11 = vmax.f32 %v2499_v37, 0.0  ;;  %v2502_v59 = vadd.f32 %v11676_v28, %v2501_v40  ;;  %v11853_v0 = vpop.permute.xlu1 %3219  ;;  %3233 = vrot.lane.b32.xlu1 %v2764_v48, %s9835_s27  ;;  %v3083_v28 = vrot.slane %v2739_v47, 1  ;;  %v3852_v48 = vsel %vm2551_vm12, %v9723_v17, %v11661_v49 }
 0x26c   : > { %v2544_v45 = vmax.f32 %v2510_v34, 0.0  ;;  %3475 = vrot.lane.b32.xlu0 %v3417_v36, %s9833_s25  ;;  %v4344_v34 = vshrl.u32 %v11875_v41, 16  ;;  %v4218_v40 = vsel %vm3978_vm2, %v4154_v27, %v11812_v53  ;;  %v11904_v47 = vrot.slane %v3286_v39, 1  ;;  %v14235_v53 = vld [vmem:[#allocation9_spill] sm:$0xff]  ;;  %v14237_v27 = vld [vmem:[#allocation12_spill] sm:$0xff] }
 0x26d   : > { %v2542_v35 = vmax.f32 %v2502_v59, 0.0  ;;  %v11863_v55 = vpop.permute.xlu0 %3117  ;;  %v3084_v49 = vsel %vm927_vm0, %v11607_v63, %v3083_v28  ;;  %v14233_v59 = vld [vmem:[#allocation8_spill] sm:$0xff]  ;;  %v4376_v18 = vshrl.u32 %v4218_v40, 16 }
 0x26e   : > { %v2679_v19 = vpack.c.bf16 %v2544_v45, %v2543_v58  ;;  %v3988_v58 = vsel %vm3978_vm2, %v3923_v26, %v11363_v50  ;;  %v4063_v36 = vsel %vm2551_vm12, %v14233_v59, %v11602_v38  ;;  %v11913_v50 = vrot.slane %v3671_v61, 1 }
 0x26f   : > { %v2678_v62 = vpack.c.bf16 %v2542_v35, %v2541_v11  ;;  %2999 = vrot.lane.b32.xlu1 %v11690_v51, %s9833_s25  ;;  %v4337_v11 = vshll.u32 %v11842_v23, 16  ;;  %v4057_v45 = vsel %vm2551_vm12, %v14235_v53, %v14234_v43  ;;  %v3929_v35 = vsel %vm3913_vm1, %v3852_v48, %v14236_v31  ;;  %v14238_v48 = vld [vmem:[#allocation16_spill] sm:$0xff]  ;;  %v2813_v31 = vld [vmem:[#allocation2 + $0x120] sm:$0x80] }
 0x270   : > { %2695 = vst.msk [vmem:[#allocation2 + $0x188] sm:$0xff] %vm2551_vm12, %v2679_v19  ;;  %3571 = vrot.lane.b32.xlu0 %v11595_v54, %s9834_s26  ;;  %v11888_v24 = vpop.permute.xlu1 %3731  ;;  %v4331_v23 = vshrl.u32 %v3988_v58, 16  ;;  %v3927_v38 = vsel %vm3913_vm1, %v3850_v29, %v11654_v15  ;;  %v11928_v19 = vor.u32 %v3674_v5, %v11913_v50  ;;  %v3828_v26 = vrot.slane %v2839_v30, 1  ;;  %v14240_v29 = vld [vmem:[#allocation13_spill] sm:$0xff] }
 0x271   : > { %2694 = vst.msk [vmem:[#allocation2 + $0x170] sm:$0xff] %vm2551_vm12, %v2678_v62  ;;  %v11896_v37 = vpop.permute.xlu0 %3451  ;;  %v4339_v28 = vor.u32 %v4337_v11, %v4336_v2  ;;  %v4152_v62 = vsel %vm3913_vm1, %v4063_v36, %v14237_v27  ;;  %v4346_v61 = vrot.slane %v4344_v34, 7  ;;  %v4148_v58 = vsel %vm3913_vm1, %v4057_v45, %v14238_v48  ;;  %v2815_v34 = vld [vmem:[#allocation2 + $0x138] sm:$0x80]  ;;  %v2787_v48 = vld [vmem:[#allocation2 + $0x130] sm:$0x1] }
 0x272   : > { %v4347_v2 = vshll.u32 %v11875_v41, 16  ;;  %v11943_v5 = vsel %vm3978_vm2, %v3927_v38, %v14240_v29  ;;  %v4333_v59 = vrot.slane %v4331_v23, 7  ;;  %v4378_v53 = vrot.slane %v4376_v18, 7  ;;  %v2766_v29 = vld [vmem:[#allocation2 + $0x120] sm:$0x80] }
 0x273   : > { %3143 = vrot.lane.b32.xlu1 %v3084_v49, %s9834_s26  ;;  %v14239_v49 = vld [vmem:[#allocation23_spill] sm:$0xff]  ;;  %v4379_v27 = vshll.u32 %v4218_v40, 16  ;;  %v4363_v40 = vshrl.u32 %v11943_v5, 16 }
 0x274   : > { %3473 = vrot.lane.b32.xlu0 %v11607_v63, %s9833_s25  ;;  %v11925_v9 = vpop.permute.xlu1 %3727  ;;  %v11936_v15 = vsel %vm3978_vm2, %v3929_v35, %v14239_v49  ;;  %v4349_v23 = vor.u32 %v4347_v2, %v4346_v61 }
 0x275   : > { %v9403_v39 = vpop.permute.xlu0 %9402 }
 0x276   : > { %v9405_v25 = vunpack.i.h.bf16 %v9403_v39  ;;  %v9404_v17 = vunpack.i.l.bf16 %v9403_v39 }
 0x277   : > { %3751 = vrot.lane.b32.xlu1 %v11928_v19, %s9835_s27  ;;  %v11945_v30 = vld [vmem:[#allocation2 + $0x188] sm:$0xff] }
 0x278   : > { %9437 = vrot.lane.b32.xlu0 %v11744_v1, %s9833_s25  ;;  %v4212_v11 = vsel %vm3978_vm2, %v4148_v58, %v9404_v17  ;;  %v4216_v36 = vsel %vm3978_vm2, %v4152_v62, %v9405_v25  ;;  %v11951_v43 = vld [vmem:[#allocation2 + $0x170] sm:$0xff]  ;;  %v11954_v41 = vrot.slane %v11945_v30, 1  ;;  %v4366_v1 = vshrl.u32 %v11936_v15, 16  ;;  %v11964_v25 = vpop.permute.xlu1 %3121 }
 0x279   : > { %v11956_v45 = vpop.permute.xlu0 %9407  ;;  %v4341_v35 = vshrl.u32 %v4212_v11, 16  ;;  %v4373_v38 = vshrl.u32 %v4216_v36, 16  ;;  %v11959_v39 = vrot.slane %v11951_v43, 1  ;;  %v4381_v11 = vor.u32 %v4379_v27, %v4378_v53  ;;  %v14244_v53 = vld [vmem:[#allocation11_spill] sm:$0xff] }
 0x27a   : > { %v3829_v62 = vsel %vm927_vm0, %v11954_v41, %v3828_v26  ;;  %v4736_v26 = vshrl.u32 %v11954_v41, 16  ;;  %v14245_v27 = vshrl.u32 %v14244_v53, 16 }
 0x27b   : > { %3573 = vrot.lane.b32.xlu1 %v2815_v34, %s9834_s26  ;;  %v4343_v18 = vrot.slane %v4341_v35, 7  ;;  %v4375_v17 = vrot.slane %v4373_v38, 7  ;;  %v3826_v58 = vsel %vm927_vm0, %v11959_v39, %v3825_v22  ;;  %v4704_v49 = vshrl.u32 %v11959_v39, 16 }
 0x27c   : > { %3569 = vrot.lane.b32.xlu0 %v2813_v31, %s9834_s26  ;;  %v4708_v61 = vshrl.u32 %v3826_v58, 16  ;;  %v4711_v2 = vshll.u32 %v3826_v58, 16  ;;  %v11978_v35 = vpack.i.bf16 %v11913_v50, %v11782_v3  ;;  %v4340_v22 = vsel %vm14242_vm11, %v4333_v59, %v4339_v28  ;;  %v2740_v31 = vld [vmem:[#allocation2 + $0x130] sm:$0x1]  ;;  %vm14266_vm11 = vmmov %vm14193_vm3 }
 0x27d   : > { %v11973_v36 = vpop.permute.xlu0 %3555  ;;  %v4350_v34 = vsel %vm14241_vm14, %v4343_v18, %v4349_v23  ;;  %v4706_v38 = vrot.slane %v4704_v49, 7  ;;  %v4740_v5 = vshrl.u32 %v3829_v62, 16  ;;  %v4743_v20 = vshll.u32 %v3829_v62, 16  ;;  %vm14265_vm14 = vmmov %vm14193_vm3 }
 0x27e   : > { %5058 = vmatprep.mubr.bf16.mxu1 %v4350_v34  ;;  %v4710_v52 = vrot.slane %v4708_v61, 7  ;;  %v14243_v58 = vshll.u32 %v11882_v10, 16  ;;  %v3291_v23 = vor.u32 %v14245_v27, %v11904_v47  ;;  %v4382_v3 = vsel %vm14193_vm3, %v4375_v17, %v4381_v11 }
 0x27f   : > { %3237 = vrot.lane.b32.xlu1 %v2766_v29, %s9835_s27  ;;  %5059 = vmatmul.mubr.bf16.gmra.mrb[24].mxu1 %v4340_v22  ;;  %v3419_v28 = vrot.slane %v2787_v48, 1  ;;  %v4368_v59 = vrot.slane %v4366_v1, 7  ;;  %v4738_v18 = vrot.slane %v4736_v26, 7  ;;  %v4742_v49 = vrot.slane %v4740_v5, 7  ;;  %v2704_v48 = vld [vmem:[#allocation2 + $0x60] sm:$0x80] }
 0x280   : > { %v11983_v51 = vrot.slane %v14243_v58, 1  ;;  %9442 = vrot.lane.b32.xlu0 %v11978_v35, %s9835_s27  ;;  %5066 = vmatprep.mubr.bf16.mxu1 %v4382_v3  ;;  %v4713_v62 = vor.u32 %v4711_v2, %v4710_v52  ;;  %v4072_v61 = vsel %vm2551_vm12, %v3291_v23, %v11896_v37  ;;  %v9409_v34 = vunpack.i.l.bf16 %v11956_v45  ;;  %v11995_v58 = vpop.permute.xlu1 %3217  ;;  %v14247_v2 = vld [vmem:[#allocation10_spill] sm:$0xff] }
 0x281   : > { %v3552_v29 = vpop.permute.xlu0 %3551  ;;  %v3086_v22 = vrot.slane %v2740_v31, 1  ;;  %v3678_v17 = vshll.u32 %v11771_v33, 16  ;;  %v4369_v1 = vshll.u32 %v11936_v15, 16  ;;  %v4365_v11 = vrot.slane %v4363_v40, 7  ;;  %v14249_v37 = vld [vmem:[#allocation26_spill] sm:$0xff]  ;;  %v12007_v31 = vld [vmem:[#allocation2 + $0xb0] sm:$0xff] }
 0x282   : > { %v4714_v53 = vsel %vm14246_vm4, %v4706_v38, %v4713_v62  ;;  %v4745_v52 = vor.u32 %v4743_v20, %v4742_v49  ;;  %v14248_v26 = vshrl.u32 %v14247_v2, 16  ;;  %v3420_v27 = vsel %vm927_vm0, %v14249_v37, %v3419_v28  ;;  %v9725_v15 = vld [vmem:[#allocation2 + $0x68] sm:$0xff]  ;;  %vm14270_vm4 = vmmov %vm14193_vm3 }
 0x283   : > { %3003 = vrot.lane.b32.xlu1 %v11805_v42, %s9833_s25  ;;  %v3300_v23 = vshll.u32 %v12007_v31, 16  ;;  %9228 = vmatmul.mubr.msk.bf16.gmra.mrb[40].mxu0 %vm2551_vm12, %v4714_v53  ;;  %v14250_v40 = vld [vmem:[#allocation28_spill] sm:$0xff]  ;;  %v4158_v38 = vsel %vm3913_vm1, %v4072_v61, %v11758_v60  ;;  %v4371_v3 = vor.u32 %v4369_v1, %v4368_v59  ;;  %v3855_v28 = vsel %vm2551_vm12, %v2704_v48, %v9409_v34 }
 0x284   : > { %v3298_v5 = vor.u32 %v14248_v26, %v11983_v51  ;;  %v3857_v20 = vsel %vm2551_vm12, %v9725_v15, %v14250_v40  ;;  %3479 = vrot.lane.b32.xlu0 %v3420_v27, %s9833_s25  ;;  %v4746_v42 = vsel %vm14251_vm5, %v4738_v18, %v4745_v52  ;;  %v12020_v49 = vrot.slane %v3678_v17, 1  ;;  %v14253_v61 = vld [vmem:[#allocation24_spill] sm:$0xff]  ;;  %v12033_v17 = vpop.permute.xlu1 %2983  ;;  %v2706_v27 = vld [vmem:[#allocation2 + $0x78] sm:$0x80]  ;;  %vm14272_vm5 = vmmov %vm14193_vm3 }
 0x285   : > { %v12018_v62 = vpop.permute.xlu0 %3457  ;;  %v3681_v53 = vshrl.u32 %v11771_v33, 16  ;;  %9231 = vmatprep.mubr.msk.bf16.mxu0 %vm2551_vm12, %v4746_v42  ;;  %v3087_v60 = vsel %vm927_vm0, %v14249_v37, %v3086_v22  ;;  %v4372_v59 = vsel %vm14252_vm6, %v4365_v11, %v4371_v3  ;;  %v3933_v18 = vsel %vm3913_vm1, %v3857_v20, %v14253_v61  ;;  %v14254_v22 = vld [vmem:[#allocation22_spill] sm:$0xff]  ;;  %vm14273_vm6 = vmmov %vm14193_vm3 }
 0x286   : > { %v4078_v2 = vsel %vm2551_vm12, %v3298_v5, %v11848_v16  ;;  %v4222_v34 = vsel %vm3978_vm2, %v4158_v38, %v11762_v8  ;;  %v3998_v16 = vsel %vm3978_vm2, %v3933_v18, %v11704_v32  ;;  %v12039_v48 = vrot.slane %v3300_v23, 1  ;;  %v14258_v18 = vld [vmem:[#allocation17_spill] sm:$0xff] }
 0x287   : > { %v4162_v1 = vsel %vm3913_vm1, %v4078_v2, %v3552_v29  ;;  %3147 = vrot.lane.b32.xlu1 %v3087_v60, %s9834_s26  ;;  %5067 = vmatmul.mubr.bf16.gmra.mrb[28].mxu1 %v4372_v59  ;;  %v3931_v11 = vsel %vm3913_vm1, %v3855_v28, %v14254_v22  ;;  %v9410_v8 = vunpack.i.h.bf16 %v11956_v45  ;;  %v12047_v26 = vor.u32 %v3681_v53, %v12020_v49  ;;  %v12049_v29 = vld [vmem:[#allocation2 + $0x148] sm:$0x1]  ;;  %v14255_v45 = vld [vmem:[#allocation15_spill] sm:$0xff]  ;;  %v14259_v22 = vld [vmem:[#allocation18_spill] sm:$0xff] }
 0x288   : > { %3575 = vrot.lane.b32.xlu0 %v11784_v14, %s9834_s26  ;;  %v3862_v32 = vsel %vm2551_vm12, %v11868_v44, %v11831_v56  ;;  %v4408_v5 = vshrl.u32 %v4222_v34, 16  ;;  %v4226_v23 = vsel %vm3978_vm2, %v4162_v1, %v11925_v9  ;;  %v4398_v15 = vshrl.u32 %v3998_v16, 16  ;;  %v14256_v44 = vld [vmem:[#allocation14_spill] sm:$0xff] }
 0x289   : > { %v3460_v52 = vpop.permute.xlu0 %3459  ;;  %v3996_v40 = vsel %vm3978_vm2, %v3931_v11, %v14255_v45  ;;  %v4075_v20 = vsel %vm2551_vm12, %v11983_v51, %v11814_v46  ;;  %v4069_v56 = vsel %vm2551_vm12, %v11904_v47, %v11827_v57  ;;  %v14257_v38 = vshrl.u32 %v14256_v44, 16  ;;  %v12075_v46 = vpop.permute.xlu1 %3127  ;;  %v2708_v45 = vld [vmem:[#allocation2 + $0x90] sm:$0x80] }
 0x28a   : > { %v3422_v9 = vrot.slane %v12049_v29, 1  ;;  %v4401_v42 = vshll.u32 %v3998_v16, 16  ;;  %v3937_v28 = vsel %vm3913_vm1, %v3862_v32, %v11750_v21  ;;  %v3860_v53 = vsel %vm2551_vm12, %v2706_v27, %v9410_v8 }
 0x28b   : > { %3755 = vrot.lane.b32.xlu1 %v12047_v26, %s9835_s27  ;;  %v3305_v3 = vor.u32 %v14257_v38, %v12039_v48  ;;  %v4440_v51 = vshrl.u32 %v4226_v23, 16  ;;  %v4410_v57 = vrot.slane %v4408_v5, 7  ;;  %v4395_v59 = vshrl.u32 %v3996_v40, 16  ;;  %v14260_v38 = vld [vmem:[#allocation19_spill] sm:$0xff] }
 0x28c   : > { %3477 = vrot.lane.b32.xlu0 %v14249_v37, %s9833_s25  ;;  %v4400_v61 = vrot.slane %v4398_v15, 7  ;;  %v4160_v1 = vsel %vm3913_vm1, %v4075_v20, %v14258_v18  ;;  %v4156_v16 = vsel %vm3913_vm1, %v4069_v56, %v14259_v22  ;;  %v4411_v21 = vshll.u32 %v4222_v34, 16 }
 0x28d   : > { %v9413_v2 = vpop.permute.xlu0 %9412  ;;  %v4084_v11 = vsel %vm2551_vm12, %v3305_v3, %v3460_v52  ;;  %v3935_v32 = vsel %vm3913_vm1, %v3860_v53, %v11863_v55  ;;  %v12092_v5 = vsel %vm3978_vm2, %v3937_v28, %v11778_v12  ;;  %v4442_v27 = vrot.slane %v4440_v51, 7  ;;  %v2768_v51 = vld [vmem:[#allocation2 + $0x138] sm:$0x80] }
 0x28e   : > { %v9415_v47 = vunpack.i.h.bf16 %v9413_v2  ;;  %v9414_v60 = vunpack.i.l.bf16 %v9413_v2  ;;  %v4413_v20 = vor.u32 %v4411_v21, %v4410_v57  ;;  %v4397_v56 = vrot.slane %v4395_v59, 7  ;;  %v2741_v59 = vld [vmem:[#allocation2 + $0x148] sm:$0x1] }
 0x28f   : > { %3243 = vrot.lane.b32.xlu1 %v11784_v14, %s9835_s27  ;;  %v4443_v55 = vshll.u32 %v4226_v23, 16  ;;  %v4000_v3 = vsel %vm3978_vm2, %v3935_v32, %v14260_v38  ;;  %v4403_v28 = vor.u32 %v4401_v42, %v4400_v61  ;;  %v3867_v53 = vsel %vm2551_vm12, %v11882_v10, %v11793_v4  ;;  %v12120_v10 = vld [vmem:[#allocation2 + $0xc8] sm:$0xff] }
 0x290   : > { %3239 = vrot.lane.b32.xlu0 %v11595_v54, %s9835_s27  ;;  %v4220_v8 = vsel %vm3978_vm2, %v4156_v16, %v9414_v60  ;;  %v4224_v29 = vsel %vm3978_vm2, %v4160_v1, %v9415_v47  ;;  %v4166_v54 = vsel %vm3913_vm1, %v4084_v11, %v11973_v36  ;;  %v4430_v36 = vshrl.u32 %v12092_v5, 16 }
 0x291   : > { %v12094_v52 = vpop.permute.xlu1 %3735  ;;  %v12096_v15 = vpop.permute.xlu0 %9417  ;;  %v4405_v14 = vshrl.u32 %v4220_v8, 16  ;;  %v4437_v34 = vshrl.u32 %v4224_v29, 16  ;;  %v4230_v23 = vsel %vm3978_vm2, %v4166_v54, %v11888_v24  ;;  %v4445_v42 = vor.u32 %v4443_v55, %v4442_v27 }
 0x292   : > { %v9419_v40 = vunpack.i.l.bf16 %v12096_v15  ;;  %v4404_v4 = vsel %vm14262_vm8, %v4397_v56, %v4403_v28  ;;  %v4427_v61 = vshrl.u32 %v4000_v3, 16  ;;  %v3423_v18 = vsel %vm927_vm0, %v11788_v13, %v3422_v9  ;;  %vm14275_vm8 = vmmov %vm14193_vm3 }
 0x293   : > { %3145 = vrot.lane.b32.xlu1 %v14249_v37, %s9834_s26  ;;  %v4407_v12 = vrot.slane %v4405_v14, 7  ;;  %v4439_v44 = vrot.slane %v4437_v34, 7  ;;  %v4432_v22 = vrot.slane %v4430_v36, 7  ;;  %v3941_v16 = vsel %vm3913_vm1, %v3867_v53, %v11723_v6 }
 0x294   : > { %3141 = vrot.lane.b32.xlu0 %v11607_v63, %s9834_s26  ;;  %v3865_v37 = vsel %vm2551_vm12, %v2708_v45, %v9419_v40  ;;  %v3307_v63 = vshll.u32 %v12120_v10, 16  ;;  %v4472_v11 = vshrl.u32 %v4230_v23, 16  ;;  %v4006_v29 = vsel %vm3978_vm2, %v3941_v16, %v11853_v0 }
 0x295   : > { %v12114_v2 = vpop.permute.xlu1 %3557  ;;  %v4414_v57 = vsel %vm14261_vm7, %v4407_v12, %v4413_v20  ;;  %v4446_v1 = vsel %vm14263_vm9, %v4439_v44, %v4445_v42  ;;  %v3939_v8 = vsel %vm3913_vm1, %v3865_v37, %v11964_v25  ;;  %v3089_v27 = vrot.slane %v2741_v59, 1  ;;  %vm14274_vm7 = vmmov %vm14193_vm3 }
 0x296   : > { %v3554_v47 = vpop.permute.xlu0 %3553  ;;  %5074 = vmatprep.mubr.bf16.mxu1 %v4414_v57  ;;  %v12117_v60 = vpop.f32.mrb[16].mxu0  ;;  %v4433_v14 = vshll.u32 %v12092_v5, 16  ;;  %v3309_v34 = vrot.slane %v3307_v63, 1  ;;  %v4429_v54 = vrot.slane %v4427_v61, 7  ;;  %v4081_v45 = vsel %vm2551_vm12, %v12039_v48, %v12018_v62  ;;  %vm14278_vm9 = vmmov %vm14193_vm3 }
 0x297   : > { %v12123_v24 = vpop.f32.mrb[17].mxu0  ;;  %3241 = vrot.lane.b32.xlu1 %v2768_v51, %s9835_s27  ;;  %5075 = vmatmul.mubr.bf16.gmra.mrb[32].mxu1 %v4404_v4  ;;  %v3685_v0 = vshll.u32 %v11951_v43, 16  ;;  %v4004_v25 = vsel %vm3978_vm2, %v3939_v8, %v11995_v58  ;;  %v4462_v20 = vshrl.u32 %v4006_v29, 16  ;;  %v4474_v56 = vrot.slane %v4472_v11, 7  ;;  %v2819_v8 = vld [vmem:[#allocation2 + $0x168] sm:$0x80] }
 0x298   : > { %3483 = vrot.lane.b32.xlu0 %v3423_v18, %s9833_s25  ;;  %5082 = vmatprep.mubr.bf16.mxu1 %v4446_v1  ;;  %v12132_v21 = vpop.f32.mrb[18].mxu0  ;;  %v4164_v5 = vsel %vm3913_vm1, %v4081_v45, %v3554_v47  ;;  %v4435_v55 = vor.u32 %v4433_v14, %v4432_v22  ;;  %v3310_v62 = vshrl.u32 %v12120_v10, 16  ;;  %v3090_v48 = vsel %vm927_vm0, %v11788_v13, %v3089_v27  ;;  %v2817_v14 = vld [vmem:[#allocation2 + $0x150] sm:$0x80] }
 0x299   : > { %v12138_v9 = vpop.f32.mrb[19].mxu0  ;;  %v12140_v32 = vpop.permute.xlu1 %3221  ;;  %v3688_v38 = vshrl.u32 %v11951_v43, 16  ;;  %v4475_v58 = vshll.u32 %v4230_v23, 16  ;;  %v4459_v36 = vshrl.u32 %v4004_v25, 16  ;;  %v12163_v51 = vrot.slane %v3685_v0, 1 }
 0x29a   : > { %v9423_v6 = vpop.permute.xlu0 %9422  ;;  %v4436_v28 = vsel %vm14264_vm10, %v4429_v54, %v4435_v55  ;;  %v4464_v37 = vrot.slane %v4462_v20, 7  ;;  %v3312_v57 = vor.u32 %v3310_v62, %v3309_v34  ;;  %v4465_v63 = vshll.u32 %v4006_v29, 16  ;;  %vm14279_vm10 = vmmov %vm14193_vm3 }
 0x29b   : > { %v9424_v40 = vunpack.i.l.bf16 %v9423_v6  ;;  %3007 = vrot.lane.b32.xlu1 %v11928_v19, %s9833_s25  ;;  %v4477_v47 = vor.u32 %v4475_v58, %v4474_v56  ;;  %v12170_v23 = vor.u32 %v3688_v38, %v12163_v51  ;;  %v4461_v1 = vrot.slane %v4459_v36, 7 }
 0x29c   : > { %3579 = vrot.lane.b32.xlu0 %v11771_v33, %s9834_s26  ;;  %v4467_v16 = vor.u32 %v4465_v63, %v4464_v37  ;;  %v9425_v0 = vunpack.i.h.bf16 %v9423_v6  ;;  %v3872_v56 = vsel %vm2551_vm12, %v12007_v31, %v12033_v17  ;;  %v12197_v6 = vpack.i.bf16 %v12163_v51, %v12020_v49  ;;  %v2710_v31 = vld [vmem:[#allocation2 + $0xa8] sm:$0x80]  ;;  %v2742_v17 = vld [vmem:[#allocation2 + $0x160] sm:$0x1] }
 0x29d   : > { %v12154_v12 = vpop.permute.xlu1 %2987  ;;  %v4228_v44 = vsel %vm3978_vm2, %v4164_v5, %v9424_v40  ;;  %v2789_v40 = vld [vmem:[#allocation2 + $0x160] sm:$0x1]  ;;  %v3945_v62 = vsel %vm3913_vm1, %v3872_v56, %v12075_v46 }
 0x29e   : > { %v3464_v3 = vpop.permute.xlu0 %3463  ;;  %v4469_v53 = vshrl.u32 %v4228_v44, 16  ;;  %v4468_v45 = vsel %vm14266_vm11, %v4461_v1, %v4467_v16  ;;  %vm14281_vm11 = vmmov %vm14193_vm3 }
 0x29f   : > { %3151 = vrot.lane.b32.xlu1 %v3090_v48, %s9834_s26  ;;  %5083 = vmatmul.mubr.bf16.gmra.mrb[36].mxu1 %v4436_v28  ;;  %v4090_v59 = vsel %vm2551_vm12, %v3312_v57, %v3464_v3  ;;  %v2564_v3 = vld [vmem:[#allocation2 + $0x1a8] sm:$0x1]  ;;  %v3692_v57 = vshll.u32 %v11945_v30, 16 }
 0x2a0   : > { %3481 = vrot.lane.b32.xlu0 %v11788_v13, %s9833_s25  ;;  %v4471_v42 = vrot.slane %v4469_v53, 7  ;;  %v2565_v46 = vsel %vm10692_vm15, 0, %v2564_v3  ;;  %vm14268_vm15 = vmmov %vm14193_vm3 }
 0x2a1   : > { %v12167_v4 = vpop.permute.xlu1 %3131  ;;  %2566 = vst [vmem:[#allocation2 + $0x1a8] sm:$0x1] %v2565_v46 }
 0x2a2   : > { %v3560_v61 = vpop.permute.xlu0 %3559  ;;  %v4478_v18 = vsel %vm14265_vm14, %v4471_v42, %v4477_v47  ;;  %vm14280_vm14 = vmmov %vm14193_vm3 }
 0x2a3   : > { %v4170_v22 = vsel %vm3913_vm1, %v4090_v59, %v3560_v61  ;;  %5090 = vmatprep.mubr.bf16.mxu1 %v4478_v18  ;;  %3759 = vrot.lane.b32.xlu1 %v12170_v23, %s9835_s27  ;;  %v3092_v59 = vrot.slane %v2742_v17, 1 }
 0x2a4   : > { %v4234_v11 = vsel %vm3978_vm2, %v4170_v22, %v12094_v52  ;;  %9447 = vrot.lane.b32.xlu0 %v11978_v35, %s9833_s25  ;;  %v2770_v35 = vld [vmem:[#allocation2 + $0x150] sm:$0x80] }
 0x2a5   : > { %v4504_v29 = vshrl.u32 %v4234_v11, 16  ;;  %v12181_v27 = vpop.permute.xlu1 %3739  ;;  %v4507_v48 = vshll.u32 %v4234_v11, 16 }
 0x2a6   : > { %v3462_v54 = vpop.permute.xlu0 %3461 }
 0x2a7   : > { %v4087_v25 = vsel %vm2551_vm12, %v3309_v34, %v3462_v54  ;;  %3581 = vrot.lane.b32.xlu1 %v2819_v8, %s9834_s26  ;;  %5091 = vmatmul.mubr.bf16.gmra.mrb[40].mxu1 %v4468_v45  ;;  %v4506_v20 = vrot.slane %v4504_v29, 7  ;;  %v3425_v34 = vrot.slane %v2789_v40, 1  ;;  %v12223_v29 = vrot.slane %v3692_v57, 1  ;;  %v14269_v57 = vld [vmem:[#allocation21_spill] sm:$0xff] }
 0x2a8   : > { %v4168_v52 = vsel %vm3913_vm1, %v4087_v25, %v12114_v2  ;;  %3577 = vrot.lane.b32.xlu0 %v2817_v14, %s9834_s26  ;;  %v9420_v2 = vunpack.i.h.bf16 %v12096_v15  ;;  %v3695_v14 = vshrl.u32 %v11945_v30, 16  ;;  %v3093_v45 = vsel %vm927_vm0, %v11776_v7, %v3092_v59  ;;  %v2840_v25 = vld [vmem:[#allocation2 + $0x1a8] sm:$0x1]  ;;  %v2712_v59 = vld [vmem:[#allocation2 + $0xc0] sm:$0x80] }
 0x2a9   : > { %v4232_v5 = vsel %vm3978_vm2, %v4168_v52, %v9425_v0  ;;  %v12193_v55 = vpop.permute.xlu1 %3227  ;;  %v4509_v36 = vor.u32 %v4507_v48, %v4506_v20  ;;  %v3426_v1 = vsel %vm927_vm0, %v11776_v7, %v3425_v34 }
 0x2aa   : > { %v4501_v44 = vshrl.u32 %v4232_v5, 16  ;;  %v3224_v38 = vpop.permute.xlu0 %3223  ;;  %v3870_v47 = vsel %vm2551_vm12, %v2710_v31, %v9420_v2  ;;  %v3831_v5 = vrot.slane %v2840_v25, 1  ;;  %v12298_v25 = vld [vmem:[#allocation2 + $0xf8] sm:$0xff] }
 0x2ab   : > { %v4010_v58 = vsel %vm3978_vm2, %v3945_v62, %v3224_v38  ;;  %3245 = vrot.lane.b32.xlu1 %v2770_v35, %s9835_s27  ;;  %v12237_v35 = vor.u32 %v3695_v14, %v12223_v29 }
 0x2ac   : > { %v4494_v28 = vshrl.u32 %v4010_v58, 16  ;;  %9452 = vrot.lane.b32.xlu0 %v12197_v6, %s9835_s27  ;;  %v4503_v53 = vrot.slane %v4501_v44, 7  ;;  %v4497_v16 = vshll.u32 %v4010_v58, 16 }
 0x2ad   : > { %v12208_v15 = vpop.permute.xlu1 %3129 }
 0x2ae   : > { %v3126_v42 = vpop.permute.xlu0 %3125  ;;  %v4510_v63 = vsel %vm14193_vm3, %v4503_v53, %v4509_v36  ;;  %v4496_v61 = vrot.slane %v4494_v28, 7  ;;  %v2790_v36 = vld [vmem:[#allocation2 + $0x178] sm:$0x1] }
 0x2af   : > { %v3943_v18 = vsel %vm3913_vm1, %v3870_v47, %v3126_v42  ;;  %5098 = vmatprep.mubr.bf16.mxu1 %v4510_v63  ;;  %3011 = vrot.lane.b32.xlu1 %v12047_v26, %s9833_s25 }
 0x2b0   : > { %v4008_v22 = vsel %vm3978_vm2, %v3943_v18, %v12140_v32  ;;  %3487 = vrot.lane.b32.xlu0 %v3426_v1, %s9833_s25  ;;  %v4499_v40 = vor.u32 %v4497_v16, %v4496_v61  ;;  %v12231_v32 = vld [vmem:[#allocation2 + $0x1a0] sm:$0xff]  ;;  %v3428_v1 = vrot.slane %v2790_v36, 1  ;;  %v3877_v16 = vsel %vm2551_vm12, %v12120_v10, %v12154_v12 }
 0x2b1   : > { %v4491_v11 = vshrl.u32 %v4008_v22, 16  ;;  %v12221_v8 = vpop.permute.xlu1 %3225  ;;  %v3830_v56 = vrot.slane %v12231_v32, 1  ;;  %v9688_v22 = vld [vmem:[%s14151_s5 + $0x8] sm:$0xff]   ;;  %v3949_v14 = vsel %vm3913_vm1, %v3877_v16, %v12167_v4  ;;  %v3699_v12 = vshll.u32 %v12231_v32, 16 }
 0x2b2   : > { %v3468_v54 = vpop.permute.xlu0 %3467  ;;  %v3429_v4 = vsel %vm927_vm0, %v11959_v39, %v3428_v1  ;;  %v3702_v36 = vshrl.u32 %v12231_v32, 16 }
 0x2b3   : > { %v4493_v0 = vrot.slane %v4491_v11, 7  ;;  %3155 = vrot.lane.b32.xlu1 %v3093_v45, %s9834_s26  ;;  %v3832_v48 = vsel %vm927_vm0, %v3830_v56, %v3831_v5  ;;  %v4768_v3 = vshrl.u32 %v3830_v56, 16  ;;  %v4096_v42 = vsel %vm2551_vm12, %v14269_v57, %v3468_v54  ;;  %v2772_v11 = vld [vmem:[#allocation2 + $0x168] sm:$0x80] }
 0x2b4   : > { %3583 = vrot.lane.b32.xlu0 %v11951_v43, %s9834_s26  ;;  %v4772_v38 = vshrl.u32 %v3832_v48, 16  ;;  %v4775_v53 = vshll.u32 %v3832_v48, 16  ;;  %v12305_v48 = vrot.slane %v3699_v12, 1 }
 0x2b5   : > { %v12233_v20 = vpop.permute.xlu1 %2991  ;;  %v4500_v52 = vsel %vm14268_vm15, %v4493_v0, %v4499_v40  ;;  %v4770_v37 = vrot.slane %v4768_v3, 7  ;;  %v4014_v40 = vsel %vm3978_vm2, %v3949_v14, %v12193_v55  ;;  %v3321_v55 = vshll.u32 %v12298_v25, 16  ;;  %vm14282_vm15 = vmmov %vm14193_vm3 }
 0x2b6   : > { %v3564_v34 = vpop.permute.xlu0 %3563  ;;  %5099 = vmatmul.mubr.bf16.gmra.mrb[44].mxu1 %v4500_v52  ;;  %v12240_v62 = vpop.f32.mrb[20].mxu0  ;;  %v4774_v28 = vrot.slane %v4772_v38, 7  ;;  %v14271_v38 = vld [vmem:[#allocation20_spill] sm:$0xff]  ;;  %v4529_v1 = vshll.u32 %v4014_v40, 16  ;;  %v3704_v16 = vor.u32 %v3702_v36, %v12305_v48 }
 0x2b7   : > { %v12242_v2 = vpop.f32.mrb[21].mxu0  ;;  %3763 = vrot.lane.b32.xlu1 %v12237_v35, %s9835_s27  ;;  %v4174_v63 = vsel %vm3913_vm1, %v4096_v42, %v3564_v34 }
 0x2b8   : > { %3485 = vrot.lane.b32.xlu0 %v11776_v7, %s9833_s25  ;;  %v12249_v44 = vpop.f32.mrb[22].mxu0  ;;  %v4777_v46 = vor.u32 %v4775_v53, %v4774_v28 }
 0x2b9   : > { %v12251_v58 = vpop.f32.mrb[23].mxu0  ;;  %v12253_v31 = vpop.permute.xlu1 %3135 }
 0x2ba   : > { %v3466_v17 = vpop.permute.xlu0 %3465  ;;  %v4778_v18 = vsel %vm14270_vm4, %v4770_v37, %v4777_v46  ;;  %v3323_v46 = vrot.slane %v3321_v55, 1  ;;  %v2823_v55 = vld [vmem:[#allocation2 + $0x198] sm:$0x80]  ;;  %vm5644_vm4 = vcmask 523271  }
 0x2bb   : > { %3251 = vrot.lane.b32.xlu1 %v11951_v43, %s9835_s27  ;;  %v9687_v43 = vld [vmem:[%s14151_s5] sm:$0xff]   ;;  %9232 = vmatmul.mubr.msk.bf16.gmra.mrb[44].mxu0 %vm2551_vm12, %v4778_v18  ;;  %v4093_v3 = vsel %vm2551_vm12, %v14271_v38, %v3466_v17 }
 0x2bc   : > { %3247 = vrot.lane.b32.xlu0 %v11771_v33, %s9835_s27  ;;  %9235 = vmatprep.subr.bf16.mxu0 %v9687_v43 }
 0x2bd   : > { %v12261_v47 = vpop.permute.xlu1 %3743  ;;  %9236 = vmatpush3.bf16.msra.mxu0 %v9687_v43 }
 0x2be   : > { %v12264_v61 = vpop.permute.xlu0 %9427  ;;  %9237 = vmatprep.subr.bf16.mxu0 %v9688_v22 }
 0x2bf   : > { %v9429_v33 = vunpack.i.l.bf16 %v12264_v61  ;;  %3153 = vrot.lane.b32.xlu1 %v11776_v7, %s9834_s26  ;;  %v4238_v7 = vsel %vm3978_vm2, %v4174_v63, %v12181_v27  ;;  %v2743_v27 = vld [vmem:[#allocation2 + $0x178] sm:$0x1] }
 0x2c0   : > { %3149 = vrot.lane.b32.xlu0 %v11788_v13, %s9834_s26  ;;  %v4536_v0 = vshrl.u32 %v4238_v7, 16  ;;  %v3095_v34 = vrot.slane %v2743_v27, 1  ;;  %v4539_v17 = vshll.u32 %v4238_v7, 16 }
 0x2c1   : > { %v3875_v54 = vsel %vm2551_vm12, %v2712_v59, %v9429_v33  ;;  %v12287_v45 = vpop.permute.xlu1 %3565  ;;  %9238 = vmatpush3.bf16.msra.mxu0 %v9688_v22  ;;  %v3324_v59 = vshrl.u32 %v12298_v25, 16 }
 0x2c2   : > { %v3562_v10 = vpop.permute.xlu0 %3561  ;;  %v3947_v13 = vsel %vm3913_vm1, %v3875_v54, %v12208_v15  ;;  %v4526_v15 = vshrl.u32 %v4014_v40, 16  ;;  %v4538_v37 = vrot.slane %v4536_v0, 7  ;;  %v3096_v43 = vsel %vm927_vm0, %v11959_v39, %v3095_v34  ;;  %v2821_v34 = vld [vmem:[#allocation2 + $0x180] sm:$0x80] }
 0x2c3   : > { %3249 = vrot.lane.b32.xlu1 %v2772_v11, %s9835_s27  ;;  %v4012_v52 = vsel %vm3978_vm2, %v3947_v13, %v12221_v8  ;;  %v4172_v8 = vsel %vm3913_vm1, %v4093_v3, %v3562_v10  ;;  %v3326_v11 = vor.u32 %v3324_v59, %v3323_v46 }
 0x2c4   : > { %3491 = vrot.lane.b32.xlu0 %v3429_v4, %s9833_s25  ;;  %v4523_v53 = vshrl.u32 %v4012_v52, 16  ;;  %v4528_v57 = vrot.slane %v4526_v15, 7  ;;  %v4541_v54 = vor.u32 %v4539_v17, %v4538_v37 }
 0x2c5   : > { %v12303_v56 = vpop.permute.xlu1 %3229 }
 0x2c6   : > { %v9433_v5 = vpop.permute.xlu0 %9432  ;;  %v4525_v22 = vrot.slane %v4523_v53, 7  ;;  %v4531_v7 = vor.u32 %v4529_v1, %v4528_v57 }
 0x2c7   : > { %v9434_v28 = vunpack.i.l.bf16 %v9433_v5  ;;  %3015 = vrot.lane.b32.xlu1 %v12170_v23, %s9833_s25  ;;  %v9435_v3 = vunpack.i.h.bf16 %v9433_v5 }
 0x2c8   : > { %3587 = vrot.lane.b32.xlu0 %v11945_v30, %s9834_s26  ;;  %v4532_v27 = vsel %vm14273_vm6, %v4525_v22, %v4531_v7  ;;  %vm14286_vm6 = vmmov %vm14193_vm3 }
 0x2c9   : > { %v12315_v42 = vpop.permute.xlu1 %2995  ;;  %v4236_v63 = vsel %vm3978_vm2, %v4172_v8, %v9434_v28 }
 0x2ca   : > { %v3472_v18 = vpop.permute.xlu0 %3471  ;;  %v4533_v33 = vshrl.u32 %v4236_v63, 16 }
 0x2cb   : > { %3159 = vrot.lane.b32.xlu1 %v3096_v43, %s9834_s26  ;;  %v4102_v13 = vsel %vm2551_vm12, %v3326_v11, %v3472_v18 }
 0x2cc   : > { %3489 = vrot.lane.b32.xlu0 %v11959_v39, %s9833_s25  ;;  %v4535_v14 = vrot.slane %v4533_v33, 7  ;;  %v2714_v33 = vld [vmem:[#allocation2 + $0xd8] sm:$0x80] }
 0x2cd   : > { %v12325_v10 = vpop.permute.xlu1 %3139 }
 0x2ce   : > { %v3568_v12 = vpop.permute.xlu0 %3567  ;;  %v4542_v4 = vsel %vm14272_vm5, %v4535_v14, %v4541_v54  ;;  %vm12499_vm5 = vmand %vm5644_vm4, %vm2546_vm13 }
 0x2cf   : > { %v4178_v40 = vsel %vm3913_vm1, %v4102_v13, %v3568_v12  ;;  %5106 = vmatprep.mubr.bf16.mxu1 %v4542_v4  ;;  %3767 = vrot.lane.b32.xlu1 %v3704_v16, %s9835_s27  ;;  %vm14285_vm13 = vmmov %vm14193_vm3 }
 0x2d0   : > { %v4242_v0 = vsel %vm3978_vm2, %v4178_v40, %v12261_v47  ;;  %9457 = vrot.lane.b32.xlu0 %v12197_v6, %s9833_s25  ;;  %5107 = vmatmul.mubr.bf16.gmra.mrb[48].mxu1 %v4532_v27  ;;  %v2791_v47 = vld [vmem:[#allocation2 + $0x190] sm:$0x1]  ;;  %v9728_v6 = vld [vmem:[#allocation2 + $0xe0] sm:$0xff]  ;;  %vm14311_vm4 = vmmov %vm14193_vm3 }
 0x2d1   : > { %v4568_v52 = vshrl.u32 %v4242_v0, 16  ;;  %v12336_v15 = vpop.permute.xlu1 %3747  ;;  %v3882_v37 = vsel %vm2551_vm12, %v9728_v6, %v12233_v20  ;;  %v4571_v63 = vshll.u32 %v4242_v0, 16  ;;  %v3431_v1 = vrot.slane %v2791_v47, 1 }
 0x2d2   : > { %v3470_v38 = vpop.permute.xlu0 %3469  ;;  %v3953_v5 = vsel %vm3913_vm1, %v3882_v37, %v12253_v31  ;;  %v2716_v37 = vld [vmem:[#allocation2 + $0xf0] sm:$0x80] }
 0x2d3   : > { %v4099_v28 = vsel %vm2551_vm12, %v3323_v46, %v3470_v38  ;;  %3589 = vrot.lane.b32.xlu1 %v2823_v55, %s9834_s26  ;;  %v4570_v53 = vrot.slane %v4568_v52, 7  ;;  %v9430_v46 = vunpack.i.h.bf16 %v12264_v61 }
 0x2d4   : > { %v4176_v36 = vsel %vm3913_vm1, %v4099_v28, %v12287_v45  ;;  %3585 = vrot.lane.b32.xlu0 %v2821_v34, %s9834_s26 }
 0x2d5   : > { %v4240_v8 = vsel %vm3978_vm2, %v4176_v36, %v9435_v3  ;;  %v3236_v57 = vpop.permute.xlu1 %3235  ;;  %v4573_v22 = vor.u32 %v4571_v63, %v4570_v53  ;;  %v3880_v54 = vsel %vm2551_vm12, %v2714_v33, %v9430_v46  ;;  %v14276_v36 = vld [vmem:[#allocation30_spill] sm:$0xff] }
 0x2d6   : > { %v4565_v17 = vshrl.u32 %v4240_v8, 16  ;;  %v3232_v59 = vpop.permute.xlu0 %3231  ;;  %v12349_v18 = vpop.f32.mrb[24].mxu0 }
 0x2d7   : > { %v4018_v45 = vsel %vm3978_vm2, %v3953_v5, %v3232_v59  ;;  %v12352_v43 = vpop.f32.mrb[25].mxu0  ;;  %3765 = vrot.lane.b32.xlu1 %v12305_v48, %s9835_s27  ;;  %v3432_v48 = vsel %vm927_vm0, %v11954_v41, %v3431_v1  ;;  %v2774_v59 = vld [vmem:[#allocation2 + $0x180] sm:$0x80] }
 0x2d8   : > { %v4558_v20 = vshrl.u32 %v4018_v45, 16  ;;  %3761 = vrot.lane.b32.xlu0 %v12223_v29, %s9835_s27  ;;  %v12358_v31 = vpop.f32.mrb[26].mxu0  ;;  %v4567_v61 = vrot.slane %v4565_v17, 7  ;;  %v4561_v40 = vshll.u32 %v4018_v45, 16 }
 0x2d9   : > { %v12360_v16 = vpop.f32.mrb[27].mxu0  ;;  %v3138_v11 = vpop.permute.xlu1 %3137 }
 0x2da   : > { %v3134_v14 = vpop.permute.xlu0 %3133  ;;  %v4574_v7 = vsel %vm14274_vm7, %v4567_v61, %v4573_v22  ;;  %v4560_v13 = vrot.slane %v4558_v20, 7  ;;  %v14277_v22 = vld [vmem:[#allocation29_spill] sm:$0xff]  ;;  %vm14287_vm7 = vmmov %vm14193_vm3 }
 0x2db   : > { %v3951_v12 = vsel %vm3913_vm1, %v3880_v54, %v3134_v14  ;;  %5114 = vmatprep.mubr.bf16.mxu1 %v4574_v7 }
 0x2dc   : > { %v4016_v4 = vsel %vm3978_vm2, %v3951_v12, %v12303_v56  ;;  %3495 = vrot.lane.b32.xlu0 %v3432_v48, %s9833_s25  ;;  %v4563_v52 = vor.u32 %v4561_v40, %v4560_v13 }
 0x2dd   : > { %v4555_v27 = vshrl.u32 %v4016_v4, 16  ;;  %v3234_v0 = vpop.permute.xlu1 %3233 }
 0x2de   : > { %v3476_v55 = vpop.permute.xlu0 %3475 }
 0x2df   : > { %v4557_v34 = vrot.slane %v4555_v27, 7  ;;  %v4108_v47 = vsel %vm2551_vm12, %v14276_v36, %v3476_v55 }
 0x2e0   : > { %3591 = vrot.lane.b32.xlu0 %v12231_v32, %s9834_s26 }
 0x2e1   : > { %v12372_v38 = vpop.permute.xlu1 %2999  ;;  %v4564_v3 = vsel %vm14275_vm8, %v4557_v34, %v4563_v52  ;;  %vm14288_vm8 = vmmov %vm14193_vm3 }
 0x2e2   : > { %v3572_v28 = vpop.permute.xlu0 %3571  ;;  %5115 = vmatmul.mubr.bf16.gmra.mrb[52].mxu1 %v4564_v3 }
 0x2e3   : > { %v4182_v32 = vsel %vm3913_vm1, %v4108_v47, %v3572_v28 }
 0x2e4   : > { %3493 = vrot.lane.b32.xlu0 %v11954_v41, %s9833_s25  ;;  %v3887_v41 = vsel %vm2551_vm12, %v12298_v25, %v12315_v42  ;;  %v4246_v46 = vsel %vm3978_vm2, %v4182_v32, %v12336_v15  ;;  %v12400_v25 = vld [vmem:[#allocation2 + $0x128] sm:$0xff]  ;;  %s8530_s25 = sshll.u32 %s14075_s17, 4  ;;  %s14098_s25 = int_to_ptr.vmem [resolvable:$true] %s8530_s25 }
 0x2e5   : > { %v12377_v56 = vpop.permute.xlu1 %3143  ;;  %v4600_v20 = vshrl.u32 %v4246_v46, 16  ;;  %v4603_v40 = vshll.u32 %v4246_v46, 16  ;;  %v3338_v27 = vshrl.u32 %v12400_v25, 16  ;;  %s9760_s24 = scalar_lea.vmem %s14098_s25, 2048  ;;  %p9767_p0 = scmp.lt.s32.totalorder %s14098_s25, %s9765_s28 }
 0x2e6   : > { %v3474_v53 = vpop.permute.xlu0 %3473  ;;  %p9761_p11 = scmp.ne.s32.totalorder %s14098_s25, %s9760_s24  ;;  %p9768_p1 = scmp.lt.s32.totalorder %s9766_s16, %s9760_s24 }
 0x2e7   : > { %v4105_v14 = vsel %vm2551_vm12, %v14277_v22, %v3474_v53  ;;  %v4602_v7 = vrot.slane %v4600_v20, 7 }
 0x2e8   : > { %3255 = vrot.lane.b32.xlu0 %v11945_v30, %s9835_s27  ;;  %v3957_v30 = vsel %vm3913_vm1, %v3887_v41, %v12325_v10  ;;  %p9762_p12 = pnand %p9761_p11, %p9926_p5  ;;  %p9769_p2 = por %p9768_p1, %p9767_p0 }
 0x2e9   : > { %v3752_v6 = vpop.permute.xlu1 %3751  ;;  %v4022_v45 = vsel %vm3978_vm2, %v3957_v30, %v3236_v57  ;;  %v4605_v32 = vor.u32 %v4603_v40, %v4602_v7 }
 0x2ea   : > { %v12384_v8 = vpop.permute.xlu0 %9437  ;;  %v4590_v10 = vshrl.u32 %v4022_v45, 16  ;;  %v4593_v34 = vshll.u32 %v4022_v45, 16  ;;  %p9763_p13 = pneg %p9762_p12 }
 0x2eb   : > { %v9439_v5 = vunpack.i.l.bf16 %v12384_v8 }
 0x2ec   : > { %3157 = vrot.lane.b32.xlu0 %v11959_v39, %s9834_s26  ;;  %v3335_v39 = vshll.u32 %v12400_v25, 16  ;;  %v4592_v12 = vrot.slane %v4590_v10, 7  ;;  %p9770_p3 = pnand %p9769_p2, %p9763_p13 }
 0x2ed   : > { %v3885_v63 = vsel %vm2551_vm12, %v2716_v37, %v9439_v5  ;;  %v3574_v17 = vpop.permute.xlu1 %3573 }
 0x2ee   : > { %v3570_v33 = vpop.permute.xlu0 %3569  ;;  %v3955_v1 = vsel %vm3913_vm1, %v3885_v63, %v3138_v11  ;;  %v3337_v13 = vrot.slane %v3335_v39, 1  ;;  %v4595_v37 = vor.u32 %v4593_v34, %v4592_v12  ;;  %v9440_v12 = vunpack.i.h.bf16 %v12384_v8 }
 0x2ef   : > { %v4020_v42 = vsel %vm3978_vm2, %v3955_v1, %v3234_v0  ;;  %v4180_v11 = vsel %vm3913_vm1, %v4105_v14, %v3570_v33 }
 0x2f0   : > { %3253 = vrot.lane.b32.xlu0 %v2774_v59, %s9835_s27  ;;  %v4587_v54 = vshrl.u32 %v4020_v42, 16  ;;  %v3340_v53 = vor.u32 %v3338_v27, %v3337_v13  ;;  %v2718_v27 = vld [vmem:[#allocation2 + $0x108] sm:$0x80] }
 0x2f1   : > { %v12404_v15 = vpop.permute.xlu1 %3237 }
 0x2f2   : > { %v9443_v61 = vpop.permute.xlu0 %9442  ;;  %v4589_v28 = vrot.slane %v4587_v54, 7 }
 0x2f3   : > { %v9444_v57 = vunpack.i.l.bf16 %v9443_v61  ;;  %v9445_v42 = vunpack.i.h.bf16 %v9443_v61 }
 0x2f4   : > { %v4596_v45 = vsel %vm14279_vm10, %v4589_v28, %v4595_v37  ;;  %vm14290_vm10 = vmmov %vm14193_vm3 }
 0x2f5   : > { %v12409_v48 = vpop.permute.xlu1 %3003  ;;  %v4244_v4 = vsel %vm3978_vm2, %v4180_v11, %v9444_v57  ;;  %v9730_v57 = vld [vmem:[#allocation2 + $0x110] sm:$0xff] }
 0x2f6   : > { %v3480_v0 = vpop.permute.xlu0 %3479  ;;  %v12413_v55 = vpop.f32.mrb[28].mxu0  ;;  %v4597_v52 = vshrl.u32 %v4244_v4, 16  ;;  %v3892_v54 = vsel %vm2551_vm12, %v9730_v57, %v12372_v38  ;;  %v3890_v38 = vsel %vm2551_vm12, %v2718_v27, %v9440_v12 }
 0x2f7   : > { %v12415_v3 = vpop.f32.mrb[29].mxu0  ;;  %v4114_v30 = vsel %vm2551_vm12, %v3340_v53, %v3480_v0 }
 0x2f8   : > { %v12417_v36 = vpop.f32.mrb[30].mxu0  ;;  %v4599_v47 = vrot.slane %v4597_v52, 7 }
 0x2f9   : > { %v12419_v5 = vpop.f32.mrb[31].mxu0  ;;  %v3148_v41 = vpop.permute.xlu1 %3147 }
 0x2fa   : > { %v3576_v46 = vpop.permute.xlu0 %3575  ;;  %v4606_v63 = vsel %vm14278_vm9, %v4599_v47, %v4605_v32  ;;  %vm14289_vm9 = vmmov %vm14193_vm3 }
 0x2fb   : > { %v4186_v59 = vsel %vm3913_vm1, %v4114_v30, %v3576_v46  ;;  %5122 = vmatprep.mubr.bf16.mxu1 %v4606_v63 }
 0x2fc   : > { %v4250_v33 = vsel %vm3978_vm2, %v4186_v59, %v3752_v6  ;;  %5123 = vmatmul.mubr.bf16.gmra.mrb[56].mxu1 %v4596_v45  ;;  %v3961_v6 = vsel %vm3913_vm1, %v3892_v54, %v12377_v56 }
 0x2fd   : > { %v4632_v1 = vshrl.u32 %v4250_v33, 16  ;;  %v3756_v20 = vpop.permute.xlu1 %3755  ;;  %v4635_v4 = vshll.u32 %v4250_v33, 16 }
 0x2fe   : > { %v3478_v39 = vpop.permute.xlu0 %3477 }
 0x2ff   : > { %v4111_v10 = vsel %vm2551_vm12, %v3337_v13, %v3478_v39  ;;  %v4634_v22 = vrot.slane %v4632_v1, 7 }
 0x300   : > { %v4184_v14 = vsel %vm3913_vm1, %v4111_v10, %v3574_v17 }
 0x301   : > { %v4248_v7 = vsel %vm3978_vm2, %v4184_v14, %v9445_v42  ;;  %v3244_v11 = vpop.permute.xlu1 %3243  ;;  %v4637_v52 = vor.u32 %v4635_v4, %v4634_v22  ;;  %v2720_v14 = vld [vmem:[#allocation2 + $0x120] sm:$0x80] }
 0x302   : > { %v4629_v40 = vshrl.u32 %v4248_v7, 16  ;;  %v3240_v61 = vpop.permute.xlu0 %3239 }
 0x303   : > { %v4026_v13 = vsel %vm3978_vm2, %v3961_v6, %v3240_v61  ;;  %v3897_v6 = vsel %vm2551_vm12, %v12400_v25, %v12409_v48 }
 0x304   : > { %v4622_v0 = vshrl.u32 %v4026_v13, 16  ;;  %v4631_v17 = vrot.slane %v4629_v40, 7  ;;  %v4625_v32 = vshll.u32 %v4026_v13, 16  ;;  %v3965_v4 = vsel %vm3913_vm1, %v3897_v6, %v3148_v41 }
 0x305   : > { %v3146_v34 = vpop.permute.xlu1 %3145  ;;  %v4030_v27 = vsel %vm3978_vm2, %v3965_v4, %v3244_v11 }
 0x306   : > { %v3142_v28 = vpop.permute.xlu0 %3141  ;;  %v4638_v53 = vsel %vm14280_vm14, %v4631_v17, %v4637_v52  ;;  %v4624_v47 = vrot.slane %v4622_v0, 7  ;;  %v4654_v48 = vshrl.u32 %v4030_v27, 16  ;;  %vm14291_vm14 = vmmov %vm14193_vm3 }
 0x307   : > { %v3959_v56 = vsel %vm3913_vm1, %v3890_v38, %v3142_v28  ;;  %5130 = vmatprep.mubr.bf16.mxu1 %v4638_v53 }
 0x308   : > { %v4024_v8 = vsel %vm3978_vm2, %v3959_v56, %v12404_v15  ;;  %v4627_v63 = vor.u32 %v4625_v32, %v4624_v47 }
 0x309   : > { %v4619_v37 = vshrl.u32 %v4024_v8, 16  ;;  %v3242_v30 = vpop.permute.xlu1 %3241  ;;  %v4656_v8 = vrot.slane %v4654_v48, 7 }
 0x30a   : > { %v3484_v46 = vpop.permute.xlu0 %3483 }
 0x30b   : > { %v4621_v59 = vrot.slane %v4619_v37, 7  ;;  %v4120_v10 = vsel %vm2551_vm12, %v11928_v19, %v3484_v46 }
 0x30d   : > { %v3008_v45 = vpop.permute.xlu1 %3007  ;;  %v4628_v33 = vsel %vm14281_vm11, %v4621_v59, %v4627_v63  ;;  %v4657_v63 = vshll.u32 %v4030_v27, 16 }
 0x30e   : > { %v3580_v1 = vpop.permute.xlu0 %3579  ;;  %5131 = vmatmul.mubr.bf16.gmra.mrb[60].mxu1 %v4628_v33 }
 0x30f   : > { %v4190_v15 = vsel %vm3913_vm1, %v4120_v10, %v3580_v1  ;;  %v4659_v10 = vor.u32 %v4657_v63, %v4656_v8 }
 0x310   : > { %v4254_v19 = vsel %vm3978_vm2, %v4190_v15, %v3756_v20 }
 0x311   : > { %v12441_v39 = vpop.permute.xlu1 %3151  ;;  %v4664_v28 = vshrl.u32 %v4254_v19, 16  ;;  %v4667_v37 = vshll.u32 %v4254_v19, 16 }
 0x312   : > { %v3482_v42 = vpop.permute.xlu0 %3481 }
 0x313   : > { %v4117_v20 = vsel %vm2551_vm12, %v11913_v50, %v3482_v42  ;;  %v4666_v56 = vrot.slane %v4664_v28, 7  ;;  %v9731_v28 = vld [vmem:[#allocation2 + $0x140] sm:$0xff] }
 0x315   : > { %v3760_v22 = vpop.permute.xlu1 %3759  ;;  %v4669_v1 = vor.u32 %v4667_v37, %v4666_v56 }
 0x316   : > { %v12446_v57 = vpop.permute.xlu0 %9447  ;;  %v12449_v7 = vpop.f32.mrb[32].mxu0 }
 0x317   : > { %v9449_v54 = vunpack.i.l.bf16 %v12446_v57  ;;  %v12454_v12 = vpop.f32.mrb[33].mxu0  ;;  %v9450_v8 = vunpack.i.h.bf16 %v12446_v57 }
 0x318   : > { %v12459_v61 = vpop.f32.mrb[34].mxu0 }
 0x319   : > { %v3895_v40 = vsel %vm2551_vm12, %v2720_v14, %v9449_v54  ;;  %v3582_v13 = vpop.permute.xlu1 %3581  ;;  %v12462_v0 = vpop.f32.mrb[35].mxu0 }
 0x31a   : > { %v3578_v17 = vpop.permute.xlu0 %3577  ;;  %v3963_v52 = vsel %vm3913_vm1, %v3895_v40, %v3146_v34 }
 0x31b   : > { %v4028_v25 = vsel %vm3978_vm2, %v3963_v52, %v3242_v30  ;;  %v4188_v11 = vsel %vm3913_vm1, %v4117_v20, %v3578_v17 }
 0x31c   : > { %v4651_v47 = vshrl.u32 %v4028_v25, 16  ;;  %v3902_v25 = vsel %vm2551_vm12, %v9731_v28, %v3008_v45  ;;  %v5667_v28 = vld [vmem:[#allocation3 + $0x30] sm:$0x80] }
 0x31d   : > { %v12466_v38 = vpop.permute.xlu1 %3245 }
 0x31e   : > { %v9453_v41 = vpop.permute.xlu0 %9452  ;;  %v4653_v59 = vrot.slane %v4651_v47, 7 }
 0x31f   : > { %v9454_v53 = vunpack.i.l.bf16 %v9453_v41  ;;  %v9455_v17 = vunpack.i.h.bf16 %v9453_v41  ;;  %v3969_v41 = vsel %vm3913_vm1, %v3902_v25, %v12441_v39 }
 0x320   : > { %v4660_v6 = vsel %vm14282_vm15, %v4653_v59, %v4659_v10  ;;  %vm14309_vm15 = vmmov %vm14193_vm3 }
 0x321   : > { %v12471_v32 = vpop.permute.xlu1 %3011  ;;  %v4252_v34 = vsel %vm3978_vm2, %v4188_v11, %v9454_v53 }
 0x322   : > { %v3488_v46 = vpop.permute.xlu0 %3487  ;;  %v4661_v30 = vshrl.u32 %v4252_v34, 16 }
 0x323   : > { %v4126_v50 = vsel %vm2551_vm12, %v12047_v26, %v3488_v46 }
 0x324   : > { %v4663_v33 = vrot.slane %v4661_v30, 7 }
 0x325   : > { %v12474_v15 = vpop.permute.xlu1 %3155 }
 0x326   : > { %v3584_v42 = vpop.permute.xlu0 %3583  ;;  %v4670_v14 = vsel %vm14193_vm3, %v4663_v33, %v4669_v1  ;;  %v2722_v33 = vld [vmem:[#allocation2 + $0x138] sm:$0x80] }
 0x327   : > { %v4194_v54 = vsel %vm3913_vm1, %v4126_v50, %v3584_v42  ;;  %5138 = vmatprep.mubr.bf16.mxu1 %v4670_v14  ;;  %v5793_v1 = vld [vmem:[#allocation3 + $0x8] sm:$0xff] }
 0x328   : > { %v4258_v4 = vsel %vm3978_vm2, %v4194_v54, %v3760_v22  ;;  %5139 = vmatmul.mubr.bf16.gmra.mrb[64].mxu1 %v4660_v6  ;;  %v12491_v22 = vld [vmem:[%s14150_s4] ss:$0 sm:$0xff]  ;;  %v5938_v54 = vshll.u32 %v5793_v1, 16  ;;  %v5941_v6 = vshrl.u32 %v5793_v1, 16 }
 0x329   : > { %v4696_v19 = vshrl.u32 %v4258_v4, 16  ;;  %v12482_v40 = vpop.permute.xlu1 %3763  ;;  %v4699_v34 = vshll.u32 %v4258_v4, 16  ;;  %v5670_v4 = vld [vmem:[#allocation3 + $0x48] sm:$0x80] }
 0x32a   : > { %v3486_v27 = vpop.permute.xlu0 %3485  ;;  %v9007_v26 = vpop.f32.mrb[16].mxu1 }
 0x32b   : > { %v4123_v52 = vsel %vm2551_vm12, %v12020_v49, %v3486_v27  ;;  %v4698_v48 = vrot.slane %v4696_v19, 7  ;;  %v9008_v53 = vpop.f32.mrb[17].mxu1 }
 0x32c   : > { %v4192_v20 = vsel %vm3913_vm1, %v4123_v52, %v3582_v13  ;;  %v9009_v49 = vadd.f32 %v9008_v53, %v9007_v26  ;;  %v9010_v56 = vpop.f32.mrb[18].mxu1  ;;  %v5664_v13 = vld [vmem:[#allocation3 + $0x18] sm:$0x80]  ;;  %v5671_v26 = vsel %vm12499_vm5, 0, %v5670_v4  ;;  %v12517_v53 = vrot.slane %v5938_v54, 1 }
 0x32d   : > { %v4256_v47 = vsel %vm3978_vm2, %v4192_v20, %v9455_v17  ;;  %v12496_v11 = vpop.permute.xlu1 %3251  ;;  %v9011_v30 = vpop.f32.mrb[19].mxu1  ;;  %v5665_v39 = vsel %vm12499_vm5, 0, %v5664_v13  ;;  %v4701_v14 = vor.u32 %v4699_v34, %v4698_v48  ;;  %v3900_v17 = vsel %vm2551_vm12, %v2722_v33, %v9450_v8  ;;  %5672 = vst [vmem:[#allocation3 + $0x48] sm:$0x80] %v5671_v26 }
 0x32e   : > { %v4693_v37 = vshrl.u32 %v4256_v47, 16  ;;  %v3248_v46 = vpop.permute.xlu0 %3247  ;;  %v5045_v63 = vadd.f32 %v9009_v49, %v12491_v22  ;;  %5666 = vst [vmem:[#allocation3 + $0x18] sm:$0x80] %v5665_v39  ;;  %v9012_v50 = vadd.f32 %v9011_v30, %v9010_v56  ;;  %v5668_v56 = vsel %vm12499_vm5, 0, %v5667_v28 }
 0x32f   : > { %v4034_v59 = vsel %vm3978_vm2, %v3969_v41, %v3248_v46  ;;  %v5943_v46 = vor.u32 %v5941_v6, %v12517_v53  ;;  %5669 = vst [vmem:[#allocation3 + $0x30] sm:$0x80] %v5668_v56  ;;  %v9732_v56 = vld [vmem:[#allocation2 + $0x158] sm:$0xff] }
 0x330   : > { %v4686_v10 = vshrl.u32 %v4034_v59, 16  ;;  %v4695_v42 = vrot.slane %v4693_v37, 7  ;;  %v5206_v57 = vadd.f32 %v12123_v24, %v5045_v63  ;;  %v5048_v19 = vadd.f32 %v9012_v50, %v12491_v22 }
 0x331   : > { %v12514_v20 = vpop.permute.xlu1 %3153  ;;  %v4689_v13 = vshll.u32 %v4034_v59, 16  ;;  %6051 = vrot.lane.b32.xlu0 %v5943_v46, %s9834_s26 }
 0x332   : > { %v3150_v27 = vpop.permute.xlu0 %3149  ;;  %v4702_v52 = vsel %vm14285_vm13, %v4695_v42, %v4701_v14  ;;  %v4688_v25 = vrot.slane %v4686_v10, 7  ;;  %v9013_v24 = vpop.f32.mrb[20].mxu1  ;;  %v5209_v41 = vadd.f32 %v12138_v9, %v5048_v19  ;;  %v5332_v30 = vmax.f32 %v5206_v57, 0.0  ;;  %vm14312_vm13 = vmmov %vm14193_vm3 }
 0x333   : > { %v3967_v48 = vsel %vm3913_vm1, %v3900_v17, %v3150_v27  ;;  %5146 = vmatprep.mubr.bf16.mxu1 %v4702_v52  ;;  %v9014_v49 = vpop.f32.mrb[21].mxu1 }
 0x334   : > { %v4032_v47 = vsel %vm3978_vm2, %v3967_v48, %v12466_v38  ;;  %v9015_v34 = vadd.f32 %v9014_v49, %v9013_v24  ;;  %v9016_v37 = vpop.f32.mrb[22].mxu1  ;;  %v5333_v39 = vmax.f32 %v5209_v41, 0.0  ;;  %v4691_v9 = vor.u32 %v4689_v13, %v4688_v25  ;;  %v5844_v52 = vld [vmem:[#allocation3 + $0x48] sm:$0x80]  ;;  %v2724_v13 = vld [vmem:[#allocation2 + $0x150] sm:$0x80] }
 0x335   : > { %v4683_v8 = vshrl.u32 %v4032_v47, 16  ;;  %v9017_v33 = vpop.f32.mrb[23].mxu1  ;;  %v5840_v1 = vld [vmem:[#allocation3 + $0x18] sm:$0x80]  ;;  %v3250_v54 = vpop.permute.xlu1 %3249 }
 0x336   : > { %v3492_v63 = vpop.permute.xlu0 %3491  ;;  %v5053_v38 = vadd.f32 %v9015_v34, %v12491_v22  ;;  %v9018_v50 = vadd.f32 %v9017_v33, %v9016_v37  ;;  %v12526_v42 = vpop.f32.mrb[36].mxu0  ;;  %6225 = vrot.lane.b32.xlu1 %v5840_v1, %s9834_s26  ;;  %v5364_v59 = vpack.c.bf16 %v5333_v39, %v5332_v30  ;;  %v5842_v28 = vld [vmem:[#allocation3 + $0x30] sm:$0x80] }
 0x337   : > { %v4685_v10 = vrot.slane %v4683_v8, 7  ;;  %v12530_v14 = vpop.f32.mrb[37].mxu0  ;;  %6229 = vrot.lane.b32.xlu0 %v5842_v28, %s9834_s26  ;;  %v4132_v24 = vsel %vm2551_vm12, %v12170_v23, %v3492_v63 }
 0x338   : > { %v5214_v57 = vadd.f32 %v12117_v60, %v5053_v38  ;;  %v5056_v6 = vadd.f32 %v9018_v50, %v12491_v22  ;;  %v12535_v19 = vpop.f32.mrb[38].mxu0  ;;  %9239 = vmatprep.mubr.msk.bf16.mxu0 %vm2551_vm12, %v5364_v59 }
 0x339   : > { %v4692_v4 = vsel %vm14286_vm6, %v4685_v10, %v4691_v9  ;;  %v12538_v17 = vpop.f32.mrb[39].mxu0  ;;  %v12545_v47 = vpop.permute.xlu1 %3015  ;;  %vm14313_vm6 = vmmov %vm14193_vm3 }
 0x33a   : > { %v3588_v27 = vpop.permute.xlu0 %3587  ;;  %5147 = vmatmul.mubr.bf16.gmra.mrb[68].mxu1 %v4692_v4  ;;  %v5217_v26 = vadd.f32 %v12132_v21, %v5056_v6  ;;  %6233 = vrot.lane.b32.xlu1 %v5844_v52, %s9834_s26  ;;  %v5334_v60 = vmax.f32 %v5214_v57, 0.0  ;;  %v3907_v21 = vsel %vm2551_vm12, %v9732_v56, %v12471_v32 }
 0x33b   : > { %v4198_v49 = vsel %vm3913_vm1, %v4132_v24, %v3588_v27  ;;  %v3973_v34 = vsel %vm3913_vm1, %v3907_v21, %v12474_v15 }
 0x33c   : > { %v5335_v25 = vmax.f32 %v5217_v26, 0.0  ;;  %v4262_v23 = vsel %vm3978_vm2, %v4198_v49, %v12482_v40  ;;  %v4038_v46 = vsel %vm3978_vm2, %v3973_v34, %v12496_v11 }
 0x33d   : > { %v3160_v30 = vpop.permute.xlu1 %3159  ;;  %v4728_v63 = vshrl.u32 %v4262_v23, 16  ;;  %v4718_v1 = vshrl.u32 %v4038_v46, 16  ;;  %v4731_v6 = vshll.u32 %v4262_v23, 16  ;;  %v4721_v27 = vshll.u32 %v4038_v46, 16 }
 0x33e   : > { %v3490_v48 = vpop.permute.xlu0 %3489  ;;  %v5365_v41 = vpack.c.bf16 %v5335_v25, %v5334_v60 }
 0x33f   : > { %v4129_v15 = vsel %vm2551_vm12, %v12163_v51, %v3490_v48  ;;  %v4730_v38 = vrot.slane %v4728_v63, 7  ;;  %v4720_v59 = vrot.slane %v4718_v1, 7 }
 0x340   : > { %9240 = vmatmul.mubr.msk.bf16.vlgmr.msra.gmra.mrb[48].mxu0 %vm2551_vm12, %v5365_v41 }
 0x341   : > { %v3768_v40 = vpop.permute.xlu1 %3767  ;;  %v4733_v28 = vor.u32 %v4731_v6, %v4730_v38 }
 0x342   : > { %v12551_v8 = vpop.permute.xlu0 %9457 }
 0x343   : > { %v9459_v37 = vunpack.i.l.bf16 %v12551_v8 }
 0x345   : > { %v3905_v39 = vsel %vm2551_vm12, %v2724_v13, %v9459_v37  ;;  %v3590_v60 = vpop.permute.xlu1 %3589 }
 0x346   : > { %v3586_v33 = vpop.permute.xlu0 %3585  ;;  %v3971_v32 = vsel %vm3913_vm1, %v3905_v39, %v12514_v20 }
 0x347   : > { %v4036_v9 = vsel %vm3978_vm2, %v3971_v32, %v3250_v54  ;;  %v4196_v50 = vsel %vm3913_vm1, %v4129_v15, %v3586_v33  ;;  %v4723_v54 = vor.u32 %v4721_v27, %v4720_v59 }
 0x348   : > { %v4715_v10 = vshrl.u32 %v4036_v9, 16 }
 0x349   : > { %v3766_v46 = vpop.permute.xlu1 %3765 }
 0x34a   : > { %v3762_v11 = vpop.permute.xlu0 %3761  ;;  %v4717_v52 = vrot.slane %v4715_v10, 7 }
 0x34b   : > { %v4260_v57 = vsel %vm3978_vm2, %v4196_v50, %v3762_v11  ;;  %v9733_v50 = vld [vmem:[#allocation2 + $0x170] sm:$0xff] }
 0x34c   : > { %v4725_v4 = vshrl.u32 %v4260_v57, 16  ;;  %v4724_v25 = vsel %vm14288_vm8, %v4717_v52, %v4723_v54  ;;  %v3912_v11 = vsel %vm2551_vm12, %v9733_v50, %v12545_v47  ;;  %vm14315_vm8 = vmmov %vm14193_vm3 }
 0x34e   : > { %v4727_v20 = vrot.slane %v4725_v4, 7  ;;  %v3496_v26 = vpop.permute.xlu0 %3495 }
 0x34f   : > { %v4138_v48 = vsel %vm2551_vm12, %v12237_v35, %v3496_v26 }
 0x350   : > { %v4734_v51 = vsel %vm14287_vm7, %v4727_v20, %v4733_v28  ;;  %v5673_v20 = vld [vmem:[#allocation3 + $0x60] sm:$0x80]  ;;  %vm14314_vm7 = vmmov %vm14193_vm3 }
 0x351   : > { %5154 = vmatprep.mubr.bf16.mxu1 %v4734_v51  ;;  %v5674_v54 = vsel %vm12499_vm5, 0, %v5673_v20 }
 0x352   : > { %v3592_v24 = vpop.permute.xlu0 %3591  ;;  %5155 = vmatmul.mubr.bf16.gmra.mrb[72].mxu1 %v4724_v25  ;;  %v9019_v41 = vpop.f32.mrb[24].mxu1  ;;  %5675 = vst [vmem:[#allocation3 + $0x60] sm:$0x80] %v5674_v54 }
 0x353   : > { %v4202_v49 = vsel %vm3913_vm1, %v4138_v48, %v3592_v24  ;;  %v9020_v56 = vpop.f32.mrb[25].mxu1 }
 0x354   : > { %v4266_v21 = vsel %vm3978_vm2, %v4202_v49, %v3768_v40  ;;  %v9021_v13 = vadd.f32 %v9020_v56, %v9019_v41  ;;  %v9022_v34 = vpop.f32.mrb[26].mxu1  ;;  %v2726_v56 = vld [vmem:[#allocation2 + $0x168] sm:$0x80] }
 0x355   : > { %v4760_v23 = vshrl.u32 %v4266_v21, 16  ;;  %v9023_v37 = vpop.f32.mrb[27].mxu1  ;;  %v4763_v6 = vshll.u32 %v4266_v21, 16 }
 0x356   : > { %v5061_v39 = vadd.f32 %v9021_v13, %v12491_v22  ;;  %v3494_v63 = vpop.permute.xlu0 %3493  ;;  %v9024_v33 = vadd.f32 %v9023_v37, %v9022_v34  ;;  %v12575_v32 = vpop.f32.mrb[40].mxu0 }
 0x357   : > { %v4135_v35 = vsel %vm2551_vm12, %v12223_v29, %v3494_v63  ;;  %v12579_v1 = vpop.f32.mrb[41].mxu0  ;;  %v4762_v9 = vrot.slane %v4760_v23, 7  ;;  %v3977_v29 = vsel %vm3913_vm1, %v3912_v11, %v3160_v30  ;;  %v9460_v30 = vunpack.i.h.bf16 %v12551_v8 }
 0x358   : > { %v5222_v15 = vadd.f32 %v12242_v2, %v5061_v39  ;;  %v5064_v40 = vadd.f32 %v9024_v33, %v12491_v22  ;;  %v4200_v10 = vsel %vm3913_vm1, %v4135_v35, %v3590_v60  ;;  %v12584_v38 = vpop.f32.mrb[42].mxu0 }
 0x359   : > { %v4264_v59 = vsel %vm3978_vm2, %v4200_v10, %v3766_v46  ;;  %v12589_v57 = vpop.f32.mrb[43].mxu0  ;;  %v4765_v48 = vor.u32 %v4763_v6, %v4762_v9  ;;  %v3910_v8 = vsel %vm2551_vm12, %v2726_v56, %v9460_v30 }
 0x35a   : > { %v5225_v4 = vadd.f32 %v12251_v58, %v5064_v40  ;;  %v4757_v2 = vshrl.u32 %v4264_v59, 16  ;;  %v3256_v27 = vpop.permute.xlu0 %3255  ;;  %v9025_v52 = vpop.f32.mrb[28].mxu1  ;;  %v5336_v47 = vmax.f32 %v5222_v15, 0.0  ;;  %v5846_v15 = vld [vmem:[#allocation3 + $0x60] sm:$0x80] }
 0x35b   : > { %v4042_v26 = vsel %vm3978_vm2, %v3977_v29, %v3256_v27  ;;  %v9026_v28 = vpop.f32.mrb[29].mxu1  ;;  %6237 = vrot.lane.b32.xlu0 %v5846_v15, %s9834_s26 }
 0x35c   : > { %v5337_v60 = vmax.f32 %v5225_v4, 0.0  ;;  %v4759_v51 = vrot.slane %v4757_v2, 7  ;;  %v9028_v25 = vpop.f32.mrb[30].mxu1  ;;  %v9027_v24 = vadd.f32 %v9026_v28, %v9025_v52  ;;  %v4750_v49 = vshrl.u32 %v4042_v26, 16 }
 0x35d   : > { %v9029_v58 = vpop.f32.mrb[31].mxu1  ;;  %v4753_v40 = vshll.u32 %v4042_v26, 16 }
 0x35e   : > { %v5366_v41 = vpack.c.bf16 %v5337_v60, %v5336_v47  ;;  %v3158_v21 = vpop.permute.xlu0 %3157  ;;  %v9030_v13 = vadd.f32 %v9029_v58, %v9028_v25  ;;  %v4766_v34 = vsel %vm14289_vm9, %v4759_v51, %v4765_v48  ;;  %v5069_v23 = vadd.f32 %v9027_v24, %v12491_v22  ;;  %vm14316_vm9 = vmmov %vm14193_vm3 }
 0x35f   : > { %5162 = vmatprep.mubr.bf16.mxu1 %v4766_v34  ;;  %v4752_v39 = vrot.slane %v4750_v49, 7  ;;  %v3975_v63 = vsel %vm3913_vm1, %v3910_v8, %v3158_v21 }
 0x360   : > { %v5072_v37 = vadd.f32 %v9030_v13, %v12491_v22  ;;  %9243 = vmatprep.mubr.msk.bf16.mxu0 %vm2551_vm12, %v5366_v41  ;;  %v5230_v46 = vadd.f32 %v12240_v62, %v5069_v23 }
 0x361   : > { %v4755_v59 = vor.u32 %v4753_v40, %v4752_v39 }
 0x362   : > { %v5233_v33 = vadd.f32 %v12249_v44, %v5072_v37  ;;  %v3254_v35 = vpop.permute.xlu0 %3253  ;;  %v5338_v10 = vmax.f32 %v5230_v46, 0.0 }
 0x363   : > { %v4040_v9 = vsel %vm3978_vm2, %v3975_v63, %v3254_v35  ;;  %vm5650_vm2 = vcmask 516096  }
 0x364   : > { %v5339_v50 = vmax.f32 %v5233_v33, 0.0  ;;  %v4747_v11 = vshrl.u32 %v4040_v9, 16  ;;  %vm12638_vm11 = vmand %vm5650_vm2, %vm14291_vm14 }
 0x365   : > { %vm14318_vm2 = vmmov %vm14193_vm3 }
 0x366   : > { %v5367_v29 = vpack.c.bf16 %v5339_v50, %v5338_v10  ;;  %v4749_v62 = vrot.slane %v4747_v11, 7  ;;  %vm14319_vm14 = vmmov %vm14318_vm2 }
 0x368   : > { %v4756_v6 = vsel %vm14290_vm10, %v4749_v62, %v4755_v59  ;;  %9244 = vmatmul.mubr.msk.bf16.gmra.mrb[52].mxu0 %vm2551_vm12, %v5367_v29  ;;  %vm14317_vm10 = vmmov %vm14193_vm3 }
 0x369   : > { %5163 = vmatmul.mubr.bf16.gmra.mrb[76].mxu1 %v4756_v6 }
 0x36a   : > { %v9031_v4 = vpop.f32.mrb[32].mxu1 }
 0x36b   : > { %v9032_v44 = vpop.f32.mrb[33].mxu1 }
 0x36c   : > { %v9033_v2 = vadd.f32 %v9032_v44, %v9031_v4  ;;  %v9034_v27 = vpop.f32.mrb[34].mxu1 }
 0x36d   : > { %v9035_v52 = vpop.f32.mrb[35].mxu1 }
 0x36e   : > { %v5077_v20 = vadd.f32 %v9033_v2, %v12491_v22  ;;  %v9036_v26 = vadd.f32 %v9035_v52, %v9034_v27 }
 0x370   : > { %v5238_v28 = vadd.f32 %v12352_v43, %v5077_v20  ;;  %v5080_v54 = vadd.f32 %v9036_v26, %v12491_v22 }
 0x372   : > { %v5241_v47 = vadd.f32 %v12360_v16, %v5080_v54  ;;  %v9037_v60 = vpop.f32.mrb[36].mxu1  ;;  %v5340_v25 = vmax.f32 %v5238_v28, 0.0 }
 0x373   : > { %v9038_v51 = vpop.f32.mrb[37].mxu1 }
 0x374   : > { %v5341_v48 = vmax.f32 %v5241_v47, 0.0  ;;  %v9039_v30 = vadd.f32 %v9038_v51, %v9037_v60  ;;  %v9040_v24 = vpop.f32.mrb[38].mxu1  ;;  %v5712_v51 = vld [vmem:[#allocation3 + $0x28] sm:$0x1] }
 0x375   : > { %v9041_v58 = vpop.f32.mrb[39].mxu1 }
 0x376   : > { %v5368_v41 = vpack.c.bf16 %v5341_v48, %v5340_v25  ;;  %v5085_v49 = vadd.f32 %v9039_v30, %v12491_v22  ;;  %v9042_v56 = vadd.f32 %v9041_v58, %v9040_v24  ;;  %v5713_v48 = vsel %vm12638_vm11, 0, %v5712_v51 }
 0x377   : > { %5714 = vst [vmem:[#allocation3 + $0x28] sm:$0x1] %v5713_v48  ;;  %v5724_v48 = vld [vmem:[#allocation3 + $0x88] sm:$0x1] }
 0x378   : > { %v5246_v21 = vadd.f32 %v12349_v18, %v5085_v49  ;;  %v5088_v13 = vadd.f32 %v9042_v56, %v12491_v22  ;;  %9247 = vmatprep.mubr.msk.bf16.mxu0 %vm2551_vm12, %v5368_v41 }
 0x37a   : > { %v5249_v43 = vadd.f32 %v12358_v31, %v5088_v13  ;;  %v9043_v16 = vpop.f32.mrb[40].mxu1  ;;  %v5342_v23 = vmax.f32 %v5246_v21, 0.0 }
 0x37b   : > { %v9044_v34 = vpop.f32.mrb[41].mxu1 }
 0x37c   : > { %v5343_v37 = vmax.f32 %v5249_v43, 0.0  ;;  %v9045_v46 = vadd.f32 %v9044_v34, %v9043_v16  ;;  %v9046_v8 = vpop.f32.mrb[42].mxu1 }
 0x37d   : > { %v9047_v39 = vpop.f32.mrb[43].mxu1 }
 0x37e   : > { %v5369_v63 = vpack.c.bf16 %v5343_v37, %v5342_v23  ;;  %v5093_v33 = vadd.f32 %v9045_v46, %v12491_v22  ;;  %v9048_v35 = vadd.f32 %v9047_v39, %v9046_v8 }
 0x380   : > { %v5254_v9 = vadd.f32 %v12415_v3, %v5093_v33  ;;  %v5096_v18 = vadd.f32 %v9048_v35, %v12491_v22  ;;  %9248 = vmatmul.mubr.msk.bf16.gmra.mrb[56].mxu0 %vm2551_vm12, %v5369_v63 }
 0x382   : > { %v5257_v15 = vadd.f32 %v12419_v5, %v5096_v18  ;;  %v5344_v31 = vmax.f32 %v5254_v9, 0.0 }
 0x384   : > { %v5345_v40 = vmax.f32 %v5257_v15, 0.0 }
 0x386   : > { %v5370_v10 = vpack.c.bf16 %v5345_v40, %v5344_v31  ;;  %v5721_v31 = vld [vmem:[#allocation3 + $0x70] sm:$0x1] }
 0x387   : > { %v5722_v40 = vsel %vm12638_vm11, 0, %v5721_v31 }
 0x388   : > { %9251 = vmatprep.mubr.msk.bf16.mxu0 %vm2551_vm12, %v5370_v10  ;;  %v5718_v10 = vld [vmem:[#allocation3 + $0x58] sm:$0x1]  ;;  %5723 = vst [vmem:[#allocation3 + $0x70] sm:$0x1] %v5722_v40 }
 0x389   : > { %v9049_v50 = vpop.f32.mrb[44].mxu1 }
 0x38a   : > { %v9050_v11 = vpop.f32.mrb[45].mxu1 }
 0x38b   : > { %v9051_v59 = vadd.f32 %v9050_v11, %v9049_v50  ;;  %v9052_v29 = vpop.f32.mrb[46].mxu1  ;;  %v5719_v50 = vsel %vm12638_vm11, 0, %v5718_v10 }
 0x38c   : > { %v9053_v62 = vpop.f32.mrb[47].mxu1  ;;  %5720 = vst [vmem:[#allocation3 + $0x58] sm:$0x1] %v5719_v50 }
 0x38d   : > { %v5101_v6 = vadd.f32 %v9051_v59, %v12491_v22  ;;  %v9054_v4 = vadd.f32 %v9053_v62, %v9052_v29 }
 0x38e   : > { %v12629_v20 = vpop.f32.mrb[44].mxu0 }
 0x38f   : > { %v5262_v3 = vadd.f32 %v12413_v55, %v5101_v6  ;;  %v5104_v44 = vadd.f32 %v9054_v4, %v12491_v22  ;;  %v12631_v26 = vpop.f32.mrb[45].mxu0  ;;  %v14292_v55 = vmov 0 }
 0x390   : > { %v12633_v28 = vpop.f32.mrb[46].mxu0  ;;  %v14293_v55 = vsel %vm12638_vm11, 4294967295, %v14292_v55 }
 0x391   : > { %v5265_v2 = vadd.f32 %v12417_v36, %v5104_v44  ;;  %v5346_v5 = vmax.f32 %v5262_v3, 0.0  ;;  %v12635_v54 = vpop.f32.mrb[47].mxu0  ;;  %14294 = vst [vmem:[#allocation8_spill] sm:$0xff] %v14293_v55  ;;  %v5715_v36 = vld [vmem:[#allocation3 + $0x40] sm:$0x1] }
 0x392   : > { %v5716_v60 = vsel %vm12638_vm11, 0, %v5715_v36 }
 0x393   : > { %v5347_v27 = vmax.f32 %v5265_v2, 0.0  ;;  %5717 = vst [vmem:[#allocation3 + $0x40] sm:$0x1] %v5716_v60 }
 0x395   : > { %v5371_v52 = vpack.c.bf16 %v5347_v27, %v5346_v5 }
 0x397   : > { %9252 = vmatmul.mubr.msk.bf16.gmra.mrb[60].mxu0 %vm2551_vm12, %v5371_v52 }
 0x3a3   : > { %v9055_v47 = vpop.f32.mrb[48].mxu1 }
 0x3a4   : > { %v9056_v25 = vpop.f32.mrb[49].mxu1 }
 0x3a5   : > { %v9057_v30 = vadd.f32 %v9056_v25, %v9055_v47  ;;  %v9058_v24 = vpop.f32.mrb[50].mxu1  ;;  %v5727_v47 = vld [vmem:[#allocation3 + $0xa0] sm:$0x1] }
 0x3a6   : > { %v9059_v58 = vpop.f32.mrb[51].mxu1  ;;  %v5728_v25 = vsel %vm12638_vm11, 0, %v5727_v47 }
 0x3a7   : > { %v5109_v41 = vadd.f32 %v9057_v30, %v12491_v22  ;;  %v9060_v49 = vadd.f32 %v9059_v58, %v9058_v24  ;;  %5729 = vst [vmem:[#allocation3 + $0xa0] sm:$0x1] %v5728_v25 }
 0x3a9   : > { %v5270_v56 = vadd.f32 %v12454_v12, %v5109_v41  ;;  %v5112_v21 = vadd.f32 %v9060_v49, %v12491_v22 }
 0x3ab   : > { %v5273_v13 = vadd.f32 %v12462_v0, %v5112_v21  ;;  %v5348_v43 = vmax.f32 %v5270_v56, 0.0 }
 0x3ad   : > { %v5349_v16 = vmax.f32 %v5273_v13, 0.0 }
 0x3af   : > { %v5372_v34 = vpack.c.bf16 %v5349_v16, %v5348_v43  ;;  %v5733_v43 = vld [vmem:[#allocation3 + $0xd0] sm:$0x1] }
 0x3b0   : > { %v5734_v16 = vsel %vm12638_vm11, 0, %v5733_v43 }
 0x3b1   : > { %9255 = vmatprep.mubr.msk.bf16.mxu0 %vm2551_vm12, %v5372_v34  ;;  %v5730_v34 = vld [vmem:[#allocation3 + $0xb8] sm:$0x1]  ;;  %5735 = vst [vmem:[#allocation3 + $0xd0] sm:$0x1] %v5734_v16 }
 0x3b5   : > { %v9061_v23 = vpop.f32.mrb[52].mxu1 }
 0x3b6   : > { %v9062_v37 = vpop.f32.mrb[53].mxu1 }
 0x3b7   : > { %v9063_v46 = vadd.f32 %v9062_v37, %v9061_v23  ;;  %v9064_v8 = vpop.f32.mrb[54].mxu1  ;;  %v5731_v23 = vsel %vm12638_vm11, 0, %v5730_v34 }
 0x3b8   : > { %v9065_v39 = vpop.f32.mrb[55].mxu1  ;;  %5732 = vst [vmem:[#allocation3 + $0xb8] sm:$0x1] %v5731_v23 }
 0x3b9   : > { %v5117_v63 = vadd.f32 %v9063_v46, %v12491_v22  ;;  %v9066_v33 = vadd.f32 %v9065_v39, %v9064_v8 }
 0x3bb   : > { %v5278_v35 = vadd.f32 %v12449_v7, %v5117_v63  ;;  %v5120_v12 = vadd.f32 %v9066_v33, %v12491_v22 }
 0x3bd   : > { %v5281_v9 = vadd.f32 %v12459_v61, %v5120_v12  ;;  %v5350_v0 = vmax.f32 %v5278_v35, 0.0 }
 0x3bf   : > { %v5351_v18 = vmax.f32 %v5281_v9, 0.0 }
 0x3c1   : > { %v5373_v15 = vpack.c.bf16 %v5351_v18, %v5350_v0 }
 0x3c3   : > { %9256 = vmatmul.mubr.msk.bf16.gmra.mrb[64].mxu0 %vm2551_vm12, %v5373_v15  ;;  %v5676_v15 = vld [vmem:[#allocation3 + $0x78] sm:$0x80] }
 0x3c4   : > { %v5677_v31 = vsel %vm12499_vm5, 0, %v5676_v15 }
 0x3c5   : > { %5678 = vst [vmem:[#allocation3 + $0x78] sm:$0x80] %v5677_v31 }
 0x3cf   : > { %v9067_v7 = vpop.f32.mrb[56].mxu1 }
 0x3d0   : > { %v9068_v11 = vpop.f32.mrb[57].mxu1 }
 0x3d1   : > { %v9069_v59 = vadd.f32 %v9068_v11, %v9067_v7  ;;  %v9070_v29 = vpop.f32.mrb[58].mxu1 }
 0x3d2   : > { %v9071_v61 = vpop.f32.mrb[59].mxu1 }
 0x3d3   : > { %v5125_v62 = vadd.f32 %v9069_v59, %v12491_v22  ;;  %v9072_v6 = vadd.f32 %v9071_v61, %v9070_v29 }
 0x3d5   : > { %v5286_v4 = vadd.f32 %v12530_v14, %v5125_v62  ;;  %v5128_v3 = vadd.f32 %v9072_v6, %v12491_v22  ;;  %v5725_v14 = vsel %vm12638_vm11, 0, %v5724_v48  ;;  %v5652_v62 = vld [vmem:[#allocation3 + $0x10] sm:$0x1] }
 0x3d6   : > { %5726 = vst [vmem:[#allocation3 + $0x88] sm:$0x1] %v5725_v14 }
 0x3d7   : > { %v5289_v44 = vadd.f32 %v12538_v17, %v5128_v3  ;;  %v5352_v2 = vmax.f32 %v5286_v4, 0.0  ;;  %v5653_v4 = vsel %vm12638_vm11, 0, %v5652_v62 }
 0x3d8   : > { %5654 = vst [vmem:[#allocation3 + $0x10] sm:$0x1] %v5653_v4 }
 0x3d9   : > { %v5353_v5 = vmax.f32 %v5289_v44, 0.0 }
 0x3db   : > { %v5374_v27 = vpack.c.bf16 %v5353_v5, %v5352_v2 }
 0x3dd   : > { %9259 = vmatprep.mubr.msk.bf16.mxu0 %vm2551_vm12, %v5374_v27 }
 0x3e1   : > { %v9073_v52 = vpop.f32.mrb[60].mxu1 }
 0x3e2   : > { %v9074_v36 = vpop.f32.mrb[61].mxu1 }
 0x3e3   : > { %v9075_v60 = vadd.f32 %v9074_v36, %v9073_v52  ;;  %v9076_v51 = vpop.f32.mrb[62].mxu1 }
 0x3e4   : > { %v9077_v30 = vpop.f32.mrb[63].mxu1 }
 0x3e5   : > { %v5133_v17 = vadd.f32 %v9075_v60, %v12491_v22  ;;  %v9078_v24 = vadd.f32 %v9077_v30, %v9076_v51 }
 0x3e7   : > { %v5294_v58 = vadd.f32 %v12526_v42, %v5133_v17  ;;  %v5136_v41 = vadd.f32 %v9078_v24, %v12491_v22 }
 0x3e9   : > { %v5297_v49 = vadd.f32 %v12535_v19, %v5136_v41  ;;  %v5354_v56 = vmax.f32 %v5294_v58, 0.0  ;;  %v5739_v58 = vld [vmem:[#allocation3 + $0x100] sm:$0x1] }
 0x3eb   : > { %v5355_v21 = vmax.f32 %v5297_v49, 0.0 }
 0x3ed   : > { %v5375_v13 = vpack.c.bf16 %v5355_v21, %v5354_v56  ;;  %v5873_v56 = vld [vmem:[#allocation3 + $0x40] sm:$0x1] }
 0x3ef   : > { %9260 = vmatmul.mubr.msk.bf16.gmra.mrb[68].mxu0 %vm2551_vm12, %v5375_v13  ;;  %v5740_v13 = vsel %vm12638_vm11, 0, %v5739_v58 }
 0x3f0   : > { %5741 = vst [vmem:[#allocation3 + $0x100] sm:$0x1] %v5740_v13 }
 0x3fb   : > { %v9079_v37 = vpop.f32.mrb[64].mxu1 }
 0x3fc   : > { %v9080_v42 = vpop.f32.mrb[65].mxu1 }
 0x3fd   : > { %v9081_v46 = vadd.f32 %v9080_v42, %v9079_v37  ;;  %v9082_v8 = vpop.f32.mrb[66].mxu1  ;;  %v5736_v37 = vld [vmem:[#allocation3 + $0xe8] sm:$0x1] }
 0x3fe   : > { %v9083_v19 = vpop.f32.mrb[67].mxu1 }
 0x3ff   : > { %v5141_v39 = vadd.f32 %v9081_v46, %v12491_v22  ;;  %v9084_v63 = vadd.f32 %v9083_v19, %v9082_v8  ;;  %v6421_v8 = vrot.slane %v5873_v56, 1 }
 0x401   : > { %v5302_v33 = vadd.f32 %v12579_v1, %v5141_v39  ;;  %v5144_v35 = vadd.f32 %v9084_v63, %v12491_v22 }
 0x403   : > { %v5305_v12 = vadd.f32 %v12589_v57, %v5144_v35  ;;  %v5356_v9 = vmax.f32 %v5302_v33, 0.0  ;;  %v12689_v57 = vld [vmem:[%s14152_s6] ss:$0 sm:$0xff]  ;;  %v5872_v35 = vld [vmem:[#allocation3 + $0x28] sm:$0x1] }
 0x405   : > { %v5357_v0 = vmax.f32 %v5305_v12, 0.0 }
 0x407   : > { %v5376_v18 = vpack.c.bf16 %v5357_v0, %v5356_v9  ;;  %v5737_v9 = vsel %vm12638_vm11, 0, %v5736_v37 }
 0x408   : > { %5738 = vst [vmem:[#allocation3 + $0xe8] sm:$0x1] %v5737_v9 }
 0x409   : > { %9263 = vmatprep.mubr.msk.bf16.mxu0 %vm2551_vm12, %v5376_v18 }
 0x40d   : > { %v9085_v40 = vpop.f32.mrb[68].mxu1 }
 0x40e   : > { %v9086_v10 = vpop.f32.mrb[69].mxu1 }
 0x40f   : > { %v9087_v50 = vadd.f32 %v9086_v10, %v9085_v40  ;;  %v9088_v7 = vpop.f32.mrb[70].mxu1  ;;  %v6418_v40 = vrot.slane %v5872_v35, 1  ;;  %v5742_v35 = vld [vmem:[#allocation3 + $0x118] sm:$0x1] }
 0x410   : > { %v9089_v11 = vpop.f32.mrb[71].mxu1 }
 0x411   : > { %v5149_v1 = vadd.f32 %v9087_v50, %v12491_v22  ;;  %v9090_v59 = vadd.f32 %v9089_v11, %v9088_v7 }
 0x413   : > { %v5310_v29 = vadd.f32 %v12575_v32, %v5149_v1  ;;  %v5152_v61 = vadd.f32 %v9090_v59, %v12491_v22  ;;  %v9241_v6 = vpop.f32.mrb[48].mxu0 }
 0x414   : > { %v5494_v44 = vadd.f32 %v9241_v6, %v12689_v57  ;;  %v5485_v2 = vpop.f32.mrb[49].mxu0 }
 0x415   : > { %v5313_v3 = vadd.f32 %v12584_v38, %v5152_v61  ;;  %v5486_v5 = vadd.f32 %v12689_v57, %v5485_v2  ;;  %v9242_v27 = vpop.f32.mrb[50].mxu0  ;;  %v5358_v52 = vmax.f32 %v5310_v29, 0.0 }
 0x416   : > { %v5497_v32 = vadd.f32 %v9242_v27, %v12689_v57  ;;  %v5488_v47 = vpop.f32.mrb[51].mxu0  ;;  %v5614_v25 = vmax.f32 %v5494_v44, 0.0 }
 0x417   : > { %v5359_v36 = vmax.f32 %v5313_v3, 0.0  ;;  %v5489_v60 = vadd.f32 %v12689_v57, %v5488_v47  ;;  %v5612_v30 = vmax.f32 %v5486_v5, 0.0 }
 0x418   : > { %v5615_v48 = vmax.f32 %v5497_v32, 0.0 }
 0x419   : > { %v5377_v51 = vpack.c.bf16 %v5359_v36, %v5358_v52  ;;  %v5613_v14 = vmax.f32 %v5489_v60, 0.0 }
 0x41a   : > { %v5761_v38 = vpack.c.bf16 %v5615_v48, %v5614_v25 }
 0x41b   : > { %9264 = vmatmul.mubr.msk.bf16.gmra.mrb[72].mxu0 %vm2551_vm12, %v5377_v51  ;;  %v5760_v17 = vpack.c.bf16 %v5613_v14, %v5612_v30 }
 0x41c   : > { %5777 = vst.msk [vmem:[#allocation3 + $0x38] sm:$0xff] %vm3913_vm1, %v5761_v38 }
 0x41d   : > { %5776 = vst.msk [vmem:[#allocation3 + $0x20] sm:$0xff] %vm3913_vm1, %v5760_v17 }
 0x423   : > { %v12703_v24 = vld [vmem:[#allocation3 + $0x38] sm:$0xff] }
 0x424   : > { %6231 = vrot.lane.b32.xlu0 %v12703_v24, %s9834_s26  ;;  %v5841_v49 = vld [vmem:[#allocation3 + $0x20] sm:$0xff]  ;;  %v6530_v21 = vshll.u32 %v12703_v24, 16  ;;  %v12714_v42 = vrot.slane %v12703_v24, 1  ;;  %v6300_v12 = vshrl.u32 %v12703_v24, 16 }
 0x425   : > { %v9091_v41 = vpop.f32.mrb[72].mxu1  ;;  %6227 = vrot.lane.b32.xlu1 %v5841_v49, %s9834_s26  ;;  %v12711_v16 = vrot.slane %v5841_v49, 1  ;;  %v5945_v39 = vshll.u32 %v5841_v49, 16  ;;  %v6293_v7 = vshrl.u32 %v5841_v49, 16 }
 0x426   : > { %v9092_v43 = vpop.f32.mrb[73].mxu1  ;;  %14295 = vst [vmem:[#allocation27_spill] sm:$0xff] %v12714_v42  ;;  %v12716_v19 = vrot.slane %v6530_v21, 1  ;;  %v6422_v15 = vsel %vm927_vm0, %v12714_v42, %v6421_v8 }
 0x427   : > { %v9093_v34 = vadd.f32 %v9092_v43, %v9091_v41  ;;  %v9094_v23 = vpop.f32.mrb[74].mxu1  ;;  %v12733_v10 = vrot.slane %v5945_v39, 1  ;;  %v6419_v1 = vsel %vm927_vm0, %v12711_v16, %v6418_v40 }
 0x428   : > { %v9095_v46 = vpop.f32.mrb[75].mxu1  ;;  %6465 = vrot.lane.b32.xlu0 %v12711_v16, %s9834_s26  ;;  %v12731_v31 = vor.u32 %v12716_v19, %v6300_v12 }
 0x429   : > { %v5157_v63 = vadd.f32 %v9093_v34, %v12491_v22  ;;  %v9096_v33 = vadd.f32 %v9095_v46, %v9094_v23  ;;  %6469 = vrot.lane.b32.xlu1 %v12714_v42, %s9834_s26  ;;  %v12742_v59 = vor.u32 %v6293_v7, %v12733_v10 }
 0x42b   : > { %v5318_v0 = vadd.f32 %v12631_v26, %v5157_v63  ;;  %v5160_v18 = vadd.f32 %v9096_v33, %v12491_v22  ;;  %v5745_v63 = vld [vmem:[#allocation3 + $0x130] sm:$0x1]  ;;  %v5874_v33 = vld [vmem:[#allocation3 + $0x58] sm:$0x1] }
 0x42c   : > { %6471 = vrot.lane.b32.xlu0 %v6422_v15, %s9834_s26  ;;  %v5746_v12 = vsel %vm12638_vm11, 0, %v5745_v63 }
 0x42d   : > { %v5321_v50 = vadd.f32 %v12635_v54, %v5160_v18  ;;  %6643 = vrot.lane.b32.xlu1 %v12731_v31, %s9834_s26  ;;  %v5360_v26 = vmax.f32 %v5318_v0, 0.0  ;;  %v5679_v54 = vld [vmem:[#allocation3 + $0x90] sm:$0x80]  ;;  %v5743_v0 = vsel %vm12638_vm11, 0, %v5742_v35  ;;  %5747 = vst [vmem:[#allocation3 + $0x130] sm:$0x1] %v5746_v12 }
 0x42e   : > { %v5680_v61 = vsel %vm12499_vm5, 0, %v5679_v54  ;;  %5744 = vst [vmem:[#allocation3 + $0x118] sm:$0x1] %v5743_v0 }
 0x42f   : > { %v5361_v11 = vmax.f32 %v5321_v50, 0.0  ;;  %5681 = vst [vmem:[#allocation3 + $0x90] sm:$0x80] %v5680_v61 }
 0x430   : > { %6467 = vrot.lane.b32.xlu0 %v6419_v1, %s9834_s26 }
 0x431   : > { %v5378_v29 = vpack.c.bf16 %v5361_v11, %v5360_v26  ;;  %6055 = vrot.lane.b32.xlu1 %v12742_v59, %s9834_s26  ;;  %v6424_v26 = vrot.slane %v5874_v33, 1 }
 0x433   : > { %9267 = vmatprep.mubr.msk.bf16.mxu0 %vm2551_vm12, %v5378_v29 }
 0x434   : > { %6059 = vrot.lane.b32.xlu0 %v12731_v31, %s9834_s26 }
 0x43b   : > { %v9245_v62 = vpop.f32.mrb[52].mxu0 }
 0x43c   : > { %v9097_v6 = vpop.f32.mrb[76].mxu1  ;;  %v5510_v4 = vadd.f32 %v9245_v62, %v12689_v57  ;;  %v5501_v3 = vpop.f32.mrb[53].mxu0 }
 0x43d   : > { %v9098_v44 = vpop.f32.mrb[77].mxu1  ;;  %v5502_v2 = vadd.f32 %v12689_v57, %v5501_v3  ;;  %v9246_v5 = vpop.f32.mrb[54].mxu0 }
 0x43e   : > { %v9099_v27 = vadd.f32 %v9098_v44, %v9097_v6  ;;  %v9100_v52 = vpop.f32.mrb[78].mxu1  ;;  %v5513_v36 = vadd.f32 %v9246_v5, %v12689_v57  ;;  %v5504_v32 = vpop.f32.mrb[55].mxu0  ;;  %v5618_v51 = vmax.f32 %v5510_v4, 0.0 }
 0x43f   : > { %v9101_v47 = vpop.f32.mrb[79].mxu1  ;;  %v5505_v60 = vadd.f32 %v12689_v57, %v5504_v32  ;;  %v5616_v14 = vmax.f32 %v5502_v2, 0.0 }
 0x440   : > { %v5165_v25 = vadd.f32 %v9099_v27, %v12491_v22  ;;  %v5619_v48 = vmax.f32 %v5513_v36, 0.0  ;;  %v9102_v30 = vadd.f32 %v9101_v47, %v9100_v52 }
 0x441   : > { %v5617_v38 = vmax.f32 %v5505_v60, 0.0  ;;  %v5877_v60 = vld [vmem:[#allocation3 + $0xa0] sm:$0x1] }
 0x442   : > { %v5326_v17 = vadd.f32 %v12629_v20, %v5165_v25  ;;  %v5763_v58 = vpack.c.bf16 %v5619_v48, %v5618_v51  ;;  %v5168_v41 = vadd.f32 %v9102_v30, %v12491_v22  ;;  %v6433_v30 = vrot.slane %v5877_v60, 1 }
 0x443   : > { %v5762_v49 = vpack.c.bf16 %v5617_v38, %v5616_v14  ;;  %v5876_v14 = vld [vmem:[#allocation3 + $0x88] sm:$0x1] }
 0x444   : > { %5779 = vst.msk [vmem:[#allocation3 + $0x68] sm:$0xff] %vm3913_vm1, %v5763_v58  ;;  %v5329_v56 = vadd.f32 %v12633_v28, %v5168_v41  ;;  %v5362_v21 = vmax.f32 %v5326_v17, 0.0  ;;  %v5875_v28 = vld [vmem:[#allocation3 + $0x70] sm:$0x1] }
 0x445   : > { %5778 = vst.msk [vmem:[#allocation3 + $0x50] sm:$0xff] %vm3913_vm1, %v5762_v49  ;;  %v6427_v39 = vrot.slane %v5875_v28, 1  ;;  %v6430_v49 = vrot.slane %v5876_v14, 1 }
 0x446   : > { %v5363_v13 = vmax.f32 %v5329_v56, 0.0 }
 0x448   : > { %v5379_v43 = vpack.c.bf16 %v5363_v13, %v5362_v21 }
 0x44a   : > { %9268 = vmatmul.mubr.msk.bf16.gmra.mrb[76].mxu0 %vm2551_vm12, %v5379_v43  ;;  %vm14300_vm12 = vmmov %vm14193_vm3 }
 0x44b   : > { %v12763_v34 = vld [vmem:[#allocation3 + $0x68] sm:$0xff] }
 0x44c   : > { %6239 = vrot.lane.b32.xlu0 %v12763_v34, %s9834_s26  ;;  %v12767_v20 = vld [vmem:[#allocation3 + $0x50] sm:$0xff]  ;;  %v6544_v22 = vshll.u32 %v12763_v34, 16  ;;  %v12773_v23 = vrot.slane %v12763_v34, 1  ;;  %v6314_v8 = vshrl.u32 %v12763_v34, 16 }
 0x44d   : > { %6235 = vrot.lane.b32.xlu1 %v12767_v20, %s9834_s26  ;;  %v12778_v46 = vrot.slane %v12767_v20, 1  ;;  %v6537_v15 = vshll.u32 %v12767_v20, 16  ;;  %v6307_v36 = vshrl.u32 %v12767_v20, 16 }
 0x44e   : > { %14296 = vst [vmem:[#allocation9_spill] sm:$0xff] %v12773_v23  ;;  %v12775_v37 = vrot.slane %v6544_v22, 1  ;;  %v6428_v7 = vsel %vm927_vm0, %v12773_v23, %v6427_v39 }
 0x44f   : > { %14297 = vst [vmem:[#allocation25_spill] sm:$0xff] %v12778_v46  ;;  %v12802_v62 = vrot.slane %v6537_v15, 1  ;;  %v6425_v3 = vsel %vm927_vm0, %v12778_v46, %v6424_v26 }
 0x450   : > { %6477 = vrot.lane.b32.xlu0 %v12773_v23, %s9834_s26  ;;  %v12788_v9 = vor.u32 %v12775_v37, %v6314_v8 }
 0x451   : > { %6473 = vrot.lane.b32.xlu1 %v12778_v46, %s9834_s26  ;;  %v9461_v52 = vpack.i.bf16 %v12802_v62, %v12716_v19  ;;  %v12816_v32 = vor.u32 %v12802_v62, %v6307_v36  ;;  %v5878_v36 = vld [vmem:[#allocation3 + $0xb8] sm:$0x1]  ;;  %v5697_v46 = vld [vmem:[#allocation3 + $0x120] sm:$0x80] }
 0x453   : > { %v9249_v18 = vpop.f32.mrb[56].mxu0 }
 0x454   : > { %v5526_v40 = vadd.f32 %v9249_v18, %v12689_v57  ;;  %v5517_v50 = vpop.f32.mrb[57].mxu0  ;;  %6651 = vrot.lane.b32.xlu0 %v12788_v9, %s9834_s26 }
 0x455   : > { %v5518_v11 = vadd.f32 %v12689_v57, %v5517_v50  ;;  %v9250_v1 = vpop.f32.mrb[58].mxu0  ;;  %6479 = vrot.lane.b32.xlu1 %v6428_v7, %s9834_s26 }
 0x456   : > { %v5529_v29 = vadd.f32 %v9250_v1, %v12689_v57  ;;  %v5520_v54 = vpop.f32.mrb[59].mxu0  ;;  %v5622_v6 = vmax.f32 %v5526_v40, 0.0 }
 0x457   : > { %v5521_v61 = vadd.f32 %v12689_v57, %v5520_v54  ;;  %v5620_v44 = vmax.f32 %v5518_v11, 0.0  ;;  %v5879_v54 = vld [vmem:[#allocation3 + $0xd0] sm:$0x1] }
 0x458   : > { %v5623_v4 = vmax.f32 %v5529_v29, 0.0  ;;  %6067 = vrot.lane.b32.xlu0 %v12788_v9, %s9834_s26 }
 0x459   : > { %v5621_v2 = vmax.f32 %v5521_v61, 0.0  ;;  %6475 = vrot.lane.b32.xlu1 %v6425_v3, %s9834_s26 }
 0x45a   : > { %v5765_v5 = vpack.c.bf16 %v5623_v4, %v5622_v6 }
 0x45b   : > { %v5764_v27 = vpack.c.bf16 %v5621_v2, %v5620_v44  ;;  %v5682_v44 = vld [vmem:[#allocation3 + $0xa8] sm:$0x80]  ;;  %v6439_v2 = vrot.slane %v5879_v54, 1 }
 0x45c   : > { %5781 = vst.msk [vmem:[#allocation3 + $0x98] sm:$0xff] %vm3913_vm1, %v5765_v5  ;;  %v5683_v5 = vsel %vm12499_vm5, 0, %v5682_v44 }
 0x45d   : > { %5780 = vst.msk [vmem:[#allocation3 + $0x80] sm:$0xff] %vm3913_vm1, %v5764_v27  ;;  %9462 = vrot.lane.b32.xlu1 %v9461_v52, %s9834_s26  ;;  %v5748_v27 = vld [vmem:[#allocation3 + $0x148] sm:$0x1]  ;;  %v5751_v52 = vld [vmem:[#allocation3 + $0x160] sm:$0x1] }
 0x45e   : > { %5684 = vst [vmem:[#allocation3 + $0xa8] sm:$0x80] %v5683_v5  ;;  %v5749_v60 = vsel %vm12638_vm11, 0, %v5748_v27 }
 0x45f   : > { %5750 = vst [vmem:[#allocation3 + $0x148] sm:$0x1] %v5749_v60 }
 0x461   : > { %6647 = vrot.lane.b32.xlu1 %v12816_v32, %s9834_s26 }
 0x463   : > { %v12820_v47 = vld [vmem:[#allocation3 + $0x98] sm:$0xff] }
 0x464   : > { %v12822_v51 = vld [vmem:[#allocation3 + $0x80] sm:$0xff]  ;;  %v6432_v48 = vrot.slane %v12820_v47, 1  ;;  %v6558_v38 = vshll.u32 %v12820_v47, 16  ;;  %v6561_v39 = vshrl.u32 %v12820_v47, 16 }
 0x465   : > { %6063 = vrot.lane.b32.xlu1 %v12816_v32, %s9834_s26  ;;  %v12827_v25 = vrot.slane %v12822_v51, 1  ;;  %v6551_v17 = vshll.u32 %v12822_v51, 16  ;;  %v6554_v11 = vshrl.u32 %v12822_v51, 16 }
 0x466   : > { %v6434_v41 = vsel %vm927_vm0, %v6432_v48, %v6433_v30  ;;  %v12839_v13 = vrot.slane %v6558_v38, 1 }
 0x467   : > { %6481 = vrot.lane.b32.xlu0 %v12827_v25, %s9834_s26  ;;  %v12845_v63 = vrot.slane %v6551_v17, 1  ;;  %v6431_v35 = vsel %vm927_vm0, %v12827_v25, %v6430_v49 }
 0x468   : > { %v12852_v18 = vor.u32 %v6561_v39, %v12839_v13  ;;  %v5824_v39 = vld [vmem:[#allocation3 + $0x10] sm:$0x1] }
 0x469   : > { %6243 = vrot.lane.b32.xlu1 %v12822_v51, %s9834_s26  ;;  %v9466_v7 = vpack.i.bf16 %v12845_v63, %v12775_v37  ;;  %v12863_v1 = vor.u32 %v6554_v11, %v12845_v63 }
 0x46a   : > { %v9253_v58 = vpop.f32.mrb[60].mxu0 }
 0x46b   : > { %v5542_v56 = vadd.f32 %v9253_v58, %v12689_v57  ;;  %v5533_v21 = vpop.f32.mrb[61].mxu0  ;;  %6487 = vrot.lane.b32.xlu0 %v6434_v41, %s9834_s26  ;;  %v6436_v58 = vrot.slane %v5878_v36, 1 }
 0x46c   : > { %v5534_v43 = vadd.f32 %v12689_v57, %v5533_v21  ;;  %v9254_v22 = vpop.f32.mrb[62].mxu0 }
 0x46d   : > { %v5545_v28 = vadd.f32 %v9254_v22, %v12689_v57  ;;  %v5536_v8 = vpop.f32.mrb[63].mxu0  ;;  %6485 = vrot.lane.b32.xlu1 %v6432_v48, %s9834_s26  ;;  %v5626_v12 = vmax.f32 %v5542_v56, 0.0  ;;  %v5752_v48 = vsel %vm12638_vm11, 0, %v5751_v52  ;;  %v6226_v22 = vpop.permute.xlu1 %6225 }
 0x46e   : > { %v5537_v33 = vadd.f32 %v12689_v57, %v5536_v8  ;;  %v5624_v15 = vmax.f32 %v5534_v43, 0.0  ;;  %5753 = vst [vmem:[#allocation3 + $0x160] sm:$0x1] %v5752_v48  ;;  %v5848_v43 = vld [vmem:[#allocation3 + $0x78] sm:$0x80] }
 0x46f   : > { %v5627_v0 = vmax.f32 %v5545_v28, 0.0  ;;  %6483 = vrot.lane.b32.xlu0 %v6431_v35, %s9834_s26 }
 0x470   : > { %v5625_v40 = vmax.f32 %v5537_v33, 0.0  ;;  %v12909_v33 = vld [vmem:[#allocation3 + $0x8] sm:$0xff] }
 0x471   : > { %v5767_v50 = vpack.c.bf16 %v5627_v0, %v5626_v12  ;;  %6659 = vrot.lane.b32.xlu1 %v12852_v18, %s9834_s26  ;;  %v6145_v35 = vrot.slane %v12909_v33, 1  ;;  %v6146_v12 = vrot.slane %v5824_v39, 1  ;;  %v12912_v0 = vpop.permute.xlu1 %6233 }
 0x472   : > { %v5766_v26 = vpack.c.bf16 %v5625_v40, %v5624_v15  ;;  %14298 = vst [vmem:[#allocation12_spill] sm:$0xff] %v12912_v0 }
 0x473   : > { %5783 = vst.msk [vmem:[#allocation3 + $0xc8] sm:$0xff] %vm3913_vm1, %v5767_v50  ;;  %9467 = vrot.lane.b32.xlu0 %v9466_v7, %s9834_s26  ;;  %v6867_v40 = vsel %vm3913_vm1, %v6145_v35, %v6226_v22  ;;  %v12917_v50 = vpop.permute.xlu0 %6051  ;;  %v6147_v11 = vsel %vm927_vm0, %v6145_v35, %v6146_v12  ;;  %v5685_v35 = vld [vmem:[#allocation3 + $0xc0] sm:$0x80]  ;;  %v5688_v12 = vld [vmem:[#allocation3 + $0xd8] sm:$0x80] }
 0x474   : > { %5782 = vst.msk [vmem:[#allocation3 + $0xb0] sm:$0xff] %vm3913_vm1, %v5766_v26 }
 0x477   : > { %6655 = vrot.lane.b32.xlu0 %v12863_v1, %s9834_s26 }
 0x47a   : > { %v12867_v29 = vld [vmem:[#allocation3 + $0xc8] sm:$0xff] }
 0x47b   : > { %v6438_v61 = vrot.slane %v12867_v29, 1  ;;  %v12870_v6 = vld [vmem:[#allocation3 + $0xb0] sm:$0xff]  ;;  %v6572_v4 = vshll.u32 %v12867_v29, 16  ;;  %v6575_v17 = vshrl.u32 %v12867_v29, 16 }
 0x47c   : > { %v6435_v3 = vrot.slane %v12870_v6, 1  ;;  %v6565_v14 = vshll.u32 %v12870_v6, 16  ;;  %v6568_v28 = vshrl.u32 %v12870_v6, 16 }
 0x47d   : > { %6493 = vrot.lane.b32.xlu0 %v6438_v61, %s9834_s26  ;;  %v12882_v30 = vrot.slane %v6572_v4, 1  ;;  %v6440_v38 = vsel %vm927_vm0, %v6438_v61, %v6439_v2  ;;  %v7147_v2 = vshrl.u32 %v6867_v40, 16  ;;  %v5689_v40 = vsel %vm12499_vm5, 0, %v5688_v12 }
 0x47e   : > { %6489 = vrot.lane.b32.xlu1 %v6435_v3, %s9834_s26  ;;  %v12893_v49 = vrot.slane %v6565_v14, 1  ;;  %v6437_v56 = vsel %vm927_vm0, %v6435_v3, %v6436_v58  ;;  %5690 = vst [vmem:[#allocation3 + $0xd8] sm:$0x80] %v5689_v40 }
 0x47f   : > { %v12891_v41 = vor.u32 %v6575_v17, %v12882_v30 }
 0x480   : > { %v9471_v21 = vpack.i.bf16 %v12893_v49, %v12839_v13  ;;  %v12905_v8 = vor.u32 %v6568_v28, %v12893_v49 }
 0x481   : > { %6247 = vrot.lane.b32.xlu0 %v12820_v47, %s9834_s26 }
 0x482   : > { %6495 = vrot.lane.b32.xlu1 %v6440_v38, %s9834_s26 }
 0x485   : > { %6667 = vrot.lane.b32.xlu0 %v12891_v41, %s9834_s26 }
 0x486   : > { %6491 = vrot.lane.b32.xlu1 %v6437_v56, %s9834_s26  ;;  %v7149_v56 = vrot.slane %v7147_v2, 7 }
 0x48a   : > { %9472 = vrot.lane.b32.xlu1 %v9471_v21, %s9834_s26  ;;  %v12925_v21 = vpop.permute.xlu0 %6229 }
 0x48e   : > { %6241 = vrot.lane.b32.xlu1 %v5848_v43, %s9834_s26  ;;  %v12929_v28 = vpop.permute.xlu0 %6237 }
 0x48f   : > { %14299 = vst [vmem:[#allocation16_spill] sm:$0xff] %v12929_v28 }
 0x492   : > { %6663 = vrot.lane.b32.xlu1 %v12905_v8, %s9834_s26 }
 0x496   : > { %v9257_v15 = vpop.f32.mrb[64].mxu0  ;;  %6071 = vrot.lane.b32.xlu1 %v12863_v1, %s9834_s26 }
 0x497   : > { %v5558_v7 = vadd.f32 %v9257_v15, %v12689_v57  ;;  %v5549_v26 = vpop.f32.mrb[65].mxu0  ;;  %v6228_v4 = vpop.permute.xlu1 %6227  ;;  %v5686_v15 = vsel %vm12499_vm5, 0, %v5685_v35 }
 0x498   : > { %v5550_v54 = vadd.f32 %v12689_v57, %v5549_v26  ;;  %v9258_v61 = vpop.f32.mrb[66].mxu0  ;;  %v6870_v5 = vsel %vm3913_vm1, %v6147_v11, %v6228_v4  ;;  %v5880_v26 = vld [vmem:[#allocation3 + $0xe8] sm:$0x1]  ;;  %5687 = vst [vmem:[#allocation3 + $0xc0] sm:$0x80] %v5686_v15  ;;  %v12936_v11 = vpop.permute.xlu0 %6231 }
 0x499   : > { %v5561_v3 = vadd.f32 %v9258_v61, %v12689_v57  ;;  %v5552_v44 = vpop.f32.mrb[67].mxu0  ;;  %v5630_v52 = vmax.f32 %v5558_v7, 0.0  ;;  %v7150_v60 = vshrl.u32 %v6870_v5, 16  ;;  %v7153_v58 = vshll.u32 %v6870_v5, 16  ;;  %v5646_v7 = vld [vmem:[#allocation3] sm:$0x80] }
 0x49a   : > { %v5553_v27 = vadd.f32 %v12689_v57, %v5552_v44  ;;  %v5628_v48 = vmax.f32 %v5550_v54, 0.0  ;;  %v5881_v61 = vld [vmem:[#allocation3 + $0x100] sm:$0x1]  ;;  %v5647_v4 = vsel %vm12499_vm5, 0, %v5646_v7  ;;  %v6442_v5 = vrot.slane %v5880_v26, 1 }
 0x49b   : > { %v5631_v36 = vmax.f32 %v5561_v3, 0.0  ;;  %v7152_v17 = vrot.slane %v7150_v60, 7  ;;  %5648 = vst [vmem:[#allocation3] sm:$0x80] %v5647_v4  ;;  %v5691_v60 = vld [vmem:[#allocation3 + $0xf0] sm:$0x80]  ;;  %v12964_v12 = vpop.permute.xlu1 %6469 }
 0x49c   : > { %v5629_v14 = vmax.f32 %v5553_v27, 0.0 }
 0x49d   : > { %v5769_v38 = vpack.c.bf16 %v5631_v36, %v5630_v52  ;;  %v7155_v22 = vor.u32 %v7153_v58, %v7152_v17  ;;  %v6445_v36 = vrot.slane %v5881_v61, 1 }
 0x49e   : > { %v5768_v43 = vpack.c.bf16 %v5629_v14, %v5628_v48  ;;  %v5757_v14 = vld [vmem:[#allocation3 + $0x190] sm:$0x1] }
 0x49f   : > { %5785 = vst.msk [vmem:[#allocation3 + $0xf8] sm:$0xff] %vm3913_vm1, %v5769_v38  ;;  %v7156_v39 = vsel %vm14300_vm12, %v7149_v56, %v7155_v22  ;;  %v6466_v38 = vpop.permute.xlu0 %6465  ;;  %v5692_v56 = vsel %vm12499_vm5, 0, %v5691_v60  ;;  %v5754_v22 = vld [vmem:[#allocation3 + $0x178] sm:$0x1]  ;;  %v6644_v4 = vpop.permute.xlu1 %6643  ;;  %vm14320_vm12 = vmmov %vm14318_vm2  ;;  %v5854_v45 = vld [vmem:[#allocation3 + $0xc0] sm:$0x80] }
 0x4a0   : > { %5784 = vst.msk [vmem:[#allocation3 + $0xe0] sm:$0xff] %vm3913_vm1, %v5768_v43  ;;  %8265 = vmatprep.subr.bf16.mxu0 %v7156_v39  ;;  %5693 = vst [vmem:[#allocation3 + $0xf0] sm:$0x80] %v5692_v56  ;;  %v5758_v39 = vsel %vm12638_vm11, 0, %v5757_v14  ;;  %v5755_v35 = vsel %vm12638_vm11, 0, %v5754_v22 }
 0x4a1   : > { %5759 = vst [vmem:[#allocation3 + $0x190] sm:$0x1] %v5758_v39  ;;  %5756 = vst [vmem:[#allocation3 + $0x178] sm:$0x1] %v5755_v35 }
 0x4a3   : > { %v6472_v26 = vpop.permute.xlu0 %6471 }
 0x4a6   : > { %v12938_v54 = vld [vmem:[#allocation3 + $0xf8] sm:$0xff] }
 0x4a7   : > { %v6444_v3 = vrot.slane %v12938_v54, 1  ;;  %v12943_v44 = vld [vmem:[#allocation3 + $0xe0] sm:$0xff]  ;;  %v6586_v52 = vshll.u32 %v12938_v54, 16  ;;  %v6589_v7 = vshrl.u32 %v12938_v54, 16 }
 0x4a8   : > { %v6441_v2 = vrot.slane %v12943_v44, 1  ;;  %v6579_v27 = vshll.u32 %v12943_v44, 16 }
 0x4a9   : > { %6501 = vrot.lane.b32.xlu0 %v6444_v3, %s9834_s26  ;;  %v12953_v58 = vrot.slane %v6586_v52, 1  ;;  %v6446_v43 = vsel %vm927_vm0, %v6444_v3, %v6445_v36  ;;  %v6582_v3 = vshrl.u32 %v12943_v44, 16 }
 0x4aa   : > { %6497 = vrot.lane.b32.xlu1 %v6441_v2, %s9834_s26  ;;  %v12950_v48 = vrot.slane %v6579_v27, 1  ;;  %v6443_v17 = vsel %vm927_vm0, %v6441_v2, %v6442_v5  ;;  %v5850_v5 = vld [vmem:[#allocation3 + $0x90] sm:$0x80]  ;;  %v12984_v27 = vpop.permute.xlu1 %6055 }
 0x4ab   : > { %14302 = vst [vmem:[#allocation13_spill] sm:$0xff] %v12953_v58  ;;  %v9476_v40 = vpack.i.bf16 %v12953_v58, %v12517_v53  ;;  %v12974_v61 = vor.u32 %v6589_v7, %v12953_v58  ;;  %v6468_v53 = vpop.permute.xlu0 %6467  ;;  %14304 = vst [vmem:[#allocation10_spill] sm:$0xff] %v12984_v27 }
 0x4ac   : > { %14301 = vst [vmem:[#allocation23_spill] sm:$0xff] %v12950_v48  ;;  %v9481_v15 = vpack.i.bf16 %v12950_v48, %v12882_v30  ;;  %v12980_v2 = vor.u32 %v6582_v3, %v12950_v48  ;;  %v6966_v55 = vsel %vm3913_vm1, %v12742_v59, %v6468_v53  ;;  %v5889_v59 = vld [vmem:[#allocation3 + $0x30] sm:$0x80]  ;;  %v6963_v53 = vsel %vm3913_vm1, %v12733_v10, %v6466_v38 }
 0x4ad   : > { %6499 = vrot.lane.b32.xlu0 %v6443_v17, %s9834_s26  ;;  %14303 = vst [vmem:[#allocation11_spill] sm:$0xff] %v12974_v61  ;;  %v7163_v0 = vshll.u32 %v6966_v55, 16 }
 0x4ae   : > { %6503 = vrot.lane.b32.xlu1 %v6446_v43, %s9834_s26 }
 0x4af   : > { %v12987_v52 = vpop.permute.xlu0 %6059 }
 0x4b0   : > { %14305 = vst [vmem:[#allocation26_spill] sm:$0xff] %v12987_v52 }
 0x4b1   : > { %9482 = vrot.lane.b32.xlu0 %v9481_v15, %s9834_s26 }
 0x4b2   : > { %9477 = vrot.lane.b32.xlu1 %v9476_v40, %s9834_s26 }
 0x4b5   : > { %6675 = vrot.lane.b32.xlu0 %v12974_v61, %s9834_s26 }
 0x4b9   : > { %6671 = vrot.lane.b32.xlu0 %v12980_v2, %s9834_s26 }
 0x4bd   : > { %6245 = vrot.lane.b32.xlu0 %v5850_v5, %s9834_s26 }
 0x4be   : > { %v12991_v60 = vpop.permute.xlu0 %6239 }
 0x4bf   : > { %v12989_v36 = vpop.permute.xlu1 %6235  ;;  %14307 = vst [vmem:[#allocation24_spill] sm:$0xff] %v12991_v60  ;;  %v5882_v60 = vld [vmem:[#allocation3 + $0x118] sm:$0x1] }
 0x4c0   : > { %14306 = vst [vmem:[#allocation28_spill] sm:$0xff] %v12989_v36  ;;  %v6448_v38 = vrot.slane %v5882_v60, 1 }
 0x4c2   : > { %v9261_v14 = vpop.f32.mrb[68].mxu0  ;;  %v13003_v58 = vpop.permute.xlu0 %6477 }
 0x4c3   : > { %v5574_v17 = vadd.f32 %v9261_v14, %v12689_v57  ;;  %v5565_v56 = vpop.f32.mrb[69].mxu0  ;;  %v12994_v43 = vpop.permute.xlu1 %6473 }
 0x4c4   : > { %v5566_v22 = vadd.f32 %v12689_v57, %v5565_v56  ;;  %v9262_v39 = vpop.f32.mrb[70].mxu0  ;;  %v7061_v56 = vsel %vm3913_vm1, %v12703_v24, %v6644_v4 }
 0x4c5   : > { %v5577_v35 = vadd.f32 %v9262_v39, %v12689_v57  ;;  %v5568_v15 = vpop.f32.mrb[71].mxu0  ;;  %v5634_v7 = vmax.f32 %v5574_v17, 0.0  ;;  %v7160_v39 = vshrl.u32 %v6966_v55, 16  ;;  %v7170_v17 = vshrl.u32 %v7061_v56, 16 }
 0x4c6   : > { %v5569_v40 = vadd.f32 %v12689_v57, %v5568_v15  ;;  %v5632_v23 = vmax.f32 %v5566_v22, 0.0  ;;  %v13015_v22 = vsel %vm3913_vm1, %v12731_v31, %v6472_v26  ;;  %v5698_v31 = vsel %vm12499_vm5, 0, %v5697_v46 }
 0x4c7   : > { %v5635_v3 = vmax.f32 %v5577_v35, 0.0  ;;  %v12999_v5 = vpop.permute.xlu1 %6479  ;;  %v5883_v35 = vld [vmem:[#allocation3 + $0x130] sm:$0x1]  ;;  %v7162_v24 = vrot.slane %v7160_v39, 7  ;;  %v7172_v52 = vrot.slane %v7170_v17, 7  ;;  %v7157_v26 = vshrl.u32 %v6963_v53, 16 }
 0x4c8   : > { %v5633_v14 = vmax.f32 %v5569_v40, 0.0  ;;  %v5694_v40 = vld [vmem:[#allocation3 + $0x108] sm:$0x80]  ;;  %v7212_v39 = vshrl.u32 %v13015_v22, 16  ;;  %5699 = vst [vmem:[#allocation3 + $0x120] sm:$0x80] %v5698_v31 }
 0x4c9   : > { %v5771_v61 = vpack.c.bf16 %v5635_v3, %v5634_v7 }
 0x4ca   : > { %v5770_v28 = vpack.c.bf16 %v5633_v14, %v5632_v23  ;;  %v13017_v23 = vpop.permute.xlu0 %6651  ;;  %v5695_v14 = vsel %vm12499_vm5, 0, %v5694_v40  ;;  %v7165_v40 = vor.u32 %v7163_v0, %v7162_v24 }
 0x4cb   : > { %5787 = vst.msk [vmem:[#allocation3 + $0x128] sm:$0xff] %vm3913_vm1, %v5771_v61  ;;  %v13008_v15 = vpop.permute.xlu1 %6475  ;;  %v5891_v61 = vld [vmem:[#allocation3 + $0x48] sm:$0x80]  ;;  %5696 = vst [vmem:[#allocation3 + $0x108] sm:$0x80] %v5695_v14 }
 0x4cc   : > { %5786 = vst.msk [vmem:[#allocation3 + $0x110] sm:$0xff] %vm3913_vm1, %v5770_v28  ;;  %v6451_v28 = vrot.slane %v5883_v35, 1 }
 0x4cf   : > { %v9463_v4 = vpop.permute.xlu1 %9462 }
 0x4d0   : > { %v9465_v7 = vunpack.i.h.bf16 %v9463_v4  ;;  %v9464_v3 = vunpack.i.l.bf16 %v9463_v4  ;;  %v7173_v4 = vshll.u32 %v7061_v56, 16 }
 0x4d2   : > { %v13024_v27 = vld [vmem:[#allocation3 + $0x128] sm:$0xff]  ;;  %v7059_v36 = vsel %vm3913_vm1, %v5889_v59, %v9464_v3  ;;  %v7064_v35 = vsel %vm3913_vm1, %v5891_v61, %v9465_v7  ;;  %v7175_v3 = vor.u32 %v7173_v4, %v7172_v52  ;;  %v13036_v61 = vpop.permute.xlu0 %6067  ;;  %v7159_v7 = vrot.slane %v7157_v26, 7 }
 0x4d3   : > { %v6648_v42 = vpop.permute.xlu1 %6647  ;;  %v6450_v55 = vrot.slane %v13024_v27, 1  ;;  %v13029_v60 = vld [vmem:[#allocation3 + $0x110] sm:$0xff]  ;;  %v7167_v17 = vshrl.u32 %v7059_v36, 16  ;;  %v6600_v59 = vshll.u32 %v13024_v27, 16  ;;  %14308 = vst [vmem:[#allocation22_spill] sm:$0xff] %v13036_v61  ;;  %v7219_v24 = vshrl.u32 %v7064_v35, 16 }
 0x4d4   : > { %v7066_v46 = vsel %vm3913_vm1, %v12767_v20, %v6648_v42  ;;  %v6447_v53 = vrot.slane %v13029_v60, 1  ;;  %v6593_v14 = vshll.u32 %v13029_v60, 16  ;;  %v6969_v36 = vsel %vm3913_vm1, %v12716_v19, %v12964_v12 }
 0x4d5   : > { %v7222_v56 = vshrl.u32 %v7066_v46, 16  ;;  %6509 = vrot.lane.b32.xlu0 %v6450_v55, %s9834_s26  ;;  %v7169_v0 = vrot.slane %v7167_v17, 7  ;;  %v7225_v20 = vshll.u32 %v7066_v46, 16  ;;  %v7214_v52 = vrot.slane %v7212_v39, 7 }
 0x4d6   : > { %6505 = vrot.lane.b32.xlu1 %v6447_v53, %s9834_s26  ;;  %v13044_v48 = vrot.slane %v6593_v14, 1  ;;  %v6449_v4 = vsel %vm927_vm0, %v6447_v53, %v6448_v38  ;;  %v7166_v17 = vsel %vm14309_vm15, %v7159_v7, %v7165_v40  ;;  %v13048_v35 = vrot.slane %v6600_v59, 1  ;;  %vm14322_vm15 = vmmov %vm14318_vm2 }
 0x4d7   : > { %v7224_v42 = vrot.slane %v7222_v56, 7  ;;  %v7176_v31 = vsel %vm14193_vm3, %v7169_v0, %v7175_v3  ;;  %v6452_v56 = vsel %vm927_vm0, %v6450_v55, %v6451_v28  ;;  %v7221_v46 = vrot.slane %v7219_v24, 7  ;;  %v13055_v39 = vpop.permute.xlu1 %6063  ;;  %vm14321_vm3 = vmmov %vm14318_vm2 }
 0x4d8   : > { %8338 = vmatprep.subr.bf16.mxu1 %v7176_v31  ;;  %14310 = vst [vmem:[#allocation15_spill] sm:$0xff] %v13048_v35  ;;  %v7209_v3 = vshrl.u32 %v6969_v36, 16  ;;  %v7215_v14 = vshll.u32 %v13015_v22, 16  ;;  %v9491_v38 = vpack.i.bf16 %v13044_v48, %v12733_v10  ;;  %v9486_v59 = vpack.i.bf16 %v13048_v35, %v12716_v19 }
 0x4d9   : > { %v7227_v26 = vor.u32 %v7225_v20, %v7224_v42  ;;  %6507 = vrot.lane.b32.xlu0 %v6449_v4, %s9834_s26  ;;  %v13051_v12 = vpop.permute.xlu0 %6481  ;;  %8339 = vmatpush1.bf16.xpose.msra.mxu1 %v7166_v17  ;;  %v6603_v22 = vshrl.u32 %v13024_v27, 16  ;;  %v6596_v0 = vshrl.u32 %v13029_v60, 16  ;;  %v6978_v10 = vsel %vm3913_vm1, %v12816_v32, %v13008_v15  ;;  %v5895_v17 = vld [vmem:[#allocation3 + $0x78] sm:$0x80] }
 0x4da   : > { %6511 = vrot.lane.b32.xlu1 %v6452_v56, %s9834_s26  ;;  %v7217_v53 = vor.u32 %v7215_v14, %v7214_v52  ;;  %v7211_v55 = vrot.slane %v7209_v3, 7  ;;  %v7071_v19 = vsel %vm3913_vm1, %v12763_v34, %v13017_v23  ;;  %v7264_v32 = vshrl.u32 %v6978_v10, 16  ;;  %v5893_v23 = vld [vmem:[#allocation3 + $0x60] sm:$0x80] }
 0x4db   : > { %v7228_v40 = vsel %vm14311_vm4, %v7221_v46, %v7227_v26  ;;  %v13073_v24 = vor.u32 %v6603_v22, %v13048_v35  ;;  %v13078_v7 = vpop.permute.xlu1 %6243  ;;  %v13081_v36 = vor.u32 %v6596_v0, %v13044_v48  ;;  %v7274_v15 = vshrl.u32 %v7071_v19, 16  ;;  %vm14323_vm4 = vmmov %vm14318_vm2 }
 0x4dc   : > { %8340 = vmatprep.subr.bf16.mxu1 %v7228_v40  ;;  %v7218_v42 = vsel %vm14312_vm13, %v7211_v55, %v7217_v53  ;;  %v6975_v34 = vsel %vm3913_vm1, %v12802_v62, %v12994_v43  ;;  %v7266_v52 = vrot.slane %v7264_v32, 7  ;;  %v6984_v3 = vsel %vm3913_vm1, %v12788_v9, %v12999_v5  ;;  %vm14324_vm13 = vmmov %vm14318_vm2 }
 0x4dd   : > { %9492 = vrot.lane.b32.xlu0 %v9491_v38, %s9834_s26  ;;  %v13064_v28 = vpop.permute.xlu0 %6487  ;;  %v7276_v46 = vrot.slane %v7274_v15, 7  ;;  %v7261_v14 = vshrl.u32 %v6975_v34, 16  ;;  %v7267_v38 = vshll.u32 %v6978_v10, 16  ;;  %v7277_v53 = vshll.u32 %v7071_v19, 16 }
 0x4de   : > { %9487 = vrot.lane.b32.xlu1 %v9486_v59, %s9834_s26  ;;  %v7316_v55 = vshrl.u32 %v6984_v3, 16  ;;  %v6981_v5 = vsel %vm3913_vm1, %v12775_v37, %v13003_v58  ;;  %v7319_v58 = vshll.u32 %v6984_v3, 16 }
 0x4df   : > { %v13093_v4 = vpop.permute.xlu1 %6485  ;;  %v7269_v0 = vor.u32 %v7267_v38, %v7266_v52  ;;  %v7279_v32 = vor.u32 %v7277_v53, %v7276_v46  ;;  %v7263_v35 = vrot.slane %v7261_v14, 7  ;;  %v7313_v38 = vshrl.u32 %v6981_v5, 16 }
 0x4e1   : > { %6683 = vrot.lane.b32.xlu0 %v13073_v24, %s9834_s26  ;;  %v13086_v20 = vpop.permute.xlu0 %6483  ;;  %8341 = vmatpush1.bf16.xpose.msra.mxu1 %v7218_v42  ;;  %v7270_v52 = vsel %vm14314_vm7, %v7263_v35, %v7269_v0  ;;  %vm14328_vm7 = vmmov %vm14318_vm2 }
 0x4e2   : > { %6679 = vrot.lane.b32.xlu1 %v13081_v36, %s9834_s26 }
 0x4e3   : > { %v6660_v61 = vpop.permute.xlu1 %6659 }
 0x4e5   : > { %v9468_v31 = vpop.permute.xlu0 %9467 }
 0x4e6   : > { %v9470_v26 = vunpack.i.h.bf16 %v9468_v31  ;;  %v9469_v56 = vunpack.i.l.bf16 %v9468_v31 }
 0x4e8   : > { %v7069_v40 = vsel %vm3913_vm1, %v5893_v23, %v9469_v56  ;;  %v7074_v43 = vsel %vm3913_vm1, %v5895_v17, %v9470_v26  ;;  %v7318_v23 = vrot.slane %v7316_v55, 7 }
 0x4e9   : > { %v7271_v59 = vshrl.u32 %v7069_v40, 16  ;;  %v6656_v22 = vpop.permute.xlu0 %6655  ;;  %v7323_v9 = vshrl.u32 %v7074_v43, 16 }
 0x4ea   : > { %v7076_v42 = vsel %vm3913_vm1, %v12822_v51, %v6656_v22  ;;  %v5700_v51 = vld [vmem:[#allocation3 + $0x138] sm:$0x80]  ;;  %v7321_v55 = vor.u32 %v7319_v58, %v7318_v23 }
 0x4eb   : > { %v7326_v15 = vshrl.u32 %v7076_v42, 16  ;;  %v7273_v31 = vrot.slane %v7271_v59, 7  ;;  %v7329_v19 = vshll.u32 %v7076_v42, 16  ;;  %v5701_v14 = vsel %vm12499_vm5, 0, %v5700_v51 }
 0x4ec   : > { %v7325_v59 = vrot.slane %v7323_v9, 7  ;;  %5702 = vst [vmem:[#allocation3 + $0x138] sm:$0x80] %v5701_v14  ;;  %v6990_v9 = vsel %vm3913_vm1, %v12863_v1, %v13086_v20  ;;  %v5884_v20 = vld [vmem:[#allocation3 + $0x148] sm:$0x1] }
 0x4ed   : > { %v7328_v10 = vrot.slane %v7326_v15, 7  ;;  %v7280_v34 = vsel %vm14313_vm6, %v7273_v31, %v7279_v32  ;;  %v7315_v31 = vrot.slane %v7313_v38, 7  ;;  %v6454_v58 = vrot.slane %v5884_v20, 1  ;;  %vm14327_vm6 = vmmov %vm14318_vm2 }
 0x4ee   : > { %v9265_v17 = vpop.f32.mrb[72].mxu0  ;;  %8342 = vmatprep.subr.bf16.mxu1 %v7280_v34 }
 0x4ef   : > { %v7331_v26 = vor.u32 %v7329_v19, %v7328_v10  ;;  %v5590_v56 = vadd.f32 %v9265_v17, %v12689_v57  ;;  %v5581_v46 = vpop.f32.mrb[73].mxu0  ;;  %8343 = vmatpush1.bf16.xpose.msra.mxu1 %v7270_v52  ;;  %v7322_v23 = vsel %vm14316_vm9, %v7315_v31, %v7321_v55  ;;  %v5703_v17 = vld [vmem:[#allocation3 + $0x150] sm:$0x80]  ;;  %vm14330_vm9 = vmmov %vm14318_vm2 }
 0x4f0   : > { %v5582_v40 = vadd.f32 %v12689_v57, %v5581_v46  ;;  %v9266_v53 = vpop.f32.mrb[74].mxu0  ;;  %v13111_v43 = vpop.permute.xlu1 %6489  ;;  %v5704_v52 = vsel %vm12499_vm5, 0, %v5703_v17 }
 0x4f1   : > { %v5593_v35 = vadd.f32 %v9266_v53, %v12689_v57  ;;  %v5584_v22 = vpop.f32.mrb[75].mxu0  ;;  %v7332_v42 = vsel %vm14315_vm8, %v7325_v59, %v7331_v26  ;;  %v5638_v32 = vmax.f32 %v5590_v56, 0.0  ;;  %5705 = vst [vmem:[#allocation3 + $0x150] sm:$0x80] %v5704_v52  ;;  %v7368_v26 = vshrl.u32 %v6990_v9, 16  ;;  %vm14329_vm8 = vmmov %vm14318_vm2 }
 0x4f2   : > { %v5585_v0 = vadd.f32 %v12689_v57, %v5584_v22  ;;  %8344 = vmatprep.subr.bf16.mxu1 %v7332_v42  ;;  %v5636_v3 = vmax.f32 %v5582_v40, 0.0  ;;  %v7081_v57 = vsel %vm3913_vm1, %v12820_v47, %v6660_v61  ;;  %v6987_v56 = vsel %vm3913_vm1, %v12845_v63, %v13051_v12  ;;  %v5897_v61 = vld [vmem:[#allocation3 + $0x90] sm:$0x80]  ;;  %v5885_v40 = vld [vmem:[#allocation3 + $0x160] sm:$0x1] }
 0x4f3   : > { %v5639_v15 = vmax.f32 %v5593_v35, 0.0  ;;  %v7378_v1 = vshrl.u32 %v7081_v57, 16  ;;  %v6996_v47 = vsel %vm3913_vm1, %v12852_v18, %v13064_v28  ;;  %v7370_v14 = vrot.slane %v7368_v26, 7  ;;  %v5899_v18 = vld [vmem:[#allocation3 + $0xa8] sm:$0x80] }
 0x4f4   : > { %v5637_v5 = vmax.f32 %v5585_v0, 0.0  ;;  %v13116_v10 = vpop.permute.xlu1 %6495  ;;  %v7365_v53 = vshrl.u32 %v6987_v56, 16  ;;  %v7420_v59 = vshrl.u32 %v6996_v47, 16  ;;  %v7371_v35 = vshll.u32 %v6990_v9, 16  ;;  %v5706_v52 = vld [vmem:[#allocation3 + $0x168] sm:$0x80] }
 0x4f5   : > { %v5773_v19 = vpack.c.bf16 %v5639_v15, %v5638_v32  ;;  %v7380_v22 = vrot.slane %v7378_v1, 7  ;;  %v7381_v0 = vshll.u32 %v7081_v57, 16  ;;  %v6993_v9 = vsel %vm3913_vm1, %v12839_v13, %v13093_v4 }
 0x4f6   : > { %v5772_v34 = vpack.c.bf16 %v5637_v5, %v5636_v3  ;;  %v7367_v26 = vrot.slane %v7365_v53, 7  ;;  %v7422_v1 = vrot.slane %v7420_v59, 7 }
 0x4f7   : > { %5789 = vst.msk [vmem:[#allocation3 + $0x158] sm:$0xff] %vm3913_vm1, %v5773_v19  ;;  %8345 = vmatpush1.bf16.xpose.msra.mxu1 %v7322_v23  ;;  %v6457_v23 = vrot.slane %v5885_v40, 1  ;;  %v7383_v17 = vor.u32 %v7381_v0, %v7380_v22  ;;  %v5709_v0 = vld [vmem:[#allocation3 + $0x180] sm:$0x80] }
 0x4f8   : > { %5788 = vst.msk [vmem:[#allocation3 + $0x140] sm:$0xff] %vm3913_vm1, %v5772_v34  ;;  %v13128_v51 = vpop.permute.xlu1 %6491  ;;  %v7373_v34 = vor.u32 %v7371_v35, %v7370_v14  ;;  %v5805_v14 = vld [vmem:[#allocation3 + $0x98] sm:$0xff]  ;;  %v5707_v35 = vsel %vm12499_vm5, 0, %v5706_v52 }
 0x4f9   : > { %5708 = vst [vmem:[#allocation3 + $0x168] sm:$0x80] %v5707_v35 }
 0x4fa   : > { %v7374_v59 = vsel %vm14318_vm2, %v7367_v26, %v7373_v34 }
 0x4fc   : > { %v9473_v46 = vpop.permute.xlu1 %9472 }
 0x4fd   : > { %v9474_v38 = vunpack.i.l.bf16 %v9473_v46  ;;  %v9475_v42 = vunpack.i.h.bf16 %v9473_v46 }
 0x4fe   : > { %v13136_v55 = vld [vmem:[#allocation3 + $0x158] sm:$0xff] }
 0x4ff   : > { %v7079_v12 = vsel %vm3913_vm1, %v5897_v61, %v9474_v38  ;;  %v6456_v32 = vrot.slane %v13136_v55, 1  ;;  %v13140_v15 = vld [vmem:[#allocation3 + $0x140] sm:$0xff]  ;;  %v6614_v19 = vshll.u32 %v13136_v55, 16  ;;  %v7084_v20 = vsel %vm3913_vm1, %v5899_v18, %v9475_v42 }
 0x500   : > { %v7375_v28 = vshrl.u32 %v7079_v12, 16  ;;  %v13142_v31 = vpop.permute.xlu1 %6241  ;;  %v6453_v3 = vrot.slane %v13140_v15, 1  ;;  %v6607_v5 = vshll.u32 %v13140_v15, 16  ;;  %v7417_v61 = vshrl.u32 %v6993_v9, 16 }
 0x501   : > { %6517 = vrot.lane.b32.xlu0 %v6456_v32, %s9834_s26  ;;  %v13157_v4 = vrot.slane %v6614_v19, 1  ;;  %v6458_v53 = vsel %vm927_vm0, %v6456_v32, %v6457_v23  ;;  %v7427_v22 = vshrl.u32 %v7084_v20, 16  ;;  %v7423_v42 = vshll.u32 %v6996_v47, 16  ;;  %v5825_v47 = vld [vmem:[#allocation3 + $0x28] sm:$0x1] }
 0x502   : > { %6513 = vrot.lane.b32.xlu1 %v6453_v3, %s9834_s26  ;;  %v7377_v57 = vrot.slane %v7375_v28, 7  ;;  %v13153_v56 = vrot.slane %v6607_v5, 1  ;;  %v6455_v38 = vsel %vm927_vm0, %v6453_v3, %v6454_v58  ;;  %v5980_v18 = vshll.u32 %v5805_v14, 16 }
 0x503   : > { %v5710_v32 = vsel %vm12499_vm5, 0, %v5709_v0  ;;  %v9496_v5 = vpack.i.bf16 %v13157_v4, %v12775_v37  ;;  %v7425_v19 = vor.u32 %v7423_v42, %v7422_v1  ;;  %v7419_v9 = vrot.slane %v7417_v61, 7 }
 0x504   : > { %v6664_v46 = vpop.permute.xlu1 %6663  ;;  %v7384_v13 = vsel %vm14317_vm10, %v7377_v57, %v7383_v17  ;;  %v9501_v12 = vpack.i.bf16 %v13153_v56, %v12802_v62  ;;  %5711 = vst [vmem:[#allocation3 + $0x180] sm:$0x80] %v5710_v32  ;;  %v6617_v34 = vshrl.u32 %v13136_v55, 16  ;;  %v7429_v62 = vrot.slane %v7427_v22, 7  ;;  %v13177_v57 = vpop.permute.xlu0 %6493  ;;  %vm14333_vm10 = vmmov %vm14318_vm2 }
 0x505   : > { %v7086_v40 = vsel %vm3913_vm1, %v12870_v6, %v6664_v46  ;;  %6515 = vrot.lane.b32.xlu0 %v6455_v38, %s9834_s26  ;;  %8346 = vmatprep.subr.bf16.mxu1 %v7384_v13  ;;  %v6610_v17 = vshrl.u32 %v13140_v15, 16  ;;  %v13182_v37 = vrot.slane %v5980_v18, 1  ;;  %v6149_v20 = vrot.slane %v5825_v47, 1 }
 0x506   : > { %v7430_v58 = vshrl.u32 %v7086_v40, 16  ;;  %6519 = vrot.lane.b32.xlu1 %v6458_v53, %s9834_s26  ;;  %8347 = vmatpush1.bf16.xpose.msra.mxu1 %v7374_v59  ;;  %v7433_v3 = vshll.u32 %v7086_v40, 16  ;;  %v13180_v52 = vor.u32 %v6617_v34, %v13157_v4  ;;  %v7426_v61 = vsel %vm14320_vm12, %v7419_v9, %v7425_v19  ;;  %v5852_v59 = vld [vmem:[#allocation3 + $0xa8] sm:$0x80]  ;;  %v9735_v9 = vld [vmem:[%s14152_s6] ss:$0 sm:$0xff]  ;;  %vm14346_vm12 = vmmov %vm14318_vm2 }
 0x507   : > { %v13186_v1 = vor.u32 %v6610_v17, %v13153_v56  ;;  %v5983_v46 = vshrl.u32 %v5805_v14, 16  ;;  %v6150_v13 = vsel %vm927_vm0, %v12711_v16, %v6149_v20  ;;  %v6789_v14 = vsel %vm3913_vm1, %v12909_v33, %v12917_v50  ;;  %v13222_v20 = vld [vmem:[#allocation3 + $0x178] sm:$0x1] }
 0x508   : > { %v7432_v28 = vrot.slane %v7430_v58, 7  ;;  %v6248_v40 = vpop.permute.xlu0 %6247  ;;  %v6876_v53 = vsel %vm3913_vm1, %v6150_v13, %v12936_v11  ;;  %v7140_v58 = vshrl.u32 %v6789_v14, 16  ;;  %v6873_v0 = vsel %vm3913_vm1, %v12711_v16, %v12925_v21  ;;  %v13208_v42 = vpop.permute.xlu1 %6071 }
 0x509   : > { %9502 = vrot.lane.b32.xlu0 %v9501_v12, %s9834_s26  ;;  %v5985_v38 = vor.u32 %v5983_v46, %v13182_v37  ;;  %v7202_v35 = vshrl.u32 %v6876_v53, 16  ;;  %v5829_v12 = vld [vmem:[#allocation3 + $0x88] sm:$0x1]  ;;  %v7199_v18 = vshrl.u32 %v6873_v0, 16  ;;  %v7002_v16 = vsel %vm3913_vm1, %v12905_v8, %v13128_v51 }
 0x50a   : > { %v7435_v23 = vor.u32 %v7433_v3, %v7432_v28  ;;  %9497 = vrot.lane.b32.xlu1 %v9496_v5, %s9834_s26  ;;  %v7142_v28 = vrot.slane %v7140_v58, 7  ;;  %v7143_v3 = vshll.u32 %v6789_v14, 16  ;;  %v6161_v5 = vrot.slane %v5829_v12, 1 }
 0x50b   : > { %v7204_v11 = vrot.slane %v7202_v35, 7  ;;  %v7472_v8 = vshrl.u32 %v7002_v16, 16 }
 0x50c   : > { %v7436_v26 = vsel %vm14319_vm14, %v7429_v62, %v7435_v23  ;;  %v6668_v22 = vpop.permute.xlu0 %6667  ;;  %v7201_v23 = vrot.slane %v7199_v18, 7  ;;  %v13231_v13 = vor.u32 %v7143_v3, %v7142_v28  ;;  %v5901_v18 = vld [vmem:[#allocation3 + $0xc0] sm:$0x80]  ;;  %vm14345_vm14 = vmmov %vm14318_vm2 }
 0x50d   : > { %6691 = vrot.lane.b32.xlu0 %v13180_v52, %s9834_s26  ;;  %8348 = vmatprep.subr.bf16.mxu1 %v7436_v26  ;;  %v7091_v19 = vsel %vm3913_vm1, %v12867_v29, %v6668_v22  ;;  %v13227_v29 = vsel %vm3913_vm1, %v12891_v41, %v13116_v10  ;;  %v6999_v41 = vsel %vm3913_vm1, %v12893_v49, %v13111_v43  ;;  %v6460_v22 = vrot.slane %v13222_v20, 1 }
 0x50e   : > { %6687 = vrot.lane.b32.xlu1 %v13186_v1, %s9834_s26  ;;  %8349 = vmatpush1.bf16.xpose.msra.mxu1 %v7426_v61  ;;  %v7482_v61 = vshrl.u32 %v7091_v19, 16  ;;  %v7524_v0 = vshrl.u32 %v13227_v29, 16  ;;  %v7474_v3 = vrot.slane %v7472_v8, 7  ;;  %v13249_v49 = vsel %vm3913_vm1, %v12882_v30, %v13177_v57 }
 0x50f   : > { %v7469_v43 = vshrl.u32 %v6999_v41, 16  ;;  %v5905_v41 = vld [vmem:[#allocation3 + $0xf0] sm:$0x80] }
 0x510   : > { %v7484_v28 = vrot.slane %v7482_v61, 7 }
 0x511   : > { %6075 = vrot.lane.b32.xlu0 %v5985_v38, %s9834_s26 }
 0x512   : > { %6251 = vrot.lane.b32.xlu1 %v12870_v6, %s9834_s26  ;;  %v7205_v6 = vshll.u32 %v6876_v53, 16  ;;  %v6162_v53 = vsel %vm927_vm0, %v12827_v25, %v6161_v5 }
 0x513   : > { %v13243_v58 = vsel %vm3913_vm1, %v6162_v53, %v6248_v40 }
 0x514   : > { %v7207_v50 = vor.u32 %v7205_v6, %v7204_v11  ;;  %v7410_v8 = vshrl.u32 %v13243_v58, 16 }
 0x516   : > { %6249 = vrot.lane.b32.xlu1 %v5852_v59, %s9834_s26  ;;  %v13236_v14 = vsel %vm14321_vm3, %v7201_v23, %v7207_v50  ;;  %v7475_v23 = vshll.u32 %v7002_v16, 16  ;;  %vm14348_vm3 = vmmov %vm14318_vm2 }
 0x51b   : > { %v13210_v32 = vpop.permute.xlu0 %6501 }
 0x51c   : > { %v13212_v33 = vpop.permute.xlu1 %6497 }
 0x51d   : > { %v9269_v21 = vpop.f32.mrb[76].mxu0 }
 0x51e   : > { %v5606_v34 = vadd.f32 %v9735_v9, %v9269_v21  ;;  %v5597_v47 = vpop.f32.mrb[77].mxu0 }
 0x51f   : > { %v5598_v62 = vadd.f32 %v9735_v9, %v5597_v47  ;;  %v9270_v17 = vpop.f32.mrb[78].mxu0  ;;  %v6500_v26 = vpop.permute.xlu0 %6499  ;;  %v7485_v47 = vshll.u32 %v7091_v19, 16 }
 0x520   : > { %v5609_v51 = vadd.f32 %v9735_v9, %v9270_v17  ;;  %v5600_v46 = vpop.f32.mrb[79].mxu0  ;;  %v13229_v38 = vpop.permute.xlu1 %6503  ;;  %v5642_v10 = vmax.f32 %v5606_v34, 0.0  ;;  %v5792_v34 = vld [vmem:[#allocation3] sm:$0x80] }
 0x521   : > { %v5601_v59 = vadd.f32 %v9735_v9, %v5600_v46  ;;  %v5640_v11 = vmax.f32 %v5598_v62, 0.0  ;;  %v5903_v62 = vld [vmem:[#allocation3 + $0xd8] sm:$0x80]  ;;  %v7487_v53 = vor.u32 %v7485_v47, %v7484_v28  ;;  %v13264_v28 = vsel %vm3913_vm1, %v12980_v2, %v6500_v26 }
 0x522   : > { %v5643_v35 = vmax.f32 %v5609_v51, 0.0  ;;  %v7526_v51 = vrot.slane %v7524_v0, 7  ;;  %v7521_v0 = vshrl.u32 %v13249_v49, 16  ;;  %v7576_v47 = vshrl.u32 %v13264_v28, 16 }
 0x523   : > { %v5641_v12 = vmax.f32 %v5601_v59, 0.0  ;;  %v9483_v6 = vpop.permute.xlu0 %9482  ;;  %v7477_v59 = vor.u32 %v7475_v23, %v7474_v3 }
 0x524   : > { %v5775_v50 = vpack.c.bf16 %v5643_v35, %v5642_v10  ;;  %v9484_v5 = vunpack.i.l.bf16 %v9483_v6  ;;  %v9478_v21 = vpop.permute.xlu1 %9477  ;;  %v9485_v40 = vunpack.i.h.bf16 %v9483_v6  ;;  %v7413_v6 = vshll.u32 %v13243_v58, 16 }
 0x525   : > { %v5774_v9 = vpack.c.bf16 %v5641_v12, %v5640_v11  ;;  %v9479_v61 = vunpack.i.l.bf16 %v9478_v21  ;;  %v9480_v30 = vunpack.i.h.bf16 %v9478_v21 }
 0x526   : > { %5791 = vst.msk [vmem:[#allocation3 + $0x188] sm:$0xff] %vm3913_vm1, %v5775_v50  ;;  %v7089_v17 = vsel %vm3913_vm1, %v5901_v18, %v9484_v5  ;;  %v7094_v10 = vsel %vm3913_vm1, %v5903_v62, %v9485_v40  ;;  %v7471_v18 = vrot.slane %v7469_v43, 7  ;;  %v7527_v50 = vshll.u32 %v13227_v29, 16 }
 0x527   : > { %5790 = vst.msk [vmem:[#allocation3 + $0x170] sm:$0xff] %vm3913_vm1, %v5774_v9  ;;  %v7479_v46 = vshrl.u32 %v7089_v17, 16  ;;  %v6676_v57 = vpop.permute.xlu0 %6675  ;;  %v6787_v19 = vsel %vm3913_vm1, %v5792_v34, %v9479_v61  ;;  %v7099_v3 = vsel %vm3913_vm1, %v5905_v41, %v9480_v30  ;;  %v7531_v9 = vshrl.u32 %v7094_v10, 16 }
 0x528   : > { %v7101_v16 = vsel %vm3913_vm1, %v12938_v54, %v6676_v57  ;;  %v7137_v35 = vshrl.u32 %v6787_v19, 16  ;;  %v7478_v58 = vsel %vm14323_vm4, %v7471_v18, %v7477_v59  ;;  %v7412_v43 = vrot.slane %v7410_v8, 7  ;;  %v13297_v18 = vld [vmem:[#allocation3 + $0xb0] sm:$0xff]  ;;  %vm14350_vm4 = vmmov %vm14318_vm2 }
 0x529   : > { %v7586_v11 = vshrl.u32 %v7101_v16, 16  ;;  %v7481_v12 = vrot.slane %v7479_v46, 7  ;;  %v7529_v29 = vor.u32 %v7527_v50, %v7526_v51  ;;  %v7583_v23 = vshrl.u32 %v7099_v3, 16 }
 0x52a   : > { %v7139_v5 = vrot.slane %v7137_v35, 7  ;;  %v7589_v62 = vshll.u32 %v7101_v16, 16  ;;  %v7533_v59 = vrot.slane %v7531_v9, 7  ;;  %v7415_v35 = vor.u32 %v7413_v6, %v7412_v43 }
 0x52b   : > { %v6672_v54 = vpop.permute.xlu0 %6671  ;;  %v7488_v21 = vsel %vm14322_vm15, %v7481_v12, %v7487_v53  ;;  %v7588_v40 = vrot.slane %v7586_v11, 7  ;;  %v14326_v11 = vld [vmem:[#allocation23_spill] sm:$0xff]  ;;  %v7585_v3 = vrot.slane %v7583_v23, 7  ;;  %vm14349_vm15 = vmmov %vm14318_vm2 }
 0x52c   : > { %v7096_v49 = vsel %vm3913_vm1, %v12943_v44, %v6672_v54  ;;  %8350 = vmatprep.subr.bf16.mxu1 %v7488_v21  ;;  %v7146_v2 = vsel %vm14324_vm13, %v7139_v5, %v13231_v13  ;;  %v7011_v12 = vsel %vm3913_vm1, %v14326_v11, %v13212_v33  ;;  %v5987_v5 = vshll.u32 %v13297_v18, 16  ;;  %vm14351_vm13 = vmmov %vm14318_vm2 }
 0x52d   : > { %v7534_v34 = vshrl.u32 %v7096_v49, 16  ;;  %8351 = vmatpush1.bf16.xpose.msra.mxu1 %v7478_v58  ;;  %v13273_v26 = vld [vmem:[#allocation3 + $0x188] sm:$0xff]  ;;  %8266 = vmatpush1.bf16.xpose.msra.mxu0 %v7146_v2  ;;  %v7537_v46 = vshll.u32 %v7096_v49, 16  ;;  %v7591_v30 = vor.u32 %v7589_v62, %v7588_v40  ;;  %v7573_v21 = vshrl.u32 %v7011_v12, 16  ;;  %v13316_v49 = vld [vmem:[#allocation3 + $0x1a0] sm:$0xff] }
 0x52e   : > { %v13276_v17 = vld [vmem:[#allocation3 + $0x170] sm:$0xff]  ;;  %v6628_v44 = vshll.u32 %v13273_v26, 16  ;;  %8267 = vmatprep.subr.bf16.mxu0 %v13236_v14  ;;  %v7523_v14 = vrot.slane %v7521_v0, 7  ;;  %v7578_v0 = vrot.slane %v7576_v47, 7  ;;  %v6631_v40 = vshrl.u32 %v13273_v26, 16  ;;  %14331 = vst [vmem:[#allocation17_spill] sm:$0xff] %v13316_v49 }
 0x52f   : > { %v7536_v61 = vrot.slane %v7534_v34, 7  ;;  %v6246_v8 = vpop.permute.xlu0 %6245  ;;  %v6459_v51 = vrot.slane %v13276_v17, 1  ;;  %v6621_v13 = vshll.u32 %v13276_v17, 16  ;;  %v6624_v6 = vshrl.u32 %v13276_v17, 16 }
 0x530   : > { %v6897_v57 = vsel %vm3913_vm1, %v12827_v25, %v6246_v8  ;;  %v13284_v53 = vrot.slane %v6628_v44, 1  ;;  %v7530_v33 = vsel %vm14328_vm7, %v7523_v14, %v7529_v29  ;;  %v5656_v29 = vld [vmem:[#allocation3 + $0x198] sm:$0x80]  ;;  %v7575_v34 = vrot.slane %v7573_v21, 7  ;;  %v14334_v14 = vld [vmem:[#allocation27_spill] sm:$0xff]  ;;  %vm14356_vm7 = vmmov %vm14318_vm2 }
 0x531   : > { %v7539_v41 = vor.u32 %v7537_v46, %v7536_v61  ;;  %v7407_v19 = vshrl.u32 %v6897_v57, 16  ;;  %v6461_v16 = vsel %vm927_vm0, %v6459_v51, %v6460_v22  ;;  %v13289_v10 = vrot.slane %v6621_v13, 1  ;;  %v5826_v61 = vld [vmem:[#allocation3 + $0x40] sm:$0x1]  ;;  %v13332_v46 = vld [vmem:[#allocation3 + $0xc8] sm:$0xff] }
 0x532   : > { %14325 = vst [vmem:[#allocation14_spill] sm:$0xff] %v13284_v53  ;;  %6523 = vrot.lane.b32.xlu0 %v6461_v16, %s9834_s26  ;;  %v9506_v25 = vpack.i.bf16 %v13284_v53, %v13182_v37  ;;  %v7592_v37 = vsel %vm14329_vm8, %v7585_v3, %v7591_v30  ;;  %v13321_v43 = vor.u32 %v6631_v40, %v13284_v53  ;;  %v6635_v2 = vshll.u32 %v13316_v49, 16  ;;  %v5887_v57 = vld [vmem:[#allocation3 + $0x190] sm:$0x1]  ;;  %v5827_v16 = vld [vmem:[#allocation3 + $0x58] sm:$0x1]  ;;  %vm14359_vm8 = vmmov %vm14318_vm2 }
 0x533   : > { %v7409_v50 = vrot.slane %v7407_v19, 7  ;;  %v7540_v20 = vsel %vm14327_vm6, %v7533_v59, %v7539_v41  ;;  %v9511_v22 = vpack.i.bf16 %v13289_v10, %v12845_v63  ;;  %v7579_v63 = vshll.u32 %v13264_v28, 16  ;;  %v13337_v59 = vld [vmem:[#allocation3 + $0xc8] sm:$0xff]  ;;  %vm14355_vm6 = vmmov %vm14318_vm2 }
 0x534   : > { %9507 = vrot.lane.b32.xlu1 %v9506_v25, %s9834_s26  ;;  %8352 = vmatprep.subr.bf16.mxu1 %v7540_v20  ;;  %v13313_v9 = vor.u32 %v6624_v6, %v13289_v10  ;;  %14332 = vst [vmem:[#allocation18_spill] sm:$0xff] %v13321_v43  ;;  %v5989_v28 = vrot.slane %v5987_v5, 1  ;;  %v5657_v47 = vsel %vm12499_vm5, 0, %v5656_v29  ;;  %v5990_v62 = vshrl.u32 %v13297_v18, 16  ;;  %v14335_v25 = vld [vmem:[#allocation28_spill] sm:$0xff]  ;;  %v9737_v20 = vld [vmem:[#allocation3 + $0x20] sm:$0xff]  ;;  %vm14344_vm5 = vmmov %vm14318_vm2 }
 0x535   : > { %8353 = vmatpush1.bf16.xpose.msra.mxu1 %v7530_v33  ;;  %v13308_v54 = vsel %vm14330_vm9, %v7409_v50, %v7415_v35  ;;  %v7581_v58 = vor.u32 %v7579_v63, %v7578_v0  ;;  %5658 = vst [vmem:[#allocation3 + $0x198] sm:$0x80] %v5657_v47  ;;  %v6638_v44 = vshrl.u32 %v13316_v49, 16  ;;  %v6637_v13 = vrot.slane %v6635_v2, 1  ;;  %v14337_v5 = vld [vmem:[#allocation12_spill] sm:$0xff]  ;;  %vm14360_vm9 = vmmov %vm14318_vm2 }
 0x536   : > { %9512 = vrot.lane.b32.xlu0 %v9511_v22, %s9834_s26  ;;  %8354 = vmatprep.subr.bf16.mxu1 %v7592_v37  ;;  %v5992_v8 = vor.u32 %v5990_v62, %v5989_v28  ;;  %v6152_v30 = vrot.slane %v5826_v61, 1  ;;  %v6462_v41 = vrot.slane %v13273_v26, 1  ;;  %v6463_v19 = vrot.slane %v5887_v57, 1  ;;  %v14336_v22 = vld [vmem:[#allocation10_spill] sm:$0xff]  ;;  %v13353_v37 = vld [vmem:[#allocation3 + $0xe0] sm:$0xff]  ;;  %v13364_v47 = vld [vmem:[#allocation3 + $0x38] sm:$0xff] }
 0x537   : > { %v7582_v23 = vsel %vm14333_vm10, %v7575_v34, %v7581_v58  ;;  %v9516_v11 = vpack.i.bf16 %v6637_v13, %v5989_v28  ;;  %v5994_v12 = vshll.u32 %v13337_v59, 16  ;;  %v6794_v3 = vsel %vm3913_vm1, %v9737_v20, %v14336_v22  ;;  %v9739_v57 = vld [vmem:[#allocation3 + $0xe0] sm:$0xff]  ;;  %vm14361_vm10 = vmmov %vm14318_vm2 }
 0x538   : > { %6695 = vrot.lane.b32.xlu1 %v13313_v9, %s9834_s26  ;;  %v6153_v35 = vsel %vm927_vm0, %v14334_v14, %v6152_v30  ;;  %v6155_v0 = vrot.slane %v5827_v16, 1  ;;  %v6464_v6 = vsel %vm927_vm0, %v6462_v41, %v6463_v19  ;;  %v6879_v21 = vsel %vm3913_vm1, %v14334_v14, %v14337_v5  ;;  %v14341_v16 = vld [vmem:[#allocation16_spill] sm:$0xff]  ;;  %v5909_v49 = vld [vmem:[#allocation3 + $0x120] sm:$0x80] }
 0x539   : > { %v6882_v50 = vsel %vm3913_vm1, %v6153_v35, %v14335_v25  ;;  %v5996_v58 = vrot.slane %v5994_v12, 1  ;;  %v7192_v29 = vshrl.u32 %v6794_v3, 16  ;;  %v5997_v34 = vshrl.u32 %v13337_v59, 16  ;;  %v5856_v25 = vld [vmem:[#allocation3 + $0xd8] sm:$0x80] }
 0x53a   : > { %6699 = vrot.lane.b32.xlu0 %v13321_v43, %s9834_s26  ;;  %v7254_v63 = vshrl.u32 %v6882_v50, 16  ;;  %v6001_v28 = vshll.u32 %v13353_v37, 16  ;;  %v7251_v2 = vshrl.u32 %v6879_v21, 16  ;;  %v7257_v22 = vshll.u32 %v6882_v50, 16  ;;  %v9691_v5 = vld [vmem:[%s14153_s7 + $0xc] ss:$20 sps:$4 sm:$0xff]  }
 0x53b   : > { %v5999_v19 = vor.u32 %v5997_v34, %v5996_v58  ;;  %v7194_v35 = vrot.slane %v7192_v29, 7  ;;  %8370 = vmatprep.mubr.bf16.mxu1 %v9691_v5 }
 0x53c   : > { %6521 = vrot.lane.b32.xlu1 %v6459_v51, %s9834_s26  ;;  %v6640_v51 = vor.u32 %v6638_v44, %v6637_v13  ;;  %v14339_v44 = vld [vmem:[#allocation25_spill] sm:$0xff]  ;;  %v13373_v13 = vld [vmem:[#allocation3 + $0xf8] sm:$0xff]  ;;  %v7253_v21 = vrot.slane %v7251_v2, 7 }
 0x53d   : > { %8355 = vmatpush1.bf16.xpose.msra.mxu1 %v7582_v23  ;;  %v14338_v23 = vld [vmem:[#allocation26_spill] sm:$0xff]  ;;  %v6156_v61 = vsel %vm927_vm0, %v14339_v44, %v6155_v0  ;;  %v13385_v14 = vsel %vm3913_vm1, %v14339_v44, %v14341_v16  ;;  %v13394_v0 = vrot.slane %v6001_v28, 1 }
 0x53e   : > { %6255 = vrot.lane.b32.xlu0 %v13332_v46, %s9834_s26  ;;  %v13369_v62 = vsel %vm3913_vm1, %v13364_v47, %v14338_v23  ;;  %v6004_v23 = vshrl.u32 %v13353_v37, 16 }
 0x53f   : > { %v7244_v20 = vshrl.u32 %v13369_v62, 16 }
 0x540   : > { %6079 = vrot.lane.b32.xlu1 %v5992_v8, %s9834_s26 }
 0x541   : > { %v7246_v53 = vrot.slane %v7244_v20, 7 }
 0x542   : > { %6253 = vrot.lane.b32.xlu0 %v5854_v45, %s9834_s26  ;;  %v14340_v45 = vld [vmem:[#allocation24_spill] sm:$0xff] }
 0x543   : > { %v13377_v30 = vsel %vm3913_vm1, %v6156_v61, %v14340_v45  ;;  %v5907_v61 = vld [vmem:[#allocation3 + $0x108] sm:$0x80] }
 0x544   : > { %6703 = vrot.lane.b32.xlu1 %v6640_v51, %s9834_s26  ;;  %v7256_v51 = vrot.slane %v7254_v63, 7  ;;  %v7195_v63 = vshll.u32 %v6794_v3, 16  ;;  %v7306_v29 = vshrl.u32 %v13377_v30, 16  ;;  %v5796_v3 = vld [vmem:[#allocation3 + $0x30] sm:$0x80] }
 0x546   : > { %9517 = vrot.lane.b32.xlu0 %v9516_v11, %s9834_s26  ;;  %v14342_v11 = vld [vmem:[#allocation11_spill] sm:$0xff]  ;;  %v7259_v44 = vor.u32 %v7257_v22, %v7256_v51  ;;  %v7197_v2 = vor.u32 %v7195_v63, %v7194_v35  ;;  %v6006_v51 = vor.u32 %v6004_v23, %v13394_v0 }
 0x547   : > { %v13350_v33 = vpop.permute.xlu0 %6509  ;;  %v13390_v12 = vsel %vm3913_vm1, %v14342_v11, %v13229_v38  ;;  %v5794_v38 = vld [vmem:[#allocation3 + $0x18] sm:$0x80] }
 0x548   : > { %6527 = vrot.lane.b32.xlu1 %v6464_v6, %s9834_s26  ;;  %v13359_v40 = vpop.permute.xlu1 %6505  ;;  %v6008_v6 = vshll.u32 %v13373_v13, 16  ;;  %v7628_v50 = vshrl.u32 %v13390_v12, 16 }
 0x54a   : > { %6525 = vrot.lane.b32.xlu0 %v6462_v41, %s9834_s26  ;;  %v13408_v22 = vrot.slane %v6008_v6, 1 }
 0x54b   : > { %v6508_v8 = vpop.permute.xlu0 %6507 }
 0x54c   : > { %6259 = vrot.lane.b32.xlu1 %v9739_v57, %s9834_s26  ;;  %v13380_v41 = vpop.permute.xlu1 %6511 }
 0x54e   : > { %6083 = vrot.lane.b32.xlu0 %v5999_v19, %s9834_s26 }
 0x54f   : > { %v9493_v34 = vpop.permute.xlu0 %9492 }
 0x550   : > { %v9495_v28 = vunpack.i.h.bf16 %v9493_v34  ;;  %v9494_v45 = vunpack.i.l.bf16 %v9493_v34  ;;  %6257 = vrot.lane.b32.xlu1 %v5856_v25, %s9834_s26  ;;  %v9488_v57 = vpop.permute.xlu1 %9487  ;;  %v7308_v34 = vrot.slane %v7306_v29, 7  ;;  %v14343_v25 = vld [vmem:[#allocation13_spill] sm:$0xff]  ;;  %v7260_v29 = vsel %vm14344_vm5, %v7253_v21, %v7259_v44  ;;  %vm14362_vm5 = vmmov %vm14318_vm2 }
 0x551   : > { %v9490_v16 = vunpack.i.h.bf16 %v9488_v57  ;;  %v9489_v11 = vunpack.i.l.bf16 %v9488_v57  ;;  %v7017_v5 = vsel %vm3913_vm1, %v14343_v25, %v13210_v32  ;;  %v7630_v57 = vrot.slane %v7628_v50, 7  ;;  %v5858_v50 = vld [vmem:[#allocation3 + $0xf0] sm:$0x80] }
 0x552   : > { %v6792_v43 = vsel %vm3913_vm1, %v5794_v38, %v9494_v45  ;;  %6081 = vrot.lane.b32.xlu0 %v5996_v58, %s9834_s26  ;;  %v7104_v35 = vsel %vm3913_vm1, %v5907_v61, %v9495_v28  ;;  %v13417_v58 = vld [vmem:[#allocation3 + $0xf8] sm:$0xff]  ;;  %v7625_v28 = vshrl.u32 %v7017_v5, 16  ;;  %v7309_v5 = vshll.u32 %v13377_v30, 16 }
 0x553   : > { %v7189_v63 = vshrl.u32 %v6792_v43, 16  ;;  %v6684_v19 = vpop.permute.xlu0 %6683  ;;  %v6797_v20 = vsel %vm3913_vm1, %v5796_v3, %v9489_v11  ;;  %v7109_v32 = vsel %vm3913_vm1, %v5909_v49, %v9490_v16  ;;  %v7635_v45 = vshrl.u32 %v7104_v35, 16  ;;  %v5815_v35 = vld [vmem:[#allocation3 + $0x110] sm:$0xff] }
 0x554   : > { %v7111_v38 = vsel %vm3913_vm1, %v13024_v27, %v6684_v19  ;;  %6263 = vrot.lane.b32.xlu1 %v13417_v58, %s9834_s26  ;;  %v6680_v6 = vpop.permute.xlu1 %6679  ;;  %v7026_v27 = vsel %vm3913_vm1, %v13081_v36, %v6508_v8  ;;  %v7631_v3 = vshll.u32 %v13390_v12, 16  ;;  %v7241_v11 = vshrl.u32 %v6797_v20, 16 }
 0x555   : > { %v7191_v23 = vrot.slane %v7189_v63, 7  ;;  %v7690_v61 = vshrl.u32 %v7111_v38, 16  ;;  %v7106_v43 = vsel %vm3913_vm1, %v13029_v60, %v6680_v6  ;;  %v7687_v49 = vshrl.u32 %v7109_v32, 16 }
 0x556   : > { %v7638_v19 = vshrl.u32 %v7106_v43, 16  ;;  %6087 = vrot.lane.b32.xlu0 %v6006_v51, %s9834_s26  ;;  %v7693_v16 = vshll.u32 %v7111_v38, 16  ;;  %v7641_v63 = vshll.u32 %v7106_v43, 16  ;;  %v7633_v36 = vor.u32 %v7631_v3, %v7630_v57 }
 0x557   : > { %v7692_v21 = vrot.slane %v7690_v61, 7  ;;  %v7198_v44 = vsel %vm14318_vm2, %v7191_v23, %v7197_v2  ;;  %v7680_v8 = vshrl.u32 %v7026_v27, 16  ;;  %v6011_v51 = vshrl.u32 %v13373_v13, 16 }
 0x558   : > { %v7640_v25 = vrot.slane %v7638_v19, 7  ;;  %6261 = vrot.lane.b32.xlu1 %v5858_v50, %s9834_s26  ;;  %8268 = vmatpush1.bf16.xpose.msra.mxu0 %v7198_v44  ;;  %v7247_v12 = vshll.u32 %v13369_v62, 16  ;;  %v7637_v2 = vrot.slane %v7635_v45, 7  ;;  %v7311_v38 = vor.u32 %v7309_v5, %v7308_v34  ;;  %v5860_v34 = vld [vmem:[#allocation3 + $0x108] sm:$0x80] }
 0x559   : > { %8269 = vmatprep.subr.bf16.mxu0 %v7260_v29  ;;  %v7695_v20 = vor.u32 %v7693_v16, %v7692_v21  ;;  %v7627_v23 = vrot.slane %v7625_v28, 7  ;;  %v7243_v32 = vrot.slane %v7241_v11, 7  ;;  %v6013_v61 = vor.u32 %v6011_v51, %v13408_v22  ;;  %v13455_v44 = vld [vmem:[#allocation3 + $0x128] sm:$0xff]  ;;  %v5864_v51 = vld [vmem:[#allocation3 + $0x138] sm:$0x80] }
 0x55a   : > { %v7643_v6 = vor.u32 %v7641_v63, %v7640_v25  ;;  %6085 = vrot.lane.b32.xlu0 %v13394_v0, %s9834_s26  ;;  %v7023_v30 = vsel %vm3913_vm1, %v13044_v48, %v13359_v40  ;;  %v7689_v13 = vrot.slane %v7687_v49, 7  ;;  %v6015_v57 = vshll.u32 %v5815_v35, 16  ;;  %v5862_v25 = vld [vmem:[#allocation3 + $0x120] sm:$0x80] }
 0x55b   : > { %v7249_v29 = vor.u32 %v7247_v12, %v7246_v53  ;;  %v7682_v43 = vrot.slane %v7680_v8, 7  ;;  %v7634_v0 = vsel %vm14346_vm12, %v7627_v23, %v7633_v36  ;;  %v14347_v50 = vshrl.u32 %v13385_v14, 16  ;;  %v13451_v14 = vld [vmem:[#allocation3 + $0x128] sm:$0xff]  ;;  %vm14364_vm12 = vmmov %vm14318_vm2 }
 0x55c   : > { %6267 = vrot.lane.b32.xlu1 %v13029_v60, %s9834_s26  ;;  %v7644_v62 = vsel %vm14345_vm14, %v7637_v2, %v7643_v6  ;;  %v7696_v48 = vsel %vm14348_vm3, %v7689_v13, %v7695_v20  ;;  %v7677_v40 = vshrl.u32 %v7023_v30, 16  ;;  %v7683_v60 = vshll.u32 %v7026_v27, 16  ;;  %v13476_v2 = vld [vmem:[#allocation3 + $0x50] sm:$0xff]  ;;  %vm14363_vm14 = vmmov %vm14318_vm2 }
 0x55d   : > { %8356 = vmatprep.subr.bf16.mxu1 %v7644_v62  ;;  %v7305_v28 = vrot.slane %v14347_v50, 7  ;;  %v7250_v45 = vsel %vm14349_vm15, %v7243_v32, %v7249_v29  ;;  %v6017_v19 = vrot.slane %v6015_v57, 1  ;;  %v6018_v11 = vshrl.u32 %v5815_v35, 16  ;;  %v14352_v35 = vld [vmem:[#allocation9_spill] sm:$0xff]  ;;  %vm14365_vm3 = vmmov %vm14318_vm2 }
 0x55e   : > { %6091 = vrot.lane.b32.xlu0 %v6013_v61, %s9834_s26  ;;  %8357 = vmatpush1.bf16.xpose.msra.mxu1 %v7634_v0  ;;  %v7685_v3 = vor.u32 %v7683_v60, %v7682_v43  ;;  %v7679_v21 = vrot.slane %v7677_v40, 7  ;;  %v6022_v49 = vshll.u32 %v13451_v14, 16  ;;  %v6025_v5 = vshrl.u32 %v13451_v14, 16  ;;  %v13498_v43 = vld [vmem:[#allocation3 + $0x68] sm:$0xff]  ;;  %vm14366_vm15 = vmmov %vm14318_vm2 }
 0x55f   : > { %8358 = vmatprep.subr.bf16.mxu1 %v7696_v48  ;;  %v7312_v53 = vsel %vm14350_vm4, %v7305_v28, %v7311_v38  ;;  %v6020_v27 = vor.u32 %v6018_v11, %v6017_v19  ;;  %v6804_v38 = vsel %vm3913_vm1, %v13476_v2, %v13055_v39  ;;  %v6891_v32 = vsel %vm3913_vm1, %v14352_v35, %v13142_v31  ;;  %v14353_v0 = vld [vmem:[#allocation22_spill] sm:$0xff]  ;;  %v14354_v11 = vld [vmem:[#allocation15_spill] sm:$0xff]  ;;  %vm14367_vm4 = vmmov %vm14318_vm2 }
 0x560   : > { %6265 = vrot.lane.b32.xlu1 %v5860_v34, %s9834_s26  ;;  %8270 = vmatpush1.bf16.xpose.msra.mxu0 %v7250_v45  ;;  %v7686_v16 = vsel %vm14351_vm13, %v7679_v21, %v7685_v3  ;;  %v6024_v63 = vrot.slane %v6022_v49, 1  ;;  %v7296_v30 = vshrl.u32 %v6804_v38, 16  ;;  %v7355_v62 = vshrl.u32 %v6891_v32, 16  ;;  %v5798_v48 = vld [vmem:[#allocation3 + $0x48] sm:$0x80]  ;;  %vm14368_vm13 = vmmov %vm14318_vm2 }
 0x561   : > { %8271 = vmatprep.subr.bf16.mxu0 %v7312_v53  ;;  %v7032_v31 = vsel %vm3913_vm1, %v13073_v24, %v13380_v41  ;;  %v13503_v34 = vsel %vm3913_vm1, %v13498_v43, %v14353_v0  ;;  %v7299_v60 = vshll.u32 %v6804_v38, 16  ;;  %v5911_v53 = vld [vmem:[#allocation3 + $0x138] sm:$0x80]  ;;  %v5800_v24 = vld [vmem:[#allocation3 + $0x60] sm:$0x80]  ;;  %v7029_v21 = vsel %vm3913_vm1, %v14354_v11, %v13350_v33 }
 0x562   : > { %6089 = vrot.lane.b32.xlu0 %v13408_v22, %s9834_s26  ;;  %v5828_v22 = vld [vmem:[#allocation3 + $0x70] sm:$0x1]  ;;  %v6027_v8 = vor.u32 %v6025_v5, %v6024_v63  ;;  %v7298_v50 = vrot.slane %v7296_v30, 7  ;;  %v7357_v28 = vrot.slane %v7355_v62, 7  ;;  %v5913_v49 = vld [vmem:[#allocation3 + $0x150] sm:$0x80] }
 0x563   : > { %v6158_v36 = vrot.slane %v5828_v22, 1  ;;  %v7348_v22 = vshrl.u32 %v13503_v34, 16  ;;  %v7729_v33 = vshrl.u32 %v7029_v21, 16  ;;  %v5870_v21 = vld [vmem:[#allocation3 + $0x180] sm:$0x80] }
 0x564   : > { %6271 = vrot.lane.b32.xlu1 %v13455_v44, %s9834_s26 }
 0x565   : > { %v6159_v12 = vsel %vm927_vm0, %v14352_v35, %v6158_v36  ;;  %v7301_v36 = vor.u32 %v7299_v60, %v7298_v50 }
 0x566   : > { %6095 = vrot.lane.b32.xlu0 %v6020_v27, %s9834_s26  ;;  %8359 = vmatpush1.bf16.xpose.msra.mxu1 %v7686_v16  ;;  %v6894_v20 = vsel %vm3913_vm1, %v6159_v12, %v13078_v7  ;;  %v5866_v7 = vld [vmem:[#allocation3 + $0x150] sm:$0x80]  ;;  %v7732_v27 = vshrl.u32 %v7032_v31, 16 }
 0x567   : > { %v7358_v23 = vshrl.u32 %v6894_v20, 16  ;;  %v7361_v29 = vshll.u32 %v6894_v20, 16 }
 0x568   : > { %6269 = vrot.lane.b32.xlu1 %v5862_v25, %s9834_s26 }
 0x569   : > { %v7360_v57 = vrot.slane %v7358_v23, 7 }
 0x56a   : > { %6093 = vrot.lane.b32.xlu0 %v6017_v19, %s9834_s26 }
 0x56b   : > { %v7363_v45 = vor.u32 %v7361_v29, %v7360_v57  ;;  %v7735_v29 = vshll.u32 %v7032_v31, 16  ;;  %v7350_v31 = vrot.slane %v7348_v22, 7  ;;  %v7731_v22 = vrot.slane %v7729_v33, 7 }
 0x56c   : > { %6275 = vrot.lane.b32.xlu1 %v13140_v15, %s9834_s26 }
 0x56d   : > { %v7364_v12 = vsel %vm14355_vm6, %v7357_v28, %v7363_v45  ;;  %vm14369_vm6 = vmmov %vm14318_vm2 }
 0x56e   : > { %6099 = vrot.lane.b32.xlu0 %v6027_v8, %s9834_s26 }
 0x570   : > { %6273 = vrot.lane.b32.xlu1 %v5864_v51, %s9834_s26 }
 0x572   : > { %6097 = vrot.lane.b32.xlu0 %v6024_v63, %s9834_s26  ;;  %v5868_v63 = vld [vmem:[#allocation3 + $0x168] sm:$0x80] }
 0x573   : > { %v13474_v6 = vpop.permute.xlu0 %6517 }
 0x574   : > { %6279 = vrot.lane.b32.xlu1 %v13136_v55, %s9834_s26  ;;  %v13486_v61 = vpop.permute.xlu1 %6513 }
 0x576   : > { %6103 = vrot.lane.b32.xlu0 %v13186_v1, %s9834_s26 }
 0x577   : > { %v6516_v13 = vpop.permute.xlu0 %6515 }
 0x578   : > { %6277 = vrot.lane.b32.xlu1 %v5866_v7, %s9834_s26  ;;  %v13491_v39 = vpop.permute.xlu1 %6519  ;;  %v7734_v7 = vrot.slane %v7732_v27, 7  ;;  %v7038_v0 = vsel %vm3913_vm1, %v13186_v1, %v6516_v13  ;;  %v9703_v27 = vld [vmem:[%s14153_s7 + $0x4] ss:$20 sps:$4 sm:$0xff]  }
 0x579   : > { %v7784_v11 = vshrl.u32 %v7038_v0, 16  ;;  %8297 = vmatprep.mubr.bf16.mxu0 %v9703_v27  ;;  %v13563_v27 = vld [vmem:[#allocation3 + $0xb8] sm:$0x1] }
 0x57a   : > { %6101 = vrot.lane.b32.xlu0 %v13153_v56, %s9834_s26 }
 0x57b   : > { %v9503_v40 = vpop.permute.xlu0 %9502 }
 0x57c   : > { %v9505_v19 = vunpack.i.h.bf16 %v9503_v40  ;;  %v9504_v3 = vunpack.i.l.bf16 %v9503_v40  ;;  %6283 = vrot.lane.b32.xlu1 %v13276_v17, %s9834_s26  ;;  %v9498_v41 = vpop.permute.xlu1 %9497 }
 0x57d   : > { %v9500_v16 = vunpack.i.h.bf16 %v9498_v41  ;;  %v9499_v25 = vunpack.i.l.bf16 %v9498_v41  ;;  %v7737_v41 = vor.u32 %v7735_v29, %v7734_v7  ;;  %v5924_v7 = vld [vmem:[#allocation3 + $0x88] sm:$0x1] }
 0x57e   : > { %v6802_v5 = vsel %vm3913_vm1, %v5798_v48, %v9504_v3  ;;  %6107 = vrot.lane.b32.xlu0 %v13180_v52, %s9834_s26  ;;  %v7114_v8 = vsel %vm3913_vm1, %v5911_v53, %v9505_v19  ;;  %v5921_v48 = vld [vmem:[#allocation3 + $0x40] sm:$0x1]  ;;  %v5660_v53 = vld [vmem:[#allocation3 + $0x1a8] sm:$0x1] }
 0x57f   : > { %v7293_v51 = vshrl.u32 %v6802_v5, 16  ;;  %v6692_v35 = vpop.permute.xlu0 %6691  ;;  %v7119_v20 = vsel %vm3913_vm1, %v5913_v49, %v9500_v16  ;;  %v6807_v38 = vsel %vm3913_vm1, %v5800_v24, %v9499_v25  ;;  %v7739_v50 = vshrl.u32 %v7114_v8, 16  ;;  %v5923_v5 = vld [vmem:[#allocation3 + $0x70] sm:$0x1] }
 0x580   : > { %v7121_v23 = vsel %vm3913_vm1, %v13136_v55, %v6692_v35  ;;  %6281 = vrot.lane.b32.xlu1 %v5868_v63, %s9834_s26  ;;  %v6688_v32 = vpop.permute.xlu1 %6687  ;;  %v7791_v55 = vshrl.u32 %v7119_v20, 16  ;;  %v7345_v40 = vshrl.u32 %v6807_v38, 16  ;;  %v5661_v13 = vsel %vm12638_vm11, 0, %v5660_v53  ;;  %vm14358_vm11 = vmmov %vm14318_vm2 }
 0x581   : > { %v7295_v30 = vrot.slane %v7293_v51, 7  ;;  %v7794_v62 = vshrl.u32 %v7121_v23, 16  ;;  %v7116_v57 = vsel %vm3913_vm1, %v13140_v15, %v6688_v32  ;;  %v7797_v19 = vshll.u32 %v7121_v23, 16  ;;  %v5922_v15 = vld [vmem:[#allocation3 + $0x58] sm:$0x1] }
 0x582   : > { %v7742_v28 = vshrl.u32 %v7116_v57, 16  ;;  %6105 = vrot.lane.b32.xlu0 %v13157_v4, %s9834_s26  ;;  %v7745_v24 = vshll.u32 %v7116_v57, 16  ;;  %5662 = vst [vmem:[#allocation3 + $0x1a8] sm:$0x1] %v5661_v13  ;;  %v7741_v25 = vrot.slane %v7739_v50, 7  ;;  %v6738_v63 = vrot.slane %v5921_v48, 1 }
 0x583   : > { %v7796_v60 = vrot.slane %v7794_v62, 7  ;;  %v7302_v45 = vsel %vm14356_vm7, %v7295_v30, %v7301_v36  ;;  %v7351_v36 = vshll.u32 %v13503_v34, 16  ;;  %v7347_v8 = vrot.slane %v7345_v40, 7  ;;  %v5925_v30 = vld [vmem:[#allocation3 + $0xa0] sm:$0x1]  ;;  %vm14370_vm7 = vmmov %vm14318_vm2 }
 0x584   : > { %v7744_v3 = vrot.slane %v7742_v28, 7  ;;  %6287 = vrot.lane.b32.xlu1 %v13273_v26, %s9834_s26  ;;  %8272 = vmatpush1.bf16.xpose.msra.mxu0 %v7302_v45  ;;  %v6737_v51 = vrot.slane %v13364_v47, 1  ;;  %v7035_v35 = vsel %vm3913_vm1, %v13153_v56, %v13486_v61  ;;  %v7793_v20 = vrot.slane %v7791_v55, 7  ;;  %v13553_v48 = vld [vmem:[#allocation3 + $0x80] sm:$0xff]  ;;  %v9745_v45 = vld [vmem:[#allocation3 + $0x98] sm:$0xff] }
 0x585   : > { %8273 = vmatprep.subr.bf16.mxu0 %v7364_v12  ;;  %v7799_v49 = vor.u32 %v7797_v19, %v7796_v60  ;;  %v6741_v38 = vrot.slane %v5922_v15, 1  ;;  %v7353_v23 = vor.u32 %v7351_v36, %v7350_v31  ;;  %v7786_v32 = vrot.slane %v7784_v11, 7  ;;  %v13561_v31 = vld [vmem:[#allocation3 + $0xa0] sm:$0x1] }
 0x586   : > { %v7747_v16 = vor.u32 %v7745_v24, %v7744_v3  ;;  %6111 = vrot.lane.b32.xlu0 %v13313_v9, %s9834_s26  ;;  %v7738_v34 = vsel %vm14359_vm8, %v7731_v22, %v7737_v41  ;;  %v6744_v33 = vrot.slane %v5923_v5, 1  ;;  %v6740_v56 = vrot.slane %v13476_v2, 1  ;;  %vm14373_vm8 = vmmov %vm14318_vm2 }
 0x587   : > { %v7800_v47 = vsel %vm14360_vm9, %v7793_v20, %v7799_v49  ;;  %v6743_v61 = vrot.slane %v13498_v43, 1  ;;  %v7781_v62 = vshrl.u32 %v7035_v35, 16  ;;  %v7787_v57 = vshll.u32 %v7038_v0, 16  ;;  %vm14374_vm9 = vmmov %vm14318_vm2 }
 0x588   : > { %6285 = vrot.lane.b32.xlu1 %v5870_v21, %s9834_s26  ;;  %v7748_v12 = vsel %vm14358_vm11, %v7741_v25, %v7747_v16  ;;  %v7354_v29 = vsel %vm14361_vm10, %v7347_v8, %v7353_v23  ;;  %v6739_v50 = vsel %vm927_vm0, %v6737_v51, %v6738_v63  ;;  %v6746_v55 = vrot.slane %v13553_v48, 1  ;;  %v13565_v63 = vld [vmem:[#allocation3 + $0xd0] sm:$0x1]  ;;  %vm14371_vm11 = vmmov %vm14318_vm2 }
 0x589   : > { %8360 = vmatprep.subr.bf16.mxu1 %v7748_v12  ;;  %v7789_v28 = vor.u32 %v7787_v57, %v7786_v32  ;;  %v6747_v2 = vrot.slane %v5924_v7, 1  ;;  %v6750_v40 = vrot.slane %v5925_v30, 1  ;;  %v7182_v43 = vshrl.u32 %v6739_v50, 16  ;;  %v13567_v12 = vld [vmem:[#allocation3 + $0xd0] sm:$0x1]  ;;  %vm14376_vm10 = vmmov %vm14318_vm2 }
 0x58a   : > { %6109 = vrot.lane.b32.xlu0 %v13289_v10, %s9834_s26  ;;  %8361 = vmatpush1.bf16.xpose.msra.mxu1 %v7738_v34  ;;  %v6742_v60 = vsel %vm927_vm0, %v6740_v56, %v6741_v38  ;;  %v6745_v0 = vsel %vm927_vm0, %v6743_v61, %v6744_v33  ;;  %v6749_v53 = vrot.slane %v9745_v45, 1  ;;  %v7783_v19 = vrot.slane %v7781_v62, 7  ;;  %v13571_v32 = vld [vmem:[#allocation3 + $0xb8] sm:$0x1]  ;;  %v13574_v33 = vld [vmem:[#allocation3 + $0x100] sm:$0x1] }
 0x58b   : > { %8362 = vmatprep.subr.bf16.mxu1 %v7800_v47  ;;  %v7234_v24 = vshrl.u32 %v6742_v60, 16  ;;  %v7286_v15 = vshrl.u32 %v6745_v0, 16  ;;  %v7184_v1 = vrot.slane %v7182_v43, 7  ;;  %v7178_v41 = vshrl.u32 %v6737_v51, 16  ;;  %v13576_v47 = vld [vmem:[#allocation3 + $0x100] sm:$0x1] }
 0x58c   : > { %8274 = vmatpush1.bf16.xpose.msra.mxu0 %v7354_v29  ;;  %v7790_v3 = vsel %vm14362_vm5, %v7783_v19, %v7789_v28  ;;  %v6751_v13 = vsel %vm927_vm0, %v6749_v53, %v6750_v40  ;;  %v7185_v11 = vshll.u32 %v6739_v50, 16  ;;  %v7230_v36 = vshrl.u32 %v6740_v56, 16  ;;  %v13578_v30 = vld [vmem:[#allocation3 + $0xe8] sm:$0x1]  ;;  %vm14378_vm5 = vmmov %vm14318_vm2  ;;  %s8972_s26 = sshll.u32 %s9909_s13, 11  ;;  %s14104_s13 = scalar_lea.sflag [#allocation5], %s323_s29 }
 0x58d   : > { %8275 = vmatprep.subr.bf16.mxu0 %v13308_v54  ;;  %v6748_v54 = vsel %vm927_vm0, %v6746_v55, %v6747_v2  ;;  %v7236_v49 = vrot.slane %v7234_v24, 7  ;;  %v7288_v16 = vrot.slane %v7286_v15, 7  ;;  %v7390_v25 = vshrl.u32 %v6751_v13, 16  ;;  %s14095_s22 = scalar_lea.hbm %s14155_s9, %s8972_s26 }
 0x58e   : > { %v7338_v21 = vshrl.u32 %v6748_v54, 16  ;;  %v7187_v5 = vor.u32 %v7185_v11, %v7184_v1  ;;  %v7237_v22 = vshll.u32 %v6742_v60, 16  ;;  %v7282_v8 = vshrl.u32 %v6743_v61, 16  ;;  %v13582_v60 = vld [vmem:[#allocation3 + $0xe8] sm:$0x1] }
 0x58f   : > { %v7289_v35 = vshll.u32 %v6745_v0, 16  ;;  %v6164_v20 = vrot.slane %v13561_v31, 1  ;;  %v6167_v51 = vrot.slane %v13563_v27, 1  ;;  %v7180_v38 = vrot.slane %v7178_v41, 7  ;;  %v6252_v0 = vpop.permute.xlu1 %6251  ;;  %v13598_v31 = vld [vmem:[#allocation3 + $0x118] sm:$0x1] }
 0x590   : > { %v7340_v23 = vrot.slane %v7338_v21, 7  ;;  %v6170_v34 = vrot.slane %v13565_v63, 1  ;;  %v7239_v56 = vor.u32 %v7237_v22, %v7236_v49  ;;  %v7392_v61 = vrot.slane %v7390_v25, 7  ;;  %v9746_v49 = vld [vmem:[#allocation3 + $0x98] sm:$0xff]  ;;  %v13606_v25 = vld [vmem:[#allocation3 + $0x130] sm:$0x1] }
 0x591   : > { %v7291_v7 = vor.u32 %v7289_v35, %v7288_v16  ;;  %v7188_v62 = vsel %vm14318_vm2, %v7180_v38, %v7187_v5  ;;  %v7334_v57 = vshrl.u32 %v6746_v55, 16  ;;  %v7341_v29 = vshll.u32 %v6748_v54, 16  ;;  %v13608_v5 = vld [vmem:[#allocation3 + $0x118] sm:$0x1]  ;;  %v13617_v35 = vld [vmem:[#allocation3 + $0x130] sm:$0x1] }
 0x592   : > { %8363 = vmatpush1.bf16.xpose.msra.mxu1 %v7790_v3  ;;  %v7232_v28 = vrot.slane %v7230_v36, 7  ;;  %v7284_v2 = vrot.slane %v7282_v8, 7  ;;  %v7386_v40 = vshrl.u32 %v6749_v53, 16  ;;  %v7393_v43 = vshll.u32 %v6751_v13, 16  ;;  %v8059_v63 = vld [vmem:[%s14154_s8 + $0x10] sm:$0xff] }
 0x593   : > { %v6762_v45 = vrot.slane %v13574_v33, 1  ;;  %v7343_v3 = vor.u32 %v7341_v29, %v7340_v23  ;;  %v6753_v24 = vrot.slane %v13571_v32, 1  ;;  %v13593_v53 = vsel %vm3913_vm1, %v13553_v48, %v13208_v42  ;;  %v6076_v48 = vpop.permute.xlu0 %6075  ;;  %v9747_v32 = vld [vmem:[#allocation3 + $0xb0] sm:$0xff] }
 0x594   : > { %v7240_v55 = vsel %vm14363_vm14, %v7232_v28, %v7239_v56  ;;  %v7292_v54 = vsel %vm14364_vm12, %v7284_v2, %v7291_v7  ;;  %v7395_v1 = vor.u32 %v7393_v43, %v7392_v61  ;;  %v13596_v13 = vsel %vm3913_vm1, %v7188_v62, 0  ;;  %v6250_v61 = vpop.permute.xlu1 %6249  ;;  %v5804_v29 = vld [vmem:[#allocation3 + $0x90] sm:$0x80]  ;;  %vm14379_vm14 = vmmov %vm14318_vm2 }
 0x595   : > { %v7336_v41 = vrot.slane %v7334_v57, 7  ;;  %v13604_v21 = vsel %vm3913_vm1, %v13180_v52, %v13491_v39  ;;  %v6163_v16 = vrot.slane %v9746_v49, 1  ;;  %v7388_v42 = vrot.slane %v7386_v40, 7  ;;  %vm14382_vm12 = vmmov %vm14318_vm2 }
 0x596   : > { %v6166_v36 = vrot.slane %v13297_v18, 1  ;;  %v13612_v22 = vsel %vm3913_vm1, %v7240_v55, 0  ;;  %v13615_v8 = vsel %vm3913_vm1, %v7292_v54, 0  ;;  %v7400_v39 = vshrl.u32 %v13593_v53, 16 }
 0x597   : > { %v7344_v52 = vsel %vm14365_vm3, %v7336_v41, %v7343_v3  ;;  %v6169_v38 = vrot.slane %v13337_v59, 1  ;;  %v7396_v23 = vsel %vm14366_vm15, %v7388_v42, %v7395_v1  ;;  %v6752_v56 = vrot.slane %v9747_v32, 1  ;;  %vm14384_vm3 = vmmov %vm14318_vm2 }
 0x598   : > { %v7836_v7 = vshrl.u32 %v13604_v21, 16  ;;  %v6765_v62 = vrot.slane %v13598_v31, 1  ;;  %v7041_v28 = vsel %vm3913_vm1, %v13157_v4, %v13474_v6  ;;  %v6165_v2 = vsel %vm927_vm0, %v6163_v16, %v6164_v20  ;;  %v8057_v20 = vld [vmem:[%s14154_s8] sm:$0xff]  ;;  %vm14385_vm15 = vmmov %vm14318_vm2 }
 0x599   : > { %v13633_v43 = vsel %vm3913_vm1, %v7344_v52, 0  ;;  %v13636_v3 = vsel %vm3913_vm1, %v6165_v2, %v6252_v0  ;;  %v13645_v54 = vsel %vm927_vm0, %v6166_v36, %v6167_v51  ;;  %v6761_v4 = vrot.slane %v13417_v58, 1  ;;  %v8058_v0 = vld [vmem:[%s14154_s8 + $0x8] sm:$0xff]  ;;  %8067 = vperm.xlu1 %9521, %v8057_v20  }
 0x59a   : > { %v13649_v6 = vsel %vm3913_vm1, %v7396_v23, 0  ;;  %v7402_v1 = vrot.slane %v7400_v39, 7  ;;  %v13662_v27 = vsel %vm927_vm0, %v6169_v38, %v6170_v34  ;;  %v13665_v51 = vsel %vm927_vm0, %v6752_v56, %v6753_v24  ;;  %8072 = vperm.xlu0 %9522, %v8058_v0   ;;  %v8061_v34 = vld [vmem:[%s14154_s8 + $0x20] sm:$0xff]  ;;  %v5802_v20 = vld [vmem:[#allocation3 + $0x78] sm:$0x80] }
 0x59b   : > { %v7833_v42 = vshrl.u32 %v7041_v28, 16  ;;  %v7838_v52 = vrot.slane %v7836_v7, 7  ;;  %v6903_v23 = vsel %vm3913_vm1, %v6163_v16, %v6250_v61  ;;  %v13669_v39 = vshrl.u32 %v6752_v56, 16  ;;  %v5917_v28 = vld [vmem:[#allocation3 + $0x180] sm:$0x80] }
 0x59c   : > { %v7403_v24 = vshll.u32 %v13593_v53, 16  ;;  %v13679_v2 = vsel %vm3913_vm1, %v9746_v49, %v6076_v48  ;;  %v7462_v7 = vshrl.u32 %v13636_v3, 16  ;;  %v7839_v56 = vshll.u32 %v13604_v21, 16  ;;  %v5915_v0 = vld [vmem:[#allocation3 + $0x168] sm:$0x80] }
 0x59d   : > { %v13688_v40 = vsel %vm927_vm0, %v6761_v4, %v6762_v45  ;;  %v7459_v48 = vshrl.u32 %v6903_v23, 16  ;;  %8077 = vperm.xlu1 %9521, %v8059_v63   ;;  %v7835_v21 = vrot.slane %v7833_v42, 7  ;;  %v7452_v50 = vshrl.u32 %v13679_v2, 16  ;;  %v8060_v45 = vld [vmem:[%s14154_s8 + $0x18] sm:$0xff] }
 0x59e   : > { %v7405_v49 = vor.u32 %v7403_v24, %v7402_v1  ;;  %8087 = vperm.xlu0 %9522, %v8061_v34   ;;  %v8063_v1 = vld [vmem:[%s14154_s8 + $0x30] sm:$0xff]  ;;  %v7464_v23 = vrot.slane %v7462_v7, 7  ;;  %v7601_v58 = vshll.u32 %v13688_v40, 16 }
 0x5a1   : > { %8082 = vperm.xlu1 %9521, %v8060_v45  }
 0x5a2   : > { %8097 = vperm.xlu0 %9522, %v8063_v1  }
 0x5a4   : > { %v13638_v55 = vpop.permute.xlu0 %6523 }
 0x5a6   : > { %v9508_v32 = vpop.permute.xlu1 %9507 }
 0x5a7   : > { %v9510_v16 = vunpack.i.h.bf16 %v9508_v32  ;;  %v9509_v61 = vunpack.i.l.bf16 %v9508_v32  ;;  %v7841_v32 = vor.u32 %v7839_v56, %v7838_v52  ;;  %v7465_v52 = vshll.u32 %v13636_v3, 16 }
 0x5a8   : > { %v9513_v11 = vpop.permute.xlu0 %9512  ;;  %v7461_v56 = vrot.slane %v7459_v48, 7 }
 0x5a9   : > { %v9515_v19 = vunpack.i.h.bf16 %v9513_v11  ;;  %v9514_v41 = vunpack.i.l.bf16 %v9513_v11  ;;  %v7129_v33 = vsel %vm3913_vm1, %v5917_v28, %v9510_v16  ;;  %v6817_v34 = vsel %vm3913_vm1, %v5804_v29, %v9509_v61 }
 0x5aa   : > { %v6696_v57 = vpop.permute.xlu1 %6695  ;;  %v7895_v53 = vshrl.u32 %v7129_v33, 16  ;;  %v7454_v29 = vrot.slane %v7452_v50, 7  ;;  %v7467_v3 = vor.u32 %v7465_v52, %v7464_v23  ;;  %v7050_v61 = vsel %vm3913_vm1, %v13313_v9, %v13638_v55 }
 0x5ab   : > { %v7124_v11 = vsel %vm3913_vm1, %v5915_v0, %v9515_v19  ;;  %v6812_v63 = vsel %vm3913_vm1, %v5802_v20, %v9514_v41  ;;  %v7126_v42 = vsel %vm3913_vm1, %v13276_v17, %v6696_v57  ;;  %v8062_v57 = vld [vmem:[%s14154_s8 + $0x28] sm:$0xff]  ;;  %v7449_v48 = vshrl.u32 %v6817_v34, 16 }
 0x5ac   : > { %v7397_v24 = vshrl.u32 %v6812_v63, 16  ;;  %v7846_v28 = vshrl.u32 %v7126_v42, 16  ;;  %v6700_v16 = vpop.permute.xlu0 %6699  ;;  %v7843_v15 = vshrl.u32 %v7124_v11, 16  ;;  %v7849_v20 = vshll.u32 %v7126_v42, 16  ;;  %8092 = vperm.xlu1 %9521, %v8062_v57  }
 0x5ad   : > { %v7131_v7 = vsel %vm3913_vm1, %v13273_v26, %v6700_v16  ;;  %v7468_v50 = vsel %vm14368_vm13, %v7461_v56, %v7467_v3  ;;  %v7888_v52 = vshrl.u32 %v7050_v61, 16  ;;  %vm14392_vm13 = vmmov %vm14318_vm2 }
 0x5ae   : > { %v7399_v19 = vrot.slane %v7397_v24, 7  ;;  %v7848_v41 = vrot.slane %v7846_v28, 7  ;;  %v7898_v0 = vshrl.u32 %v7131_v7, 16  ;;  %v6522_v17 = vpop.permute.xlu1 %6521  ;;  %v7901_v45 = vshll.u32 %v7131_v7, 16 }
 0x5af   : > { %v7047_v63 = vsel %vm3913_vm1, %v13289_v10, %v6522_v17  ;;  %v7845_v23 = vrot.slane %v7843_v15, 7  ;;  %v7897_v24 = vrot.slane %v7895_v53, 7  ;;  %v7455_v10 = vshll.u32 %v13679_v2, 16 }
 0x5b0   : > { %v7851_v33 = vor.u32 %v7849_v20, %v7848_v41  ;;  %v7900_v26 = vrot.slane %v7898_v0, 7  ;;  %v6256_v1 = vpop.permute.xlu0 %6255  ;;  %v7406_v11 = vsel %vm14367_vm4, %v7399_v19, %v7405_v49  ;;  %v8064_v49 = vld [vmem:[%s14154_s8 + $0x38] sm:$0xff]  ;;  %v7451_v28 = vrot.slane %v7449_v48, 7  ;;  %v14372_v48 = vld [vmem:[#allocation17_spill] sm:$0xff]  ;;  %vm14391_vm4 = vmmov %vm14318_vm2 }
 0x5b1   : > { %v6912_v42 = vsel %vm3913_vm1, %v13645_v54, %v6256_v1  ;;  %8276 = vmatpush1.bf16.xpose.msra.mxu0 %v7406_v11  ;;  %v7885_v16 = vshrl.u32 %v7047_v63, 16  ;;  %v7842_v19 = vsel %vm14370_vm7, %v7835_v21, %v7841_v32  ;;  %v7457_v41 = vor.u32 %v7455_v10, %v7454_v29  ;;  %8102 = vperm.xlu1 %9521, %v8064_v49   ;;  %v5919_v11 = vld [vmem:[#allocation3 + $0x198] sm:$0x80]  ;;  %vm14394_vm7 = vmmov %vm14318_vm2 }
 0x5b2   : > { %v7903_v9 = vor.u32 %v7901_v45, %v7900_v26  ;;  %v7514_v55 = vshrl.u32 %v6912_v42, 16  ;;  %v6080_v34 = vpop.permute.xlu1 %6079  ;;  %8277 = vmatprep.subr.bf16.mxu0 %v7468_v50  ;;  %v7852_v15 = vsel %vm14369_vm6, %v7845_v23, %v7851_v33  ;;  %v13735_v20 = vshrl.u32 %v6761_v4, 16  ;;  %vm14393_vm6 = vmmov %vm14318_vm2 }
 0x5b3   : > { %v13725_v54 = vsel %vm3913_vm1, %v13297_v18, %v6080_v34  ;;  %8364 = vmatprep.subr.bf16.mxu1 %v7852_v15  ;;  %v7598_v0 = vshrl.u32 %v13688_v40, 16  ;;  %v7890_v17 = vrot.slane %v7888_v52, 7  ;;  %v7517_v57 = vshll.u32 %v6912_v42, 16  ;;  %v13743_v52 = vld [vmem:[#allocation3 + $0x110] sm:$0xff]  ;;  %v14375_v15 = vld [vmem:[#allocation18_spill] sm:$0xff] }
 0x5b4   : > { %v7516_v56 = vrot.slane %v7514_v55, 7  ;;  %v6254_v7 = vpop.permute.xlu0 %6253  ;;  %v7904_v53 = vsel %vm14371_vm11, %v7897_v24, %v7903_v9  ;;  %8365 = vmatpush1.bf16.xpose.msra.mxu1 %v7842_v19  ;;  %v7504_v3 = vshrl.u32 %v13725_v54, 16  ;;  %v7891_v29 = vshll.u32 %v7050_v61, 16  ;;  %vm14396_vm11 = vmmov %vm14318_vm2 }
 0x5b5   : > { %v6909_v2 = vsel %vm3913_vm1, %v6166_v36, %v6254_v7  ;;  %8366 = vmatprep.subr.bf16.mxu1 %v7904_v53  ;;  %v5806_v36 = vld [vmem:[#allocation3 + $0xa8] sm:$0x80]  ;;  %v7458_v33 = vsel %vm14373_vm8, %v7451_v28, %v7457_v41  ;;  %v7887_v4 = vrot.slane %v7885_v16, 7  ;;  %v7600_v23 = vrot.slane %v7598_v0, 7  ;;  %vm14397_vm8 = vmmov %vm14318_vm2 }
 0x5b6   : > { %v7511_v21 = vshrl.u32 %v6909_v2, 16  ;;  %v6704_v32 = vpop.permute.xlu1 %6703  ;;  %v7519_v26 = vor.u32 %v7517_v57, %v7516_v56  ;;  %v6764_v61 = vrot.slane %v13743_v52, 1  ;;  %v7893_v9 = vor.u32 %v7891_v29, %v7890_v17  ;;  %v14377_v17 = vld [vmem:[#allocation14_spill] sm:$0xff]  ;;  %v9751_v52 = vld [vmem:[#allocation3 + $0xe0] sm:$0xff] }
 0x5b7   : > { %v7136_v18 = vsel %vm3913_vm1, %v14372_v48, %v6704_v32  ;;  %v7506_v55 = vrot.slane %v7504_v3, 7  ;;  %v7507_v2 = vshll.u32 %v13725_v54, 16 }
 0x5b8   : > { %v7513_v45 = vrot.slane %v7511_v21, 7  ;;  %v7950_v1 = vshrl.u32 %v7136_v18, 16  ;;  %v9518_v63 = vpop.permute.xlu0 %9517  ;;  %v7953_v34 = vshll.u32 %v7136_v18, 16  ;;  %v7894_v41 = vsel %vm14376_vm10, %v7887_v4, %v7893_v9  ;;  %vm14400_vm10 = vmmov %vm14318_vm2 }
 0x5b9   : > { %v9520_v42 = vunpack.i.h.bf16 %v9518_v63  ;;  %v9519_v50 = vunpack.i.l.bf16 %v9518_v63  ;;  %8278 = vmatpush1.bf16.xpose.msra.mxu0 %v7458_v33  ;;  %v13760_v3 = vsel %vm927_vm0, %v6764_v61, %v6765_v62  ;;  %v7603_v4 = vor.u32 %v7601_v58, %v7600_v23  ;;  %v13765_v63 = vld [vmem:[#allocation3 + $0x148] sm:$0x1]  ;;  %v5808_v23 = vld [vmem:[#allocation3 + $0xc0] sm:$0x80] }
 0x5ba   : > { %v6528_v24 = vpop.permute.xlu1 %6527  ;;  %v7520_v40 = vsel %vm14374_vm9, %v7513_v45, %v7519_v26  ;;  %v7952_v49 = vrot.slane %v7950_v1, 7  ;;  %v9749_v62 = vld [vmem:[#allocation3 + $0xc8] sm:$0xff]  ;;  %vm14399_vm9 = vmmov %vm14318_vm2 }
 0x5bb   : > { %v7134_v10 = vsel %vm3913_vm1, %v5919_v11, %v9520_v42  ;;  %v6822_v28 = vsel %vm3913_vm1, %v5806_v36, %v9519_v50  ;;  %v7056_v16 = vsel %vm3913_vm1, %v14375_v15, %v6528_v24  ;;  %8279 = vmatprep.subr.bf16.mxu0 %v7520_v40  ;;  %v7509_v36 = vor.u32 %v7507_v2, %v7506_v55 }
 0x5bc   : > { %v7947_v56 = vshrl.u32 %v7134_v10, 16  ;;  %v7501_v7 = vshrl.u32 %v6822_v28, 16  ;;  %v7940_v19 = vshrl.u32 %v7056_v16, 16  ;;  %v6526_v53 = vpop.permute.xlu0 %6525  ;;  %v7943_v0 = vshll.u32 %v7056_v16, 16  ;;  %8367 = vmatpush1.bf16.xpose.msra.mxu1 %v7894_v41 }
 0x5bd   : > { %v7053_v57 = vsel %vm3913_vm1, %v14377_v17, %v6526_v53  ;;  %v7955_v33 = vor.u32 %v7953_v34, %v7952_v49  ;;  %v7650_v11 = vshrl.u32 %v13760_v3, 16  ;;  %v6767_v55 = vrot.slane %v13455_v44, 1 }
 0x5be   : > { %v7503_v21 = vrot.slane %v7501_v7, 7  ;;  %v7942_v32 = vrot.slane %v7940_v19, 7  ;;  %v7937_v29 = vshrl.u32 %v7053_v57, 16  ;;  %v6260_v48 = vpop.permute.xlu1 %6259  ;;  %v7949_v18 = vrot.slane %v7947_v56, 7 }
 0x5bf   : > { %v6918_v54 = vsel %vm3913_vm1, %v13662_v27, %v6260_v48  ;;  %v7442_v40 = vshrl.u32 %v13665_v51, 16  ;;  %v7596_v10 = vrot.slane %v13735_v20, 7  ;;  %v6771_v28 = vrot.slane %v13765_v63, 1 }
 0x5c0   : > { %v7945_v26 = vor.u32 %v7943_v0, %v7942_v32  ;;  %v7939_v45 = vrot.slane %v7937_v29, 7  ;;  %v7566_v1 = vshrl.u32 %v6918_v54, 16  ;;  %v6084_v31 = vpop.permute.xlu0 %6083  ;;  %v7510_v50 = vsel %vm14378_vm5, %v7503_v21, %v7509_v36  ;;  %vm14401_vm5 = vmmov %vm14318_vm2 }
 0x5c1   : > { %v6829_v42 = vsel %vm3913_vm1, %v9749_v62, %v6084_v31  ;;  %v7956_v9 = vsel %vm14318_vm2, %v7949_v18, %v7955_v33  ;;  %8280 = vmatpush1.bf16.xpose.msra.mxu0 %v7510_v50  ;;  %v7445_v15 = vshll.u32 %v13665_v51, 16  ;;  %v7569_v16 = vshll.u32 %v6918_v54, 16  ;;  %v9689_v31 = vld [vmem:[%s14153_s7 + $0x8] ss:$20 sps:$4 sm:$0xff]   ;;  %v13809_v62 = vld [vmem:[#allocation3 + $0x140] sm:$0xff] }
 0x5c2   : > { %v7568_v34 = vrot.slane %v7566_v1, 7  ;;  %v7556_v27 = vshrl.u32 %v6829_v42, 16  ;;  %8368 = vmatprep.subr.bf16.mxu1 %v7956_v9  ;;  %v6258_v58 = vpop.permute.xlu1 %6257  ;;  %v7946_v24 = vsel %vm14379_vm14, %v7939_v45, %v7945_v26  ;;  %v14380_v53 = vrot.slane %v13578_v30, 1  ;;  %v9692_v50 = vld [vmem:[%s14153_s7 + $0x34] ss:$20 sps:$4 sm:$0xff]   ;;  %vm14402_vm14 = vmmov %vm14318_vm2 }
 0x5c3   : > { %v6915_v49 = vsel %vm3913_vm1, %v6169_v38, %v6258_v58  ;;  %v14381_v41 = vrot.slane %v13353_v37, 1  ;;  %v7604_v38 = vsel %vm14382_vm12, %v7596_v10, %v7603_v4  ;;  %v7652_v20 = vrot.slane %v7650_v11, 7  ;;  %v13805_v11 = vld [vmem:[#allocation3 + $0x160] sm:$0x1]  ;;  %vm14403_vm12 = vmmov %vm14318_vm2 }
 0x5c4   : > { %v7558_v56 = vrot.slane %v7556_v27, 7  ;;  %v7563_v7 = vshrl.u32 %v6915_v49, 16  ;;  %v6082_v19 = vpop.permute.xlu0 %6081  ;;  %8369 = vmatpush1.bf16.xpose.msra.mxu1 %v7946_v24  ;;  %v14383_v0 = vrot.slane %v13606_v25, 1  ;;  %v7571_v57 = vor.u32 %v7569_v16, %v7568_v34  ;;  %v13798_v25 = vld [vmem:[#allocation3 + $0xf8] sm:$0xff] }
 0x5c5   : > { %v6174_v2 = vsel %vm927_vm0, %v14381_v41, %v14380_v53  ;;  %v6827_v59 = vsel %vm3913_vm1, %v5808_v23, %v6082_v19  ;;  %v7559_v21 = vshll.u32 %v6829_v42, 16  ;;  %9325 = vmatprep.subr.msk.bf16.mxu1 %vm3913_vm1, %v7604_v38  ;;  %v7646_v18 = vshrl.u32 %v6764_v61, 16  ;;  %v5810_v23 = vld [vmem:[#allocation3 + $0xd8] sm:$0x80] }
 0x5c6   : > { %v13791_v17 = vsel %vm927_vm0, %v6767_v55, %v14383_v0  ;;  %v7565_v30 = vrot.slane %v7563_v7, 7  ;;  %v7553_v32 = vshrl.u32 %v6827_v59, 16  ;;  %v6264_v29 = vpop.permute.xlu1 %6263  ;;  %v7653_v36 = vshll.u32 %v13760_v3, 16 }
 0x5c7   : > { %v6924_v48 = vsel %vm3913_vm1, %v6174_v2, %v6264_v29  ;;  %v6175_v33 = vrot.slane %v13798_v25, 1  ;;  %v7561_v54 = vor.u32 %v7559_v21, %v7558_v56  ;;  %v7702_v63 = vshrl.u32 %v13791_v17, 16 }
 0x5c8   : > { %v7555_v4 = vrot.slane %v7553_v32, 7  ;;  %v7618_v26 = vshrl.u32 %v6924_v48, 16  ;;  %v6088_v45 = vpop.permute.xlu0 %6087  ;;  %v7572_v1 = vsel %vm14384_vm3, %v7565_v30, %v7571_v57  ;;  %v7655_v3 = vor.u32 %v7653_v36, %v7652_v20  ;;  %vm14404_vm3 = vmmov %vm14318_vm2 }
 0x5c9   : > { %v6834_v61 = vsel %vm3913_vm1, %v9751_v52, %v6088_v45  ;;  %8281 = vmatprep.subr.bf16.mxu0 %v7572_v1  ;;  %v13812_v42 = vrot.slane %v13809_v62, 1  ;;  %v14386_v24 = vrot.slane %v13567_v12, 1  ;;  %v14387_v49 = vrot.slane %v13332_v46, 1 }
 0x5ca   : > { %v7620_v9 = vrot.slane %v7618_v26, 7  ;;  %v7608_v34 = vshrl.u32 %v6834_v61, 16  ;;  %v6262_v27 = vpop.permute.xlu1 %6261  ;;  %v7562_v58 = vsel %vm14385_vm15, %v7555_v4, %v7561_v54  ;;  %v14388_v16 = vmov %v14381_v41  ;;  %v13850_v54 = vld [vmem:[#allocation3 + $0x158] sm:$0xff]  ;;  %vm14405_vm15 = vmmov %vm14318_vm2 }
 0x5cb   : > { %v13823_v10 = vsel %vm927_vm0, %v14387_v49, %v14386_v24  ;;  %v6921_v56 = vsel %vm3913_vm1, %v14388_v16, %v6262_v27  ;;  %8282 = vmatpush1.bf16.xpose.msra.mxu0 %v7562_v58  ;;  %v7648_v7 = vrot.slane %v7646_v18, 7  ;;  %v6774_v19 = vrot.slane %v13805_v11, 1  ;;  %8371 = vmatmul.mubr.bf16.vlgmr.msra.gmra.mrb[80].mxu1 %v9689_v31  ;;  %v9694_v11 = vld [vmem:[%s14153_s7 + $0x30] ss:$20 sps:$4 sm:$0xff]  }
 0x5cc   : > { %v14389_v53 = vmov %v14387_v49  ;;  %v7621_v2 = vshll.u32 %v6924_v48, 16  ;;  %v7610_v59 = vrot.slane %v7608_v34, 7  ;;  %v7615_v12 = vshrl.u32 %v6921_v56, 16  ;;  %v6086_v38 = vpop.permute.xlu0 %6085  ;;  %9140 = vmatpush3.bf16.xpose.msra.mxu1 %v13596_v13  ;;  %8380 = vmatprep.mubr.bf16.mxu1 %v9692_v50  ;;  %v5812_v27 = vld [vmem:[#allocation3 + $0xf0] sm:$0x80] }
 0x5cd   : > { %v13831_v41 = vshrl.u32 %v14389_v53, 16  ;;  %v14390_v20 = vrot.slane %v13576_v47, 1  ;;  %v6832_v0 = vsel %vm3913_vm1, %v5810_v23, %v6086_v38  ;;  %v7656_v57 = vsel %vm14391_vm4, %v7648_v7, %v7655_v3  ;;  %v9695_v3 = vld [vmem:[%s14153_s7 + $0x5c] ss:$20 sps:$4 sm:$0xff]   ;;  %vm14406_vm4 = vmmov %vm14318_vm2 }
 0x5ce   : > { %v7704_v46 = vrot.slane %v7702_v63, 7  ;;  %v13843_v21 = vsel %vm927_vm0, %v13812_v42, %v6771_v28  ;;  %v7623_v30 = vor.u32 %v7621_v2, %v7620_v9  ;;  %v7611_v32 = vshll.u32 %v6834_v61, 16  ;;  %9326 = vmatprep.subr.msk.bf16.mxu1 %vm3913_vm1, %v7656_v57  ;;  %v6268_v48 = vpop.permute.xlu1 %6267 }
 0x5cf   : > { %v6177_v37 = vsel %vm927_vm0, %v6175_v33, %v14390_v20  ;;  %v7617_v29 = vrot.slane %v7615_v12, 7  ;;  %v7605_v47 = vshrl.u32 %v6832_v0, 16  ;;  %v7698_v13 = vshrl.u32 %v6767_v55, 16 }
 0x5d0   : > { %v6930_v18 = vsel %vm3913_vm1, %v6177_v37, %v6268_v48  ;;  %v7705_v36 = vshll.u32 %v13791_v17, 16  ;;  %v13853_v28 = vrot.slane %v13850_v54, 1  ;;  %v7613_v4 = vor.u32 %v7611_v32, %v7610_v59  ;;  %v6092_v1 = vpop.permute.xlu0 %6091  ;;  %v9754_v17 = vld [vmem:[#allocation3 + $0x110] sm:$0xff] }
 0x5d1   : > { %v7607_v26 = vrot.slane %v7605_v47, 7  ;;  %v7670_v45 = vshrl.u32 %v6930_v18, 16  ;;  %v7624_v31 = vsel %vm14392_vm13, %v7617_v29, %v7623_v30  ;;  %v6839_v44 = vsel %vm3913_vm1, %v13798_v25, %v6092_v1  ;;  %v5934_v30 = vld [vmem:[#allocation3 + $0x178] sm:$0x1]  ;;  %v13892_v1 = vld [vmem:[#allocation3 + $0x170] sm:$0xff]  ;;  %vm14408_vm13 = vmmov %vm14318_vm2 }
 0x5d2   : > { %8283 = vmatprep.subr.bf16.mxu0 %v7624_v31  ;;  %v7707_v55 = vor.u32 %v7705_v36, %v7704_v46  ;;  %v6178_v52 = vrot.slane %v9754_v17, 1  ;;  %v7754_v61 = vshrl.u32 %v13843_v21, 16  ;;  %v7660_v50 = vshrl.u32 %v6839_v44, 16  ;;  %v6266_v9 = vpop.permute.xlu1 %6265 }
 0x5d3   : > { %v7672_v63 = vrot.slane %v7670_v45, 7  ;;  %v7614_v34 = vsel %vm14393_vm6, %v7607_v26, %v7613_v4  ;;  %v7440_v58 = vrot.slane %v13669_v39, 7  ;;  %v6927_v23 = vsel %vm3913_vm1, %v6175_v33, %v6266_v9  ;;  %8381 = vmatmul.mubr.bf16.gmra.mrb[84].mxu1 %v9694_v11  ;;  %v9697_v4 = vld [vmem:[%s14153_s7 + $0x58] ss:$20 sps:$4 sm:$0xff]   ;;  %vm14409_vm6 = vmmov %vm14318_vm2 }
 0x5d4   : > { %8284 = vmatpush1.bf16.xpose.msra.mxu0 %v7614_v34  ;;  %v7700_v24 = vrot.slane %v7698_v13, 7  ;;  %v6181_v49 = vrot.slane %v13451_v14, 1  ;;  %v7494_v16 = vshrl.u32 %v13823_v10, 16  ;;  %v7673_v56 = vshll.u32 %v6930_v18, 16  ;;  %v6090_v2 = vpop.permute.xlu0 %6089  ;;  %9142 = vmatpush3.bf16.xpose.msra.mxu1 %v13612_v22  ;;  %v9698_v11 = vld [vmem:[%s14153_s7 + $0x84] ss:$20 sps:$4 sm:$0xff]  }
 0x5d5   : > { %v7662_v7 = vrot.slane %v7660_v50, 7  ;;  %v7667_v53 = vshrl.u32 %v6927_v23, 16  ;;  %v13874_v59 = vsel %vm927_vm0, %v13853_v28, %v6774_v19  ;;  %v6837_v12 = vsel %vm3913_vm1, %v5812_v27, %v6090_v2  ;;  %8390 = vmatprep.mubr.bf16.mxu1 %v9695_v3 }
 0x5d6   : > { %v7708_v25 = vsel %vm14394_vm7, %v7700_v24, %v7707_v55  ;;  %v14395_v33 = vrot.slane %v13608_v5, 1  ;;  %v7756_v20 = vrot.slane %v7754_v61, 7  ;;  %v7675_v37 = vor.u32 %v7673_v56, %v7672_v63  ;;  %v6272_v19 = vpop.permute.xlu1 %6271  ;;  %v5814_v63 = vld [vmem:[#allocation3 + $0x108] sm:$0x80]  ;;  %vm14410_vm7 = vmmov %vm14318_vm2 }
 0x5d7   : > { %v7663_v0 = vshll.u32 %v6839_v44, 16  ;;  %v7669_v57 = vrot.slane %v7667_v53, 7  ;;  %v7657_v46 = vshrl.u32 %v6837_v12, 16  ;;  %9327 = vmatprep.subr.msk.bf16.mxu1 %vm3913_vm1, %v7708_v25  ;;  %v7750_v22 = vshrl.u32 %v13812_v42, 16  ;;  %v5837_v12 = vld [vmem:[#allocation3 + $0x148] sm:$0x1] }
 0x5d8   : > { %v6180_v38 = vsel %vm927_vm0, %v6178_v52, %v14395_v33  ;;  %v7757_v29 = vshll.u32 %v13843_v21, 16  ;;  %v7806_v5 = vshrl.u32 %v13874_v59, 16  ;;  %v6096_v13 = vpop.permute.xlu0 %6095  ;;  %v13895_v21 = vrot.slane %v13892_v1, 1 }
 0x5d9   : > { %v6936_v32 = vsel %vm3913_vm1, %v6180_v38, %v6272_v19  ;;  %v7665_v47 = vor.u32 %v7663_v0, %v7662_v7  ;;  %v7659_v48 = vrot.slane %v7657_v46, 7  ;;  %v7676_v36 = vsel %vm14396_vm11, %v7669_v57, %v7675_v37  ;;  %v5935_v46 = vld [vmem:[#allocation3 + $0x190] sm:$0x1] }
 0x5da   : > { %v7722_v18 = vshrl.u32 %v6936_v32, 16  ;;  %v6844_v26 = vsel %vm3913_vm1, %v9754_v17, %v6096_v13  ;;  %8285 = vmatprep.subr.bf16.mxu0 %v7676_v36  ;;  %v7759_v45 = vor.u32 %v7757_v29, %v7756_v20  ;;  %v6777_v31 = vrot.slane %v5934_v30, 1  ;;  %v6270_v61 = vpop.permute.xlu1 %6269  ;;  %v9756_v13 = vld [vmem:[#allocation3 + $0x128] sm:$0xff] }
 0x5db   : > { %v7712_v55 = vshrl.u32 %v6844_v26, 16  ;;  %v7666_v3 = vsel %vm14397_vm8, %v7659_v48, %v7665_v47  ;;  %v7497_v17 = vshll.u32 %v13823_v10, 16  ;;  %v6933_v50 = vsel %vm3913_vm1, %v6178_v52, %v6270_v61  ;;  %8391 = vmatmul.mubr.bf16.gmra.mrb[88].mxu1 %v9697_v4  ;;  %v13922_v48 = vld [vmem:[#allocation3 + $0x160] sm:$0x1] }
 0x5dc   : > { %v7724_v44 = vrot.slane %v7722_v18, 7  ;;  %8286 = vmatpush1.bf16.xpose.msra.mxu0 %v7666_v3  ;;  %v7752_v9 = vrot.slane %v7750_v22, 7  ;;  %v14398_v34 = vrot.slane %v13617_v35, 1  ;;  %v7808_v23 = vrot.slane %v7806_v5, 7  ;;  %v6094_v53 = vpop.permute.xlu0 %6093  ;;  %9144 = vmatpush3.bf16.xpose.msra.mxu1 %v13615_v8  ;;  %v9700_v18 = vld [vmem:[%s14153_s7 + $0x80] ss:$20 sps:$4 sm:$0xff]  }
 0x5dd   : > { %v7725_v24 = vshll.u32 %v6936_v32, 16  ;;  %v7714_v56 = vrot.slane %v7712_v55, 7  ;;  %v7719_v7 = vshrl.u32 %v6933_v50, 16  ;;  %v7802_v2 = vshrl.u32 %v13853_v28, 16  ;;  %8400 = vmatprep.mubr.bf16.mxu1 %v9698_v11  ;;  %v5816_v3 = vld [vmem:[#allocation3 + $0x120] sm:$0x80] }
 0x5de   : > { %v6183_v27 = vsel %vm927_vm0, %v6181_v49, %v14398_v34  ;;  %v6842_v25 = vsel %vm3913_vm1, %v5814_v63, %v6094_v53  ;;  %v7760_v52 = vsel %vm14399_vm9, %v7752_v9, %v7759_v45  ;;  %v7809_v35 = vshll.u32 %v13874_v59, 16  ;;  %v6276_v57 = vpop.permute.xlu1 %6275 }
 0x5df   : > { %v13915_v33 = vsel %vm927_vm0, %v13895_v21, %v6777_v31  ;;  %v7727_v38 = vor.u32 %v7725_v24, %v7724_v44  ;;  %v7715_v20 = vshll.u32 %v6844_v26, 16  ;;  %v7721_v37 = vrot.slane %v7719_v7, 7  ;;  %9328 = vmatprep.subr.msk.bf16.mxu1 %vm3913_vm1, %v7760_v52  ;;  %v13929_v26 = vld [vmem:[#allocation3 + $0x188] sm:$0xff]  ;;  %v13935_v31 = vld [vmem:[%s14153_s7 + $0x10] ss:$20 sps:$4 sm:$0xff]  }
 0x5e0   : > { %v7709_v0 = vshrl.u32 %v6842_v25, 16  ;;  %v6942_v19 = vsel %vm3913_vm1, %v6183_v27, %v6276_v57  ;;  %v7811_v8 = vor.u32 %v7809_v35, %v7808_v23  ;;  %v6185_v30 = vrot.slane %v5837_v12, 1  ;;  %v6100_v5 = vpop.permute.xlu0 %6099 }
 0x5e1   : > { %v7444_v59 = vrot.slane %v7442_v40, 7  ;;  %v7717_v32 = vor.u32 %v7715_v20, %v7714_v56  ;;  %v7774_v29 = vshrl.u32 %v6942_v19, 16  ;;  %v7728_v47 = vsel %vm14400_vm10, %v7721_v37, %v7727_v38 }
 0x5e2   : > { %v7711_v22 = vrot.slane %v7709_v0, 7  ;;  %v6849_v36 = vsel %vm3913_vm1, %v9756_v13, %v6100_v5  ;;  %8287 = vmatprep.subr.bf16.mxu0 %v7728_v47  ;;  %v7858_v4 = vshrl.u32 %v13915_v33, 16  ;;  %v6779_v40 = vrot.slane %v13929_v26, 1  ;;  %v6274_v55 = vpop.permute.xlu1 %6273  ;;  %v13960_v0 = vld [vmem:[#allocation3 + $0x1a0] sm:$0xff] }
 0x5e3   : > { %v6780_v45 = vrot.slane %v5935_v46, 1  ;;  %v7776_v11 = vrot.slane %v7774_v29, 7  ;;  %v7764_v44 = vshrl.u32 %v6849_v36, 16  ;;  %v7804_v63 = vrot.slane %v7802_v2, 7  ;;  %8401 = vmatmul.mubr.bf16.gmra.mrb[92].mxu1 %v9700_v18  ;;  %v5936_v2 = vld [vmem:[#allocation3 + $0x1a8] sm:$0x1] }
 0x5e4   : > { %v7718_v61 = vsel %vm14401_vm5, %v7711_v22, %v7717_v32  ;;  %v6939_v50 = vsel %vm3913_vm1, %v6181_v49, %v6274_v55  ;;  %v6186_v9 = vsel %vm927_vm0, %v13812_v42, %v6185_v30  ;;  %v6188_v34 = vrot.slane %v13922_v48, 1  ;;  %v6098_v7 = vpop.permute.xlu0 %6097  ;;  %9146 = vmatpush3.bf16.xpose.msra.mxu1 %v13633_v43  ;;  %9155 = vmatprep.mubr.msk.bf16.mxu1 %vm3913_vm1, %v13935_v31 }
 0x5e5   : > { %8288 = vmatpush1.bf16.xpose.msra.mxu0 %v7718_v61  ;;  %v7496_v27 = vrot.slane %v7494_v16, 7  ;;  %v7777_v23 = vshll.u32 %v6942_v19, 16  ;;  %v7766_v24 = vrot.slane %v7764_v44, 7  ;;  %v7771_v56 = vshrl.u32 %v6939_v50, 16 }
 0x5e6   : > { %v7812_v53 = vsel %vm14318_vm2, %v7804_v63, %v7811_v8  ;;  %v6847_v14 = vsel %vm3913_vm1, %v5816_v3, %v6098_v7  ;;  %v7854_v49 = vshrl.u32 %v13895_v21, 16  ;;  %v7860_v12 = vrot.slane %v7858_v4, 7  ;;  %v6280_v20 = vpop.permute.xlu1 %6279  ;;  %v5818_v4 = vld [vmem:[#allocation3 + $0x138] sm:$0x80] }
 0x5e7   : > { %v13953_v25 = vsel %vm927_vm0, %v6779_v40, %v6780_v45  ;;  %v7779_v16 = vor.u32 %v7777_v23, %v7776_v11  ;;  %v7767_v52 = vshll.u32 %v6849_v36, 16  ;;  %v7773_v35 = vrot.slane %v7771_v56, 7  ;;  %9329 = vmatprep.subr.msk.bf16.mxu1 %vm3913_vm1, %v7812_v53  ;;  %v5839_v56 = vld [vmem:[#allocation3 + $0x178] sm:$0x1] }
 0x5e8   : > { %v7761_v38 = vshrl.u32 %v6847_v14, 16  ;;  %v6948_v43 = vsel %vm3913_vm1, %v6186_v9, %v6280_v20  ;;  %v7861_v37 = vshll.u32 %v13915_v33, 16  ;;  %v6782_v57 = vrot.slane %v13960_v0, 1  ;;  %v6104_v32 = vpop.permute.xlu0 %6103 }
 0x5e9   : > { %v6783_v46 = vrot.slane %v5936_v2, 1  ;;  %v7769_v19 = vor.u32 %v7767_v52, %v7766_v24  ;;  %v7826_v30 = vshrl.u32 %v6948_v43, 16  ;;  %v7780_v22 = vsel %vm14402_vm14, %v7773_v35, %v7779_v16 }
 0x5ea   : > { %v7763_v8 = vrot.slane %v7761_v38, 7  ;;  %v6854_v29 = vsel %vm3913_vm1, %v13809_v62, %v6104_v32  ;;  %8289 = vmatprep.subr.bf16.mxu0 %v7780_v22  ;;  %v7863_v5 = vor.u32 %v7861_v37, %v7860_v12  ;;  %v7447_v47 = vor.u32 %v7445_v15, %v7444_v59  ;;  %v6278_v13 = vpop.permute.xlu1 %6277  ;;  %v13978_v15 = vld [vmem:[#allocation3 + $0xe0] sm:$0xff]  ;;  %v5820_v37 = vld [vmem:[#allocation3 + $0x150] sm:$0x80] }
 0x5eb   : > { %v7910_v33 = vshrl.u32 %v13953_v25, 16  ;;  %v7828_v48 = vrot.slane %v7826_v30, 7  ;;  %v7816_v18 = vshrl.u32 %v6854_v29, 16  ;;  %v13972_v45 = vor.u32 %v7497_v17, %v7496_v27 }
 0x5ec   : > { %v7770_v36 = vsel %vm14403_vm12, %v7763_v8, %v7769_v19  ;;  %v6945_v62 = vsel %vm3913_vm1, %v13812_v42, %v6278_v13  ;;  %v7856_v11 = vrot.slane %v7854_v49, 7  ;;  %v6189_v51 = vsel %vm927_vm0, %v13853_v28, %v6188_v34  ;;  %v6102_v3 = vpop.permute.xlu0 %6101  ;;  %9148 = vmatpush3.bf16.xpose.msra.mxu1 %v13649_v6 }
 0x5ed   : > { %8290 = vmatpush1.bf16.xpose.msra.mxu0 %v7770_v36  ;;  %v6758_v59 = vrot.slane %v13978_v15, 1  ;;  %v7829_v44 = vshll.u32 %v6948_v43, 16  ;;  %v7818_v55 = vrot.slane %v7816_v18, 7  ;;  %v7823_v61 = vshrl.u32 %v6945_v62, 16 }
 0x5ee   : > { %v6784_v10 = vsel %vm927_vm0, %v6782_v57, %v6783_v46  ;;  %v6852_v17 = vsel %vm3913_vm1, %v5818_v4, %v6102_v3  ;;  %v7864_v42 = vsel %vm14404_vm3, %v7856_v11, %v7863_v5  ;;  %v7906_v63 = vshrl.u32 %v6779_v40, 16  ;;  %v6284_v24 = vpop.permute.xlu1 %6283 }
 0x5ef   : > { %v7912_v50 = vrot.slane %v7910_v33, 7  ;;  %v7831_v9 = vor.u32 %v7829_v44, %v7828_v48  ;;  %v7819_v34 = vshll.u32 %v6854_v29, 16  ;;  %v7825_v27 = vrot.slane %v7823_v61, 7  ;;  %9330 = vmatprep.subr.msk.bf16.mxu1 %vm3913_vm1, %v7864_v42 }
 0x5f0   : > { %v7813_v23 = vshrl.u32 %v6852_v17, 16  ;;  %v6954_v7 = vsel %vm3913_vm1, %v6189_v51, %v6284_v24  ;;  %v7448_v6 = vsel %vm14405_vm15, %v7440_v58, %v7447_v47  ;;  %v7913_v53 = vshll.u32 %v13953_v25, 16  ;;  %v6108_v49 = vpop.permute.xlu0 %6107 }
 0x5f1   : > { %v7962_v2 = vshrl.u32 %v6784_v10, 16  ;;  %v7821_v26 = vor.u32 %v7819_v34, %v7818_v55  ;;  %v7878_v14 = vshrl.u32 %v6954_v7, 16  ;;  %v7832_v12 = vsel %vm14406_vm4, %v7825_v27, %v7831_v9  ;;  %v5822_v27 = vld [vmem:[#allocation3 + $0x168] sm:$0x80] }
 0x5f2   : > { %v7815_v40 = vrot.slane %v7813_v23, 7  ;;  %v6859_v16 = vsel %vm3913_vm1, %v13850_v54, %v6108_v49  ;;  %8291 = vmatprep.subr.bf16.mxu0 %v7832_v12  ;;  %v7915_v52 = vor.u32 %v7913_v53, %v7912_v50  ;;  %v6191_v35 = vrot.slane %v5839_v56, 1  ;;  %v6282_v20 = vpop.permute.xlu1 %6281 }
 0x5f3   : > { %v14407_v38 = vrot.slane %v13582_v60, 1  ;;  %v7880_v58 = vrot.slane %v7878_v14, 7  ;;  %v7868_v25 = vshrl.u32 %v6859_v16, 16  ;;  %v7908_v46 = vrot.slane %v7906_v63, 7 }
 0x5f4   : > { %v7822_v43 = vsel %vm14408_vm13, %v7815_v40, %v7821_v26  ;;  %v6951_v19 = vsel %vm3913_vm1, %v13853_v28, %v6282_v20  ;;  %v7958_v54 = vshrl.u32 %v6782_v57, 16  ;;  %v7964_v8 = vrot.slane %v7962_v2, 7  ;;  %v6106_v29 = vpop.permute.xlu0 %6105  ;;  %v9708_v20 = vld [vmem:[%s14153_s7 + $0x38] ss:$20 sps:$4 sm:$0xff]  }
 0x5f5   : > { %v6760_v39 = vsel %vm927_vm0, %v6758_v59, %v14407_v38  ;;  %8292 = vmatpush1.bf16.xpose.msra.mxu0 %v7822_v43  ;;  %v7965_v60 = vshll.u32 %v6784_v10, 16  ;;  %v7881_v30 = vshll.u32 %v6954_v7, 16  ;;  %v7870_v32 = vrot.slane %v7868_v25, 7  ;;  %v9705_v25 = vld [vmem:[%s14153_s7 + $0x2c] ss:$20 sps:$4 sm:$0xff]  }
 0x5f6   : > { %v7875_v22 = vshrl.u32 %v6951_v19, 16  ;;  %v8233_v5 = vsel %vm3913_vm1, %v7448_v6, 0  ;;  %v6857_v47 = vsel %vm3913_vm1, %v5820_v37, %v6106_v29  ;;  %v7916_v33 = vsel %vm14409_vm6, %v7908_v46, %v7915_v52  ;;  %v6288_v36 = vpop.permute.xlu1 %6287  ;;  %v9707_v43 = vld [vmem:[%s14153_s7 + $0x28] ss:$20 sps:$4 sm:$0xff]   ;;  %v9712_v46 = vld [vmem:[%s14153_s7 + $0x60] ss:$20 sps:$4 sm:$0xff]  }
 0x5f7   : > { %9150 = vmatpush3.bf16.xpose.msra.mxu1 %v8233_v5  ;;  %v6192_v28 = vsel %vm927_vm0, %v13895_v21, %v6191_v35  ;;  %v7546_v48 = vshrl.u32 %v6760_v39, 16  ;;  %v7883_v18 = vor.u32 %v7881_v30, %v7880_v58  ;;  %v7871_v0 = vshll.u32 %v6859_v16, 16  ;;  %vm14411_vm0 = vmmov %vm14318_vm2  ;;  %v9701_v58 = vld [vmem:[%s14153_s7] ss:$20 sps:$4 sm:$0xff]   ;;  %v9713_v19 = vld [vmem:[%s14153_s7 + $0x7c] ss:$20 sps:$4 sm:$0xff]  }
 0x5f8   : > { %v7877_v57 = vrot.slane %v7875_v22, 7  ;;  %v7865_v13 = vshrl.u32 %v6857_v47, 16  ;;  %9331 = vmatprep.subr.msk.bf16.mxu1 %vm3913_vm1, %v7916_v33  ;;  %v6960_v4 = vsel %vm3913_vm1, %v6192_v28, %v6288_v36  ;;  %v7492_v62 = vrot.slane %v13831_v41, 7  ;;  %v6112_v3 = vpop.permute.xlu0 %6111  ;;  %vm14412_vm11 = vmmov %vm14411_vm0  ;;  %v9709_v37 = vld [vmem:[%s14153_s7 + $0x54] ss:$20 sps:$4 sm:$0xff]  }
 0x5f9   : > { %v7960_v11 = vrot.slane %v7958_v54, 7  ;;  %v7967_v51 = vor.u32 %v7965_v60, %v7964_v8  ;;  %v7873_v44 = vor.u32 %v7871_v0, %v7870_v32  ;;  %v7930_v61 = vshrl.u32 %v6960_v4, 16  ;;  %vm14413_vm8 = vmmov %vm14411_vm0  ;;  %v9716_v54 = vld [vmem:[%s14153_s7 + $0x88] ss:$20 sps:$4 sm:$0xff]   ;;  %v9715_v8 = vld [vmem:[%s14153_s7 + $0x78] ss:$20 sps:$4 sm:$0xff]  }
 0x5fa   : > { %v7867_v55 = vrot.slane %v7865_v13, 7  ;;  %v7884_v10 = vsel %vm14410_vm7, %v7877_v57, %v7883_v18  ;;  %v6864_v17 = vsel %vm3913_vm1, %v13892_v1, %v6112_v3  ;;  %v7500_v42 = vsel %vm14411_vm0, %v7492_v62, %v13972_v45  ;;  %v6286_v34 = vpop.permute.xlu1 %6285  ;;  %vm14414_vm9 = vmmov %vm14411_vm0 }
 0x5fb   : > { %8293 = vmatprep.subr.bf16.mxu0 %v7884_v10  ;;  %v7548_v63 = vrot.slane %v7546_v48, 7  ;;  %v7932_v50 = vrot.slane %v7930_v61, 7  ;;  %v7920_v9 = vshrl.u32 %v6864_v17, 16  ;;  %v6957_v23 = vsel %vm3913_vm1, %v13895_v21, %v6286_v34  ;;  %vm14415_vm10 = vmmov %vm14411_vm0 }
 0x5fc   : > { %v7874_v41 = vsel %vm14412_vm11, %v7867_v55, %v7873_v44  ;;  %v7968_v24 = vsel %vm14413_vm8, %v7960_v11, %v7967_v51  ;;  %v7542_v1 = vshrl.u32 %v6758_v59, 16  ;;  %v7549_v56 = vshll.u32 %v6760_v39, 16  ;;  %v6110_v53 = vpop.permute.xlu0 %6109  ;;  %vm14416_vm5 = vmmov %vm14411_vm0 }
 0x5fd   : > { %8294 = vmatpush1.bf16.xpose.msra.mxu0 %v7874_v41  ;;  %v7933_v7 = vshll.u32 %v6960_v4, 16  ;;  %v7922_v6 = vrot.slane %v7920_v9, 7  ;;  %v7927_v45 = vshrl.u32 %v6957_v23, 16  ;;  %v8236_v2 = vsel %vm3913_vm1, %v7500_v42, 0 }
 0x5fe   : > { %v6862_v26 = vsel %vm3913_vm1, %v5822_v27, %v6110_v53  ;;  %v7551_v40 = vor.u32 %v7549_v56, %v7548_v63  ;;  %v7923_v49 = vshll.u32 %v6864_v17, 16  ;;  %v7544_v16 = vrot.slane %v7542_v1, 7 }
 0x5ff   : > { %9152 = vmatpush3.bf16.xpose.msra.mxu1 %v8236_v2  ;;  %v7935_v14 = vor.u32 %v7933_v7, %v7932_v50  ;;  %v7929_v21 = vrot.slane %v7927_v45, 7  ;;  %v7917_v12 = vshrl.u32 %v6862_v26, 16 }
 0x600   : > { %9332 = vmatprep.subr.msk.bf16.mxu1 %vm3913_vm1, %v7968_v24  ;;  %v7925_v15 = vor.u32 %v7923_v49, %v7922_v6  ;;  %v7552_v35 = vsel %vm14415_vm10, %v7544_v16, %v7551_v40 }
 0x601   : > { %v7919_v59 = vrot.slane %v7917_v12, 7  ;;  %v7936_v52 = vsel %vm14414_vm9, %v7929_v21, %v7935_v14  ;;  %v8239_v39 = vsel %vm3913_vm1, %v7552_v35, 0 }
 0x602   : > { %8295 = vmatprep.subr.bf16.mxu0 %v7936_v52 }
 0x603   : > { %v7926_v38 = vsel %vm14416_vm5, %v7919_v59, %v7925_v15 }
 0x605   : > { %8296 = vmatpush1.bf16.xpose.msra.mxu0 %v7926_v38 }
 0x607   : > { %9154 = vmatpush3.bf16.xpose.msra.mxu1 %v8239_v39 }
 0x60c   : > { %8298 = vmatmul.mubr.bf16.vlgmr.msra.gmra.mrb[80].mxu0 %v9701_v58 }
 0x60d   : > { %8307 = vmatprep.mubr.bf16.mxu0 %v9705_v25 }
 0x60e   : > { %9156 = vmatmul.mubr.msk.bf16.vlgmr.msra.gmra.mrb[80].mxu1 %vm3913_vm1, %v13935_v31  ;;  %v9711_v31 = vld [vmem:[%s14153_s7 + $0x50] ss:$20 sps:$4 sm:$0xff]  }
 0x60f   : > { %9157 = vmatprep.mubr.msk.bf16.mxu1 %vm3913_vm1, %v9708_v20 }
 0x614   : > { %8308 = vmatmul.mubr.bf16.gmra.mrb[84].mxu0 %v9707_v43 }
 0x615   : > { %8317 = vmatprep.mubr.bf16.mxu0 %v9709_v37 }
 0x616   : > { %9158 = vmatmul.mubr.msk.bf16.gmra.mrb[84].mxu1 %vm3913_vm1, %v9708_v20 }
 0x617   : > { %9159 = vmatprep.mubr.msk.bf16.mxu1 %vm3913_vm1, %v9712_v46 }
 0x618   : > { %v8068_v60 = vpop.permute.xlu1 %8067 }
 0x619   : > { %v8073_v32 = vpop.permute.xlu0 %8072 }
 0x61c   : > { %8318 = vmatmul.mubr.bf16.gmra.mrb[88].mxu0 %v9711_v31  ;;  %v8078_v22 = vpop.permute.xlu1 %8077 }
 0x61d   : > { %8327 = vmatprep.mubr.bf16.mxu0 %v9713_v19  ;;  %v8088_v40 = vpop.permute.xlu0 %8087 }
 0x61e   : > { %9160 = vmatmul.mubr.msk.bf16.gmra.mrb[88].mxu1 %vm3913_vm1, %v9712_v46 }
 0x61f   : > { %9161 = vmatprep.mubr.msk.bf16.mxu1 %vm3913_vm1, %v9716_v54 }
 0x620   : > { %v8083_v17 = vpop.permute.xlu1 %8082 }
 0x624   : > { %8328 = vmatmul.mubr.bf16.gmra.mrb[92].mxu0 %v9715_v8 }
 0x626   : > { %9162 = vmatmul.mubr.msk.bf16.gmra.mrb[92].mxu1 %vm3913_vm1, %v9716_v54 }
 0x62b   : > { %v8093_v12 = vpop.permute.xlu1 %8092 }
 0x6df   : > { %v8299_v30 = vpop.f32.mrb[80].mxu0 }
 0x6e0   : > { %v8300_v29 = vadd.f32 %v8299_v30, %v8068_v60  ;;  %v8301_v5 = vpop.f32.mrb[81].mxu0  ;;  %v8098_v30 = vpop.permute.xlu0 %8097 }
 0x6e1   : > { %v8302_v47 = vadd.f32 %v8301_v5, %v8068_v60  ;;  %v8445_v33 = vpop.f32.mrb[80].mxu1  ;;  %v8303_v28 = vpop.f32.mrb[82].mxu0 }
 0x6e2   : > { %v9276_v48 = vadd.f32 %v8445_v33, %v8300_v29  ;;  %v8304_v18 = vadd.f32 %v8303_v28, %v8073_v32  ;;  %v8447_v0 = vpop.f32.mrb[81].mxu1  ;;  %v8305_v57 = vpop.f32.mrb[83].mxu0 }
 0x6e3   : > { %v9278_v13 = vadd.f32 %v8447_v0, %v8302_v47  ;;  %v8306_v36 = vadd.f32 %v8305_v57, %v8073_v32  ;;  %v8449_v4 = vpop.f32.mrb[82].mxu1  ;;  %v8103_v29 = vpop.permute.xlu1 %8102 }
 0x6e4   : > { %v8484_v62 = vmax.f32 %v9276_v48, 0.0  ;;  %v9280_v11 = vadd.f32 %v8449_v4, %v8304_v18  ;;  %v8451_v51 = vpop.f32.mrb[83].mxu1 }
 0x6e5   : > { %v8485_v44 = vmax.f32 %v9278_v13, 0.0  ;;  %v9282_v55 = vadd.f32 %v8451_v51, %v8306_v36 }
 0x6e6   : > { %8500 = vst [vmem:[%s14075_s17] sm:$0xff] %v8484_v62  ;;  %v8486_v61 = vmax.f32 %v9280_v11, 0.0 }
 0x6e7   : > { %8501 = vst [vmem:[%s14075_s17 + $0x8] sm:$0xff] %v8485_v44  ;;  %v8487_v3 = vmax.f32 %v9282_v55, 0.0  ;;  %v8309_v10 = vpop.f32.mrb[84].mxu0 }
 0x6e8   : > { %8502 = vst [vmem:[%s14075_s17 + $0x10] sm:$0xff] %v8486_v61  ;;  %v8310_v42 = vadd.f32 %v8309_v10, %v8078_v22  ;;  %v8311_v63 = vpop.f32.mrb[85].mxu0 }
 0x6e9   : > { %8503 = vst [vmem:[%s14075_s17 + $0x18] sm:$0xff] %v8487_v3  ;;  %v8312_v50 = vadd.f32 %v8311_v63, %v8078_v22  ;;  %v8455_v9 = vpop.f32.mrb[84].mxu1  ;;  %v8313_v34 = vpop.f32.mrb[86].mxu0 }
 0x6ea   : > { %v9284_v41 = vadd.f32 %v8455_v9, %v8310_v42  ;;  %v8314_v27 = vadd.f32 %v8313_v34, %v8083_v17  ;;  %v8457_v23 = vpop.f32.mrb[85].mxu1  ;;  %v8315_v24 = vpop.f32.mrb[87].mxu0 }
 0x6eb   : > { %v9286_v1 = vadd.f32 %v8457_v23, %v8312_v50  ;;  %v8316_v56 = vadd.f32 %v8315_v24, %v8083_v17  ;;  %v8459_v7 = vpop.f32.mrb[86].mxu1 }
 0x6ec   : > { %v8488_v6 = vmax.f32 %v9284_v41, 0.0  ;;  %v9288_v45 = vadd.f32 %v8459_v7, %v8314_v27  ;;  %v8461_v53 = vpop.f32.mrb[87].mxu1 }
 0x6ed   : > { %v8489_v2 = vmax.f32 %v9286_v1, 0.0  ;;  %v9290_v26 = vadd.f32 %v8461_v53, %v8316_v56 }
 0x6ee   : > { %8504 = vst [vmem:[%s14075_s17 + $0x20] sm:$0xff] %v8488_v6  ;;  %v8490_v14 = vmax.f32 %v9288_v45, 0.0 }
 0x6ef   : > { %8505 = vst [vmem:[%s14075_s17 + $0x28] sm:$0xff] %v8489_v2  ;;  %v8491_v49 = vmax.f32 %v9290_v26, 0.0  ;;  %v8319_v21 = vpop.f32.mrb[88].mxu0 }
 0x6f0   : > { %8506 = vst [vmem:[%s14075_s17 + $0x30] sm:$0xff] %v8490_v14  ;;  %v8320_v16 = vadd.f32 %v8319_v21, %v8088_v40  ;;  %v8321_v15 = vpop.f32.mrb[89].mxu0 }
 0x6f1   : > { %8507 = vst [vmem:[%s14075_s17 + $0x38] sm:$0xff] %v8491_v49  ;;  %v8322_v59 = vadd.f32 %v8321_v15, %v8088_v40  ;;  %v8465_v52 = vpop.f32.mrb[88].mxu1  ;;  %v8323_v35 = vpop.f32.mrb[90].mxu0 }
 0x6f2   : > { %v9292_v38 = vadd.f32 %v8465_v52, %v8320_v16  ;;  %v8324_v39 = vadd.f32 %v8323_v35, %v8093_v12  ;;  %v8467_v58 = vpop.f32.mrb[89].mxu1  ;;  %v8325_v25 = vpop.f32.mrb[91].mxu0 }
 0x6f3   : > { %v9294_v20 = vadd.f32 %v8467_v58, %v8322_v59  ;;  %v8326_v43 = vadd.f32 %v8325_v25, %v8093_v12  ;;  %v8469_v37 = vpop.f32.mrb[90].mxu1 }
 0x6f4   : > { %v8492_v46 = vmax.f32 %v9292_v38, 0.0  ;;  %v9296_v31 = vadd.f32 %v8469_v37, %v8324_v39  ;;  %v8471_v19 = vpop.f32.mrb[91].mxu1 }
 0x6f5   : > { %v8493_v54 = vmax.f32 %v9294_v20, 0.0  ;;  %v9298_v8 = vadd.f32 %v8471_v19, %v8326_v43 }
 0x6f6   : > { %8508 = vst [vmem:[%s14075_s17 + $0x40] sm:$0xff] %v8492_v46  ;;  %v8494_v60 = vmax.f32 %v9296_v31, 0.0 }
 0x6f7   : > { %8509 = vst [vmem:[%s14075_s17 + $0x48] sm:$0xff] %v8493_v54  ;;  %v8495_v32 = vmax.f32 %v9298_v8, 0.0  ;;  %v8329_v22 = vpop.f32.mrb[92].mxu0 }
 0x6f8   : > { %8510 = vst [vmem:[%s14075_s17 + $0x50] sm:$0xff] %v8494_v60  ;;  %v8330_v5 = vadd.f32 %v8329_v22, %v8098_v30  ;;  %v8331_v47 = vpop.f32.mrb[93].mxu0 }
 0x6f9   : > { %8511 = vst [vmem:[%s14075_s17 + $0x58] sm:$0xff] %v8495_v32  ;;  %v8332_v33 = vadd.f32 %v8331_v47, %v8098_v30  ;;  %v8475_v28 = vpop.f32.mrb[92].mxu1  ;;  %v8333_v48 = vpop.f32.mrb[94].mxu0 }
 0x6fa   : > { %v9300_v18 = vadd.f32 %v8475_v28, %v8330_v5  ;;  %v8334_v0 = vadd.f32 %v8333_v48, %v8103_v29  ;;  %v8477_v57 = vpop.f32.mrb[93].mxu1  ;;  %v8335_v13 = vpop.f32.mrb[95].mxu0 }
 0x6fb   : > { %v9302_v36 = vadd.f32 %v8477_v57, %v8332_v33  ;;  %v8336_v4 = vadd.f32 %v8335_v13, %v8103_v29  ;;  %v8479_v62 = vpop.f32.mrb[94].mxu1 }
 0x6fc   : > { %v8496_v11 = vmax.f32 %v9300_v18, 0.0  ;;  %v9304_v51 = vadd.f32 %v8479_v62, %v8334_v0  ;;  %v8481_v44 = vpop.f32.mrb[95].mxu1 }
 0x6fd   : > { %v8497_v55 = vmax.f32 %v9302_v36, 0.0  ;;  %v9306_v61 = vadd.f32 %v8481_v44, %v8336_v4 }
 0x6fe   : > { %8512 = vst [vmem:[%s14075_s17 + $0x60] sm:$0xff] %v8496_v11  ;;  %v8498_v3 = vmax.f32 %v9304_v51, 0.0 }
 0x6ff   : > { %8513 = vst [vmem:[%s14075_s17 + $0x68] sm:$0xff] %v8497_v55  ;;  %v8499_v10 = vmax.f32 %v9306_v61, 0.0 }
 0x700   : > { %8514 = vst [vmem:[%s14075_s17 + $0x70] sm:$0xff] %v8498_v3 }
 0x701   : > { %8515 = vst [vmem:[%s14075_s17 + $0x78] sm:$0xff] %v8499_v10 }
 0x702   : > { %9773 = shalt.err (!%p9770_p3)
}
 0x703   : > { %s9774_s29 = scalar_lea.hbm %s14095_s22, 2048  ;;  %s9778_s27 = scalar_lea.hbm %s14155_s9, 4096 }
 0x704   : > { %p9775_p4 = scmp.ne.s32.totalorder %s14095_s22, %s9774_s29  ;;  %p9779_p9 = scmp.lt.u32.totalorder %s14095_s22, %s14155_s9 }
 0x705   : > { %p9780_p10 = scmp.lt.u32.totalorder %s9778_s27, %s9774_s29  ;;  %p9782_p12 = scmp.lt.u32.totalorder %s9774_s29, %s14095_s22 }
 0x706   : > { %p9776_p7 = pnand %p9775_p4, %p9926_p5 }
 0x707   : > { %p9781_p11 = por %p9780_p10, %p9779_p9 }
 0x708   : > { %p9777_p8 = pneg %p9776_p7 }
 0x709   : > { %p9783_p13 = por %p9782_p12, %p9781_p11 }
 0x70b   : > { %p9784_p0 = pnand %p9783_p13, %p9777_p8 }
 0x70d   : > { %9787 = shalt.err (!%p9784_p0)
}
 0x70e   : > { %s9837_s24 = smov 256  }
 0x70f   : > { %9334 = dma.vmem_to_hbm [thread:$0]  (%p9926_p5), %s14098_s25, 2048, %s14095_s22, %s14104_s13, %s9837_s24, %s9837_s24, %s9831_s23  }
 0x710 PF: > { %p9340_p1 = scmp.ge.s32.totalorder %s9822_s12, 2  ;;  %s8545_s28 = sand.u32 1, %s9810_s30  }
 0x711   : > { %s8546_s16 = scalar_lea.sflag [#allocation5], %s8545_s28 }
 0x712   : > { %p9337_p2 = pnand %p9340_p1, %p9930_p6 }
 0x714   : > { %9805 = dma.done.wait (!%p9337_p2), %s8546_s16, 2048  }
 0x715   : > { %9807 = vsyncadd (!%p9337_p2), %s8546_s16, 4294965248  ;;  %p19_p3 = scmp.ge.s32.totalorder %s9913_s15, 4   ;;  %s14417_s30 = smov %s9814_s10 }
 0x716   : > { %s14418_s10 = smov %s9818_s11  ;;  %s14419_s11 = smov %s9924_s18 }
 0x717   : > { %s14420_s12 = smov %s9913_s15  ;;  %21 = sbr.rel (!%p19_p3) target bundleno = 3 (0x3), region = 99 }
 0x71e   :  { %8551 = vsyncpa [#allocation5], 1 }
 0x71f   :  { %8553 = vsyncpa [#allocation5 + $0x1], 1 }

</bundles_post_ra>
